<compile_context>
chip_gen: v6e
topology: v6e:2x2x1
jax: 0.10.0
libtpu: 0.0.40
codegen_flags: <defaults>
</compile_context>

<pallas_src>
import functools

import jax
import jax.numpy as jnp
from jax.experimental import pallas as pl
from jax.experimental.pallas import tpu as pltpu

_TAPS = tuple((dy, dx) for dy in range(3) for dx in range(3))


def _round_up(x, m):
    return (x + m - 1) // m * m


# ---------------------------------------------------------------------------
# Fused kernel (one image per grid step)
# ---------------------------------------------------------------------------
def _residual_block_kernel(identity_shortcut, H, W, Cin, Cip, Cout, Cp, *refs):
    if identity_shortcut:
        (x_ref, w1_ref, b1_ref, w2_ref, b2_ref,
         out_ref, xpad_sc, h1pad_sc) = refs
        wsc_ref = bsc_ref = None
    else:
        (x_ref, w1_ref, b1_ref, w2_ref, b2_ref, wsc_ref, bsc_ref,
         out_ref, xpad_sc, h1pad_sc) = refs

    # One-time zero of the persistent halo buffers: 1-px border and the
    # channel-pad lanes stay zero for every image; only the interior is
    # rewritten each grid step (grid axis is "arbitrary" == sequential).
    @pl.when(pl.program_id(0) == 0)
    def _():
        xpad_sc[...] = jnp.zeros_like(xpad_sc)
        h1pad_sc[...] = jnp.zeros_like(h1pad_sc)

    # bf16 cast happens in-kernel: x is read from HBM once as f32.
    xpad_sc[1:H + 1, 1:W + 1, :Cin] = x_ref[0].astype(xpad_sc.dtype)

    # Center tap of the (lane-dense, channel-padded) input; also reused as the
    # shortcut operand so the lane-sparse (H, W, Cin) block is never relaid out.
    xc = xpad_sc[1:H + 1, 1:W + 1, :].reshape(H * W, Cip)

    def conv3x3(pad_sc, w_ref, c_in, center=None):
        """3x3 'SAME' conv as 9 accumulating MXU dots (K = c_in per tap)."""
        acc = None
        for t, (dy, dx) in enumerate(_TAPS):
            if center is not None and (dy, dx) == (1, 1):
                xt = center
            else:
                xt = pad_sc[dy:dy + H, dx:dx + W, :].reshape(H * W, c_in)
            d = jnp.dot(xt, w_ref[t], preferred_element_type=jnp.float32)
            acc = d if acc is None else acc + d
        return acc

    # conv1 (BN1 scale folded into w1) -> bias -> ReLU; f32 epilogue.
    h1 = jnp.maximum(conv3x3(xpad_sc, w1_ref, Cip, center=xc) + b1_ref[...],
                     0.0)                                   # (H*W, Cp) f32

    # h1 never touches HBM: lane-dense bf16 copy with a 1-px halo for conv2.
    h1pad_sc[1:H + 1, 1:W + 1, :] = (
        h1.reshape(H, W, Cp).astype(h1pad_sc.dtype))

    # conv2 (BN2 scale folded into w2) -> bias.
    main = conv3x3(h1pad_sc, w2_ref, Cp) + b2_ref[...]      # (H*W, Cp) f32

    # Shortcut branch (trace-time choice: identity add vs 1x1 conv + folded BN).
    if identity_shortcut:
        sc = xc.astype(jnp.float32)          # Cin == Cout; pad lanes are zero
    else:
        sc = jnp.dot(xc, wsc_ref[...], preferred_element_type=jnp.float32)
        sc = sc + bsc_ref[...]

    # Lane-dense (H*W, Cp) bf16 store: unmasked vst, no in-kernel reshape.
    out_ref[0] = jnp.maximum(main + sc, 0.0).astype(out_ref.dtype)


# ---------------------------------------------------------------------------
# Wrapper
# ---------------------------------------------------------------------------
def residual_block_pallas(x_nhwc, params):
    """x_nhwc: (N, H, W, Cin) float32.  Returns (N, H, W, Cout) float32."""
    N, H, W, Cin = x_nhwc.shape
    Cout = params["w1"].shape[-1]
    identity_shortcut = "wsc" not in params
    bf16 = jnp.bfloat16
    f32 = jnp.float32

    # Lane-dense channel padding (multiples of 128).
    Cip = max(_round_up(Cin, 128), 128)
    Cp = max(_round_up(Cout, 128), 128)

    def pad_w3x3(w, scale, ci_pad, co_pad):
        # fold BN scale per output channel, reshape to (9, Ci, Co), zero-pad.
        k = (w * scale).reshape(9, w.shape[2], w.shape[3])
        k = jnp.pad(k, ((0, 0),
                        (0, ci_pad - w.shape[2]),
                        (0, co_pad - w.shape[3])))
        return k.astype(bf16)

    def pad_b(b, co_pad):
        return jnp.pad(b, (0, co_pad - b.shape[0])).reshape(1, co_pad).astype(f32)

    w1 = pad_w3x3(params["w1"], params["s1"], Cip, Cp)        # (9, Cip, Cp)
    w2 = pad_w3x3(params["w2"], params["s2"], Cp, Cp)         # (9, Cp,  Cp)
    b1 = pad_b(params["b1"], Cp)
    b2 = pad_b(params["b2"], Cp)

    inputs = [x_nhwc.astype(f32), w1, b1, w2, b2]
    in_specs = [
        pl.BlockSpec((1, H, W, Cin), lambda b: (b, 0, 0, 0)),
        pl.BlockSpec((9, Cip, Cp), lambda b: (0, 0, 0)),
        pl.BlockSpec((1, Cp), lambda b: (0, 0)),
        pl.BlockSpec((9, Cp, Cp), lambda b: (0, 0, 0)),
        pl.BlockSpec((1, Cp), lambda b: (0, 0)),
    ]
    if not identity_shortcut:
        wsc = jnp.pad(params["wsc"] * params["ssc"][None, :],
                      ((0, Cip - Cin), (0, Cp - Cout))).astype(bf16)
        bsc = pad_b(params["bsc"], Cp)
        inputs += [wsc, bsc]
        in_specs += [pl.BlockSpec((Cip, Cp), lambda b: (0, 0)),
                     pl.BlockSpec((1, Cp), lambda b: (0, 0))]

    kernel = functools.partial(_residual_block_kernel,
                               identity_shortcut, H, W, Cin, Cip, Cout, Cp)

    out = pl.pallas_call(
        kernel,
        out_shape=jax.ShapeDtypeStruct((N, H * W, Cp), bf16),
        grid=(N,),
        in_specs=in_specs,
        out_specs=pl.BlockSpec((1, H * W, Cp), lambda b: (b, 0, 0)),
        scratch_shapes=[
            pltpu.VMEM((H + 2, W + 2, Cip), bf16),   # zero-padded input halo
            pltpu.VMEM((H + 2, W + 2, Cp), bf16),    # zero-padded h1 (fused)
        ],
        # "arbitrary": the one-time scratch init makes steps order-dependent.
        compiler_params=pltpu.CompilerParams(
            dimension_semantics=("arbitrary",)),
    )(*inputs)

    # Free layout plumbing back to NHWC (+ drop channel padding).
    return out[:, :, :Cout].reshape(N, H, W, Cout).astype(x_nhwc.dtype)


# ---------------------------------------------------------------------------
# Pure-JAX reference (f32) for correctness check
# ---------------------------------------------------------------------------
def residual_block_ref(x_nhwc, params):
    def conv(x, w):
        return jax.lax.conv_general_dilated(
            x, w, (1, 1), "SAME", dimension_numbers=("NHWC", "HWIO", "NHWC"))

    def bn(y, s, b):
        return y * s.reshape(1, 1, 1, -1) + b.reshape(1, 1, 1, -1)

    h = jax.nn.relu(bn(conv(x_nhwc, params["w1"]), params["s1"], params["b1"]))
    h = bn(conv(h, params["w2"]), params["s2"], params["b2"])
    if "wsc" in params:
        sc = bn(conv(x_nhwc, params["wsc"][None, None, :, :]),
                params["ssc"], params["bsc"])
    else:
        sc = x_nhwc
    return jax.nn.relu(h + sc)


# ---------------------------------------------------------------------------
# Parameter construction (deterministic, synthetic, eval-mode folded BN)
# ---------------------------------------------------------------------------
def make_params(key, in_channels, out_channels, eps=1e-5):
    ks = jax.random.split(key, 12)

    def fold_bn(gamma, beta, mean, var):
        scale = gamma / jnp.sqrt(var + eps)
        shift = beta - mean * scale
        return scale, shift

    def bn_params(k0, k1, k2, k3, c):
        gamma = 0.5 + jax.random.uniform(k0, (c,), jnp.float32)
        beta = 0.1 * jax.random.normal(k1, (c,), jnp.float32)
        mean = 0.1 * jax.random.normal(k2, (c,), jnp.float32)
        var = 0.5 + jax.random.uniform(k3, (c,), jnp.float32)
        return fold_bn(gamma, beta, mean, var)

    fan1 = in_channels * 9
    fan2 = out_channels * 9
    w1 = jax.random.normal(ks[0], (3, 3, in_channels, out_channels),
                           jnp.float32) / jnp.sqrt(fan1)
    w2 = jax.random.normal(ks[1], (3, 3, out_channels, out_channels),
                           jnp.float32) / jnp.sqrt(fan2)
    s1, b1 = bn_params(ks[2], ks[3], ks[4], ks[5], out_channels)
    s2, b2 = bn_params(ks[6], ks[7], ks[8], ks[9], out_channels)

    p = dict(w1=w1, s1=s1, b1=b1, w2=w2, s2=s2, b2=b2)
    if in_channels != out_channels:
        wsc = jax.random.normal(ks[10], (in_channels, out_channels),
                                jnp.float32) / jnp.sqrt(in_channels)
        ssc, bsc = bn_params(*jax.random.split(ks[11], 4), out_channels)
        p.update(wsc=wsc, ssc=ssc, bsc=bsc)
    # identity shortcut (in == out, stride 1) is a plain add in-kernel
    return p


def _check(out, ref, tag):
    rel_l2 = jnp.linalg.norm(out - ref) / (jnp.linalg.norm(ref) + 1e-12)
    max_abs = jnp.max(jnp.abs(out - ref))
    if not (bool(rel_l2 < 2e-2) and bool(max_abs < 1e-1)):
        raise AssertionError(
            f"Pallas ResidualBlock mismatch [{tag}]: "
            f"rel_l2={rel_l2}, max_abs={max_abs}")


# ---------------------------------------------------------------------------
if __name__ == "__main__":
    key = jax.random.PRNGKey(0)
    k_x1, k_p1, k_x2, k_p2 = jax.random.split(key, 4)

    run = jax.jit(residual_block_pallas)

    # Case 1: Cin != Cout -> 1x1-conv + BN shortcut (stride = 1).
    N, Cin, Cout, H, W = 2, 4, 8, 16, 16
    x_nchw = jax.random.normal(k_x1, (N, Cin, H, W), jnp.float32)
    x_nhwc = jnp.transpose(x_nchw, (0, 2, 3, 1))
    params = make_params(k_p1, Cin, Cout)
    out = jax.block_until_ready(run(x_nhwc, params))
    _check(out, residual_block_ref(x_nhwc, params), "conv-shortcut")

    # Case 2: Cin == Cout -> identity shortcut.
    Cin2 = Cout2 = 8
    x_nchw2 = jax.random.normal(k_x2, (N, Cin2, H, W), jnp.float32)
    x_nhwc2 = jnp.transpose(x_nchw2, (0, 2, 3, 1))
    params2 = make_params(k_p2, Cin2, Cout2)
    out2 = jax.block_until_ready(run(x_nhwc2, params2))
    _check(out2, residual_block_ref(x_nhwc2, params2), "identity-shortcut")

    print("KERNEL_OK")
</pallas_src>

<mosaic_0001>
module attributes {stable_mosaic.version = 11 : i64} {
  func.func @_residual_block_kernel(%arg0: i32, %arg1: memref<1x16x16x4xf32, #tpu.memory_space<vmem>>, %arg2: memref<9x128x128xbf16, #tpu.memory_space<vmem>>, %arg3: memref<1x128xf32, #tpu.memory_space<vmem>>, %arg4: memref<9x128x128xbf16, #tpu.memory_space<vmem>>, %arg5: memref<1x128xf32, #tpu.memory_space<vmem>>, %arg6: memref<128x128xbf16, #tpu.memory_space<vmem>>, %arg7: memref<1x128xf32, #tpu.memory_space<vmem>>, %arg8: memref<1x256x128xbf16, #tpu.memory_space<vmem>>, %arg9: memref<18x18x128xbf16, #tpu.memory_space<vmem>>, %arg10: memref<18x18x128xbf16, #tpu.memory_space<vmem>>) attributes {dimension_semantics = [#tpu.dimension_semantics<arbitrary>], iteration_bounds = array<i64: 2>, scalar_prefetch = 0 : i64, scratch_operands = 2 : i64, tpu.core_type = #tpu.core_type<tc>, window_params = [{transform_indices = @transform_0, window_bounds = array<i64: 1, 16, 16, 4>}, {pipeline_mode = #tpu.pipeline_mode<synchronous>, transform_indices = @transform_1, window_bounds = array<i64: 9, 128, 128>}, {pipeline_mode = #tpu.pipeline_mode<synchronous>, transform_indices = @transform_2, window_bounds = array<i64: 1, 128>}, {pipeline_mode = #tpu.pipeline_mode<synchronous>, transform_indices = @transform_3, window_bounds = array<i64: 9, 128, 128>}, {pipeline_mode = #tpu.pipeline_mode<synchronous>, transform_indices = @transform_4, window_bounds = array<i64: 1, 128>}, {pipeline_mode = #tpu.pipeline_mode<synchronous>, transform_indices = @transform_5, window_bounds = array<i64: 128, 128>}, {pipeline_mode = #tpu.pipeline_mode<synchronous>, transform_indices = @transform_6, window_bounds = array<i64: 1, 128>}, {transform_indices = @transform_7, window_bounds = array<i64: 1, 256, 128>}]} {
    %c0_i32 = arith.constant 0 : i32
    %0 = arith.cmpi eq, %arg0, %c0_i32 : i32
    %1 = arith.extui %0 : i1 to i32
    %c0_i32_0 = arith.constant 0 : i32
    %2 = arith.cmpi ne, %1, %c0_i32_0 : i32
    scf.if %2 {
      %cst_141 = arith.constant 0.000000e+00 : bf16
      %136 = vector.broadcast %cst_141 : bf16 to vector<18x18x128xbf16>
      %c0_142 = arith.constant 0 : index
      %c0_143 = arith.constant 0 : index
      %c0_144 = arith.constant 0 : index
      %137 = vector.load %arg9[%c0_142, %c0_143, %c0_144] : memref<18x18x128xbf16, #tpu.memory_space<vmem>>, vector<18x18x128xbf16>
      tpu.vector_store %arg9[%c0_142, %c0_143, %c0_144], %136 {strides = array<i32>} : memref<18x18x128xbf16, #tpu.memory_space<vmem>>, vector<18x18x128xbf16>,
      %cst_145 = arith.constant 0.000000e+00 : bf16
      %138 = vector.broadcast %cst_145 : bf16 to vector<18x18x128xbf16>
      %c0_146 = arith.constant 0 : index
      %c0_147 = arith.constant 0 : index
      %c0_148 = arith.constant 0 : index
      %139 = vector.load %arg10[%c0_146, %c0_147, %c0_148] : memref<18x18x128xbf16, #tpu.memory_space<vmem>>, vector<18x18x128xbf16>
      tpu.vector_store %arg10[%c0_146, %c0_147, %c0_148], %138 {strides = array<i32>} : memref<18x18x128xbf16, #tpu.memory_space<vmem>>, vector<18x18x128xbf16>,
    } else {
    }
    %c0 = arith.constant 0 : index
    %c0_1 = arith.constant 0 : index
    %c0_2 = arith.constant 0 : index
    %c0_3 = arith.constant 0 : index
    %3 = vector.load %arg1[%c0, %c0_1, %c0_2, %c0_3] : memref<1x16x16x4xf32, #tpu.memory_space<vmem>>, vector<1x16x16x4xf32>
    %4 = vector.shape_cast %3 : vector<1x16x16x4xf32> to vector<16x16x4xf32>
    %5 = arith.truncf %4 : vector<16x16x4xf32> to vector<16x16x4xbf16>
    %c1 = arith.constant 1 : index
    %c1_4 = arith.constant 1 : index
    %c0_5 = arith.constant 0 : index
    %6 = vector.load %arg9[%c1, %c1_4, %c0_5] : memref<18x18x128xbf16, #tpu.memory_space<vmem>>, vector<16x16x4xbf16>
    tpu.vector_store %arg9[%c1, %c1_4, %c0_5], %5 {strides = array<i32>} : memref<18x18x128xbf16, #tpu.memory_space<vmem>>, vector<16x16x4xbf16>,
    %c1_6 = arith.constant 1 : index
    %c1_7 = arith.constant 1 : index
    %c0_8 = arith.constant 0 : index
    %7 = vector.load %arg9[%c1_6, %c1_7, %c0_8] : memref<18x18x128xbf16, #tpu.memory_space<vmem>>, vector<16x16x128xbf16>
    %8 = vector.shape_cast %7 : vector<16x16x128xbf16> to vector<256x128xbf16>
    %c0_9 = arith.constant 0 : index
    %c0_10 = arith.constant 0 : index
    %c0_11 = arith.constant 0 : index
    %9 = vector.load %arg9[%c0_9, %c0_10, %c0_11] : memref<18x18x128xbf16, #tpu.memory_space<vmem>>, vector<16x16x128xbf16>
    %10 = vector.shape_cast %9 : vector<16x16x128xbf16> to vector<256x128xbf16>
    %c0_12 = arith.constant 0 : index
    %c0_13 = arith.constant 0 : index
    %c0_14 = arith.constant 0 : index
    %11 = vector.load %arg2[%c0_12, %c0_13, %c0_14] : memref<9x128x128xbf16, #tpu.memory_space<vmem>>, vector<1x128x128xbf16>
    %12 = vector.shape_cast %11 : vector<1x128x128xbf16> to vector<128x128xbf16>
    %cst = arith.constant dense<0.000000e+00> : vector<256x128xf32>
    %13 = tpu.matmul %10, %12, %cst {dimension_numbers = #tpu.dot_dimension_numbers<[1], [0], [0], [1], [0, 0, 1, 1], [], []>} : vector<256x128xbf16>, vector<128x128xbf16>, vector<256x128xf32> -> vector<256x128xf32>
    %c0_15 = arith.constant 0 : index
    %c1_16 = arith.constant 1 : index
    %c0_17 = arith.constant 0 : index
    %14 = vector.load %arg9[%c0_15, %c1_16, %c0_17] : memref<18x18x128xbf16, #tpu.memory_space<vmem>>, vector<16x16x128xbf16>
    %15 = vector.shape_cast %14 : vector<16x16x128xbf16> to vector<256x128xbf16>
    %c1_18 = arith.constant 1 : index
    %c0_19 = arith.constant 0 : index
    %c0_20 = arith.constant 0 : index
    %16 = vector.load %arg2[%c1_18, %c0_19, %c0_20] : memref<9x128x128xbf16, #tpu.memory_space<vmem>>, vector<1x128x128xbf16>
    %17 = vector.shape_cast %16 : vector<1x128x128xbf16> to vector<128x128xbf16>
    %cst_21 = arith.constant dense<0.000000e+00> : vector<256x128xf32>
    %18 = tpu.matmul %15, %17, %cst_21 {dimension_numbers = #tpu.dot_dimension_numbers<[1], [0], [0], [1], [0, 0, 1, 1], [], []>} : vector<256x128xbf16>, vector<128x128xbf16>, vector<256x128xf32> -> vector<256x128xf32>
    %19 = arith.addf %13, %18 : vector<256x128xf32>
    %c0_22 = arith.constant 0 : index
    %c2 = arith.constant 2 : index
    %c0_23 = arith.constant 0 : index
    %20 = vector.load %arg9[%c0_22, %c2, %c0_23] : memref<18x18x128xbf16, #tpu.memory_space<vmem>>, vector<16x16x128xbf16>
    %21 = vector.shape_cast %20 : vector<16x16x128xbf16> to vector<256x128xbf16>
    %c2_24 = arith.constant 2 : index
    %c0_25 = arith.constant 0 : index
    %c0_26 = arith.constant 0 : index
    %22 = vector.load %arg2[%c2_24, %c0_25, %c0_26] : memref<9x128x128xbf16, #tpu.memory_space<vmem>>, vector<1x128x128xbf16>
    %23 = vector.shape_cast %22 : vector<1x128x128xbf16> to vector<128x128xbf16>
    %cst_27 = arith.constant dense<0.000000e+00> : vector<256x128xf32>
    %24 = tpu.matmul %21, %23, %cst_27 {dimension_numbers = #tpu.dot_dimension_numbers<[1], [0], [0], [1], [0, 0, 1, 1], [], []>} : vector<256x128xbf16>, vector<128x128xbf16>, vector<256x128xf32> -> vector<256x128xf32>
    %25 = arith.addf %19, %24 : vector<256x128xf32>
    %c1_28 = arith.constant 1 : index
    %c0_29 = arith.constant 0 : index
    %c0_30 = arith.constant 0 : index
    %26 = vector.load %arg9[%c1_28, %c0_29, %c0_30] : memref<18x18x128xbf16, #tpu.memory_space<vmem>>, vector<16x16x128xbf16>
    %27 = vector.shape_cast %26 : vector<16x16x128xbf16> to vector<256x128xbf16>
    %c3 = arith.constant 3 : index
    %c0_31 = arith.constant 0 : index
    %c0_32 = arith.constant 0 : index
    %28 = vector.load %arg2[%c3, %c0_31, %c0_32] : memref<9x128x128xbf16, #tpu.memory_space<vmem>>, vector<1x128x128xbf16>
    %29 = vector.shape_cast %28 : vector<1x128x128xbf16> to vector<128x128xbf16>
    %cst_33 = arith.constant dense<0.000000e+00> : vector<256x128xf32>
    %30 = tpu.matmul %27, %29, %cst_33 {dimension_numbers = #tpu.dot_dimension_numbers<[1], [0], [0], [1], [0, 0, 1, 1], [], []>} : vector<256x128xbf16>, vector<128x128xbf16>, vector<256x128xf32> -> vector<256x128xf32>
    %31 = arith.addf %25, %30 : vector<256x128xf32>
    %c4 = arith.constant 4 : index
    %c0_34 = arith.constant 0 : index
    %c0_35 = arith.constant 0 : index
    %32 = vector.load %arg2[%c4, %c0_34, %c0_35] : memref<9x128x128xbf16, #tpu.memory_space<vmem>>, vector<1x128x128xbf16>
    %33 = vector.shape_cast %32 : vector<1x128x128xbf16> to vector<128x128xbf16>
    %cst_36 = arith.constant dense<0.000000e+00> : vector<256x128xf32>
    %34 = tpu.matmul %8, %33, %cst_36 {dimension_numbers = #tpu.dot_dimension_numbers<[1], [0], [0], [1], [0, 0, 1, 1], [], []>} : vector<256x128xbf16>, vector<128x128xbf16>, vector<256x128xf32> -> vector<256x128xf32>
    %35 = arith.addf %31, %34 : vector<256x128xf32>
    %c1_37 = arith.constant 1 : index
    %c2_38 = arith.constant 2 : index
    %c0_39 = arith.constant 0 : index
    %36 = vector.load %arg9[%c1_37, %c2_38, %c0_39] : memref<18x18x128xbf16, #tpu.memory_space<vmem>>, vector<16x16x128xbf16>
    %37 = vector.shape_cast %36 : vector<16x16x128xbf16> to vector<256x128xbf16>
    %c5 = arith.constant 5 : index
    %c0_40 = arith.constant 0 : index
    %c0_41 = arith.constant 0 : index
    %38 = vector.load %arg2[%c5, %c0_40, %c0_41] : memref<9x128x128xbf16, #tpu.memory_space<vmem>>, vector<1x128x128xbf16>
    %39 = vector.shape_cast %38 : vector<1x128x128xbf16> to vector<128x128xbf16>
    %cst_42 = arith.constant dense<0.000000e+00> : vector<256x128xf32>
    %40 = tpu.matmul %37, %39, %cst_42 {dimension_numbers = #tpu.dot_dimension_numbers<[1], [0], [0], [1], [0, 0, 1, 1], [], []>} : vector<256x128xbf16>, vector<128x128xbf16>, vector<256x128xf32> -> vector<256x128xf32>
    %41 = arith.addf %35, %40 : vector<256x128xf32>
    %c2_43 = arith.constant 2 : index
    %c0_44 = arith.constant 0 : index
    %c0_45 = arith.constant 0 : index
    %42 = vector.load %arg9[%c2_43, %c0_44, %c0_45] : memref<18x18x128xbf16, #tpu.memory_space<vmem>>, vector<16x16x128xbf16>
    %43 = vector.shape_cast %42 : vector<16x16x128xbf16> to vector<256x128xbf16>
    %c6 = arith.constant 6 : index
    %c0_46 = arith.constant 0 : index
    %c0_47 = arith.constant 0 : index
    %44 = vector.load %arg2[%c6, %c0_46, %c0_47] : memref<9x128x128xbf16, #tpu.memory_space<vmem>>, vector<1x128x128xbf16>
    %45 = vector.shape_cast %44 : vector<1x128x128xbf16> to vector<128x128xbf16>
    %cst_48 = arith.constant dense<0.000000e+00> : vector<256x128xf32>
    %46 = tpu.matmul %43, %45, %cst_48 {dimension_numbers = #tpu.dot_dimension_numbers<[1], [0], [0], [1], [0, 0, 1, 1], [], []>} : vector<256x128xbf16>, vector<128x128xbf16>, vector<256x128xf32> -> vector<256x128xf32>
    %47 = arith.addf %41, %46 : vector<256x128xf32>
    %c2_49 = arith.constant 2 : index
    %c1_50 = arith.constant 1 : index
    %c0_51 = arith.constant 0 : index
    %48 = vector.load %arg9[%c2_49, %c1_50, %c0_51] : memref<18x18x128xbf16, #tpu.memory_space<vmem>>, vector<16x16x128xbf16>
    %49 = vector.shape_cast %48 : vector<16x16x128xbf16> to vector<256x128xbf16>
    %c7 = arith.constant 7 : index
    %c0_52 = arith.constant 0 : index
    %c0_53 = arith.constant 0 : index
    %50 = vector.load %arg2[%c7, %c0_52, %c0_53] : memref<9x128x128xbf16, #tpu.memory_space<vmem>>, vector<1x128x128xbf16>
    %51 = vector.shape_cast %50 : vector<1x128x128xbf16> to vector<128x128xbf16>
    %cst_54 = arith.constant dense<0.000000e+00> : vector<256x128xf32>
    %52 = tpu.matmul %49, %51, %cst_54 {dimension_numbers = #tpu.dot_dimension_numbers<[1], [0], [0], [1], [0, 0, 1, 1], [], []>} : vector<256x128xbf16>, vector<128x128xbf16>, vector<256x128xf32> -> vector<256x128xf32>
    %53 = arith.addf %47, %52 : vector<256x128xf32>
    %c2_55 = arith.constant 2 : index
    %c2_56 = arith.constant 2 : index
    %c0_57 = arith.constant 0 : index
    %54 = vector.load %arg9[%c2_55, %c2_56, %c0_57] : memref<18x18x128xbf16, #tpu.memory_space<vmem>>, vector<16x16x128xbf16>
    %55 = vector.shape_cast %54 : vector<16x16x128xbf16> to vector<256x128xbf16>
    %c8 = arith.constant 8 : index
    %c0_58 = arith.constant 0 : index
    %c0_59 = arith.constant 0 : index
    %56 = vector.load %arg2[%c8, %c0_58, %c0_59] : memref<9x128x128xbf16, #tpu.memory_space<vmem>>, vector<1x128x128xbf16>
    %57 = vector.shape_cast %56 : vector<1x128x128xbf16> to vector<128x128xbf16>
    %cst_60 = arith.constant dense<0.000000e+00> : vector<256x128xf32>
    %58 = tpu.matmul %55, %57, %cst_60 {dimension_numbers = #tpu.dot_dimension_numbers<[1], [0], [0], [1], [0, 0, 1, 1], [], []>} : vector<256x128xbf16>, vector<128x128xbf16>, vector<256x128xf32> -> vector<256x128xf32>
    %59 = arith.addf %53, %58 : vector<256x128xf32>
    %c0_61 = arith.constant 0 : index
    %c0_62 = arith.constant 0 : index
    %60 = vector.load %arg3[%c0_61, %c0_62] : memref<1x128xf32, #tpu.memory_space<vmem>>, vector<1x128xf32>
    %61 = vector.broadcast %60 : vector<1x128xf32> to vector<256x128xf32>
    %62 = arith.addf %59, %61 : vector<256x128xf32>
    %cst_63 = arith.constant 0.000000e+00 : f32
    %63 = vector.broadcast %cst_63 : f32 to vector<256x128xf32>
    %64 = arith.maximumf %62, %63 : vector<256x128xf32>
    %65 = vector.shape_cast %64 : vector<256x128xf32> to vector<16x16x128xf32>
    %66 = arith.truncf %65 : vector<16x16x128xf32> to vector<16x16x128xbf16>
    %c1_64 = arith.constant 1 : index
    %c1_65 = arith.constant 1 : index
    %c0_66 = arith.constant 0 : index
    %67 = vector.load %arg10[%c1_64, %c1_65, %c0_66] : memref<18x18x128xbf16, #tpu.memory_space<vmem>>, vector<16x16x128xbf16>
    tpu.vector_store %arg10[%c1_64, %c1_65, %c0_66], %66 {strides = array<i32>} : memref<18x18x128xbf16, #tpu.memory_space<vmem>>, vector<16x16x128xbf16>,
    %c0_67 = arith.constant 0 : index
    %c0_68 = arith.constant 0 : index
    %c0_69 = arith.constant 0 : index
    %68 = vector.load %arg10[%c0_67, %c0_68, %c0_69] : memref<18x18x128xbf16, #tpu.memory_space<vmem>>, vector<16x16x128xbf16>
    %69 = vector.shape_cast %68 : vector<16x16x128xbf16> to vector<256x128xbf16>
    %c0_70 = arith.constant 0 : index
    %c0_71 = arith.constant 0 : index
    %c0_72 = arith.constant 0 : index
    %70 = vector.load %arg4[%c0_70, %c0_71, %c0_72] : memref<9x128x128xbf16, #tpu.memory_space<vmem>>, vector<1x128x128xbf16>
    %71 = vector.shape_cast %70 : vector<1x128x128xbf16> to vector<128x128xbf16>
    %cst_73 = arith.constant dense<0.000000e+00> : vector<256x128xf32>
    %72 = tpu.matmul %69, %71, %cst_73 {dimension_numbers = #tpu.dot_dimension_numbers<[1], [0], [0], [1], [0, 0, 1, 1], [], []>} : vector<256x128xbf16>, vector<128x128xbf16>, vector<256x128xf32> -> vector<256x128xf32>
    %c0_74 = arith.constant 0 : index
    %c1_75 = arith.constant 1 : index
    %c0_76 = arith.constant 0 : index
    %73 = vector.load %arg10[%c0_74, %c1_75, %c0_76] : memref<18x18x128xbf16, #tpu.memory_space<vmem>>, vector<16x16x128xbf16>
    %74 = vector.shape_cast %73 : vector<16x16x128xbf16> to vector<256x128xbf16>
    %c1_77 = arith.constant 1 : index
    %c0_78 = arith.constant 0 : index
    %c0_79 = arith.constant 0 : index
    %75 = vector.load %arg4[%c1_77, %c0_78, %c0_79] : memref<9x128x128xbf16, #tpu.memory_space<vmem>>, vector<1x128x128xbf16>
    %76 = vector.shape_cast %75 : vector<1x128x128xbf16> to vector<128x128xbf16>
    %cst_80 = arith.constant dense<0.000000e+00> : vector<256x128xf32>
    %77 = tpu.matmul %74, %76, %cst_80 {dimension_numbers = #tpu.dot_dimension_numbers<[1], [0], [0], [1], [0, 0, 1, 1], [], []>} : vector<256x128xbf16>, vector<128x128xbf16>, vector<256x128xf32> -> vector<256x128xf32>
    %78 = arith.addf %72, %77 : vector<256x128xf32>
    %c0_81 = arith.constant 0 : index
    %c2_82 = arith.constant 2 : index
    %c0_83 = arith.constant 0 : index
    %79 = vector.load %arg10[%c0_81, %c2_82, %c0_83] : memref<18x18x128xbf16, #tpu.memory_space<vmem>>, vector<16x16x128xbf16>
    %80 = vector.shape_cast %79 : vector<16x16x128xbf16> to vector<256x128xbf16>
    %c2_84 = arith.constant 2 : index
    %c0_85 = arith.constant 0 : index
    %c0_86 = arith.constant 0 : index
    %81 = vector.load %arg4[%c2_84, %c0_85, %c0_86] : memref<9x128x128xbf16, #tpu.memory_space<vmem>>, vector<1x128x128xbf16>
    %82 = vector.shape_cast %81 : vector<1x128x128xbf16> to vector<128x128xbf16>
    %cst_87 = arith.constant dense<0.000000e+00> : vector<256x128xf32>
    %83 = tpu.matmul %80, %82, %cst_87 {dimension_numbers = #tpu.dot_dimension_numbers<[1], [0], [0], [1], [0, 0, 1, 1], [], []>} : vector<256x128xbf16>, vector<128x128xbf16>, vector<256x128xf32> -> vector<256x128xf32>
    %84 = arith.addf %78, %83 : vector<256x128xf32>
    %c1_88 = arith.constant 1 : index
    %c0_89 = arith.constant 0 : index
    %c0_90 = arith.constant 0 : index
    %85 = vector.load %arg10[%c1_88, %c0_89, %c0_90] : memref<18x18x128xbf16, #tpu.memory_space<vmem>>, vector<16x16x128xbf16>
    %86 = vector.shape_cast %85 : vector<16x16x128xbf16> to vector<256x128xbf16>
    %c3_91 = arith.constant 3 : index
    %c0_92 = arith.constant 0 : index
    %c0_93 = arith.constant 0 : index
    %87 = vector.load %arg4[%c3_91, %c0_92, %c0_93] : memref<9x128x128xbf16, #tpu.memory_space<vmem>>, vector<1x128x128xbf16>
    %88 = vector.shape_cast %87 : vector<1x128x128xbf16> to vector<128x128xbf16>
    %cst_94 = arith.constant dense<0.000000e+00> : vector<256x128xf32>
    %89 = tpu.matmul %86, %88, %cst_94 {dimension_numbers = #tpu.dot_dimension_numbers<[1], [0], [0], [1], [0, 0, 1, 1], [], []>} : vector<256x128xbf16>, vector<128x128xbf16>, vector<256x128xf32> -> vector<256x128xf32>
    %90 = arith.addf %84, %89 : vector<256x128xf32>
    %c1_95 = arith.constant 1 : index
    %c1_96 = arith.constant 1 : index
    %c0_97 = arith.constant 0 : index
    %91 = vector.load %arg10[%c1_95, %c1_96, %c0_97] : memref<18x18x128xbf16, #tpu.memory_space<vmem>>, vector<16x16x128xbf16>
    %92 = vector.shape_cast %91 : vector<16x16x128xbf16> to vector<256x128xbf16>
    %c4_98 = arith.constant 4 : index
    %c0_99 = arith.constant 0 : index
    %c0_100 = arith.constant 0 : index
    %93 = vector.load %arg4[%c4_98, %c0_99, %c0_100] : memref<9x128x128xbf16, #tpu.memory_space<vmem>>, vector<1x128x128xbf16>
    %94 = vector.shape_cast %93 : vector<1x128x128xbf16> to vector<128x128xbf16>
    %cst_101 = arith.constant dense<0.000000e+00> : vector<256x128xf32>
    %95 = tpu.matmul %92, %94, %cst_101 {dimension_numbers = #tpu.dot_dimension_numbers<[1], [0], [0], [1], [0, 0, 1, 1], [], []>} : vector<256x128xbf16>, vector<128x128xbf16>, vector<256x128xf32> -> vector<256x128xf32>
    %96 = arith.addf %90, %95 : vector<256x128xf32>
    %c1_102 = arith.constant 1 : index
    %c2_103 = arith.constant 2 : index
    %c0_104 = arith.constant 0 : index
    %97 = vector.load %arg10[%c1_102, %c2_103, %c0_104] : memref<18x18x128xbf16, #tpu.memory_space<vmem>>, vector<16x16x128xbf16>
    %98 = vector.shape_cast %97 : vector<16x16x128xbf16> to vector<256x128xbf16>
    %c5_105 = arith.constant 5 : index
    %c0_106 = arith.constant 0 : index
    %c0_107 = arith.constant 0 : index
    %99 = vector.load %arg4[%c5_105, %c0_106, %c0_107] : memref<9x128x128xbf16, #tpu.memory_space<vmem>>, vector<1x128x128xbf16>
    %100 = vector.shape_cast %99 : vector<1x128x128xbf16> to vector<128x128xbf16>
    %cst_108 = arith.constant dense<0.000000e+00> : vector<256x128xf32>
    %101 = tpu.matmul %98, %100, %cst_108 {dimension_numbers = #tpu.dot_dimension_numbers<[1], [0], [0], [1], [0, 0, 1, 1], [], []>} : vector<256x128xbf16>, vector<128x128xbf16>, vector<256x128xf32> -> vector<256x128xf32>
    %102 = arith.addf %96, %101 : vector<256x128xf32>
    %c2_109 = arith.constant 2 : index
    %c0_110 = arith.constant 0 : index
    %c0_111 = arith.constant 0 : index
    %103 = vector.load %arg10[%c2_109, %c0_110, %c0_111] : memref<18x18x128xbf16, #tpu.memory_space<vmem>>, vector<16x16x128xbf16>
    %104 = vector.shape_cast %103 : vector<16x16x128xbf16> to vector<256x128xbf16>
    %c6_112 = arith.constant 6 : index
    %c0_113 = arith.constant 0 : index
    %c0_114 = arith.constant 0 : index
    %105 = vector.load %arg4[%c6_112, %c0_113, %c0_114] : memref<9x128x128xbf16, #tpu.memory_space<vmem>>, vector<1x128x128xbf16>
    %106 = vector.shape_cast %105 : vector<1x128x128xbf16> to vector<128x128xbf16>
    %cst_115 = arith.constant dense<0.000000e+00> : vector<256x128xf32>
    %107 = tpu.matmul %104, %106, %cst_115 {dimension_numbers = #tpu.dot_dimension_numbers<[1], [0], [0], [1], [0, 0, 1, 1], [], []>} : vector<256x128xbf16>, vector<128x128xbf16>, vector<256x128xf32> -> vector<256x128xf32>
    %108 = arith.addf %102, %107 : vector<256x128xf32>
    %c2_116 = arith.constant 2 : index
    %c1_117 = arith.constant 1 : index
    %c0_118 = arith.constant 0 : index
    %109 = vector.load %arg10[%c2_116, %c1_117, %c0_118] : memref<18x18x128xbf16, #tpu.memory_space<vmem>>, vector<16x16x128xbf16>
    %110 = vector.shape_cast %109 : vector<16x16x128xbf16> to vector<256x128xbf16>
    %c7_119 = arith.constant 7 : index
    %c0_120 = arith.constant 0 : index
    %c0_121 = arith.constant 0 : index
    %111 = vector.load %arg4[%c7_119, %c0_120, %c0_121] : memref<9x128x128xbf16, #tpu.memory_space<vmem>>, vector<1x128x128xbf16>
    %112 = vector.shape_cast %111 : vector<1x128x128xbf16> to vector<128x128xbf16>
    %cst_122 = arith.constant dense<0.000000e+00> : vector<256x128xf32>
    %113 = tpu.matmul %110, %112, %cst_122 {dimension_numbers = #tpu.dot_dimension_numbers<[1], [0], [0], [1], [0, 0, 1, 1], [], []>} : vector<256x128xbf16>, vector<128x128xbf16>, vector<256x128xf32> -> vector<256x128xf32>
    %114 = arith.addf %108, %113 : vector<256x128xf32>
    %c2_123 = arith.constant 2 : index
    %c2_124 = arith.constant 2 : index
    %c0_125 = arith.constant 0 : index
    %115 = vector.load %arg10[%c2_123, %c2_124, %c0_125] : memref<18x18x128xbf16, #tpu.memory_space<vmem>>, vector<16x16x128xbf16>
    %116 = vector.shape_cast %115 : vector<16x16x128xbf16> to vector<256x128xbf16>
    %c8_126 = arith.constant 8 : index
    %c0_127 = arith.constant 0 : index
    %c0_128 = arith.constant 0 : index
    %117 = vector.load %arg4[%c8_126, %c0_127, %c0_128] : memref<9x128x128xbf16, #tpu.memory_space<vmem>>, vector<1x128x128xbf16>
    %118 = vector.shape_cast %117 : vector<1x128x128xbf16> to vector<128x128xbf16>
    %cst_129 = arith.constant dense<0.000000e+00> : vector<256x128xf32>
    %119 = tpu.matmul %116, %118, %cst_129 {dimension_numbers = #tpu.dot_dimension_numbers<[1], [0], [0], [1], [0, 0, 1, 1], [], []>} : vector<256x128xbf16>, vector<128x128xbf16>, vector<256x128xf32> -> vector<256x128xf32>
    %120 = arith.addf %114, %119 : vector<256x128xf32>
    %c0_130 = arith.constant 0 : index
    %c0_131 = arith.constant 0 : index
    %121 = vector.load %arg5[%c0_130, %c0_131] : memref<1x128xf32, #tpu.memory_space<vmem>>, vector<1x128xf32>
    %122 = vector.broadcast %121 : vector<1x128xf32> to vector<256x128xf32>
    %123 = arith.addf %120, %122 : vector<256x128xf32>
    %c0_132 = arith.constant 0 : index
    %c0_133 = arith.constant 0 : index
    %124 = vector.load %arg6[%c0_132, %c0_133] : memref<128x128xbf16, #tpu.memory_space<vmem>>, vector<128x128xbf16>
    %cst_134 = arith.constant dense<0.000000e+00> : vector<256x128xf32>
    %125 = tpu.matmul %8, %124, %cst_134 {dimension_numbers = #tpu.dot_dimension_numbers<[1], [0], [0], [1], [0, 0, 1, 1], [], []>} : vector<256x128xbf16>, vector<128x128xbf16>, vector<256x128xf32> -> vector<256x128xf32>
    %c0_135 = arith.constant 0 : index
    %c0_136 = arith.constant 0 : index
    %126 = vector.load %arg7[%c0_135, %c0_136] : memref<1x128xf32, #tpu.memory_space<vmem>>, vector<1x128xf32>
    %127 = vector.broadcast %126 : vector<1x128xf32> to vector<256x128xf32>
    %128 = arith.addf %125, %127 : vector<256x128xf32>
    %129 = arith.addf %123, %128 : vector<256x128xf32>
    %cst_137 = arith.constant 0.000000e+00 : f32
    %130 = vector.broadcast %cst_137 : f32 to vector<256x128xf32>
    %131 = arith.maximumf %129, %130 : vector<256x128xf32>
    %132 = arith.truncf %131 : vector<256x128xf32> to vector<256x128xbf16>
    %c0_138 = arith.constant 0 : index
    %c0_139 = arith.constant 0 : index
    %c0_140 = arith.constant 0 : index
    %133 = vector.load %arg8[%c0_138, %c0_139, %c0_140] : memref<1x256x128xbf16, #tpu.memory_space<vmem>>, vector<1x256x128xbf16>
    %134 = vector.shape_cast %133 : vector<1x256x128xbf16> to vector<256x128xbf16>
    %135 = vector.shape_cast %132 : vector<256x128xbf16> to vector<1x256x128xbf16>
    tpu.vector_store %arg8[%c0_138, %c0_139, %c0_140], %135 {strides = array<i32>} : memref<1x256x128xbf16, #tpu.memory_space<vmem>>, vector<1x256x128xbf16>,
    return
  }
  func.func @transform_0(%arg0: i32) -> (i32, i32, i32, i32) {
    %c0_i32 = arith.constant 0 : i32
    %c0_i32_0 = arith.constant 0 : i32
    %c0_i32_1 = arith.constant 0 : i32
    %c0_i32_2 = arith.constant 0 : i32
    return %arg0, %c0_i32, %c0_i32_0, %c0_i32_1 : i32, i32, i32, i32
  }
  func.func @transform_1(%arg0: i32) -> (i32, i32, i32) {
    %c0_i32 = arith.constant 0 : i32
    %c0_i32_0 = arith.constant 0 : i32
    %c0_i32_1 = arith.constant 0 : i32
    %c0_i32_2 = arith.constant 0 : i32
    return %c0_i32, %c0_i32_0, %c0_i32_1 : i32, i32, i32
  }
  func.func @transform_2(%arg0: i32) -> (i32, i32) {
    %c0_i32 = arith.constant 0 : i32
    %c0_i32_0 = arith.constant 0 : i32
    %c0_i32_1 = arith.constant 0 : i32
    return %c0_i32, %c0_i32_0 : i32, i32
  }
  func.func @transform_3(%arg0: i32) -> (i32, i32, i32) {
    %c0_i32 = arith.constant 0 : i32
    %c0_i32_0 = arith.constant 0 : i32
    %c0_i32_1 = arith.constant 0 : i32
    %c0_i32_2 = arith.constant 0 : i32
    return %c0_i32, %c0_i32_0, %c0_i32_1 : i32, i32, i32
  }
  func.func @transform_4(%arg0: i32) -> (i32, i32) {
    %c0_i32 = arith.constant 0 : i32
    %c0_i32_0 = arith.constant 0 : i32
    %c0_i32_1 = arith.constant 0 : i32
    return %c0_i32, %c0_i32_0 : i32, i32
  }
  func.func @transform_5(%arg0: i32) -> (i32, i32) {
    %c0_i32 = arith.constant 0 : i32
    %c0_i32_0 = arith.constant 0 : i32
    %c0_i32_1 = arith.constant 0 : i32
    return %c0_i32, %c0_i32_0 : i32, i32
  }
  func.func @transform_6(%arg0: i32) -> (i32, i32) {
    %c0_i32 = arith.constant 0 : i32
    %c0_i32_0 = arith.constant 0 : i32
    %c0_i32_1 = arith.constant 0 : i32
    return %c0_i32, %c0_i32_0 : i32, i32
  }
  func.func @transform_7(%arg0: i32) -> (i32, i32, i32) {
    %c0_i32 = arith.constant 0 : i32
    %c0_i32_0 = arith.constant 0 : i32
    %c0_i32_1 = arith.constant 0 : i32
    return %arg0, %c0_i32, %c0_i32_0 : i32, i32, i32
  }
}

</mosaic_0001>

<bundles_post_ra>
// kernel: residual_block_pallas.1
= control target key start
LH: loop header
LB: loop body
LE: loop exit
PB: predicated region body
PF: predicated region fallthrough
CT: control target
= control target key end

     0   :  { %s14537_s24 = smov 0   ;;  %s20104_s0 = inlined_call_operand.vmem [shape: f32[2,16,16,4], index: 0, kind: input, shape index: {}]   ;;  %s20105_s1 = inlined_call_operand.vmem [shape: bf16[9,128,128], index: 1, kind: input, shape index: {}]   ;;  %s20106_s2 = inlined_call_operand.vmem [shape: f32[1,128], index: 2, kind: input, shape index: {}]   ;;  %s20107_s3 = inlined_call_operand.vmem [shape: bf16[9,128,128], index: 3, kind: input, shape index: {}]   ;;  %s20108_s4 = inlined_call_operand.vmem [shape: f32[1,128], index: 4, kind: input, shape index: {}]   ;;  %s20109_s5 = inlined_call_operand.vmem [shape: bf16[128,128], index: 5, kind: input, shape index: {}]   ;;  %s20110_s6 = inlined_call_operand.vmem [shape: f32[1,128], index: 6, kind: input, shape index: {}]   ;;  %s20111_s7 = inlined_call_operand.vmem [shape: bf16[2,256,128], index: 7, kind: output, shape index: {}]  }
   0x1 LB: > { %s11726_s25 = sadd.s32 4294967295, %s14494_s24   ;;  %p11730_p0 = scmp.ge.s32.totalorder %s14494_s24, 1  ;;  %s14494_s24 = sphi %s14537_s24, %s17_s24  }
   0x2   : > { %p237_p1 = scmp.lt.s32.totalorder %s14494_s24, 3 }
   0x4   : > { %p238_p2 = pnand %p11730_p0, %p237_p1 }
   0x6   : > { %241 = sbr.rel (%p238_p2) target bundleno = 1256 (0x4e8), region = 48 }
   0xb   : > { %p269_p3 = scmp.lt.s32.totalorder %s11726_s25, 1  ;;  %p11735_p4 = scmp.ne.s32.totalorder %s11726_s25, 0 }
   0xd   : > { %s270_s26 = scalar_select %p269_p3, %s11726_s25, 1 }
   0xe   : > { %283 = sbr.rel (%p11735_p4) target bundleno = 74 (0x4a), region = 52 }
   0xf   : > { %s12629_s27 = sshll.u32 %s270_s26, 8  ;;  %s12630_s28 = sshll.u32 %s270_s26, 7 }
  0x10   : > { %s14548_s8 = scalar_lea.vmem %s20104_s0, %s12629_s27  ;;  %s14553_s11 = scalar_lea.vmem %s20111_s7, %s12630_s28 }
  0x13   : > { %v14496_v0 = vmov 0  }
  0x14   : > { %284 = vst [vmem:[#allocation2] sm:$0xf] %v14496_v0  ;;  %285 = vst [vmem:[#allocation2 + $0x4] sm:$0xf] %v14496_v0 }
  0x15   : > { %286 = vst [vmem:[#allocation2 + $0x8] sm:$0x1] %v14496_v0  ;;  %287 = vst [vmem:[#allocation2 + $0xc] sm:$0xf] %v14496_v0 }
  0x16   : > { %288 = vst [vmem:[#allocation2 + $0x10] sm:$0xf] %v14496_v0  ;;  %289 = vst [vmem:[#allocation2 + $0x14] sm:$0x1] %v14496_v0 }
  0x17   : > { %290 = vst [vmem:[#allocation2 + $0x18] sm:$0xf] %v14496_v0  ;;  %291 = vst [vmem:[#allocation2 + $0x1c] sm:$0xf] %v14496_v0 }
  0x18   : > { %292 = vst [vmem:[#allocation2 + $0x20] sm:$0x1] %v14496_v0  ;;  %293 = vst [vmem:[#allocation2 + $0x24] sm:$0xf] %v14496_v0 }
  0x19   : > { %294 = vst [vmem:[#allocation2 + $0x28] sm:$0xf] %v14496_v0  ;;  %295 = vst [vmem:[#allocation2 + $0x2c] sm:$0x1] %v14496_v0 }
  0x1a   : > { %296 = vst [vmem:[#allocation2 + $0x30] sm:$0xf] %v14496_v0  ;;  %297 = vst [vmem:[#allocation2 + $0x34] sm:$0xf] %v14496_v0 }
  0x1b   : > { %298 = vst [vmem:[#allocation2 + $0x38] sm:$0x1] %v14496_v0  ;;  %299 = vst [vmem:[#allocation2 + $0x3c] sm:$0xf] %v14496_v0 }
  0x1c   : > { %300 = vst [vmem:[#allocation2 + $0x40] sm:$0xf] %v14496_v0  ;;  %301 = vst [vmem:[#allocation2 + $0x44] sm:$0x1] %v14496_v0 }
  0x1d   : > { %302 = vst [vmem:[#allocation2 + $0x48] sm:$0xf] %v14496_v0  ;;  %303 = vst [vmem:[#allocation2 + $0x4c] sm:$0xf] %v14496_v0 }
  0x1e   : > { %304 = vst [vmem:[#allocation2 + $0x50] sm:$0x1] %v14496_v0  ;;  %305 = vst [vmem:[#allocation2 + $0x54] sm:$0xf] %v14496_v0 }
  0x1f   : > { %306 = vst [vmem:[#allocation2 + $0x58] sm:$0xf] %v14496_v0  ;;  %307 = vst [vmem:[#allocation2 + $0x5c] sm:$0x1] %v14496_v0 }
  0x20   : > { %308 = vst [vmem:[#allocation2 + $0x60] sm:$0xf] %v14496_v0  ;;  %309 = vst [vmem:[#allocation2 + $0x64] sm:$0xf] %v14496_v0 }
  0x21   : > { %310 = vst [vmem:[#allocation2 + $0x68] sm:$0x1] %v14496_v0  ;;  %311 = vst [vmem:[#allocation2 + $0x6c] sm:$0xf] %v14496_v0 }
  0x22   : > { %312 = vst [vmem:[#allocation2 + $0x70] sm:$0xf] %v14496_v0  ;;  %313 = vst [vmem:[#allocation2 + $0x74] sm:$0x1] %v14496_v0 }
  0x23   : > { %314 = vst [vmem:[#allocation2 + $0x78] sm:$0xf] %v14496_v0  ;;  %315 = vst [vmem:[#allocation2 + $0x7c] sm:$0xf] %v14496_v0 }
  0x24   : > { %316 = vst [vmem:[#allocation2 + $0x80] sm:$0x1] %v14496_v0  ;;  %317 = vst [vmem:[#allocation2 + $0x84] sm:$0xf] %v14496_v0 }
  0x25   : > { %318 = vst [vmem:[#allocation2 + $0x88] sm:$0xf] %v14496_v0  ;;  %319 = vst [vmem:[#allocation2 + $0x8c] sm:$0x1] %v14496_v0 }
  0x26   : > { %320 = vst [vmem:[#allocation2 + $0x90] sm:$0xf] %v14496_v0  ;;  %321 = vst [vmem:[#allocation2 + $0x94] sm:$0xf] %v14496_v0 }
  0x27   : > { %322 = vst [vmem:[#allocation2 + $0x98] sm:$0x1] %v14496_v0  ;;  %323 = vst [vmem:[#allocation2 + $0x9c] sm:$0xf] %v14496_v0 }
  0x28   : > { %324 = vst [vmem:[#allocation2 + $0xa0] sm:$0xf] %v14496_v0  ;;  %325 = vst [vmem:[#allocation2 + $0xa4] sm:$0x1] %v14496_v0 }
  0x29   : > { %326 = vst [vmem:[#allocation2 + $0xa8] sm:$0xf] %v14496_v0  ;;  %327 = vst [vmem:[#allocation2 + $0xac] sm:$0xf] %v14496_v0 }
  0x2a   : > { %328 = vst [vmem:[#allocation2 + $0xb0] sm:$0x1] %v14496_v0  ;;  %329 = vst [vmem:[#allocation2 + $0xb4] sm:$0xf] %v14496_v0 }
  0x2b   : > { %330 = vst [vmem:[#allocation2 + $0xb8] sm:$0xf] %v14496_v0  ;;  %331 = vst [vmem:[#allocation2 + $0xbc] sm:$0x1] %v14496_v0 }
  0x2c   : > { %332 = vst [vmem:[#allocation2 + $0xc0] sm:$0xf] %v14496_v0  ;;  %333 = vst [vmem:[#allocation2 + $0xc4] sm:$0xf] %v14496_v0 }
  0x2d   : > { %334 = vst [vmem:[#allocation2 + $0xc8] sm:$0x1] %v14496_v0  ;;  %335 = vst [vmem:[#allocation2 + $0xcc] sm:$0xf] %v14496_v0 }
  0x2e   : > { %336 = vst [vmem:[#allocation2 + $0xd0] sm:$0xf] %v14496_v0  ;;  %337 = vst [vmem:[#allocation2 + $0xd4] sm:$0x1] %v14496_v0 }
  0x2f   : > { %338 = vst [vmem:[#allocation3] sm:$0xf] %v14496_v0  ;;  %339 = vst [vmem:[#allocation3 + $0x4] sm:$0xf] %v14496_v0 }
  0x30   : > { %340 = vst [vmem:[#allocation3 + $0x8] sm:$0x1] %v14496_v0  ;;  %341 = vst [vmem:[#allocation3 + $0xc] sm:$0xf] %v14496_v0 }
  0x31   : > { %342 = vst [vmem:[#allocation3 + $0x10] sm:$0xf] %v14496_v0  ;;  %343 = vst [vmem:[#allocation3 + $0x14] sm:$0x1] %v14496_v0 }
  0x32   : > { %344 = vst [vmem:[#allocation3 + $0x18] sm:$0xf] %v14496_v0  ;;  %345 = vst [vmem:[#allocation3 + $0x1c] sm:$0xf] %v14496_v0 }
  0x33   : > { %346 = vst [vmem:[#allocation3 + $0x20] sm:$0x1] %v14496_v0  ;;  %347 = vst [vmem:[#allocation3 + $0x24] sm:$0xf] %v14496_v0 }
  0x34   : > { %348 = vst [vmem:[#allocation3 + $0x28] sm:$0xf] %v14496_v0  ;;  %349 = vst [vmem:[#allocation3 + $0x2c] sm:$0x1] %v14496_v0 }
  0x35   : > { %350 = vst [vmem:[#allocation3 + $0x30] sm:$0xf] %v14496_v0  ;;  %351 = vst [vmem:[#allocation3 + $0x34] sm:$0xf] %v14496_v0 }
  0x36   : > { %352 = vst [vmem:[#allocation3 + $0x38] sm:$0x1] %v14496_v0  ;;  %353 = vst [vmem:[#allocation3 + $0x3c] sm:$0xf] %v14496_v0 }
  0x37   : > { %354 = vst [vmem:[#allocation3 + $0x40] sm:$0xf] %v14496_v0  ;;  %355 = vst [vmem:[#allocation3 + $0x44] sm:$0x1] %v14496_v0 }
  0x38   : > { %356 = vst [vmem:[#allocation3 + $0x48] sm:$0xf] %v14496_v0  ;;  %357 = vst [vmem:[#allocation3 + $0x4c] sm:$0xf] %v14496_v0 }
  0x39   : > { %358 = vst [vmem:[#allocation3 + $0x50] sm:$0x1] %v14496_v0  ;;  %359 = vst [vmem:[#allocation3 + $0x54] sm:$0xf] %v14496_v0 }
  0x3a   : > { %360 = vst [vmem:[#allocation3 + $0x58] sm:$0xf] %v14496_v0  ;;  %361 = vst [vmem:[#allocation3 + $0x5c] sm:$0x1] %v14496_v0 }
  0x3b   : > { %362 = vst [vmem:[#allocation3 + $0x60] sm:$0xf] %v14496_v0  ;;  %363 = vst [vmem:[#allocation3 + $0x64] sm:$0xf] %v14496_v0 }
  0x3c   : > { %364 = vst [vmem:[#allocation3 + $0x68] sm:$0x1] %v14496_v0  ;;  %365 = vst [vmem:[#allocation3 + $0x6c] sm:$0xf] %v14496_v0 }
  0x3d   : > { %366 = vst [vmem:[#allocation3 + $0x70] sm:$0xf] %v14496_v0  ;;  %367 = vst [vmem:[#allocation3 + $0x74] sm:$0x1] %v14496_v0 }
  0x3e   : > { %368 = vst [vmem:[#allocation3 + $0x78] sm:$0xf] %v14496_v0  ;;  %369 = vst [vmem:[#allocation3 + $0x7c] sm:$0xf] %v14496_v0 }
  0x3f   : > { %370 = vst [vmem:[#allocation3 + $0x80] sm:$0x1] %v14496_v0  ;;  %371 = vst [vmem:[#allocation3 + $0x84] sm:$0xf] %v14496_v0 }
  0x40   : > { %372 = vst [vmem:[#allocation3 + $0x88] sm:$0xf] %v14496_v0  ;;  %373 = vst [vmem:[#allocation3 + $0x8c] sm:$0x1] %v14496_v0 }
  0x41   : > { %374 = vst [vmem:[#allocation3 + $0x90] sm:$0xf] %v14496_v0  ;;  %375 = vst [vmem:[#allocation3 + $0x94] sm:$0xf] %v14496_v0 }
  0x42   : > { %376 = vst [vmem:[#allocation3 + $0x98] sm:$0x1] %v14496_v0  ;;  %377 = vst [vmem:[#allocation3 + $0x9c] sm:$0xf] %v14496_v0 }
  0x43   : > { %378 = vst [vmem:[#allocation3 + $0xa0] sm:$0xf] %v14496_v0  ;;  %379 = vst [vmem:[#allocation3 + $0xa4] sm:$0x1] %v14496_v0 }
  0x44   : > { %380 = vst [vmem:[#allocation3 + $0xa8] sm:$0xf] %v14496_v0  ;;  %381 = vst [vmem:[#allocation3 + $0xac] sm:$0xf] %v14496_v0 }
  0x45   : > { %382 = vst [vmem:[#allocation3 + $0xb0] sm:$0x1] %v14496_v0  ;;  %383 = vst [vmem:[#allocation3 + $0xb4] sm:$0xf] %v14496_v0 }
  0x46   : > { %384 = vst [vmem:[#allocation3 + $0xb8] sm:$0xf] %v14496_v0  ;;  %385 = vst [vmem:[#allocation3 + $0xbc] sm:$0x1] %v14496_v0 }
  0x47   : > { %386 = vst [vmem:[#allocation3 + $0xc0] sm:$0xf] %v14496_v0  ;;  %387 = vst [vmem:[#allocation3 + $0xc4] sm:$0xf] %v14496_v0 }
  0x48   : > { %388 = vst [vmem:[#allocation3 + $0xc8] sm:$0x1] %v14496_v0  ;;  %389 = vst [vmem:[#allocation3 + $0xcc] sm:$0xf] %v14496_v0 }
  0x49   : > { %390 = vst [vmem:[#allocation3 + $0xd0] sm:$0xf] %v14496_v0  ;;  %391 = vst [vmem:[#allocation3 + $0xd4] sm:$0x1] %v14496_v0 }
  0x4a PF: > { %v14215_v1 = vld [vmem:[%s20105_s1 + $0x78] sm:$0xff]   ;;  %v14216_v2 = vld [vmem:[%s20105_s1 + $0x70] sm:$0xff]   ;;  %v14217_v3 = vld [vmem:[%s20105_s1 + $0x68] sm:$0xff]   ;;  %vm844_vm0 = vcmask 27648   ;;  %vm1010_vm1 = vsmask.f32 3328 }
  0x4b   : > { %13278 = vmatprep.subr.bf16.mxu0 %v14215_v1  ;;  %14190 = vmatprep.subr.bf16.mxu1 %v14215_v1  ;;  %v14218_v4 = vld [vmem:[%s20105_s1 + $0x60] sm:$0xff]   ;;  %vm1011_vm2 = vsmask.f32 7440  ;;  %v1445_v7 = vld [vmem:[#allocation2 + $0x8] sm:$0x1]  ;;  %v406_v13 = vld [vmem:[%s14548_s8 + $0x70] sm:$0xff] }
  0x4c   : > { %13279 = vmatpush3.bf16.msra.mxu0 %v14215_v1  ;;  %14198 = vmatpush3.bf16.msra.mxu1 %v14215_v1  ;;  %v1397_v5 = vld [vmem:[#allocation2] sm:$0xf]  ;;  %v1398_v6 = vld [vmem:[#allocation2 + $0x4] sm:$0xf]  ;;  %v1481_v12 = vshll.u32 %v1445_v7, 16  ;;  %v407_v14 = vld [vmem:[%s14548_s8 + $0x78] sm:$0xff]  ;;  %v12645_v18 = vpack.c.bf16 %v406_v13, %v406_v13 }
  0x4d   : > { %13280 = vmatprep.subr.bf16.mxu0 %v14216_v2  ;;  %14191 = vmatprep.subr.bf16.mxu1 %v14216_v2  ;;  %v1462_v8 = vshrl.u32 %v1397_v5, 16  ;;  %v1465_v9 = vshll.u32 %v1397_v5, 16  ;;  %v1471_v10 = vshll.u32 %v1398_v6, 16  ;;  %v1475_v11 = vshrl.u32 %v1398_v6, 16  ;;  %v14219_v15 = vld [vmem:[%s20105_s1 + $0x58] sm:$0xff]   ;;  %v392_v23 = vld [vmem:[%s14548_s8] sm:$0xff]  ;;  %vm14685_vm6 = vmor %vm1010_vm1, %vm1011_vm2 }
  0x4e   : > { %vm852_vm3 = vcmask 24576   ;;  %v12646_v19 = vpack.c.bf16 %v407_v14, %v407_v14  ;;  %v1483_v22 = vrot.slane %v1481_v12, 5  ;;  %vm520_vm4 = vsmask.f32 256  ;;  %v393_v27 = vld [vmem:[%s14548_s8 + $0x8] sm:$0xff]  ;;  %v408_v28 = vld [vmem:[%s14548_s8 + $0x80] sm:$0xff] }
  0x4f   : > { %v1464_v16 = vrot.slane %v1462_v8, 4  ;;  %v1467_v17 = vrot.slane %v1465_v9, 5  ;;  %v1473_v20 = vrot.slane %v1471_v10, 5  ;;  %v1477_v21 = vrot.slane %v1475_v11, 4  ;;  %v14220_v33 = vld [vmem:[%s20105_s1 + $0x50] sm:$0xff]   ;;  %vm14694_vm8 = vmand %vm852_vm3, %vm520_vm4  ;;  %v409_v39 = vld [vmem:[%s14548_s8 + $0x88] sm:$0xff] }
  0x50   : > { %13281 = vmatpush3.bf16.msra.mxu0 %v14216_v2  ;;  %14199 = vmatpush3.bf16.msra.mxu1 %v14216_v2  ;;  %vm521_vm5 = vsmask.f32 4368  ;;  %v643_v25 = vshrl.u32 %v12645_v18, 16  ;;  %v646_v26 = vshll.u32 %v12645_v18, 16  ;;  %v20186_v29 = vmov 0  ;;  %v14221_v52 = vld [vmem:[%s20105_s1 + $0x48] sm:$0xff]  }
  0x51   : > { %13282 = vmatprep.subr.bf16.mxu0 %v14217_v3  ;;  %14192 = vmatprep.subr.bf16.mxu1 %v14217_v3  ;;  %v1468_v24 = vor.u32 %v1467_v17, %v1464_v16  ;;  %v20187_v29 = vsel %vm14685_vm6, 4294967295, %v20186_v29  ;;  %v1478_v30 = vor.u32 %v1477_v21, %v1473_v20  ;;  %v651_v31 = vshrl.u32 %v12646_v19, 16  ;;  %v899_v43 = vld [vmem:[#allocation2 + $0x60] sm:$0xf]  ;;  %v903_v44 = vld [vmem:[#allocation2 + $0x68] sm:$0x1]  ;;  %vm14709_vm10 = vmor %vm520_vm4, %vm521_vm5 }
  0x52   : > { %20188 = vst [vmem:[#allocation4_spill] sm:$0xff] %v20187_v29  ;;  %v654_v32 = vshll.u32 %v12646_v19, 16  ;;  %vm845_vm7 = vsmask.f32 7938  ;;  %v645_v35 = vrot.slane %v643_v25, 7  ;;  %v20189_v36 = vmov 0 }
  0x53   : > { %v1469_v34 = vrot.slane %v1468_v24, 4  ;;  %v20190_v36 = vsel %vm14694_vm8, 4294967295, %v20189_v36  ;;  %v12631_v37 = vpack.c.bf16 %v392_v23, %v392_v23  ;;  %v12632_v38 = vpack.c.bf16 %v393_v27, %v393_v27  ;;  %vm14701_vm9 = vmand %vm844_vm0, %vm845_vm7  ;;  %v847_v57 = vld [vmem:[#allocation2 + $0xc] sm:$0xf]  ;;  %v854_v1 = vld [vmem:[#allocation2 + $0x14] sm:$0x1] }
  0x54   : > { %13283 = vmatpush3.bf16.msra.mxu0 %v14217_v3  ;;  %14200 = vmatpush3.bf16.msra.mxu1 %v14217_v3  ;;  %20191 = vst [vmem:[#allocation5_spill] sm:$0xff] %v20190_v36  ;;  %v1479_v40 = vrot.slane %v1478_v30, 4  ;;  %v653_v41 = vrot.slane %v651_v31, 7  ;;  %v20192_v42 = vmov 0  ;;  %v12647_v45 = vpack.c.bf16 %v408_v28, %v408_v28  ;;  %v394_v7 = vld [vmem:[%s14548_s8 + $0x10] sm:$0xff]  ;;  %v395_v11 = vld [vmem:[%s14548_s8 + $0x18] sm:$0xff] }
  0x55   : > { %13284 = vmatprep.subr.bf16.mxu0 %v14218_v4  ;;  %14193 = vmatprep.subr.bf16.mxu1 %v14218_v4  ;;  %v20193_v42 = vsel %vm14701_vm9, 4294967295, %v20192_v42  ;;  %v12648_v46 = vpack.c.bf16 %v409_v39, %v409_v39  ;;  %v1474_v47 = vsel %vm14685_vm6, %v1469_v34, %v1473_v20  ;;  %v20195_v48 = vmov 0  ;;  %v906_v16 = vld [vmem:[#allocation2 + $0x6c] sm:$0xf]  ;;  %v14222_v18 = vld [vmem:[%s20105_s1 + $0x40] sm:$0xff]   ;;  %v410_v34 = vld [vmem:[%s14548_s8 + $0x90] sm:$0xff] }
  0x56   : > { %20194 = vst [vmem:[#allocation6_spill] sm:$0xff] %v20193_v42  ;;  %v20196_v48 = vsel %vm14709_vm10, 4294967295, %v20195_v48  ;;  %v648_v49 = vor.u32 %v646_v26, %v645_v35  ;;  %v649_v50 = vrot.slane %v645_v35, 4  ;;  %v524_v51 = vshrl.u32 %v12631_v37, 16  ;;  %v910_v25 = vld [vmem:[#allocation2 + $0x74] sm:$0x1] }
  0x57   : > { %20197 = vst [vmem:[#allocation7_spill] sm:$0xff] %v20196_v48  ;;  %v1484_v53 = vsel %vm14685_vm6, %v1479_v40, %v1483_v22  ;;  %v656_v54 = vor.u32 %v654_v32, %v653_v41  ;;  %v658_v55 = vrot.slane %v653_v41, 4  ;;  %v527_v56 = vshll.u32 %v12631_v37, 16  ;;  %v14742_v32 = vld [vmem:[%s20105_s1 + $0x38] sm:$0xff]  }
  0x58   : > { %13285 = vmatpush3.bf16.msra.mxu0 %v14218_v4  ;;  %14201 = vmatpush3.bf16.msra.mxu1 %v14218_v4  ;;  %v11784_v58 = vcombine.low %v1474_v47, %v1484_v53  ;;  %v900_v59 = vsel %vm14701_vm9, %v648_v49, %v899_v43  ;;  %v526_v60 = vrot.slane %v524_v51, 7  ;;  %v532_v61 = vshrl.u32 %v12632_v38, 16  ;;  %v14748_v37 = vld [vmem:[%s20105_s1 + $0xb8] sm:$0xff]  }
  0x59   : > { %13286 = vmatprep.subr.bf16.mxu0 %v14219_v15  ;;  %14194 = vmatprep.subr.bf16.mxu1 %v14219_v15  ;;  %v657_v62 = vsel %vm14709_vm10, %v649_v50, %v656_v54  ;;  %901 = vst [vmem:[#allocation2 + $0x60] sm:$0xf] %v900_v59  ;;  %v904_v63 = vsel %vm14694_vm8, %v658_v55, %v903_v44  ;;  %v535_v0 = vshll.u32 %v12632_v38, 16  ;;  %v660_v2 = vshrl.u32 %v12647_v45, 16  ;;  %v411_v40 = vld [vmem:[%s14548_s8 + $0x98] sm:$0xff] }
  0x5a   : > { %13294 = vmatprep.mubr.bf16.mxu0 %v11784_v58  ;;  %902 = vst.msk [vmem:[#allocation2 + $0x64] sm:$0xf] %vm844_vm0, %v657_v62  ;;  %905 = vst [vmem:[#allocation2 + $0x68] sm:$0x1] %v904_v63  ;;  %v529_v3 = vor.u32 %v527_v56, %v526_v60  ;;  %v530_v4 = vrot.slane %v526_v60, 4  ;;  %v534_v5 = vrot.slane %v532_v61, 7  ;;  %v12633_v12 = vpack.c.bf16 %v394_v7, %v394_v7 }
  0x5b   : > { %v663_v6 = vshll.u32 %v12647_v45, 16  ;;  %v662_v8 = vrot.slane %v660_v2, 7  ;;  %v668_v9 = vshrl.u32 %v12648_v46, 16  ;;  %v671_v10 = vshll.u32 %v12648_v46, 16 }
  0x5c   : > { %13287 = vmatpush3.bf16.msra.mxu0 %v14219_v15  ;;  %14202 = vmatpush3.bf16.msra.mxu1 %v14219_v15  ;;  %v537_v13 = vor.u32 %v535_v0, %v534_v5  ;;  %v539_v14 = vrot.slane %v534_v5, 4  ;;  %v848_v15 = vsel %vm14701_vm9, %v529_v3, %v847_v57  ;;  %v12634_v17 = vpack.c.bf16 %v395_v11, %v395_v11  ;;  %v857_v57 = vld [vmem:[#allocation2 + $0x18] sm:$0xf] }
  0x5d   : > { %13288 = vmatprep.subr.bf16.mxu0 %v14220_v33  ;;  %14195 = vmatprep.subr.bf16.mxu1 %v14220_v33  ;;  %849 = vst [vmem:[#allocation2 + $0xc] sm:$0xf] %v848_v15  ;;  %v665_v19 = vor.u32 %v663_v6, %v662_v8  ;;  %v666_v20 = vrot.slane %v662_v8, 4  ;;  %v670_v21 = vrot.slane %v668_v9, 7  ;;  %v541_v22 = vshrl.u32 %v12633_v12, 16 }
  0x5e   : > { %v538_v23 = vsel %vm14709_vm10, %v530_v4, %v537_v13  ;;  %v855_v24 = vsel %vm14694_vm8, %v539_v14, %v854_v1  ;;  %v544_v26 = vshll.u32 %v12633_v12, 16  ;;  %v549_v27 = vshrl.u32 %v12634_v17, 16 }
  0x5f   : > { %851 = vst.msk [vmem:[#allocation2 + $0x10] sm:$0xf] %vm844_vm0, %v538_v23  ;;  %856 = vst [vmem:[#allocation2 + $0x14] sm:$0x1] %v855_v24  ;;  %v673_v28 = vor.u32 %v671_v10, %v670_v21  ;;  %v675_v30 = vrot.slane %v670_v21, 4  ;;  %v907_v31 = vsel %vm14701_vm9, %v665_v19, %v906_v16  ;;  %v552_v39 = vshll.u32 %v12634_v17, 16 }
  0x60   : > { %13289 = vmatpush3.bf16.msra.mxu0 %v14220_v33  ;;  %14203 = vmatpush3.bf16.msra.mxu1 %v14220_v33  ;;  %v543_v33 = vrot.slane %v541_v22, 7  ;;  %v1413_v35 = vld [vmem:[#allocation2 + $0x60] sm:$0xf]  ;;  %908 = vst [vmem:[#allocation2 + $0x6c] sm:$0xf] %v907_v31  ;;  %v14750_v38 = vrot.slane %v549_v27, 7  ;;  %v14761_v62 = vpack.c.bf16 %v411_v40, %v411_v40 }
  0x61   : > { %13290 = vmatprep.subr.bf16.mxu0 %v14221_v52  ;;  %14196 = vmatprep.subr.bf16.mxu1 %v14221_v52  ;;  %v1414_v41 = vld [vmem:[#allocation2 + $0x64] sm:$0xf]  ;;  %v1453_v43 = vld [vmem:[#allocation2 + $0x68] sm:$0x1]  ;;  %v1654_v44 = vshrl.u32 %v1413_v35, 16  ;;  %v1657_v45 = vshll.u32 %v1413_v35, 16  ;;  %v674_v46 = vsel %vm14709_vm10, %v666_v20, %v673_v28  ;;  %v911_v47 = vsel %vm14694_vm8, %v675_v30, %v910_v25 }
  0x62   : > { %v1663_v49 = vshll.u32 %v1414_v41, 16  ;;  %v1667_v50 = vshrl.u32 %v1414_v41, 16  ;;  %v1673_v51 = vshll.u32 %v1453_v43, 16  ;;  %909 = vst.msk [vmem:[#allocation2 + $0x70] sm:$0xf] %vm844_vm0, %v674_v46  ;;  %v546_v55 = vor.u32 %v544_v26, %v543_v33 }
  0x63   : > { %912 = vst [vmem:[#allocation2 + $0x74] sm:$0x1] %v911_v47  ;;  %v1656_v53 = vrot.slane %v1654_v44, 4  ;;  %v1659_v54 = vrot.slane %v1657_v45, 5  ;;  %v547_v56 = vrot.slane %v543_v33, 4  ;;  %v554_v61 = vor.u32 %v552_v39, %v14750_v38 }
  0x64   : > { %13291 = vmatpush3.bf16.msra.mxu0 %v14221_v52  ;;  %14204 = vmatpush3.bf16.msra.mxu1 %v14221_v52  ;;  %v14758_v52 = vpack.c.bf16 %v410_v34, %v410_v34  ;;  %v1665_v58 = vrot.slane %v1663_v49, 5  ;;  %v1669_v59 = vrot.slane %v1667_v50, 4  ;;  %v1399_v60 = vld [vmem:[#allocation2 + $0xc] sm:$0xf]  ;;  %v1675_v0 = vrot.slane %v1673_v51, 5 }
  0x65   : > { %13292 = vmatprep.subr.bf16.mxu0 %v14222_v18  ;;  %14197 = vmatprep.subr.bf16.mxu1 %v14222_v18  ;;  %v1660_v63 = vor.u32 %v1659_v54, %v1656_v53  ;;  %v1486_v1 = vshrl.u32 %v1399_v60, 16  ;;  %v1489_v2 = vshll.u32 %v1399_v60, 16  ;;  %v555_v6 = vsel %vm14709_vm10, %v547_v56, %v554_v61  ;;  %v861_v17 = vld [vmem:[#allocation2 + $0x20] sm:$0x1] }
  0x66   : > { %v1670_v3 = vor.u32 %v1669_v59, %v1665_v58  ;;  %v1400_v4 = vld [vmem:[#allocation2 + $0x10] sm:$0xf]  ;;  %v1446_v5 = vld [vmem:[#allocation2 + $0x14] sm:$0x1]  ;;  %v556_v7 = vrot.slane %v14750_v38, 4  ;;  %v858_v8 = vsel %vm14701_vm9, %v546_v55, %v857_v57  ;;  %v680_v56 = vshll.u32 %v14758_v52, 16 }
  0x67   : > { %v1661_v9 = vrot.slane %v1660_v63, 4  ;;  %v1488_v10 = vrot.slane %v1486_v1, 4  ;;  %v1491_v11 = vrot.slane %v1489_v2, 5  ;;  %v1495_v12 = vshll.u32 %v1400_v4, 16  ;;  %v1415_v13 = vld [vmem:[#allocation2 + $0x6c] sm:$0xf] }
  0x68   : > { %13293 = vmatpush3.bf16.msra.mxu0 %v14222_v18  ;;  %14205 = vmatpush3.bf16.msra.mxu1 %v14222_v18  ;;  %859 = vst [vmem:[#allocation2 + $0x18] sm:$0xf] %v858_v8  ;;  %860 = vst.msk [vmem:[#allocation2 + $0x1c] sm:$0xf] %vm844_vm0, %v555_v6  ;;  %v1671_v14 = vrot.slane %v1670_v3, 4  ;;  %v1499_v15 = vshrl.u32 %v1400_v4, 16  ;;  %v862_v44 = vsel %vm14694_vm8, %v556_v7, %v861_v17 }
  0x69   : > { %13326 = vmatprep.subr.bf16.mxu1 %v14742_v32  ;;  %13374 = vmatprep.subr.bf16.mxu0 %v14748_v37  ;;  %v1505_v16 = vshll.u32 %v1446_v5, 16  ;;  %v677_v18 = vshrl.u32 %v14758_v52, 16  ;;  %v1666_v19 = vsel %vm14685_vm6, %v1661_v9, %v1665_v58  ;;  %v1492_v20 = vor.u32 %v1491_v11, %v1488_v10  ;;  %v1416_v22 = vld [vmem:[#allocation2 + $0x70] sm:$0xf]  ;;  %863 = vst [vmem:[#allocation2 + $0x20] sm:$0x1] %v862_v44 }
  0x6a   : > { %v1497_v21 = vrot.slane %v1495_v12, 5  ;;  %v1454_v23 = vld [vmem:[#allocation2 + $0x74] sm:$0x1]  ;;  %v1678_v24 = vshrl.u32 %v1415_v13, 16  ;;  %v1676_v25 = vsel %vm14685_vm6, %v1671_v14, %v1675_v0  ;;  %v1501_v26 = vrot.slane %v1499_v15, 4  ;;  %v396_v5 = vld [vmem:[%s14548_s8 + $0x20] sm:$0xff] }
  0x6b   : > { %v1507_v27 = vrot.slane %v1505_v16, 5  ;;  %v1681_v28 = vshll.u32 %v1415_v13, 16  ;;  %v11792_v30 = vcombine.low %v1666_v19, %v1676_v25  ;;  %v1493_v31 = vrot.slane %v1492_v20, 4  ;;  %v913_v63 = vld [vmem:[#allocation2 + $0x78] sm:$0xf]  ;;  %v14226_v1 = vld [vmem:[%s20105_s1 + $0xb0] sm:$0xff]  }
  0x6c   : > { %v1680_v33 = vrot.slane %v1678_v24, 4  ;;  %v1687_v34 = vshll.u32 %v1416_v22, 16  ;;  %v1502_v35 = vor.u32 %v1501_v26, %v1497_v21  ;;  %v1691_v39 = vshrl.u32 %v1416_v22, 16  ;;  %v397_v6 = vld [vmem:[%s14548_s8 + $0x28] sm:$0xff]  ;;  %v917_v16 = vld [vmem:[#allocation2 + $0x80] sm:$0x1] }
  0x6d   : > { %v1683_v38 = vrot.slane %v1681_v28, 5  ;;  %v1697_v40 = vshll.u32 %v1454_v23, 16  ;;  %13310 = vmatprep.mubr.bf16.mxu1 %v11792_v30  ;;  %v1498_v41 = vsel %vm14685_vm6, %v1493_v31, %v1497_v21  ;;  %v14780_v45 = vrot.slane %v677_v18, 7  ;;  %v14225_v20 = vld [vmem:[%s20105_s1 + $0x30] sm:$0xff]   ;;  %v412_v24 = vld [vmem:[%s14548_s8 + $0xa0] sm:$0xff]  ;;  %v413_v28 = vld [vmem:[%s14548_s8 + $0xa8] sm:$0xff] }
  0x6e   : > { %v1689_v43 = vrot.slane %v1687_v34, 5  ;;  %v1503_v46 = vrot.slane %v1502_v35, 4  ;;  %v1693_v49 = vrot.slane %v1691_v39, 4  ;;  %v685_v12 = vshrl.u32 %v14761_v62, 16  ;;  %v14228_v30 = vld [vmem:[%s20105_s1 + $0xa8] sm:$0xff]  }
  0x6f   : > { %v1684_v47 = vor.u32 %v1683_v38, %v1680_v33  ;;  %v1699_v50 = vrot.slane %v1697_v40, 5  ;;  %v1401_v51 = vld [vmem:[#allocation2 + $0x18] sm:$0xf]  ;;  %v1402_v53 = vld [vmem:[#allocation2 + $0x1c] sm:$0xf]  ;;  %v683_v57 = vrot.slane %v14780_v45, 4  ;;  %v682_v9 = vor.u32 %v680_v56, %v14780_v45 }
  0x70   : > { %v1510_v54 = vshrl.u32 %v1401_v51, 16  ;;  %v1513_v55 = vshll.u32 %v1401_v51, 16  ;;  %v1508_v58 = vsel %vm14685_vm6, %v1503_v46, %v1507_v27  ;;  %v1694_v60 = vor.u32 %v1693_v49, %v1689_v43  ;;  %v1447_v21 = vld [vmem:[#allocation2 + $0x20] sm:$0x1]  ;;  %v864_v38 = vld [vmem:[#allocation2 + $0x24] sm:$0xf] }
  0x71   : > { %v1685_v59 = vrot.slane %v1684_v47, 4  ;;  %v1519_v61 = vshll.u32 %v1402_v53, 16  ;;  %v11785_v0 = vcombine.low %v1498_v41, %v1508_v58  ;;  %v1523_v4 = vshrl.u32 %v1402_v53, 16  ;;  %v868_v44 = vld [vmem:[#allocation2 + $0x2c] sm:$0x1]  ;;  %v14230_v46 = vld [vmem:[%s20105_s1 + $0xa0] sm:$0xff]  }
  0x72   : > { %v1512_v2 = vrot.slane %v1510_v54, 4  ;;  %v1515_v3 = vrot.slane %v1513_v55, 5  ;;  %v1695_v7 = vrot.slane %v1694_v60, 4  ;;  %v688_v13 = vshll.u32 %v14761_v62, 16  ;;  %v14227_v45 = vld [vmem:[%s20105_s1 + $0x28] sm:$0xff]   ;;  %v398_v51 = vld [vmem:[%s14548_s8 + $0x30] sm:$0xff] }
  0x73   : > { %v1690_v52 = vsel %vm14685_vm6, %v1685_v59, %v1689_v43  ;;  %v1521_v8 = vrot.slane %v1519_v61, 5  ;;  %13295 = vmatmul.mubr.bf16.vlgmr.msra.gmra.mxu0 %v11785_v0  ;;  %v1525_v11 = vrot.slane %v1523_v4, 4  ;;  %v914_v15 = vsel %vm14701_vm9, %v682_v9, %v913_v63  ;;  %v399_v58 = vld [vmem:[%s14548_s8 + $0x38] sm:$0xff]  ;;  %v414_v63 = vld [vmem:[%s14548_s8 + $0xb0] sm:$0xff] }
  0x74   : > { %v1516_v10 = vor.u32 %v1515_v3, %v1512_v2  ;;  %v1700_v14 = vsel %vm14685_vm6, %v1695_v7, %v1699_v50  ;;  %13375 = vmatpush3.bf16.msra.mxu0 %v14748_v37  ;;  %v12635_v17 = vpack.c.bf16 %v396_v5, %v396_v5  ;;  %v12636_v18 = vpack.c.bf16 %v397_v6, %v397_v6  ;;  %v14232_v9 = vld [vmem:[%s20105_s1 + $0x98] sm:$0xff]  }
  0x75   : > { %v11793_v19 = vcombine.low %v1690_v52, %v1700_v14  ;;  %13376 = vmatprep.subr.bf16.mxu0 %v14226_v1  ;;  %v1526_v22 = vor.u32 %v1525_v11, %v1521_v8  ;;  %v687_v23 = vrot.slane %v685_v12, 7  ;;  %915 = vst [vmem:[#allocation2 + $0x78] sm:$0xf] %v914_v15  ;;  %v1529_v37 = vshll.u32 %v1447_v21, 16  ;;  %v920_v11 = vld [vmem:[#allocation2 + $0x84] sm:$0xf] }
  0x76   : > { %v1517_v62 = vrot.slane %v1516_v10, 4  ;;  %v558_v25 = vshrl.u32 %v12635_v17, 16  ;;  %v561_v26 = vshll.u32 %v12635_v17, 16  ;;  %v566_v27 = vshrl.u32 %v12636_v18, 16 }
  0x77   : > { %13311 = vmatmul.mubr.bf16.vlgmr.msra.gmra.mxu1 %v11793_v19  ;;  %v1527_v33 = vrot.slane %v1526_v22, 4  ;;  %v690_v34 = vor.u32 %v688_v13, %v687_v23  ;;  %v692_v35 = vrot.slane %v687_v23, 4  ;;  %v1531_v39 = vrot.slane %v1529_v37, 5  ;;  %v924_v19 = vld [vmem:[#allocation2 + $0x8c] sm:$0x1]  ;;  %v415_v23 = vld [vmem:[%s14548_s8 + $0xb8] sm:$0xff] }
  0x78   : > { %v1522_v31 = vsel %vm14685_vm6, %v1517_v62, %v1521_v8  ;;  %13327 = vmatpush3.bf16.msra.mxu1 %v14742_v32  ;;  %13377 = vmatpush3.bf16.msra.mxu0 %v14226_v1  ;;  %v560_v40 = vrot.slane %v558_v25, 7  ;;  %v568_v41 = vrot.slane %v566_v27, 7  ;;  %v569_v43 = vshll.u32 %v12636_v18, 16  ;;  %v14229_v8 = vld [vmem:[%s20105_s1 + $0x20] sm:$0xff]   ;;  %v14234_v37 = vld [vmem:[%s20105_s1 + $0x90] sm:$0xff]  }
  0x79   : > { %13328 = vmatprep.subr.bf16.mxu1 %v14225_v20  ;;  %v691_v47 = vsel %vm14709_vm10, %v683_v57, %v690_v34  ;;  %v918_v32 = vsel %vm14694_vm8, %v692_v35, %v917_v16  ;;  %v12651_v49 = vpack.c.bf16 %v412_v24, %v412_v24  ;;  %v12652_v50 = vpack.c.bf16 %v413_v28, %v413_v28  ;;  %v14231_v24 = vld [vmem:[%s20105_s1 + $0x18] sm:$0xff]  }
  0x7a   : > { %v1532_v53 = vsel %vm14685_vm6, %v1527_v33, %v1531_v39  ;;  %916 = vst.msk [vmem:[#allocation2 + $0x7c] sm:$0xf] %vm844_vm0, %v691_v47  ;;  %919 = vst [vmem:[#allocation2 + $0x80] sm:$0x1] %v918_v32  ;;  %v563_v54 = vor.u32 %v561_v26, %v560_v40  ;;  %v564_v55 = vrot.slane %v560_v40, 4  ;;  %v571_v56 = vor.u32 %v569_v43, %v568_v41 }
  0x7b   : > { %13378 = vmatprep.subr.bf16.mxu0 %v14228_v30  ;;  %v11786_v59 = vcombine.low %v1522_v31, %v1532_v53  ;;  %v573_v57 = vrot.slane %v568_v41, 4  ;;  %v694_v60 = vshrl.u32 %v12651_v49, 16  ;;  %v697_v61 = vshll.u32 %v12651_v49, 16  ;;  %v14233_v49 = vld [vmem:[%s20105_s1 + $0x10] sm:$0xff]  }
  0x7c   : > { %13329 = vmatpush3.bf16.msra.mxu1 %v14225_v20  ;;  %v1417_v0 = vld [vmem:[#allocation2 + $0x78] sm:$0xf]  ;;  %v572_v1 = vsel %vm14709_vm10, %v564_v55, %v571_v56  ;;  %v865_v2 = vsel %vm14701_vm9, %v563_v54, %v864_v38  ;;  %v702_v3 = vshrl.u32 %v12652_v50, 16  ;;  %v705_v4 = vshll.u32 %v12652_v50, 16  ;;  %13379 = vmatpush3.bf16.msra.mxu0 %v14228_v30 }
  0x7d   : > { %13298 = vmatprep.mubr.bf16.mxu0 %v11786_v59  ;;  %v1702_v5 = vshrl.u32 %v1417_v0, 16  ;;  %v1705_v6 = vshll.u32 %v1417_v0, 16  ;;  %866 = vst [vmem:[#allocation2 + $0x24] sm:$0xf] %v865_v2  ;;  %867 = vst.msk [vmem:[#allocation2 + $0x28] sm:$0xf] %vm844_vm0, %v572_v1  ;;  %v869_v52 = vsel %vm14694_vm8, %v573_v57, %v868_v44  ;;  %13330 = vmatprep.subr.bf16.mxu1 %v14227_v45 }
  0x7e   : > { %v696_v7 = vrot.slane %v694_v60, 7  ;;  %870 = vst [vmem:[#allocation2 + $0x2c] sm:$0x1] %v869_v52  ;;  %v704_v10 = vrot.slane %v702_v3, 7  ;;  %13380 = vmatprep.subr.bf16.mxu0 %v14230_v46  ;;  %v12637_v12 = vpack.c.bf16 %v398_v51, %v398_v51  ;;  %v12638_v13 = vpack.c.bf16 %v399_v58, %v399_v58  ;;  %v14235_v3 = vld [vmem:[%s20105_s1 + $0x8] sm:$0xff]  }
  0x7f   : > { %v14841_v14 = vpack.c.bf16 %v414_v63, %v414_v63  ;;  %v1704_v15 = vrot.slane %v1702_v5, 4  ;;  %v1707_v16 = vrot.slane %v1705_v6, 5  ;;  %v14859_v32 = vpack.c.bf16 %v415_v23, %v415_v23 }
  0x80   : > { %v699_v17 = vor.u32 %v697_v61, %v696_v7  ;;  %v700_v18 = vrot.slane %v696_v7, 4  ;;  %v707_v20 = vor.u32 %v705_v4, %v704_v10  ;;  %v709_v21 = vrot.slane %v704_v10, 4  ;;  %13331 = vmatpush3.bf16.msra.mxu1 %v14227_v45  ;;  %13381 = vmatpush3.bf16.msra.mxu0 %v14230_v46  ;;  %v871_v61 = vld [vmem:[#allocation2 + $0x30] sm:$0xf]  ;;  %v875_v7 = vld [vmem:[#allocation2 + $0x38] sm:$0x1] }
  0x81   : > { %v575_v62 = vshrl.u32 %v12637_v12, 16  ;;  %v578_v22 = vshll.u32 %v12637_v12, 16  ;;  %v1418_v25 = vld [vmem:[#allocation2 + $0x7c] sm:$0xf]  ;;  %v1455_v26 = vld [vmem:[#allocation2 + $0x80] sm:$0x1]  ;;  %v1708_v27 = vor.u32 %v1707_v16, %v1704_v15  ;;  %13332 = vmatprep.subr.bf16.mxu1 %v14229_v8  ;;  %13382 = vmatprep.subr.bf16.mxu0 %v14232_v9 }
  0x82   : > { %v921_v28 = vsel %vm14701_vm9, %v699_v17, %v920_v11  ;;  %v583_v30 = vshrl.u32 %v12638_v13, 16  ;;  %v586_v31 = vshll.u32 %v12638_v13, 16  ;;  %v1711_v33 = vshll.u32 %v1418_v25, 16  ;;  %v14236_v13 = vld [vmem:[%s20105_s1 + $0x88] sm:$0xff]  }
  0x83   : > { %v1715_v34 = vshrl.u32 %v1418_v25, 16  ;;  %v1721_v35 = vshll.u32 %v1455_v26, 16  ;;  %v708_v38 = vsel %vm14709_vm10, %v700_v18, %v707_v20  ;;  %922 = vst [vmem:[#allocation2 + $0x84] sm:$0xf] %v921_v28  ;;  %v1709_v39 = vrot.slane %v1708_v27, 4 }
  0x84   : > { %923 = vst.msk [vmem:[#allocation2 + $0x88] sm:$0xf] %vm844_vm0, %v708_v38  ;;  %v925_v40 = vsel %vm14694_vm8, %v709_v21, %v924_v19  ;;  %v577_v41 = vrot.slane %v575_v62, 7  ;;  %v14857_v43 = vrot.slane %v583_v30, 7  ;;  %v1713_v44 = vrot.slane %v1711_v33, 5  ;;  %13333 = vmatpush3.bf16.msra.mxu1 %v14229_v8  ;;  %13383 = vmatpush3.bf16.msra.mxu0 %v14232_v9 }
  0x85   : > { %v1717_v45 = vrot.slane %v1715_v34, 4  ;;  %v1723_v46 = vrot.slane %v1721_v35, 5  ;;  %v1403_v47 = vld [vmem:[#allocation2 + $0x24] sm:$0xf]  ;;  %926 = vst [vmem:[#allocation2 + $0x8c] sm:$0x1] %v925_v40  ;;  %13334 = vmatprep.subr.bf16.mxu1 %v14231_v24  ;;  %13384 = vmatprep.subr.bf16.mxu0 %v14234_v37 }
  0x86   : > { %v14864_v50 = vld [vmem:[#allocation2 + $0x28] sm:$0xf]  ;;  %v14866_v51 = vld [vmem:[#allocation2 + $0x2c] sm:$0x1]  ;;  %v1534_v53 = vshrl.u32 %v1403_v47, 16  ;;  %v1537_v54 = vshll.u32 %v1403_v47, 16  ;;  %v580_v55 = vor.u32 %v578_v22, %v577_v41  ;;  %v588_v56 = vor.u32 %v586_v31, %v14857_v43 }
  0x87   : > { %v1714_v58 = vsel %vm14685_vm6, %v1709_v39, %v1713_v44  ;;  %v1718_v59 = vor.u32 %v1717_v45, %v1713_v44  ;;  %v1543_v57 = vshll.u32 %v14864_v50, 16  ;;  %v1547_v60 = vshrl.u32 %v14864_v50, 16  ;;  %v14238_v44 = vld [vmem:[%s20105_s1 + $0x80] sm:$0xff]  }
  0x88   : > { %v1536_v63 = vrot.slane %v1534_v53, 4  ;;  %v1539_v0 = vrot.slane %v1537_v54, 5  ;;  %v1553_v1 = vshll.u32 %v14866_v51, 16  ;;  %v581_v2 = vrot.slane %v577_v41, 4  ;;  %13335 = vmatpush3.bf16.msra.mxu1 %v14231_v24  ;;  %13385 = vmatpush3.bf16.msra.mxu0 %v14234_v37  ;;  %v400_v24 = vld [vmem:[%s14548_s8 + $0x40] sm:$0xff]  ;;  %v401_v41 = vld [vmem:[%s14548_s8 + $0x48] sm:$0xff] }
  0x89   : > { %v1719_v4 = vrot.slane %v1718_v59, 4  ;;  %v1545_v5 = vrot.slane %v1543_v57, 5  ;;  %v1549_v6 = vrot.slane %v1547_v60, 4  ;;  %v590_v52 = vrot.slane %v14857_v43, 4  ;;  %13336 = vmatprep.subr.bf16.mxu1 %v14233_v49  ;;  %13386 = vmatprep.subr.bf16.mxu0 %v14236_v13  ;;  %v14237_v37 = vld [vmem:[%s20105_s1] sm:$0xff]   ;;  %v14909_v53 = vld [vmem:[%s20105_s1 + $0xf8] sm:$0xff]  }
  0x8a   : > { %v1540_v8 = vor.u32 %v1539_v0, %v1536_v63  ;;  %v1555_v9 = vrot.slane %v1553_v1, 5  ;;  %v1419_v10 = vld [vmem:[#allocation2 + $0x84] sm:$0xf]  ;;  %v589_v11 = vsel %vm14709_vm10, %v581_v2, %v588_v56  ;;  %v872_v12 = vsel %vm14701_vm9, %v580_v55, %v871_v61  ;;  %v14915_v57 = vld [vmem:[%s20105_s1 + $0x138] sm:$0xff]  }
  0x8b   : > { %v1724_v15 = vsel %vm14685_vm6, %v1719_v4, %v1723_v46  ;;  %v1550_v16 = vor.u32 %v1549_v6, %v1545_v5  ;;  %v1420_v17 = vld [vmem:[#allocation2 + $0x88] sm:$0xf]  ;;  %v1726_v18 = vshrl.u32 %v1419_v10, 16  ;;  %v1729_v19 = vshll.u32 %v1419_v10, 16  ;;  %873 = vst [vmem:[#allocation2 + $0x30] sm:$0xf] %v872_v12 }
  0x8c   : > { %874 = vst.msk [vmem:[#allocation2 + $0x34] sm:$0xf] %vm844_vm0, %v589_v11  ;;  %v11794_v20 = vcombine.low %v1714_v58, %v1724_v15  ;;  %v1541_v21 = vrot.slane %v1540_v8, 4  ;;  %v1456_v62 = vld [vmem:[#allocation2 + $0x8c] sm:$0x1]  ;;  %v1735_v22 = vshll.u32 %v1420_v17, 16  ;;  %13337 = vmatpush3.bf16.msra.mxu1 %v14233_v49  ;;  %13387 = vmatpush3.bf16.msra.mxu0 %v14236_v13  ;;  %v876_v34 = vsel %vm14694_vm8, %v590_v52, %v875_v7 }
  0x8d   : > { %v1739_v23 = vshrl.u32 %v1420_v17, 16  ;;  %v1551_v25 = vrot.slane %v1550_v16, 4  ;;  %v1728_v26 = vrot.slane %v1726_v18, 4  ;;  %v1731_v27 = vrot.slane %v1729_v19, 5  ;;  %13338 = vmatprep.subr.bf16.mxu1 %v14235_v3  ;;  %877 = vst [vmem:[#allocation2 + $0x38] sm:$0x1] %v876_v34  ;;  %13388 = vmatprep.subr.bf16.mxu0 %v14238_v44 }
  0x8e   : > { %v1745_v28 = vshll.u32 %v1456_v62, 16  ;;  %13314 = vmatprep.mubr.bf16.mxu1 %v11794_v20  ;;  %v1546_v30 = vsel %vm14685_vm6, %v1541_v21, %v1545_v5  ;;  %v1737_v31 = vrot.slane %v1735_v22, 5  ;;  %v711_v40 = vshrl.u32 %v14841_v14, 16  ;;  %v416_v43 = vld [vmem:[%s14548_s8 + $0xc0] sm:$0xff]  ;;  %v927_v58 = vld [vmem:[#allocation2 + $0x90] sm:$0xf] }
  0x8f   : > { %v1741_v33 = vrot.slane %v1739_v23, 4  ;;  %v1556_v35 = vsel %vm14685_vm6, %v1551_v25, %v1555_v9  ;;  %v1732_v38 = vor.u32 %v1731_v27, %v1728_v26  ;;  %v714_v47 = vshll.u32 %v14841_v14, 16  ;;  %v931_v12 = vld [vmem:[#allocation2 + $0x98] sm:$0x1]  ;;  %v417_v22 = vld [vmem:[%s14548_s8 + $0xc8] sm:$0xff] }
  0x90   : > { %v1747_v39 = vrot.slane %v1745_v28, 5  ;;  %v11787_v45 = vcombine.low %v1546_v30, %v1556_v35  ;;  %v719_v49 = vshrl.u32 %v14859_v32, 16  ;;  %v713_v55 = vrot.slane %v711_v40, 7  ;;  %13339 = vmatpush3.bf16.msra.mxu1 %v14235_v3  ;;  %13389 = vmatpush3.bf16.msra.mxu0 %v14238_v44  ;;  %v878_v26 = vld [vmem:[#allocation2 + $0x3c] sm:$0xf]  ;;  %v402_v40 = vld [vmem:[%s14548_s8 + $0x50] sm:$0xff] }
  0x91   : > { %v1742_v46 = vor.u32 %v1741_v33, %v1737_v31  ;;  %v1733_v54 = vrot.slane %v1732_v38, 4  ;;  %v722_v56 = vshll.u32 %v14859_v32, 16  ;;  %v12639_v59 = vpack.c.bf16 %v400_v24, %v400_v24  ;;  %13340 = vmatprep.subr.bf16.mxu1 %v14237_v37  ;;  %13470 = vmatprep.subr.bf16.mxu0 %v14915_v57  ;;  %v882_v33 = vld [vmem:[#allocation2 + $0x44] sm:$0x1] }
  0x92   : > { %13299 = vmatmul.mubr.bf16.gmra.mxu0 %v11787_v45  ;;  %v14917_v60 = vld [vmem:[#allocation2 + $0x30] sm:$0xf]  ;;  %v721_v63 = vrot.slane %v719_v49, 7  ;;  %v12640_v0 = vpack.c.bf16 %v401_v41, %v401_v41  ;;  %v14921_v1 = vpack.c.bf16 %v416_v43, %v416_v43  ;;  %v716_v52 = vor.u32 %v714_v47, %v713_v55  ;;  %v403_v47 = vld [vmem:[%s14548_s8 + $0x58] sm:$0xff] }
  0x93   : > { %v1743_v14 = vrot.slane %v1742_v46, 4  ;;  %v14919_v61 = vld [vmem:[#allocation2 + $0x34] sm:$0xf]  ;;  %v1738_v32 = vsel %vm14685_vm6, %v1733_v54, %v1737_v31  ;;  %v1558_v2 = vshrl.u32 %v14917_v60, 16  ;;  %v1561_v3 = vshll.u32 %v14917_v60, 16  ;;  %v419_v54 = vld [vmem:[%s14548_s8 + $0xd8] sm:$0xff] }
  0x94   : > { %v1567_v4 = vshll.u32 %v14919_v61, 16  ;;  %v1571_v6 = vshrl.u32 %v14919_v61, 16  ;;  %v717_v7 = vrot.slane %v713_v55, 4  ;;  %13341 = vmatpush3.bf16.msra.mxu1 %v14237_v37  ;;  %v14932_v13 = vld [vmem:[#allocation2 + $0x38] sm:$0x1]  ;;  %v724_v16 = vor.u32 %v722_v56, %v721_v63  ;;  %v418_v49 = vld [vmem:[%s14548_s8 + $0xd0] sm:$0xff] }
  0x95   : > { %v1748_v5 = vsel %vm14685_vm6, %v1743_v14, %v1747_v39  ;;  %v1560_v9 = vrot.slane %v1558_v2, 4  ;;  %v1563_v10 = vrot.slane %v1561_v3, 5  ;;  %v726_v17 = vrot.slane %v721_v63, 4  ;;  %13422 = vmatprep.subr.bf16.mxu1 %v14909_v53  ;;  %v934_v46 = vld [vmem:[#allocation2 + $0x9c] sm:$0xf] }
  0x96   : > { %v11795_v8 = vcombine.low %v1738_v32, %v1748_v5  ;;  %v1569_v11 = vrot.slane %v1567_v4, 5  ;;  %v1573_v15 = vrot.slane %v1571_v6, 4  ;;  %v928_v18 = vsel %vm14701_vm9, %v716_v52, %v927_v58 }
  0x97   : > { %v1564_v19 = vor.u32 %v1563_v10, %v1560_v9  ;;  %v1577_v20 = vshll.u32 %v14932_v13, 16  ;;  %929 = vst [vmem:[#allocation2 + $0x90] sm:$0xf] %v928_v18  ;;  %v592_v21 = vshrl.u32 %v12639_v59, 16  ;;  %v595_v62 = vshll.u32 %v12639_v59, 16 }
  0x98   : > { %13315 = vmatmul.mubr.bf16.gmra.mxu1 %v11795_v8  ;;  %v1574_v23 = vor.u32 %v1573_v15, %v1569_v11  ;;  %v725_v24 = vsel %vm14709_vm10, %v717_v7, %v724_v16  ;;  %v932_v37 = vsel %vm14694_vm8, %v726_v17, %v931_v12  ;;  %v600_v25 = vshrl.u32 %v12640_v0, 16  ;;  %v938_v12 = vld [vmem:[#allocation2 + $0xa4] sm:$0x1] }
  0x99   : > { %v1565_v27 = vrot.slane %v1564_v19, 4  ;;  %v1579_v28 = vrot.slane %v1577_v20, 5  ;;  %930 = vst.msk [vmem:[#allocation2 + $0x94] sm:$0xf] %vm844_vm0, %v725_v24  ;;  %933 = vst [vmem:[#allocation2 + $0x98] sm:$0x1] %v932_v37  ;;  %v12656_v38 = vpack.c.bf16 %v417_v22, %v417_v22  ;;  %v12641_v8 = vpack.c.bf16 %v402_v40, %v402_v40 }
  0x9a   : > { %v594_v30 = vrot.slane %v592_v21, 7  ;;  %v603_v31 = vshll.u32 %v12640_v0, 16  ;;  %v1575_v34 = vrot.slane %v1574_v23, 4  ;;  %v602_v35 = vrot.slane %v600_v25, 7 }
  0x9b   : > { %v728_v39 = vshrl.u32 %v14921_v1, 16  ;;  %v1570_v41 = vsel %vm14685_vm6, %v1565_v27, %v1569_v11  ;;  %v731_v45 = vshll.u32 %v14921_v1, 16  ;;  %v736_v0 = vshrl.u32 %v12656_v38, 16 }
  0x9c   : > { %v597_v43 = vor.u32 %v595_v62, %v594_v30  ;;  %v598_v44 = vrot.slane %v594_v30, 4  ;;  %v1580_v55 = vsel %vm14685_vm6, %v1575_v34, %v1579_v28  ;;  %v605_v56 = vor.u32 %v603_v31, %v602_v35  ;;  %v404_v28 = vld [vmem:[%s14548_s8 + $0x60] sm:$0xff] }
  0x9d   : > { %v607_v58 = vrot.slane %v602_v35, 4  ;;  %v730_v59 = vrot.slane %v728_v39, 7  ;;  %v11788_v14 = vcombine.low %v1570_v41, %v1580_v55  ;;  %v739_v32 = vshll.u32 %v12656_v38, 16 }
  0x9e   : > { %v879_v63 = vsel %vm14701_vm9, %v597_v43, %v878_v26  ;;  %v14956_v2 = vld [vmem:[#allocation2 + $0x90] sm:$0xf]  ;;  %v606_v1 = vsel %vm14709_vm10, %v598_v44, %v605_v56  ;;  %v738_v7 = vrot.slane %v736_v0, 7  ;;  %v14971_v15 = vpack.c.bf16 %v403_v47, %v403_v47 }
  0x9f   : > { %880 = vst [vmem:[#allocation2 + $0x3c] sm:$0xf] %v879_v63  ;;  %v883_v3 = vsel %vm14694_vm8, %v607_v58, %v882_v33  ;;  %v733_v4 = vor.u32 %v731_v45, %v730_v59  ;;  %v734_v5 = vrot.slane %v730_v59, 4  ;;  %13302 = vmatprep.mubr.bf16.mxu0 %v11788_v14  ;;  %v1750_v6 = vshrl.u32 %v14956_v2, 16  ;;  %881 = vst.msk [vmem:[#allocation2 + $0x40] sm:$0xf] %vm844_vm0, %v606_v1 }
  0xa0   : > { %v1753_v52 = vshll.u32 %v14956_v2, 16  ;;  %884 = vst [vmem:[#allocation2 + $0x44] sm:$0x1] %v883_v3  ;;  %v14965_v9 = vld [vmem:[#allocation2 + $0x94] sm:$0xf]  ;;  %v14973_v16 = vpack.c.bf16 %v418_v49, %v418_v49  ;;  %v14975_v17 = vpack.c.bf16 %v419_v54, %v419_v54  ;;  %v741_v22 = vor.u32 %v739_v32, %v738_v7 }
  0xa1   : > { %v14967_v10 = vld [vmem:[#allocation2 + $0x98] sm:$0x1]  ;;  %v935_v11 = vsel %vm14701_vm9, %v733_v4, %v934_v46  ;;  %v1752_v18 = vrot.slane %v1750_v6, 4  ;;  %v1759_v20 = vshll.u32 %v14965_v9, 16  ;;  %v1763_v21 = vshrl.u32 %v14965_v9, 16 }
  0xa2   : > { %v1755_v19 = vrot.slane %v1753_v52, 5  ;;  %936 = vst [vmem:[#allocation2 + $0x9c] sm:$0xf] %v935_v11  ;;  %v1769_v62 = vshll.u32 %v14967_v10, 16  ;;  %v743_v23 = vrot.slane %v738_v7, 4  ;;  %v609_v24 = vshrl.u32 %v12641_v8, 16 }
  0xa3   : > { %v1761_v25 = vrot.slane %v1759_v20, 5  ;;  %v1765_v26 = vrot.slane %v1763_v21, 4  ;;  %v612_v27 = vshll.u32 %v12641_v8, 16  ;;  %v742_v31 = vsel %vm14709_vm10, %v734_v5, %v741_v22  ;;  %v885_v59 = vld [vmem:[#allocation2 + $0x48] sm:$0xf]  ;;  %v420_v7 = vld [vmem:[%s14548_s8 + $0xe0] sm:$0xff] }
  0xa4   : > { %v1756_v37 = vor.u32 %v1755_v19, %v1752_v18  ;;  %v1771_v30 = vrot.slane %v1769_v62, 5  ;;  %v939_v33 = vsel %vm14694_vm8, %v743_v23, %v938_v12  ;;  %v14985_v34 = vrot.slane %v609_v24, 7  ;;  %937 = vst.msk [vmem:[#allocation2 + $0xa0] sm:$0xf] %vm844_vm0, %v742_v31  ;;  %v405_v52 = vld [vmem:[%s14548_s8 + $0x68] sm:$0xff] }
  0xa5   : > { %v1766_v38 = vor.u32 %v1765_v26, %v1761_v25  ;;  %940 = vst [vmem:[#allocation2 + $0xa4] sm:$0x1] %v939_v33  ;;  %v617_v40 = vshrl.u32 %v14971_v15, 16  ;;  %v620_v41 = vshll.u32 %v14971_v15, 16  ;;  %v14999_v49 = vpack.c.bf16 %v404_v28, %v404_v28  ;;  %v889_v31 = vld [vmem:[#allocation2 + $0x50] sm:$0x1] }
  0xa6   : > { %v1757_v35 = vrot.slane %v1756_v37, 4  ;;  %v14987_v39 = vld [vmem:[#allocation2 + $0x3c] sm:$0xf]  ;;  %v14992_v43 = vld [vmem:[#allocation2 + $0x40] sm:$0xf]  ;;  %v614_v47 = vor.u32 %v612_v27, %v14985_v34  ;;  %v615_v1 = vrot.slane %v14985_v34, 4  ;;  %v15021_v37 = vpack.c.bf16 %v405_v52, %v405_v52 }
  0xa7   : > { %v14994_v44 = vld [vmem:[#allocation2 + $0x44] sm:$0x1]  ;;  %v1582_v45 = vshrl.u32 %v14987_v39, 16  ;;  %v1585_v46 = vshll.u32 %v14987_v39, 16  ;;  %v1767_v55 = vrot.slane %v1766_v38, 4  ;;  %v1591_v56 = vshll.u32 %v14992_v43, 16 }
  0xa8   : > { %v1762_v54 = vsel %vm14685_vm6, %v1757_v35, %v1761_v25  ;;  %v1595_v58 = vshrl.u32 %v14992_v43, 16  ;;  %v1601_v0 = vshll.u32 %v14994_v44, 16  ;;  %v619_v20 = vrot.slane %v617_v40, 7 }
  0xa9   : > { %v1584_v14 = vrot.slane %v1582_v45, 4  ;;  %v1587_v63 = vrot.slane %v1585_v46, 5  ;;  %v15006_v32 = vld [vmem:[#allocation2 + $0x9c] sm:$0xf]  ;;  %v1772_v3 = vsel %vm14685_vm6, %v1767_v55, %v1771_v30  ;;  %v1593_v4 = vrot.slane %v1591_v56, 5 }
  0xaa   : > { %20198 = vst [vmem:[#allocation8_spill] sm:$0xff] %v15006_v32  ;;  %v1597_v5 = vrot.slane %v1595_v58, 4  ;;  %v1774_v6 = vshrl.u32 %v15006_v32, 16  ;;  %v11796_v8 = vcombine.low %v1762_v54, %v1772_v3  ;;  %v1603_v12 = vrot.slane %v1601_v0, 5 }
  0xab   : > { %v1588_v11 = vor.u32 %v1587_v63, %v1584_v14  ;;  %v1777_v15 = vshll.u32 %v15006_v32, 16  ;;  %v886_v21 = vsel %vm14701_vm9, %v614_v47, %v885_v59  ;;  %v15017_v22 = vld [vmem:[#allocation2 + $0xa0] sm:$0xf]  ;;  %v15023_v25 = vpack.c.bf16 %v420_v7, %v420_v7 }
  0xac   : > { %v1598_v18 = vor.u32 %v1597_v5, %v1593_v4  ;;  %v1776_v19 = vrot.slane %v1774_v6, 4  ;;  %13318 = vmatprep.mubr.bf16.mxu1 %v11796_v8  ;;  %v15019_v23 = vld [vmem:[#allocation2 + $0xa4] sm:$0x1]  ;;  %887 = vst [vmem:[#allocation2 + $0x48] sm:$0xf] %v886_v21  ;;  %v1783_v27 = vshll.u32 %v15017_v22, 16  ;;  %v622_v35 = vor.u32 %v620_v41, %v619_v20 }
  0xad   : > { %v1589_v62 = vrot.slane %v1588_v11, 4  ;;  %v1779_v24 = vrot.slane %v1777_v15, 5  ;;  %v1787_v28 = vshrl.u32 %v15017_v22, 16  ;;  %v1793_v30 = vshll.u32 %v15019_v23, 16 }
  0xae   : > { %v1599_v26 = vrot.slane %v1598_v18, 4  ;;  %v624_v38 = vrot.slane %v619_v20, 4  ;;  %v1785_v45 = vrot.slane %v1783_v27, 5  ;;  %v623_v56 = vsel %vm14709_vm10, %v615_v1, %v622_v35  ;;  %v941_v1 = vld [vmem:[#allocation2 + $0xa8] sm:$0xf] }
  0xaf   : > { %v1594_v33 = vsel %vm14685_vm6, %v1589_v62, %v1593_v4  ;;  %v1780_v34 = vor.u32 %v1779_v24, %v1776_v19  ;;  %v1789_v46 = vrot.slane %v1787_v28, 4  ;;  %v1795_v47 = vrot.slane %v1793_v30, 5  ;;  %888 = vst.msk [vmem:[#allocation2 + $0x4c] sm:$0xf] %vm844_vm0, %v623_v56  ;;  %v892_v19 = vld [vmem:[#allocation2 + $0x54] sm:$0xf] }
  0xb0   : > { %v1604_v40 = vsel %vm14685_vm6, %v1599_v26, %v1603_v12  ;;  %v890_v58 = vsel %vm14694_vm8, %v624_v38, %v889_v31  ;;  %v745_v41 = vshrl.u32 %v14973_v16, 16  ;;  %v748_v14 = vshll.u32 %v14973_v16, 16  ;;  %v945_v16 = vld [vmem:[#allocation2 + $0xb0] sm:$0x1]  ;;  %v421_v24 = vld [vmem:[%s14548_s8 + $0xe8] sm:$0xff] }
  0xb1   : > { %v11789_v54 = vcombine.low %v1594_v33, %v1604_v40  ;;  %v1781_v55 = vrot.slane %v1780_v34, 4  ;;  %v1790_v59 = vor.u32 %v1789_v46, %v1785_v45  ;;  %891 = vst [vmem:[#allocation2 + $0x50] sm:$0x1] %v890_v58  ;;  %v753_v63 = vshrl.u32 %v14975_v17, 16 }
  0xb2   : > { %v756_v3 = vshll.u32 %v14975_v17, 16  ;;  %v626_v4 = vshrl.u32 %v14999_v49, 16  ;;  %v629_v5 = vshll.u32 %v14999_v49, 16  ;;  %v747_v7 = vrot.slane %v745_v41, 7 }
  0xb3   : > { %13303 = vmatmul.mubr.bf16.gmra.mxu0 %v11789_v54  ;;  %v1786_v0 = vsel %vm14685_vm6, %v1781_v55, %v1785_v45  ;;  %v1791_v6 = vrot.slane %v1790_v59, 4  ;;  %v15045_v52 = vld [vmem:[#allocation2 + $0x48] sm:$0xf]  ;;  %v755_v8 = vrot.slane %v753_v63, 7  ;;  %v634_v11 = vshrl.u32 %v15021_v37, 16 }
  0xb4   : > { %v1606_v12 = vshrl.u32 %v15045_v52, 16  ;;  %v1609_v15 = vshll.u32 %v15045_v52, 16  ;;  %v628_v18 = vrot.slane %v626_v4, 7  ;;  %v637_v17 = vshll.u32 %v15021_v37, 16  ;;  %v896_v59 = vld [vmem:[#allocation2 + $0x5c] sm:$0x1] }
  0xb5   : > { %v1796_v49 = vsel %vm14685_vm6, %v1791_v6, %v1795_v47  ;;  %v750_v20 = vor.u32 %v748_v14, %v747_v7  ;;  %v751_v21 = vrot.slane %v747_v7, 4  ;;  %v758_v62 = vor.u32 %v756_v3, %v755_v8 }
  0xb6   : > { %v11797_v26 = vcombine.low %v1786_v0, %v1796_v49  ;;  %v1608_v27 = vrot.slane %v1606_v12, 4  ;;  %v1611_v28 = vrot.slane %v1609_v15, 5  ;;  %v760_v30 = vrot.slane %v755_v8, 4  ;;  %v15058_v35 = vld [vmem:[#allocation2 + $0x4c] sm:$0xf] }
  0xb7   : > { %v759_v31 = vsel %vm14709_vm10, %v751_v21, %v758_v62  ;;  %v942_v33 = vsel %vm14701_vm9, %v750_v20, %v941_v1  ;;  %v631_v34 = vor.u32 %v629_v5, %v628_v18  ;;  %v632_v37 = vrot.slane %v628_v18, 4  ;;  %v15077_v15 = vld [vmem:[#allocation2 + $0x8] sm:$0x1] }
  0xb8   : > { %13319 = vmatmul.mubr.bf16.gmra.mxu1 %v11797_v26  ;;  %v15060_v38 = vld [vmem:[#allocation2 + $0x50] sm:$0x1]  ;;  %v1612_v40 = vor.u32 %v1611_v28, %v1608_v27  ;;  %943 = vst [vmem:[#allocation2 + $0xa8] sm:$0xf] %v942_v33  ;;  %944 = vst.msk [vmem:[#allocation2 + $0xac] sm:$0xf] %vm844_vm0, %v759_v31  ;;  %v946_v45 = vsel %vm14694_vm8, %v760_v30, %v945_v16  ;;  %v12660_v47 = vpack.c.bf16 %v421_v24, %v421_v24 }
  0xb9   : > { %v636_v46 = vrot.slane %v634_v11, 7  ;;  %v1615_v54 = vshll.u32 %v15058_v35, 16  ;;  %v1619_v55 = vshrl.u32 %v15058_v35, 16  ;;  %v1625_v56 = vshll.u32 %v15060_v38, 16  ;;  %947 = vst [vmem:[#allocation2 + $0xb0] sm:$0x1] %v946_v45 }
  0xba   : > { %v893_v58 = vsel %vm14701_vm9, %v631_v34, %v892_v19  ;;  %v762_v63 = vshrl.u32 %v15023_v25, 16  ;;  %v1613_v0 = vrot.slane %v1612_v40, 4  ;;  %v765_v4 = vshll.u32 %v15023_v25, 16  ;;  %v948_v24 = vld [vmem:[#allocation2 + $0xb4] sm:$0xf] }
  0xbb   : > { %v639_v41 = vor.u32 %v637_v17, %v636_v46  ;;  %v641_v14 = vrot.slane %v636_v46, 4  ;;  %894 = vst [vmem:[#allocation2 + $0x54] sm:$0xf] %v893_v58  ;;  %v1617_v3 = vrot.slane %v1615_v54, 5  ;;  %v1621_v1 = vrot.slane %v1619_v55, 4 }
  0xbc   : > { %v764_v7 = vrot.slane %v762_v63, 7  ;;  %v770_v8 = vshrl.u32 %v12660_v47, 16  ;;  %v1627_v11 = vrot.slane %v1625_v56, 5  ;;  %v773_v12 = vshll.u32 %v12660_v47, 16  ;;  %v952_v46 = vld [vmem:[#allocation2 + $0xbc] sm:$0x1] }
  0xbd   : > { %v640_v5 = vsel %vm14709_vm10, %v632_v37, %v639_v41  ;;  %v897_v6 = vsel %vm14694_vm8, %v641_v14, %v896_v59  ;;  %v1622_v16 = vor.u32 %v1621_v1, %v1617_v3  ;;  %v2496_v18 = vrot.slane %v15077_v15, 5  ;;  %v2440_v58 = vld [vmem:[#allocation2] sm:$0xe] }
  0xbe   : > { %895 = vst.msk [vmem:[#allocation2 + $0x58] sm:$0xf] %vm844_vm0, %v640_v5  ;;  %898 = vst [vmem:[#allocation2 + $0x5c] sm:$0x1] %v897_v6  ;;  %v768_v17 = vrot.slane %v764_v7, 4  ;;  %v772_v25 = vrot.slane %v770_v8, 7  ;;  %v1618_v19 = vsel %vm14685_vm6, %v1613_v0, %v1617_v3  ;;  %v767_v62 = vor.u32 %v765_v4, %v764_v7 }
  0xbf   : > { %vm2488_vm11 = vcmask 1042432   ;;  %v1623_v49 = vrot.slane %v1622_v16, 4  ;;  %v15082_v20 = vld [vmem:[#allocation2 + $0xa8] sm:$0xf]  ;;  %v15084_v21 = vld [vmem:[#allocation2 + $0xac] sm:$0xf] }
  0xc0   : > { %20199 = vst [vmem:[#allocation9_spill] sm:$0xff] %v15082_v20  ;;  %20200 = vst [vmem:[#allocation10_spill] sm:$0xff] %v15084_v21  ;;  %vm2489_vm12 = vcmask 1046532   ;;  %v15086_v26 = vld [vmem:[#allocation2 + $0xb0] sm:$0x1]  ;;  %v1798_v27 = vshrl.u32 %v15082_v20, 16  ;;  %v775_v40 = vor.u32 %v773_v12, %v772_v25  ;;  %v949_v5 = vsel %vm14701_vm9, %v767_v62, %v948_v24 }
  0xc1   : > { %v1801_v28 = vshll.u32 %v15082_v20, 16  ;;  %v1807_v30 = vshll.u32 %v15084_v21, 16  ;;  %v1811_v31 = vshrl.u32 %v15084_v21, 16  ;;  %v1628_v33 = vsel %vm14685_vm6, %v1623_v49, %v1627_v11  ;;  %950 = vst [vmem:[#allocation2 + $0xb4] sm:$0xf] %v949_v5  ;;  %vm15120_vm13 = vmor %vm2488_vm11, %vm2489_vm12 }
  0xc2   : > { %v1817_v34 = vshll.u32 %v15086_v26, 16  ;;  %v15095_v37 = vld [vmem:[#allocation2 + $0x54] sm:$0xf]  ;;  %v777_v45 = vrot.slane %v772_v25, 4  ;;  %v11790_v47 = vcombine.low %v1618_v19, %v1628_v33  ;;  %v1800_v54 = vrot.slane %v1798_v27, 4 }
  0xc3   : > { %v1803_v55 = vrot.slane %v1801_v28, 5  ;;  %v1809_v56 = vrot.slane %v1807_v30, 5  ;;  %v1813_v59 = vrot.slane %v1811_v31, 4  ;;  %v1630_v14 = vshrl.u32 %v15095_v37, 16  ;;  %v2441_v12 = vld [vmem:[#allocation2 + $0xc] sm:$0xe] }
  0xc4   : > { %v1819_v41 = vrot.slane %v1817_v34, 5  ;;  %v1633_v63 = vshll.u32 %v15095_v37, 16  ;;  %13306 = vmatprep.mubr.bf16.mxu0 %v11790_v47  ;;  %v776_v4 = vsel %vm14709_vm10, %v768_v17, %v775_v40  ;;  %v953_v6 = vsel %vm14694_vm8, %v777_v45, %v952_v46  ;;  %v15113_v28 = vld [vmem:[#allocation2 + $0x4] sm:$0xf]  ;;  %v14450_v31 = vld [vmem:[#allocation2 + $0x14] sm:$0x1] }
  0xc5   : > { %v1804_v0 = vor.u32 %v1803_v55, %v1800_v54  ;;  %v15099_v3 = vld [vmem:[#allocation2 + $0x58] sm:$0xf]  ;;  %v15101_v1 = vld [vmem:[#allocation2 + $0x5c] sm:$0x1]  ;;  %v1814_v7 = vor.u32 %v1813_v59, %v1809_v56  ;;  %v1632_v8 = vrot.slane %v1630_v14, 4  ;;  %v11832_v49 = vrot.slane %v2440_v58, 9 }
  0xc6   : > { %v1635_v16 = vrot.slane %v1633_v63, 5  ;;  %v1639_v11 = vshll.u32 %v15099_v3, 16  ;;  %951 = vst.msk [vmem:[#allocation2 + $0xb8] sm:$0xf] %vm844_vm0, %v776_v4  ;;  %954 = vst [vmem:[#allocation2 + $0xbc] sm:$0x1] %v953_v6  ;;  %v20209_v20 = vcombine.low %v14987_v39, %v14992_v43 }
  0xc7   : > { %v1805_v25 = vrot.slane %v1804_v0, 4  ;;  %v1643_v19 = vshrl.u32 %v15099_v3, 16  ;;  %v1649_v17 = vshll.u32 %v15101_v1, 16  ;;  %v1815_v62 = vrot.slane %v1814_v7, 4  ;;  %v2442_v46 = vld [vmem:[#allocation2 + $0x18] sm:$0xe] }
  0xc8   : > { %v1636_v24 = vor.u32 %v1635_v16, %v1632_v8  ;;  %v1641_v27 = vrot.slane %v1639_v11, 5  ;;  %v2493_v30 = vrot.slane %v15113_v28, 5  ;;  %v2503_v33 = vrot.slane %v14450_v31, 5  ;;  %v15126_v0 = vld [vmem:[#allocation2 + $0x10] sm:$0xf] }
  0xc9   : > { %v1810_v34 = vsel %vm14685_vm6, %v1805_v25, %v1809_v56  ;;  %v1645_v40 = vrot.slane %v1643_v19, 4  ;;  %v20201_v45 = vmov 0  ;;  %v1820_v47 = vsel %vm14685_vm6, %v1815_v62, %v1819_v41  ;;  %v15135_v41 = vld [vmem:[#allocation2 + $0x1c] sm:$0xf]  ;;  %v15140_v11 = vld [vmem:[#allocation2 + $0xb4] sm:$0xf] }
  0xca   : > { %v20202_v45 = vsel %vm15120_vm13, 4294967295, %v20201_v45  ;;  %v1637_v54 = vrot.slane %v1636_v24, 4  ;;  %v1651_v55 = vrot.slane %v1649_v17, 5  ;;  %v2495_v58 = vrot.slane %v2493_v30, 4  ;;  %20204 = vst [vmem:[#allocation12_spill] sm:$0xff] %v15140_v11 }
  0xcb   : > { %20203 = vst [vmem:[#allocation11_spill] sm:$0xff] %v20202_v45  ;;  %v11798_v59 = vcombine.low %v1810_v34, %v1820_v47  ;;  %v1646_v14 = vor.u32 %v1645_v40, %v1641_v27  ;;  %v11833_v63 = vrot.slane %v2441_v12, 9  ;;  %v2500_v56 = vrot.slane %v15126_v0, 5  ;;  %v14453_v25 = vld [vmem:[#allocation2 + $0x20] sm:$0x1] }
  0xcc   : > { %v2494_v4 = vsel %vm15120_vm13, %v11832_v49, %v2493_v30  ;;  %v2497_v5 = vsel %vm15120_vm13, %v2495_v58, %v2496_v18  ;;  %v11834_v6 = vrot.slane %v2442_v46, 9  ;;  %v2507_v7 = vrot.slane %v15135_v41, 5  ;;  %v2443_v34 = vld [vmem:[#allocation2 + $0x24] sm:$0xe]  ;;  %v15418_v39 = vld [vmem:[#allocation2 + $0x28] sm:$0xf] }
  0xcd   : > { %13322 = vmatprep.mubr.bf16.mxu1 %v11798_v59  ;;  %v1642_v8 = vsel %vm14685_vm6, %v1637_v54, %v1641_v27  ;;  %v1647_v16 = vrot.slane %v1646_v14, 4  ;;  %v15142_v12 = vld [vmem:[#allocation2 + $0xb8] sm:$0xf]  ;;  %v2510_v19 = vrot.slane %v14453_v25, 5  ;;  %v15144_v15 = vld [vmem:[#allocation2 + $0xbc] sm:$0x1]  ;;  %v11864_v30 = vcombine.low %v2494_v4, %v2497_v5 }
  0xce   : > { %20205 = vst [vmem:[#allocation13_spill] sm:$0xff] %v15142_v12  ;;  %v1822_v18 = vshrl.u32 %v15140_v11, 16  ;;  %v1825_v17 = vshll.u32 %v15140_v11, 16  ;;  %v1831_v49 = vshll.u32 %v15142_v12, 16  ;;  %v1835_v62 = vshrl.u32 %v15142_v12, 16 }
  0xcf   : > { %v1652_v24 = vsel %vm14685_vm6, %v1647_v16, %v1651_v55  ;;  %v1841_v27 = vshll.u32 %v15144_v15, 16  ;;  %v2502_v31 = vrot.slane %v2500_v56, 4  ;;  %v2509_v59 = vrot.slane %v2507_v7, 4  ;;  %v968_v11 = vld [vmem:[#allocation2 + $0x24] sm:$0xf] }
  0xd0   : > { %v11791_v40 = vcombine.low %v1642_v8, %v1652_v24  ;;  %v1824_v46 = vrot.slane %v1822_v18, 4  ;;  %v1827_v47 = vrot.slane %v1825_v17, 5  ;;  %v1833_v54 = vrot.slane %v1831_v49, 5  ;;  %v14454_v24 = vld [vmem:[#allocation2] sm:$0xf] }
  0xd1   : > { %v1837_v58 = vrot.slane %v1835_v62, 4  ;;  %v2501_v25 = vsel %vm15120_vm13, %v11833_v63, %v2500_v56  ;;  %v2514_v36 = vrot.slane %v14864_v50, 5  ;;  %v1843_v55 = vrot.slane %v1841_v27, 5  ;;  %v2444_v56 = vld [vmem:[#allocation2 + $0x30] sm:$0xe] }
  0xd2   : > { %13307 = vmatmul.mubr.bf16.gmra.mxu0 %v11791_v40  ;;  %v1828_v14 = vor.u32 %v1827_v47, %v1824_v46  ;;  %v2504_v4 = vsel %vm15120_vm13, %v2502_v31, %v2503_v33  ;;  %v11835_v5 = vrot.slane %v2443_v34, 9  ;;  %v2508_v16 = vsel %vm15120_vm13, %v11834_v6, %v2507_v7  ;;  %v2445_v7 = vld [vmem:[#allocation2 + $0x3c] sm:$0xe]  ;;  %v2446_v34 = vld [vmem:[#allocation2 + $0x48] sm:$0xe]  ;;  %v14242_v40 = vld [vmem:[%s20105_s1 + $0x130] sm:$0xff]  }
  0xd3   : > { %v1838_v48 = vor.u32 %v1837_v58, %v1833_v54  ;;  %13390 = vmatprep.mubr.bf16.mxu0 %v11864_v30  ;;  %v2511_v18 = vsel %vm15120_vm13, %v2509_v59, %v2510_v19  ;;  %v2516_v49 = vrot.slane %v2514_v36, 4  ;;  %v2517_v63 = vrot.slane %v14866_v51, 5  ;;  %v15171_v19 = vld [vmem:[#allocation2 + $0xc] sm:$0xf]  ;;  %v2447_v58 = vld [vmem:[#allocation2 + $0x54] sm:$0xe] }
  0xd4   : > { %v1829_v8 = vrot.slane %v1828_v14, 4  ;;  %v2521_v50 = vrot.slane %v14919_v61, 5  ;;  %v11808_v33 = vcombine.low %v14454_v24, %v15113_v28  ;;  %v11865_v27 = vcombine.low %v2501_v25, %v2504_v4  ;;  %v15316_v6 = vld [vmem:[#allocation2 + $0x8c] sm:$0x1] }
  0xd5   : > { %v1839_v17 = vrot.slane %v1838_v48, 4  ;;  %v11809_v51 = vcombine.low %v15171_v19, %v15126_v0  ;;  %v11866_v30 = vcombine.low %v2508_v16, %v2511_v18  ;;  %v15177_v31 = vsel %vm15120_vm13, %v11835_v5, %v2514_v36  ;;  %v15188_v5 = vld [vmem:[#allocation2 + $0x24] sm:$0xf]  ;;  %v15271_v19 = vld [vmem:[#allocation2 + $0x7c] sm:$0xf] }
  0xd6   : > { %v1834_v62 = vsel %vm14685_vm6, %v1829_v8, %v1833_v54  ;;  %v11836_v46 = vrot.slane %v2444_v56, 9  ;;  %v2524_v47 = vrot.slane %v14932_v13, 5  ;;  %v2528_v54 = vrot.slane %v14992_v43, 5  ;;  %v15190_v8 = vld [vmem:[#allocation2 + $0x28] sm:$0xf] }
  0xd7   : > { %v1844_v48 = vsel %vm14685_vm6, %v1839_v17, %v1843_v55  ;;  %v2518_v59 = vsel %vm15120_vm13, %v2516_v49, %v2517_v63  ;;  %v2523_v14 = vrot.slane %v2521_v50, 4  ;;  %v11837_v25 = vrot.slane %v2445_v7, 9  ;;  %v14456_v55 = vld [vmem:[#allocation2 + $0x18] sm:$0xf]  ;;  %v963_v13 = vld [vmem:[#allocation2 + $0x10] sm:$0xf] }
  0xd8   : > { %v11799_v28 = vcombine.low %v1834_v62, %v1844_v48  ;;  %v2535_v36 = vrot.slane %v15058_v35, 5  ;;  %v11810_v4 = vcombine.low %v14456_v55, %v15135_v41  ;;  %v2531_v16 = vrot.slane %v14994_v44, 5  ;;  %v14459_v41 = vld [vmem:[#allocation2 + $0x68] sm:$0x1]  ;;  %v971_v43 = vld [vmem:[#allocation2 + $0x30] sm:$0xf] }
  0xd9   : > { %v11838_v18 = vrot.slane %v2446_v34, 9  ;;  %v2530_v17 = vrot.slane %v2528_v54, 4  ;;  %v2538_v63 = vrot.slane %v15060_v38, 5  ;;  %v2542_v56 = vrot.slane %v15099_v3, 5 }
  0xda   : > { %13323 = vmatmul.mubr.bf16.gmra.mxu1 %v11799_v28  ;;  %13391 = vmatmul.mubr.bf16.vlgmr.msra.gmra.mxu0 %v11865_v27  ;;  %v2537_v49 = vrot.slane %v2535_v36, 4  ;;  %v2552_v62 = vrot.slane %v14459_v41, 5  ;;  %v11867_v24 = vcombine.low %v15177_v31, %v2518_v59  ;;  %v2522_v44 = vsel %vm15120_vm13, %v11836_v46, %v2521_v50  ;;  %v2449_v31 = vld [vmem:[#allocation2 + $0x6c] sm:$0xe]  ;;  %v15219_v46 = vld [vmem:[#allocation2 + $0x64] sm:$0xf] }
  0xdb   : > { %13342 = vmatprep.mubr.bf16.mxu1 %v11808_v33  ;;  %13471 = vmatpush3.bf16.msra.mxu0 %v14915_v57  ;;  %v14244_v57 = vld [vmem:[%s20105_s1 + $0x128] sm:$0xff]   ;;  %v2448_v33 = vld [vmem:[#allocation2 + $0x60] sm:$0xe]  ;;  %v2525_v38 = vsel %vm15120_vm13, %v2523_v14, %v2524_v47  ;;  %v11839_v7 = vrot.slane %v2447_v58, 9  ;;  %v2544_v48 = vrot.slane %v2542_v56, 4  ;;  %v15211_v34 = vsel %vm15120_vm13, %v11837_v25, %v2528_v54 }
  0xdc   : > { %13394 = vmatprep.mubr.bf16.mxu0 %v11866_v30  ;;  %13472 = vmatprep.subr.bf16.mxu0 %v14242_v40  ;;  %v2545_v30 = vrot.slane %v15101_v1, 5  ;;  %v15217_v28 = vsel %vm15120_vm13, %v11838_v18, %v2535_v36  ;;  %v2549_v47 = vrot.slane %v15219_v46, 5  ;;  %v15224_v1 = vsel %vm15120_vm13, %v2530_v17, %v2531_v16  ;;  %v15230_v59 = vld [vmem:[#allocation2 + $0x70] sm:$0xf]  ;;  %v2450_v25 = vld [vmem:[#allocation2 + $0x78] sm:$0xe] }
  0xdd   : > { %v15228_v54 = vsel %vm15120_vm13, %v2537_v49, %v2538_v63  ;;  %v11840_v58 = vrot.slane %v2448_v33, 9  ;;  %v2556_v14 = vrot.slane %v15230_v59, 5  ;;  %v14241_v36 = vld [vmem:[%s20105_s1 + $0xf0] sm:$0xff]   ;;  %v11868_v55 = vcombine.low %v2522_v44, %v2525_v38  ;;  %v14246_v16 = vld [vmem:[%s20105_s1 + $0x120] sm:$0xff]   ;;  %v962_v27 = vld [vmem:[#allocation2 + $0xc] sm:$0xf] }
  0xde   : > { %v15241_v18 = vld [vmem:[#allocation2 + $0x60] sm:$0xf]  ;;  %v2551_v49 = vrot.slane %v2549_v47, 4  ;;  %v15247_v63 = vsel %vm15120_vm13, %v11839_v7, %v2542_v56  ;;  %v15251_v41 = vsel %vm15120_vm13, %v2544_v48, %v2545_v30  ;;  %v11841_v44 = vrot.slane %v2449_v31, 9  ;;  %v14463_v33 = vld [vmem:[#allocation2 + $0x74] sm:$0x1] }
  0xdf   : > { %13473 = vmatpush3.bf16.msra.mxu0 %v14242_v40  ;;  %v2559_v38 = vrot.slane %v14463_v33, 5  ;;  %v15253_v40 = vld [vmem:[#allocation2 + $0x84] sm:$0xe]  ;;  %v11869_v17 = vcombine.low %v15211_v34, %v15224_v1  ;;  %v2558_v7 = vrot.slane %v2556_v14, 4  ;;  %v11842_v50 = vrot.slane %v2450_v25, 9  ;;  %v15333_v56 = vld [vmem:[%s20105_s1 + $0x110] sm:$0xff]  }
  0xe0   : > { %13474 = vmatprep.subr.bf16.mxu0 %v14244_v57  ;;  %v15265_v48 = vsel %vm15120_vm13, %v11840_v58, %v2549_v47  ;;  %v15269_v0 = vsel %vm15120_vm13, %v2551_v49, %v2552_v62  ;;  %v15282_v31 = vld [vmem:[#allocation2 + $0x6c] sm:$0xf]  ;;  %v15286_v34 = vld [vmem:[#allocation2 + $0x78] sm:$0xf]  ;;  %v2453_v1 = vld [vmem:[#allocation2 + $0x9c] sm:$0xe]  ;;  %v15292_v58 = vsel %vm15120_vm13, %v11841_v44, %v2556_v14 }
  0xe1   : > { %v14468_v25 = vld [vmem:[#allocation2 + $0x80] sm:$0x1]  ;;  %v15294_v49 = vld [vmem:[#allocation2 + $0x84] sm:$0xf]  ;;  %v11843_v62 = vrot.slane %v15253_v40, 9  ;;  %v15306_v14 = vsel %vm15120_vm13, %v2558_v7, %v2559_v38  ;;  %v2584_v7 = vrot.slane %v15017_v22, 5 }
  0xe2   : > { %13343 = vmatmul.mubr.bf16.vlgmr.msra.gmra.mxu1 %v11809_v51  ;;  %13395 = vmatmul.mubr.bf16.gmra.mxu0 %v11867_v24  ;;  %v2563_v51 = vrot.slane %v15271_v19, 5  ;;  %v15274_v24 = vld [vmem:[#allocation2 + $0x88] sm:$0xf]  ;;  %v14245_v47 = vld [vmem:[%s20105_s1 + $0xe0] sm:$0xff]   ;;  %v15322_v38 = vld [vmem:[#allocation2 + $0x90] sm:$0xe] }
  0xe3   : > { %13423 = vmatpush3.bf16.msra.mxu1 %v14909_v53  ;;  %13346 = vmatprep.mubr.bf16.mxu1 %v11810_v4  ;;  %v2570_v30 = vrot.slane %v15274_v24, 5  ;;  %v14243_v53 = vld [vmem:[%s20105_s1 + $0xe8] sm:$0xff]   ;;  %v2591_v42 = vrot.slane %v15084_v21, 5  ;;  %v2594_v32 = vrot.slane %v15086_v26, 5  ;;  %v2586_v21 = vrot.slane %v2584_v7, 4 }
  0xe4   : > { %13424 = vmatprep.subr.bf16.mxu1 %v14241_v36  ;;  %13398 = vmatprep.mubr.bf16.mxu0 %v11868_v55  ;;  %v2566_v55 = vrot.slane %v14468_v25, 5  ;;  %v2454_v4 = vld [vmem:[#allocation2 + $0xa8] sm:$0xe]  ;;  %v15310_v44 = vsel %vm15120_vm13, %v11842_v50, %v2563_v51  ;;  %v2565_v25 = vrot.slane %v2563_v51, 4  ;;  %v14248_v50 = vld [vmem:[%s20105_s1 + $0x118] sm:$0xff]   ;;  %v20206_v51 = vcombine.low %v15188_v5, %v15190_v8 }
  0xe5   : > { %13475 = vmatpush3.bf16.msra.mxu0 %v14244_v57  ;;  %v15314_v33 = vrot.slane %v2570_v30, 4  ;;  %v11845_v57 = vrot.slane %v2453_v1, 9  ;;  %v11846_v40 = vrot.slane %v2454_v4, 9  ;;  %v2577_v4 = vrot.slane %v14965_v9, 5 }
  0xe6   : > { %13476 = vmatprep.subr.bf16.mxu0 %v14246_v16  ;;  %v20207_v26 = vcombine.low %v14917_v60, %v14919_v61  ;;  %v15356_v5 = vsel %vm15120_vm13, %v2565_v25, %v2566_v55  ;;  %v14247_v60 = vld [vmem:[%s20105_s1 + $0xd8] sm:$0xff]   ;;  %v1014_v55 = vshrl.u32 %v962_v27, 16  ;;  %v11844_v25 = vrot.slane %v15322_v38, 9 }
  0xe7   : > { %13425 = vmatpush3.bf16.msra.mxu1 %v14241_v36  ;;  %v2587_v36 = vrot.slane %v15019_v23, 5  ;;  %v15349_v1 = vsel %vm15120_vm13, %v11845_v57, %v2584_v7  ;;  %v15360_v8 = vsel %vm15120_vm13, %v11846_v40, %v2591_v42  ;;  %v20208_v57 = vcombine.low %v15217_v28, %v15228_v54 }
  0xe8   : > { %13426 = vmatprep.subr.bf16.mxu1 %v14243_v53  ;;  %v1017_v40 = vshll.u32 %v962_v27, 16  ;;  %v2580_v7 = vrot.slane %v14967_v10, 5  ;;  %v15383_v27 = vld [vmem:[#allocation2 + $0x14] sm:$0x1]  ;;  %v2601_v38 = vrot.slane %v15144_v15, 5  ;;  %v1027_v23 = vshrl.u32 %v963_v13, 16 }
  0xe9   : > { %13477 = vmatpush3.bf16.msra.mxu0 %v14246_v16  ;;  %v15344_v16 = vsel %vm15120_vm13, %v11843_v62, %v2570_v30  ;;  %v2598_v30 = vrot.slane %v15142_v12, 5  ;;  %v965_v62 = vld [vmem:[#allocation2 + $0x18] sm:$0xf]  ;;  %v15371_v61 = vsel %vm15120_vm13, %v2586_v21, %v2587_v36  ;;  %v2579_v21 = vrot.slane %v2577_v4, 4  ;;  %v967_v12 = vld [vmem:[#allocation2 + $0x20] sm:$0x1] }
  0xea   : > { %13347 = vmatmul.mubr.bf16.gmra.mxu1 %v20206_v51  ;;  %13399 = vmatmul.mubr.bf16.gmra.mxu0 %v11869_v17  ;;  %v2593_v17 = vrot.slane %v2591_v42, 4  ;;  %v1023_v42 = vshll.u32 %v963_v13, 16  ;;  %v966_v51 = vld [vmem:[#allocation2 + $0x1c] sm:$0xf]  ;;  %v1038_v28 = vshrl.u32 %v965_v62, 16  ;;  %v14252_v15 = vld [vmem:[%s20105_s1 + $0x108] sm:$0xff]  }
  0xeb   : > { %13350 = vmatprep.mubr.bf16.mxu1 %v20207_v26  ;;  %13427 = vmatpush3.bf16.msra.mxu1 %v14243_v53  ;;  %v2455_v53 = vld [vmem:[#allocation2 + $0xb4] sm:$0xe]  ;;  %v1016_v26 = vrot.slane %v1014_v55, 4  ;;  %v1041_v55 = vshll.u32 %v965_v62, 16  ;;  %v1029_v13 = vrot.slane %v1027_v23, 4  ;;  %v20211_v62 = vrot.slane %v15316_v6, 5 }
  0xec   : > { %13402 = vmatprep.mubr.bf16.mxu0 %v20208_v57  ;;  %13428 = vmatprep.subr.bf16.mxu1 %v14245_v47  ;;  %v15379_v54 = vsel %vm15120_vm13, %v2593_v17, %v2594_v32  ;;  %v1019_v57 = vrot.slane %v1017_v40, 5  ;;  %v11847_v10 = vrot.slane %v2455_v53, 9  ;;  %v14249_v32 = vld [vmem:[%s20105_s1 + $0xd0] sm:$0xff]   ;;  %v15390_v36 = vrot.slane %v1023_v42, 5 }
  0xed   : > { %13478 = vmatprep.subr.bf16.mxu0 %v14248_v50  ;;  %v1047_v53 = vshll.u32 %v966_v51, 16  ;;  %v1051_v40 = vshrl.u32 %v966_v51, 16  ;;  %v20210_v42 = vcombine.low %v15247_v63, %v15251_v41  ;;  %v15412_v23 = vsel %vm15120_vm13, %v11844_v25, %v2577_v4  ;;  %v14251_v63 = vld [vmem:[%s20105_s1 + $0xc8] sm:$0xff]  }
  0xee   : > { %13479 = vmatpush3.bf16.msra.mxu0 %v14248_v50  ;;  %v2600_v50 = vrot.slane %v2598_v30, 4  ;;  %v1020_v17 = vor.u32 %v1019_v57, %v1016_v26  ;;  %v15408_v26 = vsel %vm15120_vm13, %v15314_v33, %v20211_v62  ;;  %v15416_v51 = vsel %vm15120_vm13, %v2579_v21, %v2580_v7  ;;  %v14255_v33 = vld [vmem:[%s20105_s1 + $0x100] sm:$0xff]   ;;  %v15474_v62 = vld [vmem:[#allocation2 + $0x38] sm:$0x1] }
  0xef   : > { %13429 = vmatpush3.bf16.msra.mxu1 %v14245_v47  ;;  %13480 = vmatprep.subr.bf16.mxu0 %v15333_v56  ;;  %v20213_v6 = vcombine.low %v15265_v48, %v15269_v0  ;;  %v15431_v41 = vsel %vm15120_vm13, %v11847_v10, %v2598_v30  ;;  %v1033_v4 = vshll.u32 %v15383_v27, 16  ;;  %v1030_v30 = vor.u32 %v1029_v13, %v15390_v36  ;;  %v15492_v47 = vld [vmem:[#allocation2 + $0x40] sm:$0xf]  ;;  %v15504_v13 = vld [vmem:[#allocation2 + $0x4c] sm:$0xf] }
  0xf0   : > { %13430 = vmatprep.subr.bf16.mxu1 %v14247_v60  ;;  %v15440_v48 = vsel %vm15120_vm13, %v2600_v50, %v2601_v38  ;;  %v15442_v0 = vrot.slane %v1020_v17, 4  ;;  %v1057_v25 = vshll.u32 %v967_v12, 16  ;;  %v15445_v7 = vrot.slane %v1047_v53, 5  ;;  %v15457_v17 = vld [vmem:[#allocation2 + $0x2c] sm:$0x1] }
  0xf1   : > { %v1053_v21 = vrot.slane %v1051_v40, 4  ;;  %v1062_v27 = vshrl.u32 %v968_v11, 16  ;;  %v1071_v57 = vshll.u32 %v15418_v39, 16  ;;  %v1075_v10 = vshrl.u32 %v15418_v39, 16 }
  0xf2   : > { %13351 = vmatmul.mubr.bf16.gmra.mxu1 %v20209_v20  ;;  %13403 = vmatmul.mubr.bf16.gmra.mxu0 %v20210_v42  ;;  %v20212_v20 = vcombine.low %v15045_v52, %v15058_v35  ;;  %v1040_v52 = vrot.slane %v1038_v28, 4  ;;  %v1043_v35 = vrot.slane %v1041_v55, 5  ;;  %v1065_v28 = vshll.u32 %v968_v11, 16  ;;  %v15459_v11 = vld [vmem:[#allocation2 + $0x34] sm:$0xf] }
  0xf3   : > { %13406 = vmatprep.mubr.bf16.mxu0 %v20213_v6  ;;  %13431 = vmatpush3.bf16.msra.mxu1 %v14247_v60  ;;  %v11874_v60 = vcombine.low %v15310_v44, %v15356_v5  ;;  %v1086_v55 = vshrl.u32 %v971_v43, 16  ;;  %v974_v44 = vld [vmem:[#allocation2 + $0x3c] sm:$0xf]  ;;  %v14254_v5 = vld [vmem:[%s20105_s1 + $0xc0] sm:$0xff]   ;;  %v15468_v53 = vrot.slane %v1030_v30, 4  ;;  %v15470_v40 = vrot.slane %v1033_v4, 5 }
  0xf4   : > { %13354 = vmatprep.mubr.bf16.mxu1 %v20212_v20  ;;  %13481 = vmatpush3.bf16.msra.mxu0 %v15333_v56  ;;  %v1044_v50 = vor.u32 %v1043_v35, %v1040_v52  ;;  %v15472_v42 = vrot.slane %v1057_v25, 5  ;;  %v1064_v20 = vrot.slane %v1062_v27, 4  ;;  %v1067_v6 = vrot.slane %v1065_v28, 5  ;;  %v977_v28 = vld [vmem:[#allocation2 + $0x48] sm:$0xf] }
  0xf5   : > { %13432 = vmatprep.subr.bf16.mxu1 %v14249_v32  ;;  %13482 = vmatprep.subr.bf16.mxu0 %v14252_v15  ;;  %v1089_v52 = vshll.u32 %v971_v43, 16  ;;  %v20214_v4 = vcombine.low %v15095_v37, %v15099_v3  ;;  %v20215_v35 = vcombine.low %v15292_v58, %v15306_v14  ;;  %v15488_v30 = vrot.slane %v1071_v57, 5  ;;  %v15499_v58 = vld [vmem:[#allocation2 + $0x44] sm:$0x1] }
  0xf6   : > { %v1077_v25 = vrot.slane %v1075_v10, 4  ;;  %v1099_v38 = vshrl.u32 %v15459_v11, 16  ;;  %v20216_v43 = vcombine.low %v15241_v18, %v15219_v46  ;;  %v15497_v37 = vrot.slane %v1044_v50, 4  ;;  %v15509_v46 = vld [vmem:[%s20105_s1 + $0x178] sm:$0xff]  }
  0xf7   : > { %13433 = vmatpush3.bf16.msra.mxu1 %v14249_v32  ;;  %v1054_v32 = vor.u32 %v1053_v21, %v15445_v7  ;;  %v1095_v21 = vshll.u32 %v15459_v11, 16  ;;  %v1088_v3 = vrot.slane %v1086_v55, 4  ;;  %v1091_v27 = vrot.slane %v1089_v52, 5 }
  0xf8   : > { %13483 = vmatpush3.bf16.msra.mxu0 %v14252_v15  ;;  %13434 = vmatprep.subr.bf16.mxu1 %v14251_v63  ;;  %v15480_v15 = vld [vmem:[%s20105_s1 + $0x1b8] sm:$0xff]   ;;  %v1110_v14 = vshrl.u32 %v974_v44, 16  ;;  %v1081_v57 = vshll.u32 %v15457_v17, 16  ;;  %v1068_v18 = vor.u32 %v1067_v6, %v1064_v20  ;;  %v1078_v50 = vor.u32 %v1077_v25, %v15488_v30 }
  0xf9   : > { %13484 = vmatprep.subr.bf16.mxu0 %v14255_v33  ;;  %v15502_v10 = vrot.slane %v1095_v21, 5  ;;  %v15520_v52 = vrot.slane %v1054_v32, 4  ;;  %v1092_v21 = vor.u32 %v1091_v27, %v1088_v3  ;;  %v1129_v12 = vshll.u32 %v15499_v58, 16  ;;  %v980_v32 = vld [vmem:[#allocation2 + $0x54] sm:$0xf] }
  0xfa   : > { %13355 = vmatmul.mubr.bf16.gmra.mxu1 %v20214_v4  ;;  %13407 = vmatmul.mubr.bf16.gmra.mxu0 %v20215_v35  ;;  %v1101_v4 = vrot.slane %v1099_v38, 4  ;;  %v1113_v35 = vshll.u32 %v974_v44, 16  ;;  %v1036_v38 = vsel %vm14685_vm6, %v15468_v53, %v15470_v40  ;;  %v1123_v44 = vshrl.u32 %v15492_v47, 16 }
  0xfb   : > { %13358 = vmatprep.mubr.bf16.mxu1 %v20216_v43  ;;  %13410 = vmatprep.mubr.bf16.mxu0 %v11874_v60  ;;  %v1119_v60 = vshll.u32 %v15492_v47, 16  ;;  %v1134_v56 = vshrl.u32 %v977_v28, 16  ;;  %v1069_v53 = vrot.slane %v1068_v18, 4  ;;  %v1083_v40 = vrot.slane %v1081_v57, 5 }
  0xfc   : > { %13435 = vmatpush3.bf16.msra.mxu1 %v14251_v63  ;;  %13485 = vmatpush3.bf16.msra.mxu0 %v14255_v33  ;;  %v1105_v63 = vshll.u32 %v15474_v62, 16  ;;  %v1112_v33 = vrot.slane %v1110_v14, 4  ;;  %v1115_v55 = vrot.slane %v1113_v35, 5  ;;  %v1102_v20 = vor.u32 %v1101_v4, %v15502_v10 }
  0xfd   : > { %13436 = vmatprep.subr.bf16.mxu1 %v14254_v5  ;;  %13566 = vmatprep.subr.bf16.mxu0 %v15480_v15  ;;  %v15523_v6 = vrot.slane %v1119_v60, 5  ;;  %v1125_v14 = vrot.slane %v1123_v44, 4  ;;  %v1137_v25 = vshll.u32 %v977_v28, 16  ;;  %v1143_v35 = vshll.u32 %v15504_v13, 16  ;;  %v15535_v60 = vld [vmem:[#allocation2 + $0x50] sm:$0x1] }
  0xfe   : > { %v1116_v43 = vor.u32 %v1115_v55, %v1112_v33  ;;  %v20217_v3 = vcombine.low %v15282_v31, %v15230_v59  ;;  %v1079_v27 = vrot.slane %v1078_v50, 4  ;;  %v1107_v4 = vrot.slane %v1105_v63, 5 }
  0xff   : > { %v1126_v33 = vor.u32 %v1125_v14, %v15523_v6  ;;  %v1136_v18 = vrot.slane %v1134_v56, 4  ;;  %v20219_v28 = vcombine.low %v15286_v34, %v15271_v19  ;;  %v20220_v57 = vcombine.low %v15412_v23, %v15416_v51  ;;  %v15548_v34 = vld [vmem:[#allocation2 + $0x5c] sm:$0x1] }
 0x100   : > { %13437 = vmatpush3.bf16.msra.mxu1 %v14254_v5  ;;  %v20218_v5 = vcombine.low %v15344_v16, %v15408_v26  ;;  %v1093_v59 = vrot.slane %v1092_v21, 4  ;;  %v1139_v31 = vrot.slane %v1137_v25, 5  ;;  %v15543_v55 = vrot.slane %v1143_v35, 5  ;;  %v15546_v26 = vld [vmem:[#allocation2 + $0x58] sm:$0xf] }
 0x101   : > { %13518 = vmatprep.subr.bf16.mxu1 %v15509_v46  ;;  %v1147_v16 = vshrl.u32 %v15504_v13, 16  ;;  %v1103_v63 = vrot.slane %v1102_v20, 4  ;;  %v1117_v50 = vrot.slane %v1116_v43, 4  ;;  %v1131_v44 = vrot.slane %v1129_v12, 5 }
 0x102   : > { %13359 = vmatmul.mubr.bf16.gmra.mxu1 %v20217_v3  ;;  %13411 = vmatmul.mubr.bf16.gmra.mxu0 %v20218_v5  ;;  %v1158_v56 = vshrl.u32 %v980_v32, 16  ;;  %v1127_v14 = vrot.slane %v1126_v33, 4  ;;  %v1140_v3 = vor.u32 %v1139_v31, %v1136_v18  ;;  %v1161_v5 = vshll.u32 %v980_v32, 16  ;;  %v15577_v33 = vld [vmem:[#allocation2 + $0x64] sm:$0xf] }
 0x103   : > { %13362 = vmatprep.mubr.bf16.mxu1 %v20219_v28  ;;  %13414 = vmatprep.mubr.bf16.mxu0 %v20220_v57  ;;  %v1149_v19 = vrot.slane %v1147_v16, 4  ;;  %v20221_v23 = vsel %vm14685_vm6, %v15442_v0, %v15390_v36  ;;  %v1153_v21 = vshll.u32 %v15535_v60, 16  ;;  %v1167_v20 = vshll.u32 %v15546_v26, 16  ;;  %v986_v18 = vld [vmem:[#allocation2 + $0x6c] sm:$0xf] }
 0x104   : > { %v15555_v51 = vcombine.low %v20221_v23, %v1036_v38  ;;  %v1171_v12 = vshrl.u32 %v15546_v26, 16  ;;  %v1050_v43 = vsel %vm14685_vm6, %v15497_v37, %v15445_v7  ;;  %v1160_v35 = vrot.slane %v1158_v56, 4  ;;  %v983_v37 = vld [vmem:[#allocation2 + $0x60] sm:$0xf]  ;;  %v989_v56 = vld [vmem:[#allocation2 + $0x78] sm:$0xf] }
 0x105   : > { %v1150_v25 = vor.u32 %v1149_v19, %v15543_v55  ;;  %v1163_v32 = vrot.slane %v1161_v5, 5  ;;  %v1060_v36 = vsel %vm14685_vm6, %v15520_v52, %v15472_v42  ;;  %v1074_v0 = vsel %vm14685_vm6, %v1069_v53, %v15488_v30 }
 0x106   : > { %20222 = vst [vmem:[#allocation14_spill] sm:$0xff] %v15555_v51  ;;  %v1084_v38 = vsel %vm14685_vm6, %v1079_v27, %v1083_v40  ;;  %v1098_v7 = vsel %vm14685_vm6, %v1093_v59, %v15502_v10  ;;  %v1108_v28 = vsel %vm14685_vm6, %v1103_v63, %v1107_v4  ;;  %v1122_v42 = vsel %vm14685_vm6, %v1117_v50, %v15523_v6  ;;  %v15595_v59 = vld [vmem:[#allocation2 + $0x70] sm:$0xf] }
 0x107   : > { %v1132_v30 = vsel %vm14685_vm6, %v1127_v14, %v1131_v44  ;;  %v1141_v52 = vrot.slane %v1140_v3, 4  ;;  %v20223_v53 = vcombine.low %v15294_v49, %v15274_v24  ;;  %v20224_v10 = vcombine.low %v15349_v1, %v15371_v61  ;;  %v15618_v3 = vld [vmem:[#allocation2 + $0x7c] sm:$0xf] }
 0x108   : > { %v1155_v40 = vrot.slane %v1153_v21, 5  ;;  %v15592_v27 = vrot.slane %v1167_v20, 5  ;;  %v1173_v4 = vrot.slane %v1171_v12, 4  ;;  %v1177_v57 = vshll.u32 %v15548_v34, 16 }
 0x109   : > { %v20225_v6 = vcombine.low %v14956_v2, %v14965_v9  ;;  %v20226_v24 = vcombine.low %v15360_v8, %v15379_v54  ;;  %v1151_v49 = vrot.slane %v1150_v25, 4  ;;  %v1164_v31 = vor.u32 %v1163_v32, %v1160_v35  ;;  %v15616_v8 = vld [vmem:[#allocation2 + $0x68] sm:$0x1] }
 0x10a   : > { %13363 = vmatmul.mubr.bf16.gmra.mxu1 %v20223_v53  ;;  %13415 = vmatmul.mubr.bf16.gmra.mxu0 %v20224_v10  ;;  %v1182_v1 = vshrl.u32 %v983_v37, 16  ;;  %v1185_v61 = vshll.u32 %v983_v37, 16  ;;  %v15603_v16 = vcombine.low %v1050_v43, %v1060_v36  ;;  %v15605_v63 = vcombine.low %v1074_v0, %v1084_v38  ;;  %v992_v38 = vld [vmem:[#allocation2 + $0x84] sm:$0xf] }
 0x10b   : > { %13366 = vmatprep.mubr.bf16.mxu1 %v20225_v6  ;;  %13418 = vmatprep.mubr.bf16.mxu0 %v20226_v24  ;;  %v1191_v50 = vshll.u32 %v15577_v33, 16  ;;  %v1195_v44 = vshrl.u32 %v15577_v33, 16  ;;  %v15609_v14 = vcombine.low %v1098_v7, %v1108_v28  ;;  %v15611_v2 = vcombine.low %v1122_v42, %v1132_v30  ;;  %v20231_v30 = vld [vmem:[#allocation8_spill] sm:$0xff]  ;;  %v15645_v6 = vld [vmem:[#allocation2 + $0x88] sm:$0xf]  ;;  %v20235_v24 = vld [vmem:[#allocation9_spill] sm:$0xff] }
 0x10c   : > { %20227 = vst [vmem:[#allocation15_spill] sm:$0xff] %v15603_v16  ;;  %20228 = vst [vmem:[#allocation16_spill] sm:$0xff] %v15605_v63  ;;  %v1146_v9 = vsel %vm14685_vm6, %v1141_v52, %v15543_v55  ;;  %v1206_v54 = vshrl.u32 %v986_v18, 16  ;;  %v1174_v19 = vor.u32 %v1173_v4, %v15592_v27  ;;  %v15621_v5 = vrot.slane %v1177_v57, 5  ;;  %v15628_v55 = vld [vmem:[#allocation2 + $0x74] sm:$0x1] }
 0x10d   : > { %20229 = vst [vmem:[#allocation17_spill] sm:$0xff] %v15609_v14  ;;  %20230 = vst [vmem:[#allocation18_spill] sm:$0xff] %v15611_v2  ;;  %v1209_v23 = vshll.u32 %v986_v18, 16  ;;  %v1215_v21 = vshll.u32 %v15595_v59, 16  ;;  %v1156_v20 = vsel %vm14685_vm6, %v1151_v49, %v1155_v40  ;;  %v15626_v12 = vrot.slane %v1164_v31, 4  ;;  %v20236_v49 = vld [vmem:[#allocation10_spill] sm:$0xff] }
 0x10e   : > { %v1184_v43 = vrot.slane %v1182_v1, 4  ;;  %v1187_v25 = vrot.slane %v1185_v61, 5  ;;  %v15630_v35 = vrot.slane %v1191_v50, 5  ;;  %v1197_v32 = vrot.slane %v1195_v44, 4  ;;  %v15635_v18 = vld [vmem:[#allocation2 + $0x80] sm:$0x1] }
 0x10f   : > { %v1208_v36 = vrot.slane %v1206_v54, 4  ;;  %v1219_v0 = vshrl.u32 %v15595_v59, 16  ;;  %v1211_v7 = vrot.slane %v1209_v23, 5  ;;  %v15633_v37 = vrot.slane %v1215_v21, 5  ;;  %20234 = vst [vmem:[#allocation8_spill] sm:$0xff] %v15645_v6 }
 0x110   : > { %v1230_v28 = vshrl.u32 %v989_v56, 16  ;;  %v1233_v42 = vshll.u32 %v989_v56, 16  ;;  %v20232_v52 = vcombine.low %v20231_v30, %v15017_v22  ;;  %v20233_v53 = vcombine.low %v15431_v41, %v15440_v48 }
 0x111   : > { %v1175_v10 = vrot.slane %v1174_v19, 4  ;;  %v1201_v40 = vshll.u32 %v15616_v8, 16  ;;  %v1221_v4 = vrot.slane %v1219_v0, 4  ;;  %v1239_v57 = vshll.u32 %v15618_v3, 16  ;;  %v14256_v0 = vld [vmem:[#allocation2 + $0xc] sm:$0xff]  }
 0x112   : > { %13367 = vmatmul.mubr.bf16.gmra.mxu1 %v20232_v52  ;;  %13419 = vmatmul.mubr.bf16.gmra.mxu0 %v20233_v53  ;;  %v20237_v31 = vcombine.low %v20235_v24, %v20236_v49  ;;  %v1188_v22 = vor.u32 %v1187_v25, %v1184_v43  ;;  %v1232_v1 = vrot.slane %v1230_v28, 4  ;;  %v1235_v61 = vrot.slane %v1233_v42, 5  ;;  %v15670_v24 = vld [vmem:[#allocation2 + $0x94] sm:$0xf] }
 0x113   : > { %13486 = vmatprep.mubr.bf16.mxu0 %v15555_v51  ;;  %v1243_v41 = vshrl.u32 %v15618_v3, 16  ;;  %v15652_v48 = vcombine.low %v1146_v9, %v1156_v20  ;;  %v1198_v50 = vor.u32 %v1197_v32, %v15630_v35  ;;  %v1225_v44 = vshll.u32 %v15628_v55, 16  ;;  %v995_v9 = vld [vmem:[#allocation2 + $0x90] sm:$0xf]  ;;  %20240 = vst [vmem:[#allocation19_spill] sm:$0xff] %v15670_v24 }
 0x114   : > { %13370 = vmatprep.mubr.bf16.mxu1 %v20237_v31  ;;  %v15656_v56 = vrot.slane %v1239_v57, 5  ;;  %v1212_v54 = vor.u32 %v1211_v7, %v1208_v36  ;;  %v1222_v19 = vor.u32 %v1221_v4, %v15633_v37  ;;  %v1254_v21 = vshrl.u32 %v992_v38, 16  ;;  %v14263_v20 = vld [vmem:[%s20105_s1 + $0x1b0] sm:$0xff]   ;;  %v15667_v4 = vld [vmem:[#allocation2 + $0x8c] sm:$0x1] }
 0x115   : > { %20238 = vst [vmem:[#allocation9_spill] sm:$0xff] %v15652_v48  ;;  %v1245_v23 = vrot.slane %v1243_v41, 4  ;;  %v1236_v30 = vor.u32 %v1235_v61, %v1232_v1  ;;  %v1249_v43 = vshll.u32 %v15635_v18, 16  ;;  %v1257_v25 = vshll.u32 %v992_v38, 16  ;;  %20239 = vst [vmem:[#allocation10_spill] sm:$0xff] %v15667_v4  ;;  %v20241_v61 = vld [vmem:[#allocation12_spill] sm:$0xff] }
 0x116   : > { %v1263_v28 = vshll.u32 %v15645_v6, 16  ;;  %v1189_v32 = vrot.slane %v1188_v22, 4  ;;  %v1203_v42 = vrot.slane %v1201_v40, 5  ;;  %v1256_v7 = vrot.slane %v1254_v21, 4  ;;  %v998_v1 = vld [vmem:[#allocation2 + $0x9c] sm:$0xf] }
 0x117   : > { %v1246_v36 = vor.u32 %v1245_v23, %v15656_v56  ;;  %v1199_v52 = vrot.slane %v1198_v50, 4  ;;  %v15665_v53 = vrot.slane %v1225_v44, 5  ;;  %v1259_v57 = vrot.slane %v1257_v25, 5  ;;  %v20242_v41 = vld [vmem:[#allocation13_spill] sm:$0xff]  ;;  %v15756_v51 = vld [vmem:[#allocation2 + $0xb0] sm:$0x1] }
 0x118   : > { %v1267_v38 = vshrl.u32 %v15645_v6, 16  ;;  %v1170_v49 = vsel %vm14685_vm6, %v15626_v12, %v15592_v27  ;;  %v1180_v40 = vsel %vm14685_vm6, %v1175_v10, %v15621_v5  ;;  %v15679_v31 = vrot.slane %v1212_v54, 4  ;;  %v15689_v27 = vld [vmem:[#allocation2 + $0xa0] sm:$0xf]  ;;  %v15695_v5 = vld [vmem:[%s20105_s1 + $0x1a8] sm:$0xff]   ;;  %20253 = vst [vmem:[#allocation27_spill] sm:$0xff] %v15756_v51 }
 0x119   : > { %v15681_v22 = vrot.slane %v1222_v19, 4  ;;  %v20243_v50 = vcombine.low %v20241_v61, %v20242_v41  ;;  %v1237_v44 = vrot.slane %v1236_v30, 4  ;;  %v1247_v23 = vrot.slane %v1246_v36, 4  ;;  %20244 = vst [vmem:[#allocation12_spill] sm:$0xff] %v15689_v27  ;;  %v14257_v61 = vld [vmem:[#allocation2 + $0x18] sm:$0xff]   ;;  %v14260_v36 = vld [vmem:[#allocation2 + $0x24] sm:$0xff]  }
 0x11a   : > { %13487 = vmatmul.mubr.bf16.vlgmr.msra.gmra.mxu0 %v15603_v16  ;;  %v1251_v21 = vrot.slane %v1249_v43, 5  ;;  %v15687_v25 = vrot.slane %v1263_v28, 5  ;;  %v1260_v12 = vor.u32 %v1259_v57, %v1256_v7  ;;  %v1269_v10 = vrot.slane %v1267_v38, 4  ;;  %v1001_v57 = vld [vmem:[#allocation2 + $0xa8] sm:$0xf] }
 0x11b   : > { %13371 = vmatmul.mubr.bf16.gmra.mxu1 %v20243_v50  ;;  %13567 = vmatpush3.bf16.msra.mxu0 %v15480_v15  ;;  %v1278_v54 = vshrl.u32 %v995_v9, 16  ;;  %v1281_v19 = vshll.u32 %v995_v9, 16  ;;  %v15698_v30 = vcombine.low %v1170_v49, %v1180_v40  ;;  %v15703_v15 = vld [vmem:[#allocation2 + $0x98] sm:$0x1]  ;;  %v1287_v43 = vshll.u32 %v15670_v24, 16 }
 0x11c   : > { %13438 = vmatprep.mubr.bf16.mxu1 %v14256_v0  ;;  %13490 = vmatprep.mubr.bf16.mxu0 %v15605_v63  ;;  %v1194_v0 = vsel %vm14685_vm6, %v1189_v32, %v15630_v35  ;;  %20246 = vst [vmem:[#allocation20_spill] sm:$0xff] %v15703_v15  ;;  %v1291_v28 = vshrl.u32 %v15670_v24, 16  ;;  %v1204_v9 = vsel %vm14685_vm6, %v1199_v52, %v1203_v42  ;;  %v1273_v32 = vshll.u32 %v15667_v4, 16  ;;  %v15723_v40 = vld [vmem:[#allocation2 + $0xac] sm:$0xf] }
 0x11d   : > { %13568 = vmatprep.subr.bf16.mxu0 %v14263_v20  ;;  %20245 = vst [vmem:[#allocation13_spill] sm:$0xff] %v15698_v30  ;;  %v1218_v7 = vsel %vm14685_vm6, %v15679_v31, %v15633_v37  ;;  %v1228_v35 = vsel %vm14685_vm6, %v15681_v22, %v15665_v53  ;;  %v1242_v38 = vsel %vm14685_vm6, %v1237_v44, %v15656_v56  ;;  %v1302_v52 = vshrl.u32 %v998_v1, 16  ;;  %v14262_v37 = vld [vmem:[%s20105_s1 + $0x170] sm:$0xff]   ;;  %v955_v6 = vld [vmem:[#allocation2 + $0xc0] sm:$0xf] }
 0x11e   : > { %v1252_v42 = vsel %vm14685_vm6, %v1247_v23, %v1251_v21  ;;  %v1305_v49 = vshll.u32 %v998_v1, 16  ;;  %20247 = vst [vmem:[#allocation21_spill] sm:$0xff] %v15723_v40  ;;  %v15728_v53 = vrot.slane %v1260_v12, 4  ;;  %v1270_v31 = vor.u32 %v1269_v10, %v15687_v25  ;;  %v15744_v10 = vld [vmem:[#allocation2 + $0xa4] sm:$0x1] }
 0x11f   : > { %13569 = vmatpush3.bf16.msra.mxu0 %v14263_v20  ;;  %v1280_v22 = vrot.slane %v1278_v54, 4  ;;  %v1311_v41 = vshll.u32 %v15689_v27, 16  ;;  %v1283_v56 = vrot.slane %v1281_v19, 5  ;;  %v15733_v50 = vrot.slane %v1287_v43, 5  ;;  %v14271_v20 = vld [vmem:[%s20105_s1 + $0x1a0] sm:$0xff]   ;;  %20249 = vst [vmem:[#allocation23_spill] sm:$0xff] %v15744_v10 }
 0x120   : > { %13570 = vmatprep.subr.bf16.mxu0 %v15695_v5  ;;  %v1293_v1 = vrot.slane %v1291_v28, 4  ;;  %v1315_v44 = vshrl.u32 %v15689_v27, 16  ;;  %v15736_v23 = vcombine.low %v1194_v0, %v1204_v9  ;;  %v15741_v21 = vrot.slane %v1273_v32, 5  ;;  %v1004_v63 = vld [vmem:[#allocation2 + $0xb4] sm:$0xf] }
 0x121   : > { %v1297_v12 = vshll.u32 %v15703_v15, 16  ;;  %v1304_v54 = vrot.slane %v1302_v52, 4  ;;  %v1307_v19 = vrot.slane %v1305_v49, 5  ;;  %v15747_v43 = vrot.slane %v1311_v41, 5  ;;  %v15749_v9 = vld [vmem:[#allocation2 + $0xb8] sm:$0xf] }
 0x122   : > { %20248 = vst [vmem:[#allocation22_spill] sm:$0xff] %v15736_v23  ;;  %13491 = vmatmul.mubr.bf16.gmra.mxu0 %v15609_v14  ;;  %v1317_v0 = vrot.slane %v1315_v44, 4  ;;  %v1326_v28 = vshrl.u32 %v1001_v57, 16  ;;  %20250 = vst [vmem:[#allocation24_spill] sm:$0xff] %v15749_v9  ;;  %v15752_v32 = vcombine.low %v1218_v7, %v1228_v35  ;;  %v15754_v16 = vcombine.low %v1242_v38, %v1252_v42  ;;  %v14266_v49 = vld [vmem:[%s20105_s1 + $0x168] sm:$0xff]   ;;  %v14261_v44 = vld [vmem:[#allocation2 + $0x30] sm:$0xff]  }
 0x123   : > { %13439 = vmatmul.mubr.bf16.vlgmr.msra.gmra.mxu1 %v14257_v61  ;;  %v1329_v52 = vshll.u32 %v1001_v57, 16  ;;  %v1335_v61 = vshll.u32 %v15723_v40, 16  ;;  %13494 = vmatprep.mubr.bf16.mxu0 %v15611_v2  ;;  %v1284_v7 = vor.u32 %v1283_v56, %v1280_v22  ;;  %v1294_v35 = vor.u32 %v1293_v1, %v15733_v50  ;;  %v14264_v56 = vld [vmem:[#allocation2 + $0x3c] sm:$0xff]  }
 0x124   : > { %13519 = vmatpush3.bf16.msra.mxu1 %v15509_v46  ;;  %13442 = vmatprep.mubr.bf16.mxu1 %v14260_v36  ;;  %20251 = vst [vmem:[#allocation25_spill] sm:$0xff] %v15752_v32  ;;  %20252 = vst [vmem:[#allocation26_spill] sm:$0xff] %v15754_v16  ;;  %v15767_v36 = vrot.slane %v1270_v31, 4  ;;  %v1328_v57 = vrot.slane %v1326_v28, 4  ;;  %v1339_v41 = vshrl.u32 %v15723_v40, 16  ;;  %v15774_v2 = vrot.slane %v1297_v12, 5 }
 0x125   : > { %13520 = vmatprep.subr.bf16.mxu1 %v14262_v37  ;;  %13571 = vmatpush3.bf16.msra.mxu0 %v15695_v5  ;;  %v1331_v38 = vrot.slane %v1329_v52, 5  ;;  %v15771_v42 = vrot.slane %v1335_v61, 5  ;;  %v1308_v14 = vor.u32 %v1307_v19, %v1304_v54  ;;  %v1321_v31 = vshll.u32 %v15744_v10, 16  ;;  %v14270_v5 = vld [vmem:[%s20105_s1 + $0x160] sm:$0xff]   ;;  %v422_v46 = vld [vmem:[%s14548_s8 + $0xf0] sm:$0xff]  ;;  %v423_v40 = vld [vmem:[%s14548_s8 + $0xf8] sm:$0xff] }
 0x126   : > { %13572 = vmatprep.subr.bf16.mxu0 %v14271_v20  ;;  %v1350_v22 = vshrl.u32 %v1004_v63, 16  ;;  %v1318_v1 = vor.u32 %v1317_v0, %v15747_v43  ;;  %v1341_v28 = vrot.slane %v1339_v41, 4  ;;  %v1353_v52 = vshll.u32 %v1004_v63, 16  ;;  %v14275_v10 = vld [vmem:[%s20105_s1 + $0x198] sm:$0xff]  }
 0x127   : > { %v1359_v61 = vshll.u32 %v15749_v9, 16  ;;  %v15783_v12 = vrot.slane %v1284_v7, 4  ;;  %v1332_v54 = vor.u32 %v1331_v38, %v1328_v57  ;;  %v1345_v19 = vshll.u32 %v15756_v51, 16  ;;  %v15792_v41 = vld [vmem:[#allocation2 + $0xbc] sm:$0x1] }
 0x128   : > { %13521 = vmatpush3.bf16.msra.mxu1 %v14262_v37  ;;  %v1363_v37 = vshrl.u32 %v15749_v9, 16  ;;  %v1295_v0 = vrot.slane %v1294_v35, 4  ;;  %v1342_v63 = vor.u32 %v1341_v28, %v15771_v42  ;;  %v1352_v27 = vrot.slane %v1350_v22, 4  ;;  %v15798_v7 = vld [vmem:[%s20105_s1 + $0x158] sm:$0xff]   ;;  %v14265_v9 = vld [vmem:[#allocation2 + $0x48] sm:$0xff]  }
 0x129   : > { %13522 = vmatprep.subr.bf16.mxu1 %v14266_v49  ;;  %13573 = vmatpush3.bf16.msra.mxu0 %v14271_v20  ;;  %v1355_v15 = vrot.slane %v1353_v52, 5  ;;  %v15803_v20 = vld [vmem:[%s20105_s1 + $0x190] sm:$0xff]   ;;  %v15805_v35 = vrot.slane %v1308_v14, 4  ;;  %v15807_v57 = vrot.slane %v1359_v61, 5  ;;  %v12661_v22 = vpack.c.bf16 %v422_v46, %v422_v46 }
 0x12a   : > { %13495 = vmatmul.mubr.bf16.gmra.mxu0 %v15652_v48  ;;  %v1365_v38 = vrot.slane %v1363_v37, 4  ;;  %v15813_v28 = vrot.slane %v1318_v1, 4  ;;  %v1323_v52 = vrot.slane %v1321_v31, 5  ;;  %v12662_v48 = vpack.c.bf16 %v423_v40, %v423_v40  ;;  %v14268_v46 = vld [vmem:[#allocation2 + $0x54] sm:$0xff]   ;;  %13574 = vmatprep.subr.bf16.mxu0 %v14275_v10 }
 0x12b   : > { %13443 = vmatmul.mubr.bf16.gmra.mxu1 %v14261_v44  ;;  %v1276_v44 = vsel %vm14685_vm6, %v15767_v36, %v15741_v21  ;;  %13498 = vmatprep.mubr.bf16.mxu0 %v15698_v30  ;;  %v1333_v14 = vrot.slane %v1332_v54, 4  ;;  %v1347_v61 = vrot.slane %v1345_v19, 5  ;;  %v779_v51 = vshrl.u32 %v12661_v22, 16  ;;  %v959_v54 = vld [vmem:[#allocation2 + $0xc8] sm:$0x1] }
 0x12c   : > { %13446 = vmatprep.mubr.bf16.mxu1 %v14264_v56  ;;  %13523 = vmatpush3.bf16.msra.mxu1 %v14266_v49  ;;  %v782_v37 = vshll.u32 %v12661_v22, 16  ;;  %v1343_v49 = vrot.slane %v1342_v63, 4  ;;  %v1356_v56 = vor.u32 %v1355_v15, %v1352_v27  ;;  %v787_v24 = vshrl.u32 %v12662_v48, 16 }
 0x12d   : > { %13524 = vmatprep.subr.bf16.mxu1 %v14270_v5  ;;  %v790_v4 = vshll.u32 %v12662_v48, 16  ;;  %13575 = vmatpush3.bf16.msra.mxu0 %v14275_v10  ;;  %v20254_v40 = vsel %vm14685_vm6, %v15728_v53, %v15687_v25  ;;  %v1366_v36 = vor.u32 %v1365_v38, %v15807_v57  ;;  %v1369_v31 = vshll.u32 %v15792_v41, 16  ;;  %v14278_v25 = vld [vmem:[%s20105_s1 + $0x150] sm:$0xff]   ;;  %v15840_v53 = vld [vmem:[#allocation2 + $0xc] sm:$0xe] }
 0x12e   : > { %v15821_v21 = vcombine.low %v20254_v40, %v1276_v44  ;;  %v781_v1 = vrot.slane %v779_v51, 7  ;;  %v1290_v48 = vsel %vm14685_vm6, %v15783_v12, %v15733_v50  ;;  %v1300_v27 = vsel %vm14685_vm6, %v1295_v0, %v15774_v2  ;;  %13576 = vmatprep.subr.bf16.mxu0 %v15803_v20  ;;  %v3635_v10 = vld [vmem:[#allocation2 + $0x24] sm:$0xe] }
 0x12f   : > { %v1314_v51 = vsel %vm14685_vm6, %v15805_v35, %v15747_v43  ;;  %v789_v15 = vrot.slane %v787_v24, 7  ;;  %v1324_v2 = vsel %vm14685_vm6, %v15813_v28, %v1323_v52  ;;  %v1338_v50 = vsel %vm14685_vm6, %v1333_v14, %v15771_v42  ;;  %v3636_v35 = vld [vmem:[#allocation2 + $0x30] sm:$0xe]  ;;  %v3637_v52 = vld [vmem:[#allocation2 + $0x3c] sm:$0xe]  ;;  %v14302_v14 = vld [vmem:[%s20105_s1 + $0x1e0] sm:$0xff]  }
 0x130   : > { %20255 = vst [vmem:[#allocation28_spill] sm:$0xff] %v15821_v21  ;;  %13525 = vmatpush3.bf16.msra.mxu1 %v14270_v5  ;;  %v14283_v5 = vld [vmem:[%s20105_s1 + $0x188] sm:$0xff]   ;;  %v784_v12 = vor.u32 %v782_v37, %v781_v1  ;;  %v785_v43 = vrot.slane %v781_v1, 4  ;;  %v1348_v24 = vsel %vm14685_vm6, %v1343_v49, %v1347_v61  ;;  %v15854_v19 = vrot.slane %v1356_v56, 4  ;;  %v14269_v56 = vld [vmem:[#allocation2 + $0x60] sm:$0xff]   ;;  %v14288_v61 = vld [vmem:[#allocation2 + $0x18] sm:$0xff]  }
 0x131   : > { %13526 = vmatprep.subr.bf16.mxu1 %v15798_v7  ;;  %v792_v0 = vor.u32 %v790_v4, %v789_v15  ;;  %v794_v63 = vrot.slane %v789_v15, 4  ;;  %v15857_v38 = vcombine.low %v1290_v48, %v1300_v27  ;;  %v1367_v42 = vrot.slane %v1366_v36, 4  ;;  %v15865_v4 = vld [vmem:[%s20105_s1 + $0x148] sm:$0xff]   ;;  %13577 = vmatpush3.bf16.msra.mxu0 %v15803_v20 }
 0x132   : > { %13499 = vmatmul.mubr.bf16.gmra.mxu0 %v15736_v23  ;;  %v1371_v22 = vrot.slane %v1369_v31, 5  ;;  %v956_v28 = vsel %vm14701_vm9, %v784_v12, %v955_v6  ;;  %v15874_v6 = vld [vmem:[%s20105_s1 + $0x180] sm:$0xff]   ;;  %v3713_v49 = vrot.slane %v15418_v39, 5  ;;  %v15879_v40 = vcombine.low %v1314_v51, %v1324_v2  ;;  %13578 = vmatprep.subr.bf16.mxu0 %v14283_v5  ;;  %v3638_v27 = vld [vmem:[#allocation2 + $0x48] sm:$0xe] }
 0x133   : > { %13447 = vmatmul.mubr.bf16.gmra.mxu1 %v14265_v9  ;;  %20256 = vst [vmem:[#allocation29_spill] sm:$0xff] %v15857_v38  ;;  %13502 = vmatprep.mubr.bf16.mxu0 %v15752_v32  ;;  %v793_v9 = vsel %vm14709_vm10, %v785_v43, %v792_v0  ;;  %957 = vst [vmem:[#allocation2 + $0xc0] sm:$0xf] %v956_v28  ;;  %v960_v37 = vsel %vm14694_vm8, %v794_v63, %v959_v54  ;;  %v11968_v31 = vrot.slane %v15840_v53, 9  ;;  %v14272_v54 = vld [vmem:[#allocation2 + $0x6c] sm:$0xff]   ;;  %vm6258_vm14 = vcmask 1043456  }
 0x134   : > { %13450 = vmatprep.mubr.bf16.mxu1 %v14268_v46  ;;  %v11970_v46 = vrot.slane %v3635_v10, 9  ;;  %13527 = vmatpush3.bf16.msra.mxu1 %v15798_v7  ;;  %20260 = vst [vmem:[#allocation6_spill] sm:$0xff] %v15879_v40  ;;  %v15881_v36 = vcombine.low %v1338_v50, %v1348_v24  ;;  %958 = vst.msk [vmem:[#allocation2 + $0xc4] sm:$0xf] %vm844_vm0, %v793_v9  ;;  %v3716_v1 = vrot.slane %v15457_v17, 5  ;;  %v3715_v20 = vrot.slane %v3713_v49, 4 }
 0x135   : > { %961 = vst [vmem:[#allocation2 + $0xc8] sm:$0x1] %v960_v37  ;;  %13528 = vmatprep.subr.bf16.mxu1 %v14278_v25  ;;  %v1362_v39 = vsel %vm14685_vm6, %v15854_v19, %v15807_v57  ;;  %v11971_v48 = vrot.slane %v3636_v35, 9  ;;  %v15894_v51 = vld [vmem:[#allocation2 + $0x10] sm:$0xf]  ;;  %v3720_v17 = vrot.slane %v15459_v11, 5  ;;  %v1372_v50 = vsel %vm14685_vm6, %v1367_v42, %v1371_v22  ;;  %13579 = vmatpush3.bf16.msra.mxu0 %v14283_v5  ;;  %vm17585_vm0 = vmand %vm6258_vm14, %vm845_vm7 }
 0x136   : > { %20261 = vst [vmem:[#allocation5_spill] sm:$0xff] %v15881_v36  ;;  %v15892_v7 = vsel %vm15120_vm13, %v11970_v46, %v3713_v49  ;;  %v3699_v15 = vrot.slane %v15894_v51, 5  ;;  %v3723_v10 = vrot.slane %v15474_v62, 5  ;;  %v11972_v2 = vrot.slane %v3637_v52, 9  ;;  %v14286_v57 = vld [vmem:[%s20105_s1 + $0x140] sm:$0xff]   ;;  %13580 = vmatprep.subr.bf16.mxu0 %v15874_v6  ;;  %v14273_v49 = vld [vmem:[#allocation2 + $0x78] sm:$0xff]  }
 0x137   : > { %v15906_v12 = vsel %vm15120_vm13, %v3715_v20, %v3716_v1  ;;  %v3727_v43 = vrot.slane %v15492_v47, 5  ;;  %v3730_v24 = vrot.slane %v15499_v58, 5  ;;  %v3639_v19 = vld [vmem:[#allocation2 + $0x54] sm:$0xe]  ;;  %v15914_v62 = vsel %vm15120_vm13, %v11971_v48, %v3720_v17  ;;  %v15921_v47 = vld [vmem:[%s20105_s1 + $0x238] sm:$0xff]  }
 0x138   : > { %13529 = vmatpush3.bf16.msra.mxu1 %v14278_v25  ;;  %v3722_v0 = vrot.slane %v3720_v17, 4  ;;  %v11973_v63 = vrot.slane %v3638_v27, 9  ;;  %v3734_v5 = vrot.slane %v15504_v13, 5  ;;  %v3737_v35 = vrot.slane %v15535_v60, 5  ;;  %v3640_v9 = vld [vmem:[#allocation2 + $0x60] sm:$0xe] }
 0x139   : > { %13530 = vmatprep.subr.bf16.mxu1 %v15865_v4  ;;  %v15925_v58 = vsel %vm15120_vm13, %v11972_v2, %v3727_v43  ;;  %v3729_v25 = vrot.slane %v3727_v43, 4  ;;  %v15930_v42 = vcombine.low %v1362_v39, %v1372_v50  ;;  %v11974_v28 = vrot.slane %v3639_v19, 9  ;;  %13581 = vmatpush3.bf16.msra.mxu0 %v15874_v6  ;;  %v3641_v20 = vld [vmem:[#allocation2 + $0x6c] sm:$0xe]  ;;  %v16145_v32 = vld [vmem:[#allocation2 + $0x24] sm:$0xe] }
 0x13a   : > { %13503 = vmatmul.mubr.bf16.gmra.mxu0 %v15754_v16  ;;  %v1007_v22 = vld [vmem:[#allocation2 + $0xc0] sm:$0xf]  ;;  %v15934_v44 = vsel %vm15120_vm13, %v3722_v0, %v3723_v10  ;;  %v3741_v52 = vrot.slane %v15546_v26, 5  ;;  %v15948_v46 = vsel %vm15120_vm13, %v11973_v63, %v3734_v5  ;;  %13662 = vmatprep.subr.bf16.mxu0 %v15921_v47  ;;  %v3736_v17 = vrot.slane %v3734_v5, 4  ;;  %v14284_v5 = vld [vmem:[#allocation2 + $0xb4] sm:$0xff]  }
 0x13b   : > { %13451 = vmatmul.mubr.bf16.gmra.mxu1 %v14269_v56  ;;  %20262 = vst [vmem:[#allocation30_spill] sm:$0xff] %v15930_v42  ;;  %13506 = vmatprep.mubr.bf16.mxu0 %v15821_v21  ;;  %v15938_v13 = vld [vmem:[#allocation2 + $0xc4] sm:$0xf]  ;;  %v1374_v60 = vshrl.u32 %v1007_v22, 16  ;;  %v15944_v37 = vsel %vm15120_vm13, %v3729_v25, %v3730_v24  ;;  %v1377_v56 = vshll.u32 %v1007_v22, 16  ;;  %v3744_v63 = vrot.slane %v15548_v34, 5 }
 0x13c   : > { %13454 = vmatprep.mubr.bf16.mxu1 %v14272_v54  ;;  %13531 = vmatpush3.bf16.msra.mxu1 %v15865_v4  ;;  %v15951_v26 = vld [vmem:[#allocation2 + $0xc8] sm:$0x1]  ;;  %v1383_v1 = vshll.u32 %v15938_v13, 16  ;;  %v1387_v54 = vshrl.u32 %v15938_v13, 16  ;;  %v15962_v4 = vld [vmem:[%s20105_s1 + $0x1f8] sm:$0xff]   ;;  %v15967_v10 = vsel %vm15120_vm13, %v11974_v28, %v3741_v52  ;;  %v3743_v43 = vrot.slane %v3741_v52, 4 }
 0x13d   : > { %v1376_v48 = vrot.slane %v1374_v60, 4  ;;  %v1393_v27 = vshll.u32 %v15951_v26, 16  ;;  %13532 = vmatprep.subr.bf16.mxu1 %v14286_v57  ;;  %v1379_v6 = vrot.slane %v1377_v56, 5  ;;  %v14276_v24 = vld [vmem:[#allocation2 + $0x84] sm:$0xff]   ;;  %v15971_v0 = vsel %vm15120_vm13, %v3736_v17, %v3737_v35  ;;  %v16143_v16 = vld [vmem:[#allocation2 + $0x2c] sm:$0x1] }
 0x13e   : > { %v1385_v2 = vrot.slane %v1383_v1, 5  ;;  %v1389_v50 = vrot.slane %v1387_v54, 4  ;;  %v11975_v25 = vrot.slane %v3640_v9, 9  ;;  %v3748_v28 = vrot.slane %v15577_v33, 5  ;;  %v3642_v9 = vld [vmem:[#allocation2 + $0x78] sm:$0xe] }
 0x13f   : > { %v1395_v19 = vrot.slane %v1393_v27, 5  ;;  %v1380_v22 = vor.u32 %v1379_v6, %v1376_v48  ;;  %v15980_v52 = vsel %vm15120_vm13, %v3743_v43, %v3744_v63  ;;  %v3751_v35 = vrot.slane %v15616_v8, 5  ;;  %v3643_v48 = vld [vmem:[#allocation2 + $0x84] sm:$0xe]  ;;  %v3644_v27 = vld [vmem:[#allocation2 + $0x90] sm:$0xe] }
 0x140   : > { %v1390_v60 = vor.u32 %v1389_v50, %v1385_v2  ;;  %13533 = vmatpush3.bf16.msra.mxu1 %v14286_v57  ;;  %v11976_v56 = vrot.slane %v3641_v20, 9  ;;  %v3755_v34 = vrot.slane %v15595_v59, 5  ;;  %v15989_v54 = vsel %vm15120_vm13, %v11975_v25, %v3748_v28  ;;  %v16149_v23 = vld [vmem:[#allocation2 + $0x34] sm:$0xf] }
 0x141   : > { %13614 = vmatprep.subr.bf16.mxu1 %v15962_v4  ;;  %v1381_v57 = vrot.slane %v1380_v22, 4  ;;  %v3750_v8 = vrot.slane %v3748_v28, 4  ;;  %v3758_v20 = vrot.slane %v15628_v55, 5  ;;  %v11977_v50 = vrot.slane %v3642_v9, 9  ;;  %v3645_v22 = vld [vmem:[#allocation2 + $0x9c] sm:$0xe] }
 0x142   : > { %13507 = vmatmul.mubr.bf16.gmra.mxu0 %v15857_v38  ;;  %v1391_v1 = vrot.slane %v1390_v60, 4  ;;  %v15994_v59 = vsel %vm15120_vm13, %v11976_v56, %v3755_v34  ;;  %v3762_v43 = vrot.slane %v15618_v3, 5  ;;  %v3765_v55 = vrot.slane %v15635_v18, 5  ;;  %v14280_v60 = vld [vmem:[#allocation2 + $0x9c] sm:$0xff]  }
 0x143   : > { %13455 = vmatmul.mubr.bf16.gmra.mxu1 %v14273_v49  ;;  %13510 = vmatprep.mubr.bf16.mxu0 %v15879_v40  ;;  %v3757_v49 = vrot.slane %v3755_v34, 4  ;;  %v1386_v17 = vsel %vm14685_vm6, %v1381_v57, %v1385_v2  ;;  %v16006_v63 = vsel %vm15120_vm13, %v3750_v8, %v3751_v35  ;;  %v14277_v2 = vld [vmem:[#allocation2 + $0x90] sm:$0xff]   ;;  %v11978_v56 = vrot.slane %v3643_v48, 9  ;;  %v20265_v57 = vld [vmem:[#allocation10_spill] sm:$0xff]  ;;  %v3646_v8 = vld [vmem:[#allocation2 + $0xa8] sm:$0xe] }
 0x144   : > { %13458 = vmatprep.mubr.bf16.mxu1 %v14276_v24  ;;  %v1396_v6 = vsel %vm14685_vm6, %v1391_v1, %v1395_v19  ;;  %v16019_v28 = vsel %vm15120_vm13, %v11977_v50, %v3762_v43  ;;  %v3764_v35 = vrot.slane %v3762_v43, 4  ;;  %v20264_v34 = vld [vmem:[#allocation8_spill] sm:$0xff]  ;;  %v3772_v1 = vrot.slane %v20265_v57, 5  ;;  %v14303_v40 = vld [vmem:[%s20105_s1 + $0x220] sm:$0xff]  }
 0x145   : > { %v16002_v24 = vcombine.low %v1386_v17, %v1396_v6  ;;  %v16010_v25 = vsel %vm15120_vm13, %v3757_v49, %v3758_v20  ;;  %v3769_v9 = vrot.slane %v20264_v34, 5  ;;  %v11979_v18 = vrot.slane %v3644_v27, 9  ;;  %v20266_v20 = vld [vmem:[#allocation19_spill] sm:$0xff]  ;;  %v20267_v6 = vld [vmem:[#allocation20_spill] sm:$0xff] }
 0x146   : > { %v16025_v49 = vsel %vm15120_vm13, %v3764_v35, %v3765_v55  ;;  %v3776_v17 = vrot.slane %v20266_v20, 5  ;;  %v3779_v3 = vrot.slane %v20267_v6, 5  ;;  %v11980_v19 = vrot.slane %v3645_v22, 9  ;;  %v20268_v34 = vld [vmem:[#allocation12_spill] sm:$0xff]  ;;  %v20270_v22 = vld [vmem:[#allocation23_spill] sm:$0xff] }
 0x147   : > { %20263 = vst [vmem:[#allocation31_spill] sm:$0xff] %v16002_v24  ;;  %v16033_v48 = vsel %vm15120_vm13, %v11978_v56, %v3769_v9  ;;  %v3771_v43 = vrot.slane %v3769_v9, 4  ;;  %v3783_v27 = vrot.slane %v20268_v34, 5  ;;  %v3647_v57 = vld [vmem:[#allocation2 + $0xb4] sm:$0xe]  ;;  %v3786_v20 = vrot.slane %v20270_v22, 5 }
 0x148   : > { %v16039_v55 = vsel %vm15120_vm13, %v11979_v18, %v3776_v17  ;;  %v3778_v35 = vrot.slane %v3776_v17, 4  ;;  %v11981_v6 = vrot.slane %v3646_v8, 9  ;;  %v20273_v34 = vld [vmem:[#allocation21_spill] sm:$0xff]  ;;  %v3648_v18 = vld [vmem:[#allocation2 + $0xc0] sm:$0xe]  ;;  %v20275_v8 = vld [vmem:[#allocation27_spill] sm:$0xff] }
 0x149   : > { %20269 = vst [vmem:[#allocation8_spill] sm:$0xff] %v16039_v55  ;;  %v16045_v56 = vsel %vm15120_vm13, %v3771_v43, %v3772_v1  ;;  %v3785_v9 = vrot.slane %v3783_v27, 4  ;;  %v3790_v50 = vrot.slane %v20273_v34, 5  ;;  %v3793_v22 = vrot.slane %v20275_v8, 5  ;;  %v14281_v34 = vld [vmem:[#allocation2 + $0xa8] sm:$0xff]  }
 0x14a   : > { %13511 = vmatmul.mubr.bf16.gmra.mxu0 %v15881_v36  ;;  %20271 = vst [vmem:[#allocation10_spill] sm:$0xff] %v16045_v56  ;;  %v11982_v33 = vrot.slane %v3647_v57, 9  ;;  %v3800_v57 = vrot.slane %v15792_v41, 5  ;;  %v11983_v8 = vrot.slane %v3648_v18, 9  ;;  %v14472_v1 = vld [vmem:[#allocation2 + $0x14] sm:$0x1]  ;;  %v20302_v56 = vcombine.low %v15967_v10, %v15980_v52 }
 0x14b   : > { %13459 = vmatmul.mubr.bf16.gmra.mxu1 %v14277_v2  ;;  %13514 = vmatprep.mubr.bf16.mxu0 %v15930_v42  ;;  %v16049_v2 = vsel %vm15120_vm13, %v11980_v19, %v3783_v27  ;;  %v16063_v19 = vsel %vm15120_vm13, %v3785_v9, %v3786_v20  ;;  %v16067_v43 = vsel %vm15120_vm13, %v11981_v6, %v3790_v50  ;;  %v3792_v27 = vrot.slane %v3790_v50, 4  ;;  %v4524_v36 = vld [vmem:[#allocation2 + $0x30] sm:$0xf]  ;;  %v14305_v10 = vld [vmem:[#allocation2 + $0x84] sm:$0xff]  }
 0x14c   : > { %13462 = vmatprep.mubr.bf16.mxu1 %v14280_v60  ;;  %20272 = vst [vmem:[#allocation19_spill] sm:$0xff] %v16049_v2  ;;  %v16056_v60 = vsel %vm15120_vm13, %v3778_v35, %v3779_v3  ;;  %20276 = vst [vmem:[#allocation12_spill] sm:$0xff] %v16063_v19  ;;  %v20278_v35 = vld [vmem:[#allocation24_spill] sm:$0xff]  ;;  %v3702_v39 = vrot.slane %v14472_v1, 5  ;;  %v3804_v6 = vrot.slane %v15938_v13, 5  ;;  %v3807_v50 = vrot.slane %v15951_v26, 5 }
 0x14d   : > { %20274 = vst [vmem:[#allocation20_spill] sm:$0xff] %v16056_v60  ;;  %20277 = vst [vmem:[#allocation23_spill] sm:$0xff] %v16067_v43  ;;  %v3797_v17 = vrot.slane %v20278_v35, 5  ;;  %v16075_v20 = vsel %vm15120_vm13, %v3792_v27, %v3793_v22  ;;  %v3701_v9 = vrot.slane %v3699_v15, 4  ;;  %v4518_v1 = vld [vmem:[#allocation2 + $0x18] sm:$0xf]  ;;  %v20299_v2 = vcombine.low %v15948_v46, %v15971_v0 }
 0x14e   : > { %20279 = vst [vmem:[#allocation21_spill] sm:$0xff] %v16075_v20  ;;  %v16089_v22 = vsel %vm15120_vm13, %v11983_v8, %v3804_v6  ;;  %v3806_v27 = vrot.slane %v3804_v6, 4  ;;  %v14473_v13 = vld [vmem:[#allocation2 + $0x1c] sm:$0xf]  ;;  %v4570_v35 = vshll.u32 %v4518_v1, 16  ;;  %v4615_v30 = vshrl.u32 %v4524_v36, 16 }
 0x14f   : > { %v16085_v41 = vsel %vm15120_vm13, %v11982_v33, %v3797_v17  ;;  %v3799_v18 = vrot.slane %v3797_v17, 4  ;;  %20281 = vst [vmem:[#allocation24_spill] sm:$0xff] %v16089_v22  ;;  %v3706_v26 = vrot.slane %v14473_v13, 5  ;;  %v3634_v33 = vld [vmem:[#allocation2 + $0x18] sm:$0xe]  ;;  %v14289_v17 = vld [vmem:[#allocation2 + $0x24] sm:$0xff]  }
 0x150   : > { %20280 = vst [vmem:[#allocation27_spill] sm:$0xff] %v16085_v41  ;;  %v16100_v8 = vsel %vm15120_vm13, %v3806_v27, %v3807_v50  ;;  %v16102_v6 = vld [vmem:[#allocation2 + $0x1c] sm:$0xf]  ;;  %v11969_v50 = vrot.slane %v3634_v33, 9  ;;  %v14474_v27 = vld [vmem:[#allocation2 + $0x20] sm:$0x1] }
 0x151   : > { %v16094_v3 = vsel %vm15120_vm13, %v3799_v18, %v3800_v57  ;;  %20283 = vst [vmem:[#allocation33_spill] sm:$0xff] %v16100_v8  ;;  %v14285_v18 = vld [vmem:[#allocation2 + $0xc0] sm:$0xff]   ;;  %v3709_v13 = vrot.slane %v14474_v27, 5  ;;  %v4580_v51 = vshrl.u32 %v16102_v6, 16  ;;  %v3708_v53 = vrot.slane %v3706_v26, 4  ;;  %v16310_v46 = vld [vmem:[%s20105_s1 + $0x1c8] sm:$0xff]  }
 0x152   : > { %13515 = vmatmul.mubr.bf16.gmra.mxu0 %v16002_v24  ;;  %20282 = vst [vmem:[#allocation32_spill] sm:$0xff] %v16094_v3  ;;  %v4572_v42 = vrot.slane %v4570_v35, 5  ;;  %v16208_v8 = vld [vmem:[#allocation2 + $0x30] sm:$0xe]  ;;  %v16210_v22 = vld [vmem:[#allocation2 + $0x44] sm:$0x1] }
 0x153   : > { %13463 = vmatmul.mubr.bf16.gmra.mxu1 %v14281_v34  ;;  %13582 = vmatprep.mubr.bf16.mxu0 %v14288_v61  ;;  %v4567_v34 = vshrl.u32 %v4518_v1, 16  ;;  %v3703_v61 = vsel %vm15120_vm13, %v3701_v9, %v3702_v39  ;;  %v4576_v1 = vshll.u32 %v16102_v6, 16  ;;  %v4521_v39 = vld [vmem:[#allocation2 + $0x24] sm:$0xf]  ;;  %v16119_v9 = vld [vmem:[#allocation2 + $0x28] sm:$0xf]  ;;  %v3710_v35 = vsel %vm15120_vm13, %v3708_v53, %v3709_v13 }
 0x154   : > { %13466 = vmatprep.mubr.bf16.mxu1 %v14284_v5  ;;  %v3700_v5 = vsel %vm15120_vm13, %v11968_v31, %v3699_v15  ;;  %v14292_v31 = vld [vmem:[#allocation2 + $0x30] sm:$0xff]   ;;  %v4582_v27 = vrot.slane %v4580_v51, 4  ;;  %v14293_v51 = vld [vmem:[#allocation2 + $0x3c] sm:$0xff]   ;;  %vm6264_vm15 = vcmask 1040384  }
 0x155   : > { %v12000_v11 = vcombine.low %v3700_v5, %v3703_v61  ;;  %v4569_v24 = vrot.slane %v4567_v34, 4  ;;  %v14295_v15 = vld [vmem:[%s20105_s1 + $0x230] sm:$0xff]   ;;  %v16121_v33 = vrot.slane %v4576_v1, 5  ;;  %v3707_v5 = vsel %vm15120_vm13, %v11969_v50, %v3706_v26  ;;  %v14299_v34 = vld [vmem:[%s20105_s1 + $0x228] sm:$0xff]   ;;  %v4520_v61 = vld [vmem:[#allocation2 + $0x20] sm:$0x1] }
 0x156   : > { %v4594_v1 = vshll.u32 %v4521_v39, 16  ;;  %v4604_v26 = vshrl.u32 %v16119_v9, 16  ;;  %v5338_v50 = vrot.slane %v16102_v6, 5  ;;  %v12001_v13 = vcombine.low %v3707_v5, %v3710_v35  ;;  %v16288_v43 = vld [vmem:[#allocation2 + $0x5c] sm:$0x1]  ;;  %vm17598_vm1 = vmand %vm6264_vm15, %vm520_vm4 }
 0x157   : > { %v4573_v57 = vor.u32 %v4572_v42, %v4569_v24  ;;  %v4586_v53 = vshll.u32 %v4520_v61, 16  ;;  %v14294_v42 = vld [vmem:[%s20105_s1 + $0x1f0] sm:$0xff]   ;;  %v5341_v21 = vrot.slane %v4520_v61, 5  ;;  %v4536_v19 = vld [vmem:[#allocation2 + $0x60] sm:$0xf] }
 0x158   : > { %v4596_v5 = vrot.slane %v4594_v1, 5  ;;  %v5340_v38 = vrot.slane %v5338_v50, 4  ;;  %v20285_v1 = vcombine.low %v15892_v7, %v15906_v12  ;;  %v4610_v7 = vshll.u32 %v16143_v16, 16  ;;  %v4527_v12 = vld [vmem:[#allocation2 + $0x3c] sm:$0xf] }
 0x159   : > { %v4574_v24 = vrot.slane %v4573_v57, 4  ;;  %v16147_v57 = vpop.f32.mrf.mxu0 }
 0x15a   : > { %13583 = vmatmul.mubr.bf16.vlgmr.msra.gmra.mxu0 %v14289_v17  ;;  %v5272_v17 = vld [vmem:[#allocation2 + $0x18] sm:$0xe]  ;;  %20284 = vst [vmem:[#allocation34_spill] sm:$0xff] %v16147_v57 }
 0x15b   : > { %13467 = vmatmul.mubr.bf16.gmra.mxu1 %v14285_v18  ;;  %13663 = vmatpush3.bf16.msra.mxu0 %v15921_v47  ;;  %v4591_v18 = vshrl.u32 %v4521_v39, 16  ;;  %v4583_v47 = vor.u32 %v4582_v27, %v16121_v33  ;;  %v14296_v39 = vld [vmem:[#allocation2 + $0x48] sm:$0xff]   ;;  %v4606_v27 = vrot.slane %v4604_v26, 4 }
 0x15c   : > { %13534 = vmatprep.mubr.bf16.mxu1 %v12000_v11  ;;  %13586 = vmatprep.mubr.bf16.mxu0 %v14292_v31  ;;  %v4600_v11 = vshll.u32 %v16119_v9, 16  ;;  %v12104_v31 = vrot.slane %v5272_v17, 9  ;;  %v4588_v17 = vrot.slane %v4586_v53, 5  ;;  %v4624_v53 = vshll.u32 %v16149_v23, 16 }
 0x15d   : > { %13664 = vmatprep.subr.bf16.mxu0 %v14295_v15  ;;  %v4593_v6 = vrot.slane %v4591_v18, 4  ;;  %v4618_v18 = vshll.u32 %v4524_v36, 16  ;;  %v4579_v36 = vsel %vm14685_vm6, %v4574_v24, %v16121_v33  ;;  %v4628_v33 = vshrl.u32 %v16149_v23, 16  ;;  %v14297_v24 = vld [vmem:[#allocation2 + $0x54] sm:$0xff]  }
 0x15e   : > { %v16141_v35 = vrot.slane %v4600_v11, 5  ;;  %v16157_v61 = vsel %vm15120_vm13, %v12104_v31, %v5338_v50  ;;  %v14298_v11 = vld [vmem:[%s20105_s1 + $0x1e8] sm:$0xff]   ;;  %v16171_v50 = vsel %vm15120_vm13, %v5340_v38, %v5341_v21  ;;  %v16178_v31 = vpop.f32.mrf.mxu0  ;;  %v14300_v38 = vld [vmem:[#allocation2 + $0x60] sm:$0xff]  }
 0x15f   : > { %13665 = vmatpush3.bf16.msra.mxu0 %v14295_v15  ;;  %v4584_v15 = vrot.slane %v4583_v47, 4  ;;  %20286 = vst [vmem:[#allocation35_spill] sm:$0xff] %v16157_v61  ;;  %v4597_v26 = vor.u32 %v4596_v5, %v4593_v6  ;;  %20287 = vst [vmem:[#allocation36_spill] sm:$0xff] %v16171_v50  ;;  %v16174_v47 = vld [vmem:[#allocation2 + $0x38] sm:$0x1]  ;;  %v16183_v6 = vrot.slane %v4615_v30, 4 }
 0x160   : > { %13666 = vmatprep.subr.bf16.mxu0 %v14299_v34  ;;  %20288 = vst [vmem:[#allocation37_spill] sm:$0xff] %v16178_v31  ;;  %v16185_v21 = vrot.slane %v4618_v18, 5  ;;  %v4639_v5 = vshrl.u32 %v4527_v12, 16  ;;  %v14307_v30 = vld [vmem:[%s20105_s1 + $0x218] sm:$0xff]   ;;  %v4634_v18 = vshll.u32 %v16174_v47, 16  ;;  %v16206_v31 = vrot.slane %v4624_v53, 5 }
 0x161   : > { %v4630_v57 = vrot.slane %v4628_v33, 4  ;;  %v16255_v33 = vld [vmem:[#allocation2 + $0x58] sm:$0xf]  ;;  %v16274_v50 = vld [vmem:[#allocation2 + $0x3c] sm:$0xe]  ;;  %v14310_v61 = vld [vmem:[%s20105_s1 + $0x1d0] sm:$0xff]  }
 0x162   : > { %13587 = vmatmul.mubr.bf16.gmra.mxu0 %v14293_v51 }
 0x163   : > { %13535 = vmatmul.mubr.bf16.vlgmr.msra.gmra.mxu1 %v12001_v13  ;;  %13590 = vmatprep.mubr.bf16.mxu0 %v14296_v39  ;;  %v16167_v13 = vld [vmem:[#allocation2 + $0x40] sm:$0xf]  ;;  %v4589_v39 = vsel %vm14685_vm6, %v4584_v15, %v4588_v17  ;;  %v16195_v15 = vrot.slane %v4597_v26, 4  ;;  %v20290_v26 = vcombine.low %v15914_v62, %v15934_v44  ;;  %v4621_v62 = vor.u32 %v16185_v21, %v16183_v6  ;;  %v14306_v6 = vld [vmem:[%s20105_s1 + $0x1d8] sm:$0xff]   ;;  %v4533_v21 = vld [vmem:[#allocation2 + $0x54] sm:$0xf] }
 0x164   : > { %13615 = vmatpush3.bf16.msra.mxu1 %v15962_v4  ;;  %13538 = vmatprep.mubr.bf16.mxu1 %v20285_v1  ;;  %v4607_v4 = vor.u32 %v4606_v27, %v16141_v35  ;;  %v4642_v27 = vshll.u32 %v4527_v12, 16  ;;  %v4648_v1 = vshll.u32 %v16167_v13, 16  ;;  %v4652_v51 = vshrl.u32 %v16167_v13, 16 }
 0x165   : > { %13616 = vmatprep.subr.bf16.mxu1 %v14294_v42  ;;  %13667 = vmatpush3.bf16.msra.mxu0 %v14299_v34  ;;  %v16202_v12 = vcombine.low %v4579_v36, %v4589_v39  ;;  %v16222_v36 = vld [vmem:[%s20105_s1 + $0x210] sm:$0xff]   ;;  %v20294_v39 = vcombine.low %v15925_v58, %v15944_v37  ;;  %v4687_v3 = vshrl.u32 %v4533_v21, 16  ;;  %v4690_v41 = vshll.u32 %v4533_v21, 16 }
 0x166   : > { %13668 = vmatprep.subr.bf16.mxu0 %v14303_v40  ;;  %v16197_v17 = vrot.slane %v4607_v4, 4  ;;  %v16215_v4 = vpop.f32.mrf.mxu1  ;;  %v4644_v34 = vrot.slane %v4642_v27, 5 }
 0x167   : > { %20289 = vst [vmem:[#allocation38_spill] sm:$0xff] %v16202_v12  ;;  %20291 = vst [vmem:[#allocation39_spill] sm:$0xff] %v16215_v4  ;;  %v16235_v4 = vrot.slane %v4648_v1, 5  ;;  %v16266_v12 = vld [vmem:[#allocation2 + $0x50] sm:$0x1]  ;;  %v4689_v52 = vrot.slane %v4687_v3, 4 }
 0x168   : > { %13617 = vmatpush3.bf16.msra.mxu1 %v14294_v42  ;;  %v16199_v42 = vrot.slane %v4610_v7, 5  ;;  %v20293_v7 = vrot.slane %v16119_v9, 5  ;;  %v16257_v58 = vpop.f32.mrf.mxu1 }
 0x169   : > { %13618 = vmatprep.subr.bf16.mxu1 %v14298_v11  ;;  %13669 = vmatpush3.bf16.msra.mxu0 %v14303_v40  ;;  %v16217_v40 = vpop.f32.mrf.mxu0  ;;  %20295 = vst [vmem:[#allocation41_spill] sm:$0xff] %v16235_v4  ;;  %20296 = vst [vmem:[#allocation42_spill] sm:$0xff] %v16257_v58  ;;  %v16271_v58 = vrot.slane %v4621_v62, 4  ;;  %v4696_v62 = vshll.u32 %v16255_v33, 16 }
 0x16a   : > { %13591 = vmatmul.mubr.bf16.gmra.mxu0 %v14297_v24  ;;  %20292 = vst [vmem:[#allocation40_spill] sm:$0xff] %v16217_v40  ;;  %v16226_v53 = vrot.slane %v20293_v7, 4  ;;  %v4530_v24 = vld [vmem:[#allocation2 + $0x48] sm:$0xf]  ;;  %v4654_v40 = vrot.slane %v4652_v51, 4  ;;  %13670 = vmatprep.subr.bf16.mxu0 %v14307_v30  ;;  %v4658_v51 = vshll.u32 %v16210_v22, 16  ;;  %v16293_v60 = vpop.f32.mrf.mxu1 }
 0x16b   : > { %13539 = vmatmul.mubr.bf16.gmra.mxu1 %v20290_v26  ;;  %v4641_v26 = vrot.slane %v4639_v5, 4  ;;  %v16237_v7 = vld [vmem:[#allocation2 + $0x4c] sm:$0xf]  ;;  %13594 = vmatprep.mubr.bf16.mxu0 %v14300_v38  ;;  %v4631_v5 = vor.u32 %v4630_v57, %v16206_v31  ;;  %v4663_v1 = vshrl.u32 %v4530_v24, 16  ;;  %v16259_v44 = vpop.f32.mrf.mxu0  ;;  %20300 = vst [vmem:[#allocation44_spill] sm:$0xff] %v16293_v60 }
 0x16c   : > { %13542 = vmatprep.mubr.bf16.mxu1 %v20294_v39  ;;  %13619 = vmatpush3.bf16.msra.mxu1 %v14298_v11  ;;  %v16250_v11 = vrot.slane %v4634_v18, 5  ;;  %v14301_v38 = vld [vmem:[#allocation2 + $0x6c] sm:$0xff]   ;;  %v4666_v39 = vshll.u32 %v4530_v24, 16  ;;  %20297 = vst [vmem:[#allocation43_spill] sm:$0xff] %v16259_v44  ;;  %v20298_v18 = vrot.slane %v16149_v23, 5  ;;  %v4672_v57 = vshll.u32 %v16237_v7, 16 }
 0x16d   : > { %13620 = vmatprep.subr.bf16.mxu1 %v14302_v14  ;;  %13671 = vmatpush3.bf16.msra.mxu0 %v14307_v30  ;;  %v4676_v27 = vshrl.u32 %v16237_v7, 16  ;;  %v14304_v24 = vld [vmem:[#allocation2 + $0x78] sm:$0xff]   ;;  %v4645_v30 = vor.u32 %v4644_v34, %v4641_v26  ;;  %v4655_v44 = vor.u32 %v4654_v40, %v16235_v4  ;;  %v4700_v34 = vshrl.u32 %v16255_v33, 16  ;;  %v16295_v21 = vpop.f32.mrf.mxu0  ;;  %v16302_v4 = vld [vmem:[#allocation2 + $0x64] sm:$0xf] }
 0x16e   : > { %v16263_v37 = vrot.slane %v20298_v18, 4  ;;  %13672 = vmatprep.subr.bf16.mxu0 %v16222_v36  ;;  %v16285_v40 = vrot.slane %v4631_v5, 4  ;;  %v4665_v26 = vrot.slane %v4663_v1, 4  ;;  %v4668_v20 = vrot.slane %v4666_v39, 5  ;;  %20301 = vst [vmem:[#allocation45_spill] sm:$0xff] %v16295_v21  ;;  %v14308_v5 = vld [vmem:[#allocation2 + $0x90] sm:$0xff]  }
 0x16f   : > { %v4682_v18 = vshll.u32 %v16266_v12, 16  ;;  %v16297_v55 = vrot.slane %v4658_v51, 5  ;;  %v16300_v1 = vrot.slane %v4672_v57, 5  ;;  %v4678_v39 = vrot.slane %v4676_v27, 4  ;;  %v16321_v57 = vld [vmem:[#allocation2 + $0x48] sm:$0xe]  ;;  %v16335_v3 = vpop.f32.mrf.mxu0 }
 0x170   : > { %13621 = vmatpush3.bf16.msra.mxu1 %v14302_v14  ;;  %v14315_v14 = vld [vmem:[%s20105_s1 + $0x208] sm:$0xff]   ;;  %v16312_v0 = vrot.slane %v4645_v30, 4  ;;  %v20303_v51 = vrot.slane %v16167_v13, 5  ;;  %v4702_v30 = vrot.slane %v4700_v34, 4  ;;  %v16331_v60 = vld [vmem:[#allocation2 + $0x54] sm:$0xe] }
 0x171   : > { %13622 = vmatprep.subr.bf16.mxu1 %v14306_v6  ;;  %13673 = vmatpush3.bf16.msra.mxu0 %v16222_v36  ;;  %v16329_v27 = vrot.slane %v4682_v18, 5  ;;  %v4714_v21 = vshll.u32 %v4536_v19, 16  ;;  %v16333_v36 = vpop.f32.mrf.mxu1  ;;  %20306 = vst [vmem:[#allocation48_spill] sm:$0xff] %v16335_v3  ;;  %v4720_v18 = vshll.u32 %v16302_v4, 16  ;;  %v16374_v3 = vld [vmem:[#allocation2 + $0x6c] sm:$0xf] }
 0x172   : > { %13595 = vmatmul.mubr.bf16.gmra.mxu0 %v14301_v38  ;;  %v16318_v38 = vrot.slane %v20303_v51, 4  ;;  %13674 = vmatprep.subr.bf16.mxu0 %v14315_v14  ;;  %v4669_v51 = vor.u32 %v4668_v20, %v4665_v26  ;;  %20305 = vst [vmem:[#allocation47_spill] sm:$0xff] %v16333_v36  ;;  %v4679_v20 = vor.u32 %v4678_v39, %v16300_v1  ;;  %v4706_v26 = vshll.u32 %v16288_v43, 16 }
 0x173   : > { %13543 = vmatmul.mubr.bf16.gmra.mxu1 %v20299_v2  ;;  %13598 = vmatprep.mubr.bf16.mxu0 %v14304_v24  ;;  %v16314_v2 = vrot.slane %v4655_v44, 4  ;;  %v16324_v24 = vrot.slane %v4696_v62, 5  ;;  %v14319_v44 = vld [vmem:[%s20105_s1 + $0x200] sm:$0xff]   ;;  %20304 = vst [vmem:[#allocation46_spill] sm:$0xff] %v16329_v27  ;;  %v20308_v62 = vrot.slane %v16145_v32, 9  ;;  %v20310_v32 = vsel %vm14685_vm6, %v16197_v17, %v16199_v42 }
 0x174   : > { %13546 = vmatprep.mubr.bf16.mxu1 %v20302_v56  ;;  %13623 = vmatpush3.bf16.msra.mxu1 %v14306_v6  ;;  %v4692_v56 = vrot.slane %v4690_v41, 5  ;;  %v4711_v6 = vshrl.u32 %v4536_v19, 16  ;;  %v20307_v41 = vrot.slane %v16119_v9, 5  ;;  %v16348_v27 = vld [vmem:[#allocation2 + $0x68] sm:$0x1]  ;;  %v14318_v19 = vld [vmem:[%s20105_s1 + $0x1c0] sm:$0xff]   ;;  %v20311_v9 = vsel %vm14685_vm6, %v16195_v15, %v16141_v35 }
 0x175   : > { %13624 = vmatprep.subr.bf16.mxu1 %v14310_v61  ;;  %20309 = vst [vmem:[#allocation49_spill] sm:$0xff] %v16348_v27  ;;  %v16363_v39 = vcombine.low %v20311_v9, %v20310_v32  ;;  %v4724_v36 = vshrl.u32 %v16302_v4, 16  ;;  %13675 = vmatpush3.bf16.msra.mxu0 %v14315_v14  ;;  %v4703_v15 = vor.u32 %v4702_v30, %v16324_v24  ;;  %v16379_v42 = vld [vmem:[#allocation2 + $0x70] sm:$0xf]  ;;  %v16388_v14 = vpop.f32.mrf.mxu1  ;;  %v20317_v30 = vrot.slane %v16237_v7, 5  ;;  %v14309_v32 = vld [vmem:[#allocation2 + $0x9c] sm:$0xff]  }
 0x176   : > { %v16343_v34 = vsel %vm15120_vm13, %v20308_v62, %v20307_v41  ;;  %v20313_v41 = vrot.slane %v16143_v16, 5  ;;  %v4693_v35 = vor.u32 %v4692_v56, %v4689_v52  ;;  %v20160_v16 = vrot.slane %v16255_v33, 5  ;;  %13676 = vmatprep.subr.bf16.mxu0 %v14319_v44  ;;  %20315 = vst [vmem:[#allocation51_spill] sm:$0xff] %v16388_v14  ;;  %v16390_v52 = vpop.f32.mrf.mxu0 }
 0x177   : > { %20312 = vst [vmem:[#allocation50_spill] sm:$0xff] %v16363_v39  ;;  %v4713_v9 = vrot.slane %v4711_v6, 4  ;;  %20316 = vst [vmem:[#allocation52_spill] sm:$0xff] %v16390_v52  ;;  %v16392_v56 = vrot.slane %v4679_v20, 4  ;;  %v16396_v17 = vrot.slane %v20317_v30, 4  ;;  %v4726_v20 = vrot.slane %v4724_v36, 4 }
 0x178   : > { %v16370_v62 = vsel %vm15120_vm13, %v16226_v53, %v20313_v41  ;;  %13625 = vmatpush3.bf16.msra.mxu1 %v14310_v61  ;;  %v16382_v53 = vrot.slane %v4669_v51, 4  ;;  %v4716_v41 = vrot.slane %v4714_v21, 5  ;;  %v20314_v61 = vcombine.low %v15989_v54, %v16006_v63  ;;  %v16401_v21 = vld [vmem:[#allocation2 + $0x60] sm:$0xe]  ;;  %v4542_v30 = vld [vmem:[#allocation2 + $0x78] sm:$0xf] }
 0x179   : > { %13626 = vmatprep.subr.bf16.mxu1 %v16310_v46  ;;  %v16398_v51 = vrot.slane %v4706_v26, 5  ;;  %v20318_v54 = vcombine.low %v15994_v59, %v16010_v25  ;;  %13677 = vmatpush3.bf16.msra.mxu0 %v14319_v44  ;;  %v16411_v26 = vrot.slane %v4693_v35, 4  ;;  %v16413_v6 = vrot.slane %v4703_v15, 4  ;;  %v16426_v35 = vpop.f32.mrf.mxu1  ;;  %v16428_v15 = vpop.f32.mrf.mxu0  ;;  %v16481_v52 = vld [vmem:[#allocation2 + $0x80] sm:$0x1] }
 0x17a   : > { %13599 = vmatmul.mubr.bf16.gmra.mxu0 %v14305_v10  ;;  %v16407_v10 = vrot.slane %v4720_v18, 5  ;;  %v16417_v59 = vrot.slane %v20160_v16, 4  ;;  %v4735_v25 = vshrl.u32 %v16374_v3, 16  ;;  %v4717_v18 = vor.u32 %v4716_v41, %v4713_v9  ;;  %20319 = vst [vmem:[#allocation53_spill] sm:$0xff] %v16426_v35  ;;  %20320 = vst [vmem:[#allocation54_spill] sm:$0xff] %v16428_v15  ;;  %v20329_v39 = vld [vmem:[#allocation10_spill] sm:$0xff] }
 0x17b   : > { %13547 = vmatmul.mubr.bf16.gmra.mxu1 %v20314_v61  ;;  %13602 = vmatprep.mubr.bf16.mxu0 %v14308_v5  ;;  %v4730_v61 = vshll.u32 %v16348_v27, 16  ;;  %v16420_v5 = vld [vmem:[#allocation2 + $0x7c] sm:$0xf]  ;;  %v4744_v44 = vshll.u32 %v16379_v42, 16  ;;  %v4637_v63 = vsel %vm14685_vm6, %v16285_v40, %v16250_v11  ;;  %v20321_v9 = vrot.slane %v16149_v23, 5 }
 0x17c   : > { %13550 = vmatprep.mubr.bf16.mxu1 %v20318_v54  ;;  %13627 = vmatpush3.bf16.msra.mxu1 %v16310_v46  ;;  %v4738_v46 = vshll.u32 %v16374_v3, 16  ;;  %v4627_v54 = vsel %vm14685_vm6, %v16271_v58, %v16206_v31  ;;  %v20322_v3 = vrot.slane %v16208_v8, 9  ;;  %v20323_v36 = vrot.slane %v16174_v47, 5  ;;  %v16453_v31 = vld [vmem:[#allocation2 + $0x74] sm:$0x1]  ;;  %v14312_v58 = vld [vmem:[#allocation2 + $0xa8] sm:$0xff]   ;;  %v16473_v47 = vpop.f32.mrf.mxu0 }
 0x17d   : > { %13628 = vmatprep.subr.bf16.mxu1 %v14318_v19  ;;  %v4727_v11 = vor.u32 %v4726_v20, %v16407_v10  ;;  %v16456_v40 = vrot.slane %v4730_v61, 5  ;;  %v4748_v8 = vshrl.u32 %v16379_v42, 16  ;;  %v4762_v35 = vshll.u32 %v4542_v30, 16  ;;  %v16464_v15 = vld [vmem:[#allocation2 + $0x6c] sm:$0xe]  ;;  %20326 = vst [vmem:[#allocation56_spill] sm:$0xff] %v16473_v47 }
 0x17e   : > { %v16444_v41 = vsel %vm15120_vm13, %v20322_v3, %v20321_v9  ;;  %v16451_v16 = vsel %vm15120_vm13, %v16263_v37, %v20323_v36  ;;  %v4759_v3 = vshrl.u32 %v4542_v30, 16  ;;  %v4545_v37 = vld [vmem:[#allocation2 + $0x84] sm:$0xf]  ;;  %v16462_v36 = vrot.slane %v4717_v18, 4  ;;  %v20339_v47 = vld [vmem:[#allocation8_spill] sm:$0xff] }
 0x17f   : > { %v4737_v14 = vrot.slane %v4735_v25, 4  ;;  %v4768_v20 = vshll.u32 %v16420_v5, 16  ;;  %v4772_v61 = vshrl.u32 %v16420_v5, 16  ;;  %v20324_v23 = vcombine.low %v16019_v28, %v16025_v49  ;;  %v20331_v28 = vld [vmem:[#allocation41_spill] sm:$0xff]  ;;  %v4548_v25 = vld [vmem:[#allocation2 + $0x90] sm:$0xf] }
 0x180   : > { %13629 = vmatpush3.bf16.msra.mxu1 %v14318_v19  ;;  %v16471_v19 = vpop.f32.mrf.mxu1  ;;  %v16475_v30 = vcombine.low %v4627_v54, %v4637_v63  ;;  %v4740_v18 = vrot.slane %v4738_v46, 5  ;;  %v16479_v9 = vrot.slane %v4744_v44, 5  ;;  %v20330_v27 = vcombine.low %v16033_v48, %v20329_v39  ;;  %v16510_v39 = vld [vmem:[#allocation2 + $0x88] sm:$0xf] }
 0x181   : > { %20325 = vst [vmem:[#allocation55_spill] sm:$0xff] %v16471_v19  ;;  %v4651_v49 = vsel %vm14685_vm6, %v16312_v0, %v20331_v28  ;;  %v20333_v63 = vrot.slane %v16274_v50, 9  ;;  %v4750_v44 = vrot.slane %v4748_v8, 4  ;;  %v4754_v54 = vshll.u32 %v16453_v31, 16  ;;  %v16516_v28 = vld [vmem:[#allocation2 + $0x8c] sm:$0x1] }
 0x182   : > { %13603 = vmatmul.mubr.bf16.gmra.mxu0 %v14309_v32  ;;  %20327 = vst [vmem:[#allocation57_spill] sm:$0xff] %v16475_v30  ;;  %20328 = vst [vmem:[#allocation58_spill] sm:$0xff] %v16479_v9  ;;  %v20332_v32 = vrot.slane %v16167_v13, 5  ;;  %v4661_v48 = vsel %vm14685_vm6, %v16314_v2, %v16297_v55  ;;  %v4761_v50 = vrot.slane %v4759_v3, 4  ;;  %v4764_v0 = vrot.slane %v4762_v35, 5  ;;  %v16518_v55 = vpop.f32.mrf.mxu1  ;;  %v16520_v2 = vpop.f32.mrf.mxu0  ;;  %v20340_v30 = vld [vmem:[#allocation20_spill] sm:$0xff] }
 0x183   : > { %13551 = vmatmul.mubr.bf16.gmra.mxu1 %v20324_v23  ;;  %13606 = vmatprep.mubr.bf16.mxu0 %v14312_v58  ;;  %v16512_v58 = vrot.slane %v4727_v11, 4  ;;  %v16514_v23 = vrot.slane %v4768_v20, 5  ;;  %v4774_v8 = vrot.slane %v4772_v61, 4  ;;  %20335 = vst [vmem:[#allocation10_spill] sm:$0xff] %v16518_v55  ;;  %20336 = vst [vmem:[#allocation41_spill] sm:$0xff] %v16520_v2  ;;  %v4741_v35 = vor.u32 %v4740_v18, %v4737_v14 }
 0x184   : > { %13554 = vmatprep.mubr.bf16.mxu1 %v20330_v27  ;;  %v16496_v46 = vsel %vm15120_vm13, %v20333_v63, %v20332_v32  ;;  %v20334_v27 = vrot.slane %v16210_v22, 5  ;;  %v4783_v32 = vshrl.u32 %v4545_v37, 16  ;;  %v14313_v22 = vld [vmem:[#allocation2 + $0xb4] sm:$0xff]   ;;  %v4786_v11 = vshll.u32 %v4545_v37, 16 }
 0x185   : > { %v4751_v20 = vor.u32 %v4750_v44, %v16479_v9  ;;  %v16528_v61 = vrot.slane %v4754_v54, 5  ;;  %v4778_v55 = vshll.u32 %v16481_v52, 16  ;;  %v16532_v19 = vld [vmem:[#allocation2 + $0x78] sm:$0xe]  ;;  %v16537_v3 = vcombine.low %v4651_v49, %v4661_v48  ;;  %v16545_v9 = vpop.f32.mrf.mxu1 }
 0x186   : > { %v16508_v13 = vsel %vm15120_vm13, %v16318_v38, %v20334_v27  ;;  %v20337_v38 = vrot.slane %v16302_v4, 5  ;;  %v14316_v27 = vld [vmem:[#allocation2 + $0xc0] sm:$0xff]   ;;  %v4785_v18 = vrot.slane %v4783_v32, 4  ;;  %v4775_v37 = vor.u32 %v4774_v8, %v16514_v23  ;;  %20342 = vst [vmem:[#allocation8_spill] sm:$0xff] %v16545_v9  ;;  %v16562_v32 = vld [vmem:[#allocation2 + $0x94] sm:$0xf] }
 0x187   : > { %20338 = vst [vmem:[#allocation59_spill] sm:$0xff] %v16528_v61  ;;  %v4792_v44 = vshll.u32 %v16510_v39, 16  ;;  %v4796_v54 = vshrl.u32 %v16510_v39, 16  ;;  %v20341_v61 = vcombine.low %v20339_v47, %v20340_v30  ;;  %v4675_v49 = vsel %vm14685_vm6, %v16382_v53, %v16300_v1  ;;  %v4551_v53 = vld [vmem:[#allocation2 + $0x9c] sm:$0xf]  ;;  %v14317_v9 = vld [vmem:[#allocation2 + $0xcc] sm:$0xff]  }
 0x188   : > { %v16524_v63 = vrot.slane %v20337_v38, 4  ;;  %v4765_v38 = vor.u32 %v4764_v0, %v4761_v50  ;;  %v16547_v50 = vpop.f32.mrf.mxu0  ;;  %v20344_v48 = vrot.slane %v16237_v7, 5  ;;  %v20345_v0 = vrot.slane %v16321_v57, 9 }
 0x189   : > { %20343 = vst [vmem:[#allocation20_spill] sm:$0xff] %v16547_v50  ;;  %v4788_v47 = vrot.slane %v4786_v11, 5  ;;  %v4802_v30 = vshll.u32 %v16516_v28, 16  ;;  %v16567_v14 = vrot.slane %v4741_v35, 4  ;;  %v16569_v1 = vrot.slane %v4751_v20, 4 }
 0x18a   : > { %13607 = vmatmul.mubr.bf16.gmra.mxu0 %v14313_v22  ;;  %v16559_v8 = vsel %vm15120_vm13, %v20345_v0, %v20344_v48  ;;  %v20346_v22 = vld [vmem:[#allocation19_spill] sm:$0xff]  ;;  %v20349_v7 = vrot.slane %v16379_v42, 5  ;;  %v16576_v11 = vrot.slane %v4765_v38, 4  ;;  %v16578_v48 = vrot.slane %v4778_v55, 5  ;;  %v16592_v38 = vpop.f32.mrf.mxu1  ;;  %v16594_v55 = vpop.f32.mrf.mxu0 }
 0x18b   : > { %13555 = vmatmul.mubr.bf16.gmra.mxu1 %v20341_v61  ;;  %v20347_v61 = vld [vmem:[#allocation12_spill] sm:$0xff]  ;;  %13610 = vmatprep.mubr.bf16.mxu0 %v14316_v27  ;;  %v16584_v35 = vrot.slane %v4775_v37, 4  ;;  %v20352_v27 = vrot.slane %v16420_v5, 5  ;;  %20354 = vst [vmem:[#allocation61_spill] sm:$0xff] %v16592_v38  ;;  %20355 = vst [vmem:[#allocation62_spill] sm:$0xff] %v16594_v55  ;;  %v4789_v0 = vor.u32 %v4788_v47, %v4785_v18  ;;  %v16596_v50 = vrot.slane %v4802_v30, 5 }
 0x18c   : > { %v20348_v2 = vcombine.low %v20346_v22, %v20347_v61  ;;  %v16573_v57 = vrot.slane %v20349_v7, 4  ;;  %20350 = vst [vmem:[#allocation19_spill] sm:$0xff] %v16578_v48  ;;  %v16590_v61 = vrot.slane %v4792_v44, 5  ;;  %v4798_v7 = vrot.slane %v4796_v54, 4  ;;  %v16598_v37 = vld [vmem:[#allocation2 + $0xa0] sm:$0xf] }
 0x18d   : > { %20351 = vst [vmem:[#allocation12_spill] sm:$0xff] %v16584_v35  ;;  %v16588_v20 = vrot.slane %v20352_v27, 4  ;;  %20356 = vst [vmem:[#allocation63_spill] sm:$0xff] %v16596_v50  ;;  %v4807_v22 = vshrl.u32 %v4548_v25, 16  ;;  %v4810_v48 = vshll.u32 %v4548_v25, 16  ;;  %v20357_v35 = vld [vmem:[#allocation46_spill] sm:$0xff]  ;;  %v4699_v47 = vsel %vm14685_vm6, %v16411_v26, %v16324_v24 }
 0x18e   : > { %13558 = vmatprep.mubr.bf16.mxu1 %v20348_v2  ;;  %v16582_v2 = vld [vmem:[#allocation2 + $0x84] sm:$0xe]  ;;  %20353 = vst [vmem:[#allocation60_spill] sm:$0xff] %v16590_v61  ;;  %v4685_v44 = vsel %vm14685_vm6, %v16392_v56, %v20357_v35  ;;  %v20358_v54 = vrot.slane %v16266_v12, 5  ;;  %v16611_v38 = vld [vmem:[#allocation2 + $0x98] sm:$0x1]  ;;  %v4709_v12 = vsel %vm14685_vm6, %v16413_v6, %v16398_v51  ;;  %v4799_v24 = vor.u32 %v4798_v7, %v16590_v61 }
 0x18f   : > { %v4816_v18 = vshll.u32 %v16562_v32, 16  ;;  %v4820_v25 = vshrl.u32 %v16562_v32, 16  ;;  %v20359_v56 = vrot.slane %v16255_v33, 5  ;;  %v20361_v35 = vrot.slane %v16288_v43, 5  ;;  %v20363_v6 = vld [vmem:[#allocation21_spill] sm:$0xff]  ;;  %v20369_v61 = vld [vmem:[#allocation27_spill] sm:$0xff] }
 0x190   : > { %v16609_v27 = vsel %vm15120_vm13, %v16396_v17, %v20358_v54  ;;  %v20360_v17 = vrot.slane %v16331_v60, 9  ;;  %v20362_v60 = vld [vmem:[#allocation23_spill] sm:$0xff]  ;;  %v16653_v7 = vld [vmem:[#allocation2 + $0x90] sm:$0xe]  ;;  %v4834_v26 = vshll.u32 %v4551_v53, 16 }
 0x191   : > { %v16636_v54 = vsel %vm15120_vm13, %v16417_v59, %v20361_v35  ;;  %v20364_v50 = vcombine.low %v20362_v60, %v20363_v6  ;;  %v16651_v59 = vrot.slane %v4807_v22, 4  ;;  %20368 = vst [vmem:[#allocation64_spill] sm:$0xff] %v16653_v7  ;;  %v4831_v35 = vshrl.u32 %v4551_v53, 16  ;;  %v4554_v51 = vld [vmem:[#allocation2 + $0xa8] sm:$0xf]  ;;  %v20370_v33 = vld [vmem:[#allocation32_spill] sm:$0xff] }
 0x192   : > { %v16629_v30 = vsel %vm15120_vm13, %v20360_v17, %v20359_v56  ;;  %v16645_v56 = vpop.f32.mrf.mxu1  ;;  %v16647_v43 = vpop.f32.mrf.mxu0  ;;  %13611 = vmatmul.mubr.bf16.gmra.mxu0 %v14317_v9  ;;  %v16649_v17 = vrot.slane %v4789_v0, 4  ;;  %v20371_v55 = vcombine.low %v20369_v61, %v20370_v33  ;;  %v20372_v60 = vld [vmem:[#allocation35_spill] sm:$0xff]  ;;  %v4840_v9 = vshll.u32 %v16598_v37, 16  ;;  %v16672_v33 = vld [vmem:[#allocation2 + $0xa4] sm:$0x1] }
 0x193   : > { %13559 = vmatmul.mubr.bf16.gmra.mxu1 %v20364_v50  ;;  %20365 = vst [vmem:[#allocation46_spill] sm:$0xff] %v16645_v56  ;;  %20366 = vst [vmem:[#allocation23_spill] sm:$0xff] %v16647_v43  ;;  %v20373_v50 = vld [vmem:[#allocation36_spill] sm:$0xff]  ;;  %v4812_v56 = vrot.slane %v4810_v48, 5  ;;  %v16661_v43 = vrot.slane %v4816_v18, 5  ;;  %v4844_v0 = vshrl.u32 %v16598_v37, 16  ;;  %v16676_v48 = vcombine.low %v4699_v47, %v4709_v12 }
 0x194   : > { %20367 = vst [vmem:[#allocation21_spill] sm:$0xff] %v16649_v17  ;;  %13562 = vmatprep.mubr.bf16.mxu1 %v20371_v55  ;;  %v20374_v6 = vcombine.low %v20372_v60, %v20373_v50  ;;  %v16665_v22 = vpop.f32.mrf.mxu0  ;;  %v16667_v17 = vcombine.low %v4675_v49, %v4685_v44  ;;  %v4822_v61 = vrot.slane %v4820_v25, 4  ;;  %v4826_v55 = vshll.u32 %v16611_v38, 16  ;;  %v16674_v60 = vld [vmem:[#allocation2 + $0xac] sm:$0xf]  ;;  %v20394_v7 = vld [vmem:[#allocation38_spill] sm:$0xff] }
 0x195   : > { %20375 = vst [vmem:[#allocation27_spill] sm:$0xff] %v16661_v43  ;;  %20376 = vst [vmem:[#allocation32_spill] sm:$0xff] %v16665_v22  ;;  %v16680_v50 = vrot.slane %v4799_v24, 4  ;;  %v20379_v49 = vrot.slane %v16510_v39, 5  ;;  %v20383_v47 = vrot.slane %v16302_v4, 5  ;;  %v20384_v12 = vrot.slane %v16401_v21, 9 }
 0x196   : > { %13678 = vmatprep.mubr.bf16.mxu0 %v20374_v6  ;;  %20377 = vst [vmem:[#allocation35_spill] sm:$0xff] %v16676_v48  ;;  %v16686_v6 = vpop.f32.mrf.mxu1  ;;  %v16688_v25 = vpop.f32.mrf.mxu0  ;;  %v4833_v18 = vrot.slane %v4831_v35, 4  ;;  %v4813_v53 = vor.u32 %v4812_v56, %v16651_v59  ;;  %v4823_v4 = vor.u32 %v4822_v61, %v16661_v43  ;;  %v16711_v21 = vld [vmem:[#allocation2 + $0xb0] sm:$0x1]  ;;  %v20391_v59 = vld [vmem:[#allocation33_spill] sm:$0xff]  ;;  %v4733_v35 = vsel %vm14685_vm6, %v16512_v58, %v16456_v40 }
 0x197   : > { %20378 = vst [vmem:[#allocation36_spill] sm:$0xff] %v16680_v50  ;;  %v16684_v44 = vrot.slane %v20379_v49, 4  ;;  %20381 = vst [vmem:[#allocation66_spill] sm:$0xff] %v16686_v6  ;;  %v16700_v24 = vsel %vm15120_vm13, %v20384_v12, %v20383_v47  ;;  %v4836_v49 = vrot.slane %v4834_v26, 5  ;;  %v16703_v6 = vrot.slane %v4840_v9, 5  ;;  %v20390_v56 = vld [vmem:[#allocation24_spill] sm:$0xff] }
 0x198   : > { %20382 = vst [vmem:[#allocation67_spill] sm:$0xff] %v16688_v25  ;;  %v4846_v25 = vrot.slane %v4844_v0, 4  ;;  %v4855_v50 = vshrl.u32 %v4554_v51, 16  ;;  %v16705_v48 = vpop.f32.mrf.mxu0  ;;  %20388 = vst [vmem:[#allocation71_spill] sm:$0xff] %v16711_v21  ;;  %v4858_v47 = vshll.u32 %v4554_v51, 16  ;;  %v4850_v26 = vshll.u32 %v16672_v33, 16 }
 0x199   : > { %20380 = vst [vmem:[#allocation65_spill] sm:$0xff] %v16684_v44  ;;  %20385 = vst [vmem:[#allocation68_spill] sm:$0xff] %v16703_v6  ;;  %v16709_v44 = vrot.slane %v4826_v55, 5  ;;  %v16715_v12 = vld [vmem:[#allocation2 + $0x9c] sm:$0xe]  ;;  %v4864_v9 = vshll.u32 %v16674_v60, 16  ;;  %v20392_v61 = vcombine.low %v20390_v56, %v20391_v59  ;;  %v20393_v51 = vcombine.low %v16343_v34, %v16370_v62 }
 0x19a   : > { %20386 = vst [vmem:[#allocation69_spill] sm:$0xff] %v16705_v48  ;;  %v4868_v0 = vshrl.u32 %v16674_v60, 16  ;;  %v16719_v22 = vpop.f32.mrf.mxu1  ;;  %v16724_v55 = vpop.f32.mrf.mxu0  ;;  %v4837_v48 = vor.u32 %v4836_v49, %v4833_v18  ;;  %v4857_v43 = vrot.slane %v4855_v50, 4  ;;  %v20395_v56 = vcombine.low %v16444_v41, %v16451_v16  ;;  %v20396_v59 = vld [vmem:[#allocation49_spill] sm:$0xff] }
 0x19b   : > { %20387 = vst [vmem:[#allocation70_spill] sm:$0xff] %v16709_v44  ;;  %20389 = vst [vmem:[#allocation72_spill] sm:$0xff] %v16719_v22  ;;  %13563 = vmatmul.mubr.bf16.gmra.mxu1 %v20392_v61  ;;  %13679 = vmatmul.mubr.bf16.vlgmr.msra.gmra.mxu0 %v20393_v51  ;;  %v20168_v44 = vrot.slane %v16598_v37, 5  ;;  %v4557_v22 = vld [vmem:[#allocation2 + $0xb4] sm:$0xf]  ;;  %v20397_v61 = vrot.slane %v20396_v59, 5  ;;  %v4847_v62 = vor.u32 %v4846_v25, %v16703_v6 }
 0x19c   : > { %13630 = vmatprep.mubr.bf16.mxu1 %v20394_v7  ;;  %13682 = vmatprep.mubr.bf16.mxu0 %v20395_v56  ;;  %v4860_v40 = vrot.slane %v4858_v47, 5  ;;  %v4874_v58 = vshll.u32 %v16711_v21, 16  ;;  %v16747_v18 = vld [vmem:[#allocation2 + $0xb8] sm:$0xf]  ;;  %v16749_v50 = vpop.f32.mrf.mxu1  ;;  %v16751_v7 = vpop.f32.mrf.mxu0  ;;  %v20399_v16 = vrot.slane %v16379_v42, 5  ;;  %v20400_v41 = vrot.slane %v16464_v15, 9 }
 0x19d   : > { %v16743_v34 = vsel %vm15120_vm13, %v16524_v63, %v20397_v61  ;;  %20398 = vst [vmem:[#allocation24_spill] sm:$0xff] %v16749_v50  ;;  %v20401_v63 = vrot.slane %v16453_v31, 5  ;;  %v16768_v47 = vrot.slane %v4864_v9, 5  ;;  %v4870_v51 = vrot.slane %v4868_v0, 4  ;;  %v16770_v56 = vld [vmem:[#allocation2 + $0xa8] sm:$0xe] }
 0x19e   : > { %v16759_v49 = vsel %vm15120_vm13, %v20400_v41, %v20399_v16  ;;  %20403 = vst [vmem:[#allocation38_spill] sm:$0xff] %v16770_v56  ;;  %v16772_v59 = vrot.slane %v4813_v53, 4  ;;  %v16774_v42 = vrot.slane %v4823_v4, 4  ;;  %v20405_v15 = vrot.slane %v16562_v32, 5  ;;  %v16781_v16 = vpop.f32.mrf.mxu1  ;;  %v16783_v41 = vpop.f32.mrf.mxu0  ;;  %v4560_v53 = vld [vmem:[#allocation2 + $0xc0] sm:$0xf] }
 0x19f   : > { %v16766_v25 = vsel %vm15120_vm13, %v16573_v57, %v20401_v63  ;;  %20402 = vst [vmem:[#allocation33_spill] sm:$0xff] %v16768_v47  ;;  %20406 = vst [vmem:[#allocation73_spill] sm:$0xff] %v16781_v16  ;;  %v16785_v57 = vrot.slane %v4837_v48, 4  ;;  %v16787_v9 = vrot.slane %v4850_v26, 5  ;;  %v16791_v4 = vrot.slane %v4847_v62, 4  ;;  %v20418_v6 = vld [vmem:[#allocation57_spill] sm:$0xff] }
 0x1a0   : > { %20404 = vst [vmem:[#allocation49_spill] sm:$0xff] %v16774_v42  ;;  %v16778_v61 = vrot.slane %v20405_v15, 4  ;;  %v16795_v63 = vrot.slane %v20168_v44, 4  ;;  %v4879_v15 = vshrl.u32 %v4557_v22, 16  ;;  %v4882_v31 = vshll.u32 %v4557_v22, 16  ;;  %v16797_v50 = vpop.f32.mrf.mxu1  ;;  %v16799_v16 = vpop.f32.mrf.mxu0 }
 0x1a1   : > { %20407 = vst [vmem:[#allocation74_spill] sm:$0xff] %v16785_v57  ;;  %20408 = vst [vmem:[#allocation75_spill] sm:$0xff] %v16787_v9  ;;  %v4861_v48 = vor.u32 %v4860_v40, %v4857_v43  ;;  %v4871_v26 = vor.u32 %v4870_v51, %v16768_v47  ;;  %v16802_v9 = vrot.slane %v4874_v58, 5  ;;  %v4888_v0 = vshll.u32 %v16747_v18, 16  ;;  %v16815_v43 = vld [vmem:[#allocation2 + $0xbc] sm:$0x1] }
 0x1a2   : > { %20409 = vst [vmem:[#allocation76_spill] sm:$0xff] %v16791_v4  ;;  %20410 = vst [vmem:[#allocation77_spill] sm:$0xff] %v16797_v50  ;;  %v20412_v62 = vsel %vm14685_vm6, %v16462_v36, %v16407_v10  ;;  %v4892_v40 = vshrl.u32 %v16747_v18, 16  ;;  %v16818_v58 = vld [vmem:[#allocation2 + $0xc4] sm:$0xf]  ;;  %v13344_v51 = vpop.f32.mrf.mxu1  ;;  %v16821_v47 = vpop.f32.mrf.mxu0  ;;  %v20414_v10 = vcombine.low %v16496_v46, %v16508_v13  ;;  %v20419_v46 = vcombine.low %v16559_v8, %v16609_v27  ;;  %v20423_v8 = vld [vmem:[#allocation37_spill] sm:$0xff] }
 0x1a3   : > { %20411 = vst [vmem:[#allocation78_spill] sm:$0xff] %v16802_v9  ;;  %v16810_v44 = vcombine.low %v20412_v62, %v4733_v35  ;;  %v20413_v9 = vld [vmem:[#allocation50_spill] sm:$0xff]  ;;  %v20416_v62 = vld [vmem:[#allocation59_spill] sm:$0xff]  ;;  %v4884_v35 = vrot.slane %v4882_v31, 5  ;;  %v16845_v50 = vrot.slane %v4861_v48, 4  ;;  %v16847_v22 = vrot.slane %v4871_v26, 4 }
 0x1a4   : > { %13631 = vmatmul.mubr.bf16.vlgmr.msra.gmra.mxu1 %v20413_v9  ;;  %13683 = vmatmul.mubr.bf16.gmra.mxu0 %v20414_v10  ;;  %v20415_v36 = vld [vmem:[#allocation58_spill] sm:$0xff]  ;;  %v4881_v10 = vrot.slane %v4879_v15, 4  ;;  %v2313_v56 = vpop.f32.mrf.mxu1  ;;  %v16843_v42 = vpop.f32.mrf.mxu0  ;;  %v16849_v9 = vrot.slane %v4888_v0, 5  ;;  %v4906_v15 = vshll.u32 %v4560_v53, 16  ;;  %v20424_v0 = vrot.slane %v16420_v5, 5 }
 0x1a5   : > { %v20417_v4 = vld [vmem:[#allocation34_spill] sm:$0xff]  ;;  %13634 = vmatprep.mubr.bf16.mxu1 %v20418_v6  ;;  %13686 = vmatprep.mubr.bf16.mxu0 %v20419_v46  ;;  %20420 = vst [vmem:[#allocation50_spill] sm:$0xff] %v16845_v50  ;;  %20421 = vst [vmem:[#allocation58_spill] sm:$0xff] %v16847_v22  ;;  %v2314_v27 = vadd.f32 %v2313_v56, %v20423_v8  ;;  %v16855_v46 = vld [vmem:[#allocation2 + $0xb4] sm:$0xe]  ;;  %v20425_v26 = vrot.slane %v16532_v19, 9 }
 0x1a6   : > { %v2322_v57 = vadd.f32 %v13344_v51, %v20417_v4  ;;  %v4903_v4 = vshrl.u32 %v4560_v53, 16  ;;  %v4894_v51 = vrot.slane %v4892_v40, 4  ;;  %v13345_v31 = vpop.f32.mrf.mxu1  ;;  %v16857_v13 = vpop.f32.mrf.mxu0  ;;  %v4898_v56 = vshll.u32 %v16815_v43, 16  ;;  %v20427_v40 = vld [vmem:[#allocation40_spill] sm:$0xff]  ;;  %v16884_v48 = vld [vmem:[#allocation2 + $0xc8] sm:$0x1] }
 0x1a7   : > { %v16874_v53 = vadd.f32 %v16751_v7, %v2314_v27  ;;  %v2325_v8 = vadd.f32 %v13345_v31, %v20427_v40  ;;  %v4885_v19 = vor.u32 %v4884_v35, %v4881_v10  ;;  %v4908_v7 = vrot.slane %v4906_v15, 5  ;;  %v16890_v31 = vld [vmem:[#allocation2 + $0xc0] sm:$0xe]  ;;  %v20430_v40 = vld [vmem:[#allocation43_spill] sm:$0xff]  ;;  %v20434_v22 = vld [vmem:[#allocation45_spill] sm:$0xff] }
 0x1a8   : > { %v16852_v6 = vadd.f32 %v16724_v55, %v2322_v57  ;;  %v16869_v55 = vsel %vm15120_vm13, %v20425_v26, %v20424_v0  ;;  %v4912_v57 = vshll.u32 %v16818_v58, 16  ;;  %v2316_v0 = vpop.f32.mrf.mxu1  ;;  %v16886_v26 = vpop.f32.mrf.mxu0  ;;  %v4905_v50 = vrot.slane %v4903_v4, 4 }
 0x1a9   : > { %20426 = vst [vmem:[#allocation34_spill] sm:$0xff] %v16874_v53  ;;  %v4916_v27 = vshrl.u32 %v16818_v58, 16  ;;  %v20431_v35 = vrot.slane %v16674_v60, 5  ;;  %v4563_v53 = vld [vmem:[#allocation2 + $0xcc] sm:$0xf]  ;;  %v20432_v15 = vcombine.low %v16629_v30, %v16636_v54  ;;  %v20435_v30 = vcombine.low %v16700_v24, %v16743_v34  ;;  %v20440_v34 = vld [vmem:[#allocation48_spill] sm:$0xff] }
 0x1aa   : > { %20422 = vst [vmem:[#allocation59_spill] sm:$0xff] %v16852_v6  ;;  %v20428_v6 = vrot.slane %v16481_v52, 5  ;;  %v16893_v52 = vadd.f32 %v16783_v41, %v2325_v8  ;;  %v13348_v21 = vpop.f32.mrf.mxu1  ;;  %v16902_v4 = vpop.f32.mrf.mxu0  ;;  %v16907_v41 = vrot.slane %v4898_v56, 5  ;;  %v16922_v54 = vrot.slane %v4885_v19, 4  ;;  %v20437_v8 = vld [vmem:[#allocation12_spill] sm:$0xff] }
 0x1ab   : > { %v16898_v10 = vrot.slane %v20431_v35, 4  ;;  %v16912_v35 = vld [vmem:[#allocation2 + $0xd0] sm:$0xf] }
 0x1ac   : > { %v16882_v5 = vsel %vm15120_vm13, %v16588_v20, %v20428_v6  ;;  %20429 = vst [vmem:[#allocation57_spill] sm:$0xff] %v16893_v52  ;;  %v2317_v20 = vadd.f32 %v2316_v0, %v20430_v40  ;;  %v4895_v6 = vor.u32 %v4894_v51, %v16849_v9  ;;  %13635 = vmatmul.mubr.bf16.gmra.mxu1 %v16537_v3  ;;  %v16910_v0 = vrot.slane %v4912_v57, 5  ;;  %v2329_v57 = vpop.f32.mrf.mxu1 }
 0x1ad   : > { %13687 = vmatmul.mubr.bf16.gmra.mxu0 %v20432_v15  ;;  %v4918_v40 = vrot.slane %v4916_v27, 4  ;;  %v2338_v3 = vadd.f32 %v13348_v21, %v20434_v22  ;;  %13638 = vmatprep.mubr.bf16.mxu1 %v16667_v17  ;;  %v2798_v15 = vpop.f32.mrf.mxu0  ;;  %v20436_v27 = vld [vmem:[#allocation19_spill] sm:$0xff]  ;;  %v4909_v17 = vor.u32 %v4908_v7, %v4905_v50  ;;  %v4922_v22 = vshll.u32 %v16884_v48, 16 }
 0x1ae   : > { %v16915_v51 = vadd.f32 %v16799_v16, %v2317_v20  ;;  %13690 = vmatprep.mubr.bf16.mxu0 %v20435_v30  ;;  %v4781_v16 = vsel %vm14685_vm6, %v20437_v8, %v20436_v27  ;;  %v20438_v20 = vrot.slane %v16747_v18, 5  ;;  %v2330_v19 = vadd.f32 %v2329_v57, %v20440_v34  ;;  %v16950_v34 = vld [vmem:[#allocation2 + $0xcc] sm:$0xe] }
 0x1af   : > { %v16935_v24 = vadd.f32 %v16821_v47, %v2338_v3  ;;  %v16938_v30 = vrot.slane %v4895_v6, 4  ;;  %v13401_v52 = vpop.f32.mrf.mxu0  ;;  %v12144_v8 = vcombine.low %v16869_v55, %v16882_v5  ;;  %v4919_v27 = vor.u32 %v4918_v40, %v16910_v0  ;;  %v20443_v47 = vld [vmem:[#allocation52_spill] sm:$0xff] }
 0x1b0   : > { %20433 = vst [vmem:[#allocation37_spill] sm:$0xff] %v16915_v51  ;;  %v16931_v21 = vrot.slane %v20438_v20, 4  ;;  %v13349_v51 = vpop.f32.mrf.mxu1  ;;  %v4927_v7 = vshrl.u32 %v4563_v53, 16  ;;  %v16946_v20 = vadd.f32 %v16843_v42, %v2330_v19  ;;  %v4930_v57 = vshll.u32 %v4563_v53, 16  ;;  %v20445_v19 = vld [vmem:[#allocation54_spill] sm:$0xff] }
 0x1b1   : > { %20439 = vst [vmem:[#allocation40_spill] sm:$0xff] %v16935_v24  ;;  %20441 = vst [vmem:[#allocation43_spill] sm:$0xff] %v16938_v30  ;;  %v2341_v3 = vadd.f32 %v13349_v51, %v20443_v47  ;;  %v4936_v6 = vshll.u32 %v16912_v35, 16  ;;  %v2801_v24 = vpop.f32.mrf.mxu0  ;;  %v16952_v30 = vrot.slane %v4909_v17, 4  ;;  %v16954_v55 = vrot.slane %v4922_v22, 5  ;;  %v20449_v22 = vld [vmem:[#allocation65_spill] sm:$0xff] }
 0x1b2   : > { %20442 = vst [vmem:[#allocation45_spill] sm:$0xff] %v16946_v20  ;;  %v2332_v56 = vpop.f32.mrf.mxu1  ;;  %v4940_v40 = vshrl.u32 %v16912_v35, 16  ;;  %v20446_v53 = vrot.slane %v16510_v39, 5  ;;  %v20447_v47 = vrot.slane %v16582_v2, 9  ;;  %v20448_v17 = vrot.slane %v16516_v28, 5 }
 0x1b3   : > { %20444 = vst [vmem:[#allocation19_spill] sm:$0xff] %v16954_v55  ;;  %v16959_v42 = vadd.f32 %v16857_v13, %v2341_v3  ;;  %v2333_v51 = vadd.f32 %v2332_v56, %v20445_v19  ;;  %v20450_v55 = vld [vmem:[#allocation35_spill] sm:$0xff]  ;;  %v13404_v13 = vpop.f32.mrf.mxu0  ;;  %v20451_v56 = vcombine.low %v16759_v49, %v16766_v25  ;;  %v16977_v39 = vrot.slane %v4919_v27, 4  ;;  %v16991_v49 = vld [vmem:[#allocation2 + $0xd4] sm:$0x1] }
 0x1b4   : > { %v5402_v50 = vsel %vm15120_vm13, %v20447_v47, %v20446_v53  ;;  %v5405_v5 = vsel %vm15120_vm13, %v20449_v22, %v20448_v17  ;;  %v13352_v20 = vpop.f32.mrf.mxu1  ;;  %13639 = vmatmul.mubr.bf16.gmra.mxu1 %v20450_v55  ;;  %v20452_v2 = vrot.slane %v16818_v58, 5  ;;  %v16983_v19 = vrot.slane %v4927_v7, 4  ;;  %v20453_v47 = vld [vmem:[#allocation56_spill] sm:$0xff] }
 0x1b5   : > { %13691 = vmatmul.mubr.bf16.gmra.mxu0 %v20451_v56  ;;  %v5443_v28 = vrot.slane %v16912_v35, 5  ;;  %v16987_v53 = vadd.f32 %v16886_v26, %v2333_v51  ;;  %v2354_v55 = vadd.f32 %v13352_v20, %v20453_v47  ;;  %13642 = vmatprep.mubr.bf16.mxu1 %v16810_v44  ;;  %v16993_v25 = vrot.slane %v4930_v57, 5  ;;  %v2814_v22 = vpop.f32.mrf.mxu0  ;;  %v20455_v56 = vld [vmem:[#allocation64_spill] sm:$0xff]  ;;  %v20458_v51 = vld [vmem:[#allocation41_spill] sm:$0xff] }
 0x1b6   : > { %v16981_v3 = vrot.slane %v20452_v2, 4  ;;  %13694 = vmatprep.mubr.bf16.mxu0 %v12144_v8  ;;  %v16995_v27 = vrot.slane %v4936_v6, 5  ;;  %v2345_v17 = vpop.f32.mrf.mxu1  ;;  %v20454_v7 = vrot.slane %v16562_v32, 5  ;;  %v20456_v2 = vrot.slane %v20455_v56, 9  ;;  %v20467_v57 = vld [vmem:[#allocation36_spill] sm:$0xff] }
 0x1b7   : > { %v20457_v20 = vrot.slane %v16611_v38, 5  ;;  %v17008_v8 = vrot.slane %v4940_v40, 4  ;;  %v17012_v6 = vadd.f32 %v16902_v4, %v2354_v55  ;;  %v2346_v32 = vadd.f32 %v2345_v17, %v20458_v51  ;;  %v13405_v40 = vpop.f32.mrf.mxu0 }
 0x1b8   : > { %v5409_v26 = vsel %vm15120_vm13, %v20456_v2, %v20454_v7  ;;  %v13353_v47 = vpop.f32.mrf.mxu1  ;;  %v20459_v7 = vsel %vm14685_vm6, %v16569_v1, %v20416_v62  ;;  %v20460_v38 = vsel %vm14685_vm6, %v16567_v14, %v20415_v36  ;;  %v12145_v56 = vcombine.low %v5402_v50, %v5405_v5  ;;  %v20461_v2 = vld [vmem:[#allocation20_spill] sm:$0xff]  ;;  %v20463_v5 = vld [vmem:[#allocation62_spill] sm:$0xff] }
 0x1b9   : > { %v5412_v44 = vsel %vm15120_vm13, %v16778_v61, %v20457_v20  ;;  %v12087_v61 = vcombine.low %v20460_v38, %v20459_v7  ;;  %v17027_v4 = vrot.slane %v5443_v28, 4  ;;  %v17030_v17 = vadd.f32 %v2798_v15, %v2346_v32  ;;  %v2817_v51 = vpop.f32.mrf.mxu0  ;;  %v20464_v15 = vld [vmem:[#allocation60_spill] sm:$0xff]  ;;  %v20465_v32 = vld [vmem:[#allocation21_spill] sm:$0xff] }
 0x1ba   : > { %v2357_v20 = vadd.f32 %v13353_v47, %v20461_v2  ;;  %v20462_v1 = vsel %vm14685_vm6, %v16576_v11, %v16514_v23  ;;  %v12146_v14 = vcombine.low %v5409_v26, %v5412_v44  ;;  %v2348_v36 = vpop.f32.mrf.mxu1  ;;  %v4795_v47 = vsel %vm14685_vm6, %v20465_v32, %v20464_v15  ;;  %v20466_v2 = vld [vmem:[#allocation63_spill] sm:$0xff] }
 0x1bb   : > { %v12088_v62 = vcombine.low %v20462_v1, %v4781_v16  ;;  %v2349_v7 = vadd.f32 %v2348_v36, %v20463_v5  ;;  %v13408_v55 = vpop.f32.mrf.mxu0  ;;  %v4805_v23 = vsel %vm14685_vm6, %v20467_v57, %v20466_v2  ;;  %v20468_v11 = vrot.slane %v16598_v37, 5  ;;  %v20470_v44 = vld [vmem:[#allocation23_spill] sm:$0xff]  ;;  %v20473_v36 = vld [vmem:[#allocation70_spill] sm:$0xff] }
 0x1bc   : > { %v17038_v50 = vadd.f32 %v13401_v52, %v2357_v20  ;;  %v13356_v38 = vpop.f32.mrf.mxu1  ;;  %13643 = vmatmul.mubr.bf16.gmra.mxu1 %v12087_v61  ;;  %v20469_v52 = vrot.slane %v16715_v12, 9  ;;  %v20471_v20 = vrot.slane %v16672_v33, 5  ;;  %v20472_v37 = vld [vmem:[#allocation27_spill] sm:$0xff] }
 0x1bd   : > { %13695 = vmatmul.mubr.bf16.gmra.mxu0 %v12145_v56  ;;  %v17055_v26 = vadd.f32 %v2801_v24, %v2349_v7  ;;  %v2370_v61 = vadd.f32 %v13356_v38, %v20470_v44  ;;  %13646 = vmatprep.mubr.bf16.mxu1 %v12088_v62  ;;  %v2830_v1 = vpop.f32.mrf.mxu0  ;;  %v4819_v12 = vsel %vm14685_vm6, %v16772_v59, %v20472_v37  ;;  %v20474_v24 = vld [vmem:[#allocation49_spill] sm:$0xff]  ;;  %v20475_v62 = vrot.slane %v16674_v60, 5  ;;  %v20480_v59 = vld [vmem:[#allocation32_spill] sm:$0xff]  ;;  %v20481_v37 = vld [vmem:[#allocation67_spill] sm:$0xff] }
 0x1be   : > { %v5416_v16 = vsel %vm15120_vm13, %v20469_v52, %v20468_v11  ;;  %13698 = vmatprep.mubr.bf16.mxu0 %v12146_v14  ;;  %v5419_v57 = vsel %vm15120_vm13, %v16795_v63, %v20471_v20  ;;  %v2361_v56 = vpop.f32.mrf.mxu1  ;;  %v4829_v5 = vsel %vm14685_vm6, %v20474_v24, %v20473_v36  ;;  %v20476_v14 = vld [vmem:[#allocation38_spill] sm:$0xff]  ;;  %v20478_v63 = vld [vmem:[#allocation71_spill] sm:$0xff]  ;;  %v12089_v52 = vcombine.low %v4795_v47, %v4805_v23 }
 0x1bf   : > { %v20477_v33 = vrot.slane %v20476_v14, 9  ;;  %v20479_v38 = vrot.slane %v20478_v63, 5  ;;  %v17082_v32 = vadd.f32 %v13404_v13, %v2370_v61  ;;  %v2362_v2 = vadd.f32 %v2361_v56, %v20480_v59  ;;  %v13409_v44 = vpop.f32.mrf.mxu0  ;;  %v20484_v47 = vld [vmem:[#allocation74_spill] sm:$0xff]  ;;  %v20485_v23 = vld [vmem:[#allocation75_spill] sm:$0xff] }
 0x1c0   : > { %v13357_v11 = vpop.f32.mrf.mxu1  ;;  %v12147_v20 = vcombine.low %v5416_v16, %v5419_v57  ;;  %v12090_v24 = vcombine.low %v4819_v12, %v4829_v5  ;;  %v20486_v16 = vld [vmem:[#allocation76_spill] sm:$0xff]  ;;  %v20487_v12 = vrot.slane %v16747_v18, 5  ;;  %v20491_v18 = vld [vmem:[#allocation33_spill] sm:$0xff] }
 0x1c1   : > { %v5423_v7 = vsel %vm15120_vm13, %v20477_v33, %v20475_v62  ;;  %v5426_v15 = vsel %vm15120_vm13, %v16898_v10, %v20479_v38  ;;  %v17085_v60 = vadd.f32 %v2814_v22, %v2362_v2  ;;  %v2373_v36 = vadd.f32 %v13357_v11, %v20481_v37  ;;  %v17088_v33 = vpop.f32.mrf.mxu0  ;;  %v20482_v10 = vld [vmem:[#allocation69_spill] sm:$0xff]  ;;  %v20483_v38 = vld [vmem:[#allocation68_spill] sm:$0xff]  ;;  %v20492_v37 = vld [vmem:[#allocation50_spill] sm:$0xff] }
 0x1c2   : > { %v12148_v62 = vcombine.low %v5423_v7, %v5426_v15  ;;  %v2364_v14 = vpop.f32.mrf.mxu1  ;;  %v4843_v22 = vsel %vm14685_vm6, %v20484_v47, %v20483_v38  ;;  %v4853_v57 = vsel %vm14685_vm6, %v20486_v16, %v20485_v23  ;;  %v20489_v15 = vld [vmem:[#allocation39_spill] sm:$0xff]  ;;  %v20490_v2 = vrot.slane %v16815_v43, 5 }
 0x1c3   : > { %v17090_v63 = vadd.f32 %v13405_v40, %v2373_v36  ;;  %v2365_v13 = vadd.f32 %v2364_v14, %v20482_v10  ;;  %v13412_v56 = vpop.f32.mrf.mxu0  ;;  %v20488_v40 = vrot.slane %v16855_v46, 9  ;;  %v4867_v46 = vsel %vm14685_vm6, %v20492_v37, %v20491_v18  ;;  %v20493_v36 = vld [vmem:[#allocation78_spill] sm:$0xff] }
 0x1c4   : > { %v13360_v61 = vpop.f32.mrf.mxu1  ;;  %13647 = vmatmul.mubr.bf16.gmra.mxu1 %v12089_v52  ;;  %v5433_v11 = vsel %vm15120_vm13, %v16931_v21, %v20490_v2  ;;  %v20496_v43 = vrot.slane %v16890_v31, 9  ;;  %v20497_v21 = vrot.slane %v16884_v48, 5  ;;  %v12091_v23 = vcombine.low %v4843_v22, %v4853_v57  ;;  %v20499_v31 = vld [vmem:[#allocation44_spill] sm:$0xff] }
 0x1c5   : > { %13699 = vmatmul.mubr.bf16.gmra.mxu0 %v12147_v20  ;;  %v5430_v5 = vsel %vm15120_vm13, %v20488_v40, %v20487_v12  ;;  %v17107_v7 = vadd.f32 %v2817_v51, %v2365_v13  ;;  %v2386_v59 = vadd.f32 %v13360_v61, %v20489_v15  ;;  %13650 = vmatprep.mubr.bf16.mxu1 %v12090_v24  ;;  %v2846_v20 = vpop.f32.mrf.mxu0  ;;  %v20494_v51 = vld [vmem:[#allocation58_spill] sm:$0xff]  ;;  %v20495_v24 = vrot.slane %v16818_v58, 5 }
 0x1c6   : > { %13702 = vmatprep.mubr.bf16.mxu0 %v12148_v62  ;;  %v2377_v52 = vpop.f32.mrf.mxu1  ;;  %v4877_v14 = vsel %vm14685_vm6, %v20494_v51, %v20493_v36  ;;  %v5440_v10 = vsel %vm15120_vm13, %v16981_v3, %v20497_v21  ;;  %v20498_v61 = vld [vmem:[#allocation42_spill] sm:$0xff]  ;;  %v12149_v12 = vcombine.low %v5430_v5, %v5433_v11  ;;  %v4891_v3 = vsel %vm14685_vm6, %v16922_v54, %v16849_v9  ;;  %v20502_v11 = vld [vmem:[#allocation51_spill] sm:$0xff]  ;;  %v20505_v36 = vld [vmem:[#allocation53_spill] sm:$0xff] }
 0x1c7   : > { %v5437_v62 = vsel %vm15120_vm13, %v20496_v43, %v20495_v24  ;;  %v17134_v13 = vadd.f32 %v13408_v55, %v2386_v59  ;;  %v2378_v38 = vadd.f32 %v2377_v52, %v20498_v61  ;;  %v13413_v16 = vpop.f32.mrf.mxu0  ;;  %v12092_v15 = vcombine.low %v4867_v46, %v4877_v14  ;;  %v20500_v55 = vld [vmem:[#allocation43_spill] sm:$0xff] }
 0x1c8   : > { %v13361_v47 = vpop.f32.mrf.mxu1  ;;  %v12150_v2 = vcombine.low %v5437_v62, %v5440_v10  ;;  %v4915_v22 = vsel %vm14685_vm6, %v16952_v30, %v16910_v0  ;;  %v4933_v9 = vor.u32 %v16993_v25, %v16983_v19  ;;  %v4946_v54 = vshll.u32 %v16991_v49, 16 }
 0x1c9   : > { %v17137_v58 = vadd.f32 %v2830_v1, %v2378_v38  ;;  %v2389_v40 = vadd.f32 %v13361_v47, %v20499_v31  ;;  %v17142_v48 = vpop.f32.mrf.mxu0  ;;  %v4901_v1 = vsel %vm14685_vm6, %v20500_v55, %v16907_v41  ;;  %v4943_v41 = vor.u32 %v17008_v8, %v16995_v27  ;;  %v20507_v31 = vld [vmem:[#allocation8_spill] sm:$0xff] }
 0x1ca   : > { %v17140_v18 = vpop.f32.mrf.mxu1  ;;  %v20503_v0 = vrot.slane %v16950_v34, 9  ;;  %v12093_v24 = vcombine.low %v4891_v3, %v4901_v1  ;;  %v4948_v34 = vrot.slane %v4946_v54, 5  ;;  %v4934_v10 = vrot.slane %v4933_v9, 4  ;;  %v20508_v1 = vld [vmem:[#allocation61_spill] sm:$0xff] }
 0x1cb   : > { %v17144_v37 = vadd.f32 %v13409_v44, %v2389_v40  ;;  %v13416_v5 = vpop.f32.mrf.mxu0  ;;  %v20501_v44 = vld [vmem:[#allocation19_spill] sm:$0xff]  ;;  %v4944_v61 = vrot.slane %v4943_v41, 4  ;;  %v20509_v41 = vld [vmem:[#allocation46_spill] sm:$0xff] }
 0x1cc   : > { %v13364_v57 = vpop.f32.mrf.mxu1  ;;  %13651 = vmatmul.mubr.bf16.gmra.mxu1 %v12091_v23  ;;  %v4925_v59 = vsel %vm14685_vm6, %v16977_v39, %v20501_v44  ;;  %v5444_v30 = vsel %vm15120_vm13, %v20503_v0, %v5443_v28  ;;  %v20504_v39 = vrot.slane %v16991_v49, 5  ;;  %v20506_v28 = vld [vmem:[#allocation55_spill] sm:$0xff]  ;;  %v14323_v0 = vld [vmem:[%s20107_s3 + $0x30] sm:$0xff]  }
 0x1cd   : > { %13703 = vmatmul.mubr.bf16.gmra.mxu0 %v12149_v12  ;;  %v2402_v52 = vadd.f32 %v13364_v57, %v20502_v11  ;;  %13654 = vmatprep.mubr.bf16.mxu1 %v12092_v15  ;;  %v2862_v8 = vpop.f32.mrf.mxu0  ;;  %v12094_v43 = vcombine.low %v4915_v22, %v4925_v59  ;;  %v4939_v15 = vsel %vm14685_vm6, %v4934_v10, %v16995_v27  ;;  %v14322_v27 = vld [vmem:[%s20107_s3 + $0x70] sm:$0xff]  }
 0x1ce   : > { %13706 = vmatprep.mubr.bf16.mxu0 %v12150_v2  ;;  %v5447_v19 = vsel %vm15120_vm13, %v17027_v4, %v20504_v39  ;;  %v2393_v25 = vpop.f32.mrf.mxu1  ;;  %v14320_v4 = vld [vmem:[%s20107_s3 + $0x78] sm:$0xff]  }
 0x1cf   : > { %v17179_v46 = vadd.f32 %v13412_v56, %v2402_v52  ;;  %v2394_v51 = vadd.f32 %v2393_v25, %v20505_v36  ;;  %v13417_v35 = vpop.f32.mrf.mxu0  ;;  %v12151_v62 = vcombine.low %v5444_v30, %v5447_v19  ;;  %13710 = vmatprep.subr.bf16.mxu1 %v14320_v4  ;;  %v20510_v19 = vld [vmem:[#allocation72_spill] sm:$0xff] }
 0x1d0   : > { %v13365_v14 = vpop.f32.mrf.mxu1  ;;  %13711 = vmatpush3.bf16.msra.mxu1 %v14320_v4 }
 0x1d1   : > { %v17182_v21 = vadd.f32 %v2846_v20, %v2394_v51  ;;  %v2405_v49 = vadd.f32 %v13365_v14, %v20506_v28  ;;  %v17190_v38 = vpop.f32.mrf.mxu0  ;;  %v14321_v20 = vld [vmem:[%s20107_s3 + $0x38] sm:$0xff]   ;;  %13712 = vmatprep.subr.bf16.mxu1 %v14322_v27  ;;  %v20511_v14 = vld [vmem:[#allocation24_spill] sm:$0xff] }
 0x1d2   : > { %v17188_v56 = vpop.f32.mrf.mxu1  ;;  %13758 = vmatprep.subr.bf16.mxu0 %v14321_v20 }
 0x1d3   : > { %v17192_v47 = vadd.f32 %v13413_v16, %v2405_v49  ;;  %v13420_v12 = vpop.f32.mrf.mxu0  ;;  %v4949_v16 = vsel %vm14685_vm6, %v4944_v61, %v4948_v34  ;;  %13759 = vmatpush3.bf16.msra.mxu0 %v14321_v20  ;;  %v14324_v49 = vld [vmem:[%s20107_s3 + $0x68] sm:$0xff]  }
 0x1d4   : > { %v13368_v23 = vpop.f32.mrf.mxu1  ;;  %13655 = vmatmul.mubr.bf16.gmra.mxu1 %v12093_v24  ;;  %v12095_v44 = vcombine.low %v4939_v15, %v4949_v16  ;;  %13760 = vmatprep.subr.bf16.mxu0 %v14323_v0  ;;  %v14325_v20 = vld [vmem:[%s20107_s3 + $0x28] sm:$0xff]  }
 0x1d5   : > { %13707 = vmatmul.mubr.bf16.gmra.mxu0 %v12151_v62  ;;  %v2418_v40 = vadd.f32 %v13368_v23, %v20507_v31  ;;  %13658 = vmatprep.mubr.bf16.mxu1 %v12094_v43  ;;  %v2878_v3 = vpop.f32.mrf.mxu0  ;;  %v20512_v62 = vld [vmem:[#allocation73_spill] sm:$0xff]  ;;  %v20513_v31 = vld [vmem:[#allocation59_spill] sm:$0xff] }
 0x1d6   : > { %v2409_v2 = vpop.f32.mrf.mxu1  ;;  %13713 = vmatpush3.bf16.msra.mxu1 %v14322_v27 }
 0x1d7   : > { %v17203_v55 = vadd.f32 %v13416_v5, %v2418_v40  ;;  %v2410_v22 = vadd.f32 %v2409_v2, %v20508_v1  ;;  %v13421_v59 = vpop.f32.mrf.mxu0  ;;  %13761 = vmatpush3.bf16.msra.mxu0 %v14323_v0  ;;  %13714 = vmatprep.subr.bf16.mxu1 %v14324_v49 }
 0x1d8   : > { %v13369_v57 = vpop.f32.mrf.mxu1  ;;  %13762 = vmatprep.subr.bf16.mxu0 %v14325_v20 }
 0x1d9   : > { %v17206_v9 = vadd.f32 %v2862_v8, %v2410_v22  ;;  %v2421_v54 = vadd.f32 %v13369_v57, %v20509_v41  ;;  %v17214_v52 = vpop.f32.mrf.mxu0 }
 0x1da   : > { %v17212_v11 = vpop.f32.mrf.mxu1  ;;  %13715 = vmatpush3.bf16.msra.mxu1 %v14324_v49 }
 0x1db   : > { %v17216_v5 = vadd.f32 %v13417_v35, %v2421_v54  ;;  %v13488_v39 = vpop.f32.mrf.mxu0  ;;  %13763 = vmatpush3.bf16.msra.mxu0 %v14325_v20 }
 0x1dc   : > { %v13372_v30 = vpop.f32.mrf.mxu1  ;;  %13659 = vmatmul.mubr.bf16.gmra.mxu1 %v12095_v44 }
 0x1dd   : > { %v2434_v25 = vadd.f32 %v13372_v30, %v20510_v19  ;;  %v3474_v36 = vpop.f32.mrf.mxu0 }
 0x1de   : > { %v2425_v8 = vpop.f32.mrf.mxu1 }
 0x1df   : > { %v17222_v51 = vadd.f32 %v13420_v12, %v2434_v25  ;;  %v2426_v24 = vadd.f32 %v2425_v8, %v20511_v14  ;;  %v13489_v43 = vpop.f32.mrf.mxu0  ;;  %v20517_v25 = vld [vmem:[#allocation40_spill] sm:$0xff] }
 0x1e0   : > { %v13373_v35 = vpop.f32.mrf.mxu1 }
 0x1e1   : > { %v17225_v34 = vadd.f32 %v2878_v3, %v2426_v24  ;;  %v2437_v28 = vadd.f32 %v13373_v35, %v20512_v62  ;;  %v17233_v61 = vpop.f32.mrf.mxu0  ;;  %v20514_v3 = vld [vmem:[#allocation34_spill] sm:$0xff]  ;;  %v20519_v35 = vld [vmem:[#allocation45_spill] sm:$0xff] }
 0x1e2   : > { %v17231_v10 = vpop.f32.mrf.mxu1 }
 0x1e3   : > { %v17235_v4 = vadd.f32 %v13421_v59, %v2437_v28  ;;  %v13492_v12 = vpop.f32.mrf.mxu0  ;;  %v20515_v59 = vld [vmem:[#allocation57_spill] sm:$0xff] }
 0x1e4   : > { %v13440_v23 = vpop.f32.mrf.mxu1 }
 0x1e5   : > { %v3281_v40 = vadd.f32 %v13440_v23, %v20513_v31  ;;  %v3490_v16 = vpop.f32.mrf.mxu0 }
 0x1e6   : > { %v3152_v15 = vpop.f32.mrf.mxu1 }
 0x1e7   : > { %v17241_v2 = vadd.f32 %v13488_v39, %v3281_v40  ;;  %v3279_v1 = vadd.f32 %v3152_v15, %v20514_v3  ;;  %v13493_v57 = vpop.f32.mrf.mxu0 }
 0x1e8   : > { %v13441_v22 = vpop.f32.mrf.mxu1 }
 0x1e9   : > { %v17244_v44 = vadd.f32 %v3474_v36, %v3279_v1  ;;  %v3282_v41 = vadd.f32 %v13441_v22, %v20515_v59  ;;  %v17249_v27 = vpop.f32.mrf.mxu0 }
 0x1ea   : > { %v17247_v54 = vpop.f32.mrf.mxu1  ;;  %20516 = vst [vmem:[#allocation12_spill] sm:$0xff] %v17249_v27 }
 0x1eb   : > { %v17251_v0 = vadd.f32 %v13489_v43, %v3282_v41  ;;  %v13496_v19 = vpop.f32.mrf.mxu0  ;;  %v14327_v43 = vld [vmem:[%s20107_s3 + $0x20] sm:$0xff]  }
 0x1ec   : > { %v13444_v30 = vpop.f32.mrf.mxu1  ;;  %13764 = vmatprep.subr.bf16.mxu0 %v14327_v43 }
 0x1ed   : > { %v3285_v8 = vadd.f32 %v13444_v30, %v20517_v25  ;;  %v3506_v14 = vpop.f32.mrf.mxu0  ;;  %13765 = vmatpush3.bf16.msra.mxu0 %v14327_v43  ;;  %v14326_v30 = vld [vmem:[%s20107_s3 + $0x60] sm:$0xff]   ;;  %v14328_v43 = vld [vmem:[%s20107_s3 + $0x58] sm:$0xff]  }
 0x1ee   : > { %v3168_v39 = vpop.f32.mrf.mxu1  ;;  %13716 = vmatprep.subr.bf16.mxu1 %v14326_v30 }
 0x1ef   : > { %v17254_v24 = vadd.f32 %v13492_v12, %v3285_v8  ;;  %v3283_v62 = vadd.f32 %v3168_v39, %v20519_v35  ;;  %v13497_v28 = vpop.f32.mrf.mxu0  ;;  %13717 = vmatpush3.bf16.msra.mxu1 %v14326_v30 }
 0x1f0   : > { %v13445_v36 = vpop.f32.mrf.mxu1  ;;  %13718 = vmatprep.subr.bf16.mxu1 %v14328_v43 }
 0x1f1   : > { %20518 = vst [vmem:[#allocation48_spill] sm:$0xff] %v17254_v24  ;;  %v17257_v49 = vadd.f32 %v3490_v16, %v3283_v62  ;;  %v3286_v20 = vadd.f32 %v13445_v36, %v16959_v42  ;;  %v17265_v31 = vpop.f32.mrf.mxu0 }
 0x1f2   : > { %v17263_v23 = vpop.f32.mrf.mxu1  ;;  %20521 = vst [vmem:[#allocation54_spill] sm:$0xff] %v17265_v31 }
 0x1f3   : > { %20520 = vst [vmem:[#allocation52_spill] sm:$0xff] %v17257_v49  ;;  %v17267_v40 = vadd.f32 %v13493_v57, %v3286_v20  ;;  %v13500_v15 = vpop.f32.mrf.mxu0  ;;  %v14329_v57 = vld [vmem:[%s20107_s3 + $0x18] sm:$0xff]   ;;  %13719 = vmatpush3.bf16.msra.mxu1 %v14328_v43 }
 0x1f4   : > { %v13448_v12 = vpop.f32.mrf.mxu1  ;;  %13766 = vmatprep.subr.bf16.mxu0 %v14329_v57 }
 0x1f5   : > { %v3289_v3 = vadd.f32 %v13448_v12, %v17012_v6  ;;  %v3522_v1 = vpop.f32.mrf.mxu0  ;;  %13767 = vmatpush3.bf16.msra.mxu0 %v14329_v57 }
 0x1f6   : > { %v3184_v16 = vpop.f32.mrf.mxu1 }
 0x1f7   : > { %v17270_v22 = vadd.f32 %v13496_v19, %v3289_v3  ;;  %v3287_v42 = vadd.f32 %v3184_v16, %v17030_v17  ;;  %v13501_v41 = vpop.f32.mrf.mxu0 }
 0x1f8   : > { %v13449_v59 = vpop.f32.mrf.mxu1 }
 0x1f9   : > { %v17279_v25 = vadd.f32 %v3506_v14, %v3287_v42  ;;  %v3290_v6 = vadd.f32 %v13449_v59, %v17038_v50  ;;  %v17284_v19 = vpop.f32.mrf.mxu0 }
 0x1fa   : > { %v17282_v8 = vpop.f32.mrf.mxu1  ;;  %20522 = vst [vmem:[#allocation65_spill] sm:$0xff] %v17284_v19 }
 0x1fb   : > { %v17286_v17 = vadd.f32 %v13497_v28, %v3290_v6  ;;  %v13504_v35 = vpop.f32.mrf.mxu0  ;;  %v14331_v28 = vld [vmem:[%s20107_s3 + $0x10] sm:$0xff]  }
 0x1fc   : > { %v13452_v39 = vpop.f32.mrf.mxu1  ;;  %13768 = vmatprep.subr.bf16.mxu0 %v14331_v28 }
 0x1fd   : > { %v3293_v62 = vadd.f32 %v13452_v39, %v17082_v32  ;;  %v3538_v20 = vpop.f32.mrf.mxu0  ;;  %13769 = vmatpush3.bf16.msra.mxu0 %v14331_v28 }
 0x1fe   : > { %v3200_v36 = vpop.f32.mrf.mxu1 }
 0x1ff   : > { %v17289_v14 = vadd.f32 %v13500_v15, %v3293_v62  ;;  %v3291_v50 = vadd.f32 %v3200_v36, %v17085_v60  ;;  %v13505_v3 = vpop.f32.mrf.mxu0 }
 0x200   : > { %v13453_v12 = vpop.f32.mrf.mxu1 }
 0x201   : > { %v17298_v16 = vadd.f32 %v3522_v1, %v3291_v50  ;;  %v3294_v32 = vadd.f32 %v13453_v12, %v17090_v63  ;;  %v17303_v15 = vpop.f32.mrf.mxu0  ;;  %v14332_v50 = vld [vmem:[%s20107_s3 + $0x8] sm:$0xff]  }
 0x202   : > { %v17301_v42 = vpop.f32.mrf.mxu1  ;;  %20523 = vst [vmem:[#allocation35_spill] sm:$0xff] %v17303_v15  ;;  %13770 = vmatprep.subr.bf16.mxu0 %v14332_v50 }
 0x203   : > { %v17305_v60 = vadd.f32 %v13501_v41, %v3294_v32  ;;  %v13508_v30 = vpop.f32.mrf.mxu0  ;;  %13771 = vmatpush3.bf16.msra.mxu0 %v14332_v50 }
 0x204   : > { %v13456_v59 = vpop.f32.mrf.mxu1 }
 0x205   : > { %v3297_v57 = vadd.f32 %v13456_v59, %v17134_v13  ;;  %v3554_v39 = vpop.f32.mrf.mxu0  ;;  %v14330_v13 = vld [vmem:[%s20107_s3 + $0x50] sm:$0xff]  }
 0x206   : > { %v3216_v6 = vpop.f32.mrf.mxu1  ;;  %13720 = vmatprep.subr.bf16.mxu1 %v14330_v13 }
 0x207   : > { %v17308_v1 = vadd.f32 %v13504_v35, %v3297_v57  ;;  %v3295_v63 = vadd.f32 %v3216_v6, %v17137_v58  ;;  %v13509_v36 = vpop.f32.mrf.mxu0  ;;  %13721 = vmatpush3.bf16.msra.mxu1 %v14330_v13  ;;  %v6374_v13 = vld [vmem:[#allocation3] sm:$0xf] }
 0x208   : > { %v13457_v62 = vpop.f32.mrf.mxu1 }
 0x209   : > { %v17314_v43 = vadd.f32 %v3538_v20, %v3295_v63  ;;  %v3298_v41 = vadd.f32 %v13457_v62, %v17144_v37  ;;  %v17322_v35 = vpop.f32.mrf.mxu0  ;;  %v14334_v63 = vld [vmem:[%s20107_s3] sm:$0xff]  }
 0x20a   : > { %v17320_v12 = vpop.f32.mrf.mxu1  ;;  %20524 = vst [vmem:[#allocation56_spill] sm:$0xff] %v17322_v35  ;;  %13772 = vmatprep.subr.bf16.mxu0 %v14334_v63 }
 0x20b   : > { %v17324_v58 = vadd.f32 %v13505_v3, %v3298_v41  ;;  %v13512_v32 = vpop.f32.mrf.mxu0  ;;  %13773 = vmatpush3.bf16.msra.mxu0 %v14334_v63 }
 0x20c   : > { %v13460_v28 = vpop.f32.mrf.mxu1 }
 0x20d   : > { %v3301_v20 = vadd.f32 %v13460_v28, %v17179_v46  ;;  %v3570_v37 = vpop.f32.mrf.mxu0  ;;  %v14333_v46 = vld [vmem:[%s20107_s3 + $0x48] sm:$0xff]  }
 0x20e   : > { %v3232_v59 = vpop.f32.mrf.mxu1  ;;  %13722 = vmatprep.subr.bf16.mxu1 %v14333_v46 }
 0x20f   : > { %v17327_v57 = vadd.f32 %v13508_v30, %v3301_v20  ;;  %v3299_v6 = vadd.f32 %v3232_v59, %v17182_v21  ;;  %v13513_v3 = vpop.f32.mrf.mxu0  ;;  %v6375_v21 = vld [vmem:[#allocation3 + $0x4] sm:$0xf]  ;;  %13723 = vmatpush3.bf16.msra.mxu1 %v14333_v46 }
 0x210   : > { %v13461_v62 = vpop.f32.mrf.mxu1  ;;  %v12233_v59 = vcombine.low %v6374_v13, %v6375_v21  ;;  %v6448_v19 = vshll.u32 %v6375_v21, 16 }
 0x211   : > { %v17333_v41 = vadd.f32 %v3554_v39, %v3299_v6  ;;  %v3302_v50 = vadd.f32 %v13461_v62, %v17192_v47  ;;  %v17341_v28 = vpop.f32.mrf.mxu0 }
 0x212   : > { %v17339_v30 = vpop.f32.mrf.mxu1  ;;  %20525 = vst [vmem:[#allocation64_spill] sm:$0xff] %v17341_v28  ;;  %13774 = vmatprep.mubr.bf16.mxu0 %v12233_v59 }
 0x213   : > { %v17343_v20 = vadd.f32 %v13509_v36, %v3302_v50  ;;  %v13516_v6 = vpop.f32.mrf.mxu0 }
 0x214   : > { %v13464_v39 = vpop.f32.mrf.mxu1 }
 0x215   : > { %v3305_v47 = vadd.f32 %v13464_v39, %v17203_v55  ;;  %v3586_v45 = vpop.f32.mrf.mxu0  ;;  %v6439_v39 = vshrl.u32 %v6374_v13, 16 }
 0x216   : > { %v3248_v62 = vpop.f32.mrf.mxu1 }
 0x217   : > { %v17346_v49 = vadd.f32 %v13512_v32, %v3305_v47  ;;  %v3303_v35 = vadd.f32 %v3248_v62, %v17206_v9  ;;  %v13517_v28 = vpop.f32.mrf.mxu0  ;;  %v6442_v47 = vshll.u32 %v6374_v13, 16  ;;  %v14337_v9 = vld [vmem:[%s20107_s3 + $0x40] sm:$0xff]  }
 0x218   : > { %v13465_v15 = vpop.f32.mrf.mxu1  ;;  %13724 = vmatprep.subr.bf16.mxu1 %v14337_v9 }
 0x219   : > { %v17349_v63 = vadd.f32 %v3570_v37, %v3303_v35  ;;  %v3306_v36 = vadd.f32 %v13465_v15, %v17216_v5  ;;  %v17354_v24 = vpop.f32.mrf.mxu0  ;;  %13725 = vmatpush3.bf16.msra.mxu1 %v14337_v9 }
 0x21a   : > { %v17352_v50 = vpop.f32.mrf.mxu1  ;;  %20526 = vst [vmem:[#allocation41_spill] sm:$0xff] %v17354_v24  ;;  %v6441_v24 = vrot.slane %v6439_v39, 4  ;;  %v6422_v39 = vld [vmem:[#allocation3 + $0x8] sm:$0x1] }
 0x21b   : > { %v17356_v46 = vadd.f32 %v13513_v3, %v3306_v36  ;;  %v17358_v59 = vpop.f32.mrf.mxu0  ;;  %v6452_v3 = vshrl.u32 %v6375_v21, 16  ;;  %v6458_v21 = vshll.u32 %v6422_v39, 16 }
 0x21c   : > { %v13468_v55 = vpop.f32.mrf.mxu1 }
 0x21d   : > { %v3309_v32 = vadd.f32 %v13468_v55, %v17222_v51  ;;  %v17364_v37 = vpop.f32.mrf.mxu0  ;;  %v6444_v55 = vrot.slane %v6442_v47, 5 }
 0x21e   : > { %v3264_v35 = vpop.f32.mrf.mxu1  ;;  %20527 = vst [vmem:[#allocation20_spill] sm:$0xff] %v17364_v37 }
 0x21f   : > { %v17366_v5 = vadd.f32 %v13516_v6, %v3309_v32  ;;  %v3307_v15 = vadd.f32 %v3264_v35, %v17225_v34  ;;  %v17369_v36 = vpop.f32.mrf.mxu0  ;;  %v6450_v34 = vrot.slane %v6448_v19, 5  ;;  %v6454_v32 = vrot.slane %v6452_v3, 4 }
 0x220   : > { %v13469_v62 = vpop.f32.mrf.mxu1  ;;  %20528 = vst [vmem:[#allocation62_spill] sm:$0xff] %v17369_v36  ;;  %v6445_v9 = vor.u32 %v6444_v55, %v6441_v24 }
 0x221   : > { %v17371_v51 = vadd.f32 %v3586_v45, %v3307_v15  ;;  %v3310_v13 = vadd.f32 %v13469_v62, %v17235_v4  ;;  %v17376_v37 = vpop.f32.mrf.mxu0  ;;  %v6455_v45 = vor.u32 %v6454_v32, %v6450_v34 }
 0x222   : > { %v17374_v31 = vpop.f32.mrf.mxu1  ;;  %20529 = vst [vmem:[#allocation60_spill] sm:$0xff] %v17376_v37  ;;  %v6446_v47 = vrot.slane %v6445_v9, 4 }
 0x223   : > { %v17378_v6 = vadd.f32 %v13517_v28, %v3310_v13  ;;  %v17382_v27 = vpop.f32.mrf.mxu0  ;;  %v6456_v62 = vrot.slane %v6455_v45, 4  ;;  %v6460_v13 = vrot.slane %v6458_v21, 5 }
 0x224   : > { %v17380_v35 = vpop.f32.mrf.mxu1  ;;  %20530 = vst [vmem:[#allocation21_spill] sm:$0xff] %v17382_v27  ;;  %v6451_v19 = vsel %vm14685_vm6, %v6446_v47, %v6450_v34 }
 0x225   : > { %v17386_v4 = vpop.f32.mrf.mxu0  ;;  %v6461_v24 = vsel %vm14685_vm6, %v6456_v62, %v6460_v13 }
 0x226   : > { %v17384_v15 = vpop.f32.mrf.mxu1  ;;  %20531 = vst [vmem:[#allocation63_spill] sm:$0xff] %v17386_v4  ;;  %v12209_v55 = vcombine.low %v6451_v19, %v6461_v24  ;;  %v14341_v19 = vld [vmem:[%s20107_s3 + $0xb8] sm:$0xff]  }
 0x227   : > { %v13589_v28 = vpop.f32.mrf.mxu0  ;;  %13806 = vmatprep.subr.bf16.mxu1 %v14341_v19 }
 0x228   : > { %v17388_v36 = vpop.f32.mrf.mxu1  ;;  %13726 = vmatprep.mubr.bf16.mxu1 %v12209_v55 }
 0x229   : > { %v17394_v27 = vpop.f32.mrf.mxu0 }
 0x22a   : > { %v17392_v3 = vpop.f32.mrf.mxu1  ;;  %20532 = vst [vmem:[#allocation36_spill] sm:$0xff] %v17394_v27 }
 0x22b   : > { %v13592_v39 = vpop.f32.mrf.mxu0 }
 0x22c   : > { %v17398_v32 = vpop.f32.mrf.mxu1 }
 0x22d   : > { %20533 = vst [vmem:[#allocation23_spill] sm:$0xff] %v17398_v32  ;;  %v4391_v45 = vpop.f32.mrf.mxu0 }
 0x22e   : > { %v17400_v9 = vpop.f32.mrf.mxu1 }
 0x22f   : > { %20534 = vst [vmem:[#allocation27_spill] sm:$0xff] %v17400_v9  ;;  %v13593_v21 = vpop.f32.mrf.mxu0 }
 0x230   : > { %v13541_v4 = vpop.f32.mrf.mxu1 }
 0x231   : > { %v4106_v37 = vadd.f32 %v13541_v4, %v17267_v40  ;;  %v17405_v47 = vpop.f32.mrf.mxu0 }
 0x232   : > { %v17403_v34 = vpop.f32.mrf.mxu1  ;;  %20536 = vst [vmem:[#allocation49_spill] sm:$0xff] %v17405_v47 }
 0x233   : > { %20535 = vst [vmem:[#allocation70_spill] sm:$0xff] %v17403_v34  ;;  %v17407_v27 = vadd.f32 %v13589_v28, %v4106_v37  ;;  %v13596_v62 = vpop.f32.mrf.mxu0 }
 0x234   : > { %v13544_v29 = vpop.f32.mrf.mxu1 }
 0x235   : > { %20537 = vst [vmem:[#allocation38_spill] sm:$0xff] %v17407_v27  ;;  %v4109_v13 = vadd.f32 %v13544_v29, %v17270_v22  ;;  %v4407_v55 = vpop.f32.mrf.mxu0 }
 0x236   : > { %v4004_v24 = vpop.f32.mrf.mxu1 }
 0x237   : > { %v17413_v9 = vadd.f32 %v13592_v39, %v4109_v13  ;;  %v4107_v40 = vadd.f32 %v4004_v24, %v17279_v25  ;;  %v13597_v34 = vpop.f32.mrf.mxu0 }
 0x238   : > { %v13545_v4 = vpop.f32.mrf.mxu1 }
 0x239   : > { %20538 = vst [vmem:[#allocation71_spill] sm:$0xff] %v17413_v9  ;;  %v17416_v47 = vadd.f32 %v4391_v45, %v4107_v40  ;;  %v4110_v37 = vadd.f32 %v13545_v4, %v17286_v17  ;;  %v17421_v29 = vpop.f32.mrf.mxu0 }
 0x23a   : > { %v17419_v28 = vpop.f32.mrf.mxu1 }
 0x23b   : > { %v17423_v22 = vadd.f32 %v13593_v21, %v4110_v37  ;;  %v13600_v32 = vpop.f32.mrf.mxu0 }
 0x23c   : > { %v13548_v27 = vpop.f32.mrf.mxu1 }
 0x23d   : > { %20539 = vst [vmem:[#allocation32_spill] sm:$0xff] %v17423_v22  ;;  %v4113_v39 = vadd.f32 %v13548_v27, %v17289_v14  ;;  %v4423_v9 = vpop.f32.mrf.mxu0  ;;  %v17441_v14 = vld [vmem:[%s20107_s3 + $0xf8] sm:$0xff]  }
 0x23e   : > { %v4020_v13 = vpop.f32.mrf.mxu1  ;;  %20542 = vst [vmem:[#allocation68_spill] sm:$0xff] %v17441_v14  ;;  %13854 = vmatprep.subr.bf16.mxu0 %v17441_v14 }
 0x23f   : > { %v17426_v25 = vadd.f32 %v13596_v62, %v4113_v39  ;;  %v4111_v19 = vadd.f32 %v4020_v13, %v17298_v16  ;;  %v13601_v24 = vpop.f32.mrf.mxu0 }
 0x240   : > { %v13549_v45 = vpop.f32.mrf.mxu1 }
 0x241   : > { %v17429_v40 = vadd.f32 %v4407_v55, %v4111_v19  ;;  %v4114_v17 = vadd.f32 %v13549_v45, %v17305_v60  ;;  %v17434_v21 = vpop.f32.mrf.mxu0 }
 0x242   : > { %v17432_v4 = vpop.f32.mrf.mxu1 }
 0x243   : > { %20540 = vst [vmem:[#allocation67_spill] sm:$0xff] %v17429_v40  ;;  %v17436_v37 = vadd.f32 %v13597_v34, %v4114_v17  ;;  %v13604_v27 = vpop.f32.mrf.mxu0 }
 0x244   : > { %v13552_v22 = vpop.f32.mrf.mxu1 }
 0x245   : > { %20541 = vst [vmem:[#allocation69_spill] sm:$0xff] %v17436_v37  ;;  %v4117_v16 = vadd.f32 %v13552_v22, %v17308_v1  ;;  %v4439_v55 = vpop.f32.mrf.mxu0 }
 0x246   : > { %v4036_v62 = vpop.f32.mrf.mxu1 }
 0x247   : > { %v17445_v60 = vadd.f32 %v13600_v32, %v4117_v16  ;;  %v4115_v39 = vadd.f32 %v4036_v62, %v17314_v43  ;;  %v13605_v34 = vpop.f32.mrf.mxu0 }
 0x248   : > { %v13553_v13 = vpop.f32.mrf.mxu1 }
 0x249   : > { %20543 = vst [vmem:[#allocation74_spill] sm:$0xff] %v17445_v60  ;;  %v17448_v19 = vadd.f32 %v4423_v9, %v4115_v39  ;;  %v4118_v45 = vadd.f32 %v13553_v13, %v17324_v58  ;;  %v17453_v37 = vpop.f32.mrf.mxu0 }
 0x24a   : > { %v17451_v17 = vpop.f32.mrf.mxu1 }
 0x24b   : > { %v17455_v40 = vadd.f32 %v13601_v24, %v4118_v45  ;;  %v13608_v22 = vpop.f32.mrf.mxu0 }
 0x24c   : > { %v13556_v1 = vpop.f32.mrf.mxu1 }
 0x24d   : > { %20544 = vst [vmem:[#allocation75_spill] sm:$0xff] %v17455_v40  ;;  %v4121_v14 = vadd.f32 %v13556_v1, %v17327_v57  ;;  %v4455_v16 = vpop.f32.mrf.mxu0 }
 0x24e   : > { %v4052_v32 = vpop.f32.mrf.mxu1 }
 0x24f   : > { %v17458_v60 = vadd.f32 %v13604_v27, %v4121_v14  ;;  %v4119_v43 = vadd.f32 %v4052_v32, %v17333_v41  ;;  %v13609_v62 = vpop.f32.mrf.mxu0 }
 0x250   : > { %v13557_v9 = vpop.f32.mrf.mxu1 }
 0x251   : > { %20545 = vst [vmem:[#allocation76_spill] sm:$0xff] %v17458_v60  ;;  %v17461_v39 = vadd.f32 %v4439_v55, %v4119_v43  ;;  %v4122_v58 = vadd.f32 %v13557_v9, %v17343_v20  ;;  %v17466_v24 = vpop.f32.mrf.mxu0  ;;  %v20549_v9 = vld [vmem:[#allocation47_spill] sm:$0xff] }
 0x252   : > { %v17464_v13 = vpop.f32.mrf.mxu1 }
 0x253   : > { %20546 = vst [vmem:[#allocation39_spill] sm:$0xff] %v17461_v39  ;;  %v17468_v45 = vadd.f32 %v13605_v34, %v4122_v58  ;;  %v13612_v57 = vpop.f32.mrf.mxu0  ;;  %v2381_v34 = vadd.f32 %v17140_v18, %v20549_v9  ;;  %v20550_v58 = vld [vmem:[#allocation10_spill] sm:$0xff] }
 0x254   : > { %v13560_v40 = vpop.f32.mrf.mxu1 }
 0x255   : > { %20547 = vst [vmem:[#allocation33_spill] sm:$0xff] %v17468_v45  ;;  %v4125_v1 = vadd.f32 %v13560_v40, %v17346_v49  ;;  %v4471_v14 = vpop.f32.mrf.mxu0  ;;  %v2397_v45 = vadd.f32 %v17188_v56, %v20550_v58  ;;  %v20551_v40 = vld [vmem:[#allocation66_spill] sm:$0xff]  ;;  %v2910_v56 = vadd.f32 %v17088_v33, %v2381_v34  ;;  %v3284_v33 = vadd.f32 %v17263_v23, %v16987_v53 }
 0x256   : > { %v4068_v27 = vpop.f32.mrf.mxu1 }
 0x257   : > { %v17471_v60 = vadd.f32 %v13608_v22, %v4125_v1  ;;  %v4123_v41 = vadd.f32 %v4068_v27, %v17349_v63  ;;  %v13613_v32 = vpop.f32.mrf.mxu0  ;;  %v2413_v22 = vadd.f32 %v17212_v11, %v20551_v40  ;;  %v20552_v1 = vld [vmem:[#allocation77_spill] sm:$0xff]  ;;  %v2914_v9 = vadd.f32 %v17142_v48, %v2397_v45 }
 0x258   : > { %v13561_v55 = vpop.f32.mrf.mxu1  ;;  %v20553_v27 = vld [vmem:[#allocation37_spill] sm:$0xff]  ;;  %v3288_v48 = vadd.f32 %v17282_v8, %v17055_v26 }
 0x259   : > { %v17474_v43 = vadd.f32 %v4455_v16, %v4123_v41  ;;  %v4126_v20 = vadd.f32 %v13561_v55, %v17356_v46  ;;  %v17483_v49 = vpop.f32.mrf.mxu0  ;;  %v2429_v16 = vadd.f32 %v17231_v10, %v20552_v1  ;;  %v3280_v46 = vadd.f32 %v17247_v54, %v20553_v27  ;;  %v20559_v27 = vld [vmem:[#allocation23_spill] sm:$0xff] }
 0x25a   : > { %v17481_v39 = vpop.f32.mrf.mxu1  ;;  %v2918_v11 = vadd.f32 %v17190_v38, %v2413_v22  ;;  %v3292_v38 = vadd.f32 %v17301_v42, %v17107_v7  ;;  %v4102_v7 = vadd.f32 %v17388_v36, %v17251_v0  ;;  %v20561_v36 = vld [vmem:[#allocation56_spill] sm:$0xff] }
 0x25b   : > { %20548 = vst [vmem:[#allocation50_spill] sm:$0xff] %v17474_v43  ;;  %v17487_v63 = vadd.f32 %v13609_v62, %v4126_v20  ;;  %v13680_v18 = vpop.f32.mrf.mxu0  ;;  %v4101_v62 = vadd.f32 %v17380_v35, %v17241_v2  ;;  %v2922_v54 = vadd.f32 %v17214_v52, %v2429_v16  ;;  %v3602_v40 = vadd.f32 %v17233_v61, %v3280_v46  ;;  %v20558_v16 = vld [vmem:[#allocation48_spill] sm:$0xff] }
 0x25c   : > { %v13564_v41 = vpop.f32.mrf.mxu1  ;;  %v4099_v2 = vadd.f32 %v17384_v15, %v17244_v44  ;;  %v3296_v61 = vadd.f32 %v17320_v12, %v2910_v56  ;;  %v3304_v53 = vadd.f32 %v17352_v50, %v2918_v11  ;;  %v20555_v12 = vld [vmem:[#allocation54_spill] sm:$0xff]  ;;  %v20556_v50 = vld [vmem:[#allocation65_spill] sm:$0xff] }
 0x25d   : > { %v4129_v55 = vadd.f32 %v13564_v41, %v17366_v5  ;;  %v5611_v43 = vpop.f32.mrf.mxu0  ;;  %v3308_v26 = vadd.f32 %v17374_v31, %v2922_v54  ;;  %v4100_v44 = vadd.f32 %v17392_v3, %v3602_v40  ;;  %v3614_v22 = vadd.f32 %v20556_v50, %v3292_v38  ;;  %v20557_v31 = vld [vmem:[#allocation20_spill] sm:$0xff]  ;;  %v20560_v41 = vld [vmem:[#allocation35_spill] sm:$0xff]  ;;  %v20563_v56 = vld [vmem:[#allocation41_spill] sm:$0xff] }
 0x25e   : > { %v4084_v58 = vpop.f32.mrf.mxu1  ;;  %v4486_v1 = vadd.f32 %v20557_v31, %v4099_v2  ;;  %v3618_v0 = vadd.f32 %v20560_v41, %v3296_v61  ;;  %v20565_v40 = vld [vmem:[#allocation60_spill] sm:$0xff]  ;;  %v20567_v2 = vld [vmem:[#allocation27_spill] sm:$0xff]  ;;  %v20568_v61 = vld [vmem:[#allocation70_spill] sm:$0xff] }
 0x25f   : > { %v17499_v20 = vadd.f32 %v13612_v57, %v4129_v55  ;;  %v4127_v10 = vadd.f32 %v4084_v58, %v17371_v51  ;;  %v13681_v45 = vpop.f32.mrf.mxu0  ;;  %v3300_v51 = vadd.f32 %v17339_v30, %v2914_v9  ;;  %v4488_v57 = vadd.f32 %v17358_v59, %v4101_v62  ;;  %v17538_v58 = vld [vmem:[%s20106_s2] ss:$0 sm:$0xff]  ;;  %v20566_v38 = vld [vmem:[#allocation52_spill] sm:$0xff] }
 0x260   : > { %v13565_v5 = vpop.f32.mrf.mxu1  ;;  %v4105_v59 = vadd.f32 %v20559_v27, %v20558_v16  ;;  %v3630_v9 = vadd.f32 %v20563_v56, %v3308_v26  ;;  %v4112_v26 = vadd.f32 %v17432_v4, %v3614_v22  ;;  %v4116_v50 = vadd.f32 %v17451_v17, %v3618_v0  ;;  %v20572_v17 = vld [vmem:[#allocation49_spill] sm:$0xff] }
 0x261   : > { %v17512_v35 = vadd.f32 %v4471_v14, %v4127_v10  ;;  %v4130_v52 = vadd.f32 %v13565_v5, %v17378_v6  ;;  %v5614_v8 = vpop.f32.mrf.mxu0  ;;  %v20554_v6 = vld [vmem:[#allocation12_spill] sm:$0xff]  ;;  %v3610_v14 = vadd.f32 %v20555_v12, %v3288_v48  ;;  %v3622_v3 = vadd.f32 %v20561_v36, %v3300_v51  ;;  %v20564_v10 = vld [vmem:[#allocation62_spill] sm:$0xff]  ;;  %v20569_v12 = vld [vmem:[#allocation21_spill] sm:$0xff] }
 0x262   : > { %v4087_v23 = vpop.f32.mrf.mxu1  ;;  %v3606_v15 = vadd.f32 %v20554_v6, %v3284_v33  ;;  %v4489_v54 = vadd.f32 %v20564_v10, %v4102_v7  ;;  %v4487_v33 = vadd.f32 %v20565_v40, %v4100_v44 }
 0x263   : > { %v17523_v42 = vadd.f32 %v13613_v32, %v4130_v52  ;;  %v20562_v32 = vld [vmem:[#allocation64_spill] sm:$0xff]  ;;  %v4103_v52 = vadd.f32 %v20567_v2, %v20566_v38  ;;  %v4120_v31 = vadd.f32 %v17464_v13, %v3622_v3 }
 0x264   : > { %v13632_v30 = vpop.f32.mrf.mxu1  ;;  %v13684_v34 = vpop.f32.mrf.mxu0  ;;  %v3626_v55 = vadd.f32 %v20562_v32, %v3304_v53  ;;  %v4104_v51 = vadd.f32 %v20568_v61, %v3606_v15  ;;  %v4108_v53 = vadd.f32 %v17419_v28, %v3610_v14  ;;  %v4128_v15 = vadd.f32 %v4087_v23, %v3630_v9  ;;  %v6269_v61 = vld [vmem:[#allocation3 + $0x18] sm:$0xf] }
 0x265   : > { %v5242_v46 = vadd.f32 %v13632_v30, %v4488_v57  ;;  %v4492_v30 = vadd.f32 %v20569_v12, %v4105_v59  ;;  %v20570_v59 = vld [vmem:[#allocation63_spill] sm:$0xff]  ;;  %v17569_v32 = vadd.f32 %v17434_v21, %v4116_v50 }
 0x266   : > { %v5113_v11 = vpop.f32.mrf.mxu1  ;;  %v5627_v62 = vpop.f32.mrf.mxu0  ;;  %v17562_v0 = vadd.f32 %v20572_v17, %v4108_v53 }
 0x267   : > { %v5740_v48 = vadd.f32 %v13680_v18, %v5242_v46  ;;  %v5240_v5 = vadd.f32 %v5113_v11, %v4486_v1  ;;  %v4124_v1 = vadd.f32 %v17481_v39, %v3626_v55  ;;  %v4490_v46 = vadd.f32 %v20570_v59, %v4103_v52 }
 0x268   : > { %v13633_v57 = vpop.f32.mrf.mxu1  ;;  %v17547_v6 = vpop.f32.mrf.mxu0  ;;  %v17565_v39 = vadd.f32 %v17421_v29, %v4112_v26  ;;  %v17572_v55 = vadd.f32 %v17453_v37, %v4120_v31  ;;  %v17578_v29 = vadd.f32 %v17483_v49, %v4128_v15  ;;  %v6260_v31 = vld [vmem:[#allocation3 + $0xc] sm:$0xf] }
 0x269   : > { %v5779_v7 = vadd.f32 %v17538_v58, %v5740_v48  ;;  %v5738_v44 = vadd.f32 %v5611_v43, %v5240_v5  ;;  %v5243_v18 = vadd.f32 %v13633_v57, %v4489_v54  ;;  %v20571_v43 = vld [vmem:[#allocation36_spill] sm:$0xff]  ;;  %v17575_v56 = vadd.f32 %v17466_v24, %v4124_v1  ;;  %v20575_v57 = vld [vmem:[#allocation38_spill] sm:$0xff] }
 0x26a   : > { %v5116_v16 = vpop.f32.mrf.mxu1  ;;  %v17555_v27 = vpop.f32.mrf.mxu0  ;;  %v17559_v41 = vadd.f32 %v20571_v43, %v4104_v51  ;;  %v6273_v43 = vld [vmem:[#allocation3 + $0x20] sm:$0x1] }
 0x26b   : > { %v5811_v28 = vmax.f32 %v5779_v7, 0.0  ;;  %v5777_v4 = vadd.f32 %v17538_v58, %v5738_v44  ;;  %v5741_v14 = vadd.f32 %v13681_v45, %v5243_v18  ;;  %v5241_v22 = vadd.f32 %v5116_v16, %v4487_v33 }
 0x26c   : > { %v13636_v13 = vpop.f32.mrf.mxu1 }
 0x26d   : > { %v12665_v23 = vpack.c.bf16 %v5811_v28, %v5811_v28  ;;  %v5809_v36 = vmax.f32 %v5777_v4, 0.0  ;;  %v5780_v45 = vadd.f32 %v17538_v58, %v5741_v14  ;;  %v5739_v3 = vadd.f32 %v5614_v8, %v5241_v22  ;;  %v17580_v33 = vpop.f32.mrf.mxu0 }
 0x26e   : > { %v5246_v9 = vadd.f32 %v13636_v13, %v4492_v30  ;;  %v5129_v11 = vpop.f32.mrf.mxu1 }
 0x26f   : > { %v5955_v10 = vshrl.u32 %v12665_v23, 16  ;;  %v12663_v54 = vpack.c.bf16 %v5809_v36, %v5809_v36  ;;  %v5812_v40 = vmax.f32 %v5780_v45, 0.0  ;;  %v5958_v8 = vshll.u32 %v12665_v23, 16  ;;  %v17591_v50 = vpop.f32.mrf.mxu0 }
 0x270   : > { %v5778_v21 = vadd.f32 %v17538_v58, %v5739_v3  ;;  %v5744_v48 = vadd.f32 %v13684_v34, %v5246_v9  ;;  %v5244_v5 = vadd.f32 %v5129_v11, %v4490_v46  ;;  %v13637_v37 = vpop.f32.mrf.mxu1 }
 0x271   : > { %v5957_v38 = vrot.slane %v5955_v10, 7  ;;  %v5938_v2 = vshrl.u32 %v12663_v54, 16  ;;  %v5941_v24 = vshll.u32 %v12663_v54, 16  ;;  %v12666_v52 = vpack.c.bf16 %v5812_v40, %v5812_v40  ;;  %v13689_v54 = vpop.f32.mrf.mxu0 }
 0x272   : > { %v5810_v51 = vmax.f32 %v5778_v21, 0.0  ;;  %v5783_v53 = vadd.f32 %v17538_v58, %v5744_v48  ;;  %v5742_v26 = vadd.f32 %v5627_v62, %v5244_v5  ;;  %v5247_v12 = vadd.f32 %v13637_v37, %v20575_v57  ;;  %v5132_v34 = vpop.f32.mrf.mxu1 }
 0x273   : > { %v5960_v30 = vor.u32 %v5958_v8, %v5957_v38  ;;  %v5961_v7 = vrot.slane %v5957_v38, 4  ;;  %v5940_v44 = vrot.slane %v5938_v2, 7  ;;  %v5963_v18 = vshrl.u32 %v12666_v52, 16 }
 0x274   : > { %v5966_v1 = vshll.u32 %v12666_v52, 16  ;;  %v12664_v15 = vpack.c.bf16 %v5810_v51, %v5810_v51  ;;  %v5815_v16 = vmax.f32 %v5783_v53, 0.0  ;;  %v5781_v28 = vadd.f32 %v17538_v58, %v5742_v26  ;;  %v13640_v4 = vpop.f32.mrf.mxu1 }
 0x275   : > { %v6270_v14 = vsel %vm17585_vm0, %v5960_v30, %v6269_v61  ;;  %v5943_v62 = vor.u32 %v5941_v24, %v5940_v44  ;;  %v5944_v22 = vrot.slane %v5940_v44, 4  ;;  %v5965_v59 = vrot.slane %v5963_v18, 7  ;;  %v6266_v24 = vld [vmem:[#allocation3 + $0x14] sm:$0x1] }
 0x276   : > { %6271 = vst [vmem:[#allocation3 + $0x18] sm:$0xf] %v6270_v14  ;;  %v5946_v17 = vshrl.u32 %v12664_v15, 16  ;;  %v5949_v13 = vshll.u32 %v12664_v15, 16  ;;  %v12669_v23 = vpack.c.bf16 %v5815_v16, %v5815_v16  ;;  %v5813_v36 = vmax.f32 %v5781_v28, 0.0  ;;  %v5145_v45 = vpop.f32.mrf.mxu1  ;;  %v20579_v18 = vld [vmem:[#allocation71_spill] sm:$0xff] }
 0x277   : > { %v6261_v3 = vsel %vm17585_vm0, %v5943_v62, %v6260_v31  ;;  %v5968_v9 = vor.u32 %v5966_v1, %v5965_v59  ;;  %v5970_v11 = vrot.slane %v5965_v59, 4  ;;  %v5745_v10 = vadd.f32 %v17547_v6, %v5247_v12  ;;  %v6283_v12 = vld [vmem:[#allocation3 + $0x30] sm:$0xf]  ;;  %v5646_v1 = vpop.f32.mrf.mxu0 }
 0x278   : > { %6262 = vst [vmem:[#allocation3 + $0xc] sm:$0xf] %v6261_v3  ;;  %v5948_v40 = vrot.slane %v5946_v17, 7  ;;  %v5989_v8 = vshrl.u32 %v12669_v23, 16  ;;  %v5992_v21 = vshll.u32 %v12669_v23, 16  ;;  %v12667_v48 = vpack.c.bf16 %v5813_v36, %v5813_v36  ;;  %v13641_v5 = vpop.f32.mrf.mxu1  ;;  %v20580_v17 = vld [vmem:[#allocation32_spill] sm:$0xff] }
 0x279   : > { %v5969_v38 = vsel %vm14709_vm10, %v5961_v7, %v5968_v9  ;;  %v6274_v2 = vsel %vm17598_vm1, %v5970_v11, %v6273_v43  ;;  %v5784_v52 = vadd.f32 %v17538_v58, %v5745_v10  ;;  %v5245_v61 = vadd.f32 %v5132_v34, %v17559_v41  ;;  %v6276_v43 = vld [vmem:[#allocation3 + $0x24] sm:$0xf]  ;;  %v13692_v10 = vpop.f32.mrf.mxu0 }
 0x27a   : > { %6272 = vst [vmem:[#allocation3 + $0x1c] sm:$0xf] %v5969_v38  ;;  %6275 = vst [vmem:[#allocation3 + $0x20] sm:$0x1] %v6274_v2  ;;  %v5951_v6 = vor.u32 %v5949_v13, %v5948_v40  ;;  %v5953_v51 = vrot.slane %v5948_v40, 4  ;;  %v5991_v53 = vrot.slane %v5989_v8, 7  ;;  %v5148_v57 = vpop.f32.mrf.mxu1  ;;  %v5250_v31 = vadd.f32 %v13640_v4, %v20579_v18 }
 0x27b   : > { %v5972_v26 = vshrl.u32 %v12667_v48, 16  ;;  %v5975_v30 = vshll.u32 %v12667_v48, 16  ;;  %v5816_v44 = vmax.f32 %v5784_v52, 0.0  ;;  %v5743_v7 = vadd.f32 %v17555_v27, %v5245_v61 }
 0x27c   : > { %v5952_v15 = vsel %vm14709_vm10, %v5944_v22, %v5951_v6  ;;  %v6267_v41 = vsel %vm17598_vm1, %v5953_v51, %v6266_v24  ;;  %v5994_v34 = vor.u32 %v5992_v21, %v5991_v53  ;;  %v5995_v16 = vrot.slane %v5991_v53, 4  ;;  %v13644_v28 = vpop.f32.mrf.mxu1  ;;  %v5659_v53 = vpop.f32.mrf.mxu0 }
 0x27d   : > { %6263 = vst [vmem:[#allocation3 + $0x10] sm:$0xf] %v5952_v15  ;;  %6268 = vst [vmem:[#allocation3 + $0x14] sm:$0x1] %v6267_v41  ;;  %v17617_v14 = vrot.slane %v5972_v26, 7  ;;  %v12670_v62 = vpack.c.bf16 %v5816_v44, %v5816_v44  ;;  %v5782_v59 = vadd.f32 %v17538_v58, %v5743_v7  ;;  %v5748_v27 = vadd.f32 %v17580_v33, %v5250_v31 }
 0x27e   : > { %v6284_v4 = vsel %vm17585_vm0, %v5994_v34, %v6283_v12  ;;  %v5248_v22 = vadd.f32 %v5145_v45, %v17416_v47  ;;  %v5251_v13 = vadd.f32 %v13641_v5, %v20580_v17  ;;  %v5249_v23 = vadd.f32 %v5148_v57, %v17562_v0  ;;  %v5161_v40 = vpop.f32.mrf.mxu1  ;;  %v6287_v0 = vld [vmem:[#allocation3 + $0x38] sm:$0x1] }
 0x27f   : > { %6285 = vst [vmem:[#allocation3 + $0x30] sm:$0xf] %v6284_v4  ;;  %v5977_v36 = vor.u32 %v5975_v30, %v17617_v14  ;;  %v5978_v3 = vrot.slane %v17617_v14, 4  ;;  %v5997_v9 = vshrl.u32 %v12670_v62, 16  ;;  %v6000_v11 = vshll.u32 %v12670_v62, 16 }
 0x280   : > { %v5814_v33 = vmax.f32 %v5782_v59, 0.0  ;;  %v5787_v8 = vadd.f32 %v17538_v58, %v5748_v27  ;;  %v5746_v21 = vadd.f32 %v17591_v50, %v5248_v22  ;;  %v5749_v48 = vadd.f32 %v13689_v54, %v5251_v13  ;;  %v13645_v26 = vpop.f32.mrf.mxu1  ;;  %v20581_v27 = vld [vmem:[#allocation67_spill] sm:$0xff] }
 0x281   : > { %v6277_v47 = vsel %vm17585_vm0, %v5977_v36, %v6276_v43  ;;  %v5999_v45 = vrot.slane %v5997_v9, 7  ;;  %v5747_v5 = vadd.f32 %v5646_v1, %v5249_v23  ;;  %v5254_v38 = vadd.f32 %v13644_v28, %v17426_v25  ;;  %v6280_v28 = vld [vmem:[#allocation3 + $0x2c] sm:$0x1]  ;;  %v13693_v43 = vpop.f32.mrf.mxu0  ;;  %v6297_v36 = vld [vmem:[#allocation3 + $0x48] sm:$0xf] }
 0x282   : > { %6278 = vst [vmem:[#allocation3 + $0x24] sm:$0xf] %v6277_v47  ;;  %v12668_v2 = vpack.c.bf16 %v5814_v33, %v5814_v33  ;;  %v5819_v24 = vmax.f32 %v5787_v8, 0.0  ;;  %v5785_v52 = vadd.f32 %v17538_v58, %v5746_v21  ;;  %v5788_v61 = vadd.f32 %v17538_v58, %v5749_v48 }
 0x283   : > { %v6002_v6 = vor.u32 %v6000_v11, %v5999_v45  ;;  %v6004_v51 = vrot.slane %v5999_v45, 4  ;;  %v5786_v50 = vadd.f32 %v17538_v58, %v5747_v5  ;;  %v5752_v54 = vadd.f32 %v13692_v10, %v5254_v38  ;;  %v5662_v38 = vpop.f32.mrf.mxu0 }
 0x284   : > { %v5980_v57 = vshrl.u32 %v12668_v2, 16  ;;  %v5983_v12 = vshll.u32 %v12668_v2, 16  ;;  %v12673_v30 = vpack.c.bf16 %v5819_v24, %v5819_v24  ;;  %v5817_v44 = vmax.f32 %v5785_v52, 0.0  ;;  %v6290_v52 = vld [vmem:[#allocation3 + $0x3c] sm:$0xf] }
 0x285   : > { %v6003_v25 = vsel %vm14709_vm10, %v5995_v16, %v6002_v6  ;;  %v6288_v7 = vsel %vm17598_vm1, %v6004_v51, %v6287_v0  ;;  %v5820_v18 = vmax.f32 %v5788_v61, 0.0  ;;  %v5818_v31 = vmax.f32 %v5786_v50, 0.0  ;;  %v5164_v16 = vpop.f32.mrf.mxu1  ;;  %v6301_v61 = vld [vmem:[#allocation3 + $0x50] sm:$0x1]  ;;  %v20582_v51 = vld [vmem:[#allocation69_spill] sm:$0xff] }
 0x286   : > { %6286 = vst [vmem:[#allocation3 + $0x34] sm:$0xf] %v6003_v25  ;;  %6289 = vst [vmem:[#allocation3 + $0x38] sm:$0x1] %v6288_v7  ;;  %v5982_v1 = vrot.slane %v5980_v57, 7  ;;  %v6023_v15 = vshrl.u32 %v12673_v30, 16  ;;  %v12671_v34 = vpack.c.bf16 %v5817_v44, %v5817_v44  ;;  %v5791_v59 = vadd.f32 %v17538_v58, %v5752_v54 }
 0x287   : > { %v6026_v41 = vshll.u32 %v12673_v30, 16  ;;  %v12674_v14 = vpack.c.bf16 %v5820_v18, %v5820_v18  ;;  %v12672_v62 = vpack.c.bf16 %v5818_v31, %v5818_v31  ;;  %v5252_v4 = vadd.f32 %v5161_v40, %v20581_v27  ;;  %v13648_v2 = vpop.f32.mrf.mxu1  ;;  %v6294_v44 = vld [vmem:[#allocation3 + $0x44] sm:$0x1] }
 0x288   : > { %v5985_v22 = vor.u32 %v5983_v12, %v5982_v1  ;;  %v5987_v17 = vrot.slane %v5982_v1, 4  ;;  %v6025_v13 = vrot.slane %v6023_v15, 7  ;;  %v6006_v23 = vshrl.u32 %v12671_v34, 16 }
 0x289   : > { %v6009_v9 = vshll.u32 %v12671_v34, 16  ;;  %v6031_v11 = vshrl.u32 %v12674_v14, 16  ;;  %v6034_v10 = vshll.u32 %v12674_v14, 16  ;;  %v6014_v33 = vshrl.u32 %v12672_v62, 16  ;;  %v5177_v34 = vpop.f32.mrf.mxu1 }
 0x28a   : > { %v5986_v8 = vsel %vm14709_vm10, %v5978_v3, %v5985_v22  ;;  %v6281_v21 = vsel %vm17598_vm1, %v5987_v17, %v6280_v28  ;;  %v6028_v48 = vor.u32 %v6026_v41, %v6025_v13  ;;  %v6029_v47 = vrot.slane %v6025_v13, 4  ;;  %v13696_v41 = vpop.f32.mrf.mxu0  ;;  %v6376_v28 = vld [vmem:[#allocation3 + $0xc] sm:$0xf] }
 0x28b   : > { %6279 = vst [vmem:[#allocation3 + $0x28] sm:$0xf] %v5986_v8  ;;  %6282 = vst [vmem:[#allocation3 + $0x2c] sm:$0x1] %v6281_v21  ;;  %v6008_v40 = vrot.slane %v6006_v23, 7  ;;  %v6033_v45 = vrot.slane %v6031_v11, 7  ;;  %v5750_v3 = vadd.f32 %v5659_v53, %v5252_v4  ;;  %v5255_v50 = vadd.f32 %v13645_v26, %v20582_v51 }
 0x28c   : > { %v6016_v0 = vrot.slane %v6014_v33, 7  ;;  %v6017_v5 = vshll.u32 %v12672_v62, 16  ;;  %v6298_v24 = vsel %vm17585_vm0, %v6028_v48, %v6297_v36  ;;  %v5823_v6 = vmax.f32 %v5791_v59, 0.0  ;;  %v20583_v17 = vld [vmem:[#allocation74_spill] sm:$0xff] }
 0x28d   : > { %6299 = vst [vmem:[#allocation3 + $0x48] sm:$0xf] %v6298_v24  ;;  %v6011_v54 = vor.u32 %v6009_v9, %v6008_v40  ;;  %v6012_v57 = vrot.slane %v6008_v40, 4  ;;  %v6036_v12 = vor.u32 %v6034_v10, %v6033_v45  ;;  %v6038_v30 = vrot.slane %v6033_v45, 4  ;;  %v6311_v10 = vld [vmem:[#allocation3 + $0x60] sm:$0xf]  ;;  %v17666_v40 = vpop.f32.mrf.mxu1 }
 0x28e   : > { %v6019_v25 = vor.u32 %v6017_v5, %v6016_v0  ;;  %v6021_v7 = vrot.slane %v6016_v0, 4  ;;  %v12677_v18 = vpack.c.bf16 %v5823_v6, %v5823_v6  ;;  %v5789_v31 = vadd.f32 %v17538_v58, %v5750_v3 }
 0x28f   : > { %v6291_v1 = vsel %vm17585_vm0, %v6011_v54, %v6290_v52  ;;  %v6037_v15 = vsel %vm14709_vm10, %v6029_v47, %v6036_v12  ;;  %v6302_v53 = vsel %vm17598_vm1, %v6038_v30, %v6301_v61  ;;  %v5753_v26 = vadd.f32 %v13693_v43, %v5255_v50  ;;  %v5675_v47 = vpop.f32.mrf.mxu0  ;;  %v17673_v52 = vld [vmem:[#allocation3 + $0x10] sm:$0xf]  ;;  %v17683_v12 = vld [vmem:[#allocation3 + $0x18] sm:$0xf] }
 0x290   : > { %6292 = vst [vmem:[#allocation3 + $0x3c] sm:$0xf] %v6291_v1  ;;  %6300 = vst [vmem:[#allocation3 + $0x4c] sm:$0xf] %v6037_v15  ;;  %v6020_v14 = vsel %vm14709_vm10, %v6012_v57, %v6019_v25  ;;  %v6295_v62 = vsel %vm17598_vm1, %v6021_v7, %v6294_v44  ;;  %v6057_v59 = vshrl.u32 %v12677_v18, 16  ;;  %v6060_v27 = vshll.u32 %v12677_v18, 16  ;;  %v17687_v44 = vpop.f32.mrf.mxu1 }
 0x291   : > { %6303 = vst [vmem:[#allocation3 + $0x50] sm:$0x1] %v6302_v53  ;;  %6293 = vst [vmem:[#allocation3 + $0x40] sm:$0xf] %v6020_v14  ;;  %v5821_v4 = vmax.f32 %v5789_v31, 0.0  ;;  %v5792_v22 = vadd.f32 %v17538_v58, %v5753_v26  ;;  %v5253_v43 = vadd.f32 %v5164_v16, %v17565_v39  ;;  %v5258_v13 = vadd.f32 %v13648_v2, %v20583_v17  ;;  %v17685_v30 = vpop.f32.mrf.mxu0  ;;  %v14346_v15 = vld [vmem:[%s20107_s3 + $0xf0] sm:$0xff]  }
 0x292   : > { %6296 = vst [vmem:[#allocation3 + $0x44] sm:$0x1] %v6295_v62  ;;  %v17663_v23 = vrot.slane %v6057_v59, 7  ;;  %v5256_v36 = vadd.f32 %v5177_v34, %v17448_v19  ;;  %v6463_v9 = vshrl.u32 %v6376_v28, 16  ;;  %v6466_v11 = vshll.u32 %v6376_v28, 16 }
 0x293   : > { %v12675_v33 = vpack.c.bf16 %v5821_v4, %v5821_v4  ;;  %v5824_v8 = vmax.f32 %v5792_v22, 0.0  ;;  %v5751_v21 = vadd.f32 %v5662_v38, %v5253_v43  ;;  %v5756_v48 = vadd.f32 %v13696_v41, %v5258_v13  ;;  %v6304_v25 = vld [vmem:[#allocation3 + $0x54] sm:$0xf]  ;;  %v6315_v34 = vld [vmem:[#allocation3 + $0x68] sm:$0x1] }
 0x294   : > { %v6062_v45 = vor.u32 %v6060_v27, %v17663_v23  ;;  %v6063_v39 = vrot.slane %v17663_v23, 4  ;;  %v5754_v16 = vadd.f32 %v5675_v47, %v5256_v36  ;;  %v17670_v0 = vrot.slane %v6463_v9, 4  ;;  %v5678_v23 = vpop.f32.mrf.mxu0  ;;  %v13652_v36 = vpop.f32.mrf.mxu1  ;;  %v20584_v9 = vld [vmem:[#allocation68_spill] sm:$0xff] }
 0x295   : > { %v6040_v5 = vshrl.u32 %v12675_v33, 16  ;;  %v6043_v2 = vshll.u32 %v12675_v33, 16  ;;  %v12678_v19 = vpack.c.bf16 %v5824_v8, %v5824_v8  ;;  %v5790_v24 = vadd.f32 %v17538_v58, %v5751_v21 }
 0x296   : > { %v6312_v38 = vsel %vm17585_vm0, %v6062_v45, %v6311_v10  ;;  %v5795_v61 = vadd.f32 %v17538_v58, %v5756_v48  ;;  %v5793_v6 = vadd.f32 %v17538_v58, %v5754_v16  ;;  %v17679_v3 = vrot.slane %v6466_v11, 5  ;;  %v6308_v10 = vld [vmem:[#allocation3 + $0x5c] sm:$0x1] }
 0x297   : > { %6313 = vst [vmem:[#allocation3 + $0x60] sm:$0xf] %v6312_v38  ;;  %v17681_v51 = vrot.slane %v6040_v5, 7  ;;  %v6065_v50 = vshrl.u32 %v12678_v19, 16  ;;  %v6068_v54 = vshll.u32 %v12678_v19, 16  ;;  %v5822_v57 = vmax.f32 %v5790_v24, 0.0 }
 0x298   : > { %v5827_v7 = vmax.f32 %v5795_v61, 0.0  ;;  %v5825_v18 = vmax.f32 %v5793_v6, 0.0  ;;  %v6476_v31 = vshrl.u32 %v17673_v52, 16  ;;  %v12234_v1 = vcombine.low %v6376_v28, %v17673_v52  ;;  %v14350_v28 = vld [vmem:[%s20107_s3 + $0xe8] sm:$0xff]   ;;  %v17704_v48 = vld [vmem:[#allocation3 + $0x1c] sm:$0xf] }
 0x299   : > { %v6045_v53 = vor.u32 %v6043_v2, %v17681_v51  ;;  %v6046_v26 = vrot.slane %v17681_v51, 4  ;;  %v6067_v41 = vrot.slane %v6065_v50, 7  ;;  %v12676_v14 = vpack.c.bf16 %v5822_v57, %v5822_v57  ;;  %v6325_v5 = vld [vmem:[#allocation3 + $0x78] sm:$0xf]  ;;  %v6318_v19 = vld [vmem:[#allocation3 + $0x6c] sm:$0xf] }
 0x29a   : > { %v12681_v62 = vpack.c.bf16 %v5827_v7, %v5827_v7  ;;  %v12679_v59 = vpack.c.bf16 %v5825_v18, %v5825_v18  ;;  %13775 = vmatmul.mubr.bf16.vlgmr.msra.gmra.mxu0 %v12234_v1  ;;  %v6487_v27 = vshrl.u32 %v17683_v12, 16  ;;  %v6490_v4 = vshll.u32 %v17683_v12, 16  ;;  %v5193_v7 = vpop.f32.mrf.mxu1  ;;  %v6380_v18 = vld [vmem:[#allocation3 + $0x24] sm:$0xf] }
 0x29b   : > { %v6305_v22 = vsel %vm17585_vm0, %v6045_v53, %v6304_v25  ;;  %v6070_v43 = vor.u32 %v6068_v54, %v6067_v41  ;;  %v6072_v17 = vrot.slane %v6067_v41, 4  ;;  %v6048_v13 = vshrl.u32 %v12676_v14, 16  ;;  %13855 = vmatpush3.bf16.msra.mxu0 %v20584_v9  ;;  %v13700_v25 = vpop.f32.mrf.mxu0 }
 0x29c   : > { %6306 = vst [vmem:[#allocation3 + $0x54] sm:$0xf] %v6305_v22  ;;  %v6051_v11 = vshll.u32 %v12676_v14, 16  ;;  %v6091_v33 = vshrl.u32 %v12681_v62, 16  ;;  %v6094_v8 = vshll.u32 %v12681_v62, 16  ;;  %v6074_v21 = vshrl.u32 %v12679_v59, 16  ;;  %13856 = vmatprep.subr.bf16.mxu0 %v14346_v15 }
 0x29d   : > { %v6071_v47 = vsel %vm14709_vm10, %v6063_v39, %v6070_v43  ;;  %v6316_v45 = vsel %vm17598_vm1, %v6072_v17, %v6315_v34  ;;  %v6050_v16 = vrot.slane %v6048_v13, 7  ;;  %v6077_v2 = vshll.u32 %v12679_v59, 16  ;;  %v14354_v39 = vld [vmem:[%s20107_s3 + $0xe0] sm:$0xff]   ;;  %v20585_v59 = vld [vmem:[#allocation75_spill] sm:$0xff]  ;;  %v20586_v43 = vld [vmem:[#allocation76_spill] sm:$0xff] }
 0x29e   : > { %6314 = vst [vmem:[#allocation3 + $0x64] sm:$0xf] %v6071_v47  ;;  %6317 = vst [vmem:[#allocation3 + $0x68] sm:$0x1] %v6316_v45  ;;  %v17710_v24 = vrot.slane %v6091_v33, 7  ;;  %v17712_v38 = vrot.slane %v6074_v21, 7  ;;  %v12235_v57 = vcombine.low %v17683_v12, %v17704_v48 }
 0x29f   : > { %v17714_v61 = vrot.slane %v6487_v27, 4  ;;  %v17716_v6 = vrot.slane %v6490_v4, 5  ;;  %v6053_v51 = vor.u32 %v6051_v11, %v6050_v16  ;;  %v6055_v50 = vrot.slane %v6050_v16, 4  ;;  %13857 = vmatpush3.bf16.msra.mxu0 %v14346_v15  ;;  %v17728_v14 = vld [vmem:[#allocation3 + $0x28] sm:$0xf]  ;;  %v20587_v17 = vld [vmem:[#allocation39_spill] sm:$0xff]  ;;  %v5691_v11 = vpop.f32.mrf.mxu0 }
 0x2a0   : > { %v6500_v54 = vshrl.u32 %v17704_v48, 16  ;;  %v6096_v1 = vor.u32 %v6094_v8, %v17710_v24  ;;  %v6097_v53 = vrot.slane %v17710_v24, 4  ;;  %v6079_v41 = vor.u32 %v6077_v2, %v17712_v38  ;;  %13858 = vmatprep.subr.bf16.mxu0 %v14350_v28  ;;  %13778 = vmatprep.mubr.bf16.mxu0 %v12235_v57  ;;  %v6423_v47 = vld [vmem:[#allocation3 + $0x14] sm:$0x1] }
 0x2a1   : > { %v6080_v34 = vrot.slane %v17712_v38, 4  ;;  %v6054_v62 = vsel %vm14709_vm10, %v6046_v26, %v6053_v51  ;;  %v6309_v12 = vsel %vm17598_vm1, %v6055_v50, %v6308_v10  ;;  %v5259_v15 = vadd.f32 %v17666_v40, %v20585_v59  ;;  %v17761_v51 = vld [vmem:[#allocation3 + $0x30] sm:$0xf]  ;;  %v17763_v50 = vpop.f32.mrf.mxu1 }
 0x2a2   : > { %v5257_v27 = vadd.f32 %v17687_v44, %v17569_v32  ;;  %6307 = vst [vmem:[#allocation3 + $0x58] sm:$0xf] %v6054_v62  ;;  %6310 = vst [vmem:[#allocation3 + $0x5c] sm:$0x1] %v6309_v12  ;;  %v6326_v4 = vsel %vm17585_vm0, %v6096_v1, %v6325_v5  ;;  %v6319_v22 = vsel %vm17585_vm0, %v6079_v41, %v6318_v19  ;;  %v6511_v10 = vshrl.u32 %v6380_v18, 16 }
 0x2a3   : > { %v5262_v26 = vadd.f32 %v13652_v36, %v20586_v43  ;;  %v5260_v13 = vadd.f32 %v5193_v7, %v20587_v17  ;;  %6327 = vst [vmem:[#allocation3 + $0x78] sm:$0xf] %v6326_v4  ;;  %6320 = vst [vmem:[#allocation3 + $0x6c] sm:$0xf] %v6319_v22  ;;  %v5757_v9 = vadd.f32 %v17685_v30, %v5259_v15  ;;  %v6514_v32 = vshll.u32 %v6380_v18, 16  ;;  %v14358_v36 = vld [vmem:[%s20107_s3 + $0xd8] sm:$0xff]   ;;  %v17782_v43 = vpop.f32.mrf.mxu0 }
 0x2a4   : > { %v5755_v40 = vadd.f32 %v5678_v23, %v5257_v27  ;;  %13859 = vmatpush3.bf16.msra.mxu0 %v14350_v28  ;;  %v6524_v8 = vshrl.u32 %v17728_v14, 16  ;;  %v12236_v21 = vcombine.low %v6380_v18, %v17728_v14  ;;  %v17752_v23 = vrot.slane %v6511_v10, 4  ;;  %v14364_v17 = vld [vmem:[%s20107_s3 + $0xc8] sm:$0xff]  }
 0x2a5   : > { %v5760_v44 = vadd.f32 %v13700_v25, %v5262_v26  ;;  %v5758_v33 = vadd.f32 %v5691_v11, %v5260_v13  ;;  %13860 = vmatprep.subr.bf16.mxu0 %v14354_v39  ;;  %v5796_v45 = vadd.f32 %v17538_v58, %v5757_v9  ;;  %v17754_v16 = vrot.slane %v6514_v32, 5  ;;  %v17784_v26 = vpop.f32.mrf.mxu1  ;;  %v17789_v10 = vld [vmem:[#allocation3 + $0x34] sm:$0xf]  ;;  %v6329_v32 = vld [vmem:[#allocation3 + $0x80] sm:$0x1] }
 0x2a6   : > { %v5794_v30 = vadd.f32 %v17538_v58, %v5755_v40  ;;  %13779 = vmatmul.mubr.bf16.gmra.mxu0 %v12236_v21  ;;  %v6469_v2 = vor.u32 %v17679_v3, %v17670_v0  ;;  %v6472_v19 = vshll.u32 %v17673_v52, 16  ;;  %v6478_v7 = vrot.slane %v6476_v31, 4  ;;  %v14362_v0 = vld [vmem:[%s20107_s3 + $0xd0] sm:$0xff]  }
 0x2a7   : > { %v5799_v28 = vadd.f32 %v17538_v58, %v5760_v44  ;;  %v5797_v5 = vadd.f32 %v17538_v58, %v5758_v33  ;;  %v5828_v57 = vmax.f32 %v5796_v45, 0.0  ;;  %v6482_v18 = vshll.u32 %v6423_v47, 16 }
 0x2a8   : > { %v5826_v25 = vmax.f32 %v5794_v30, 0.0  ;;  %13861 = vmatpush3.bf16.msra.mxu0 %v14354_v39  ;;  %v17767_v62 = vrot.slane %v6469_v2, 4  ;;  %v17769_v12 = vrot.slane %v6472_v19, 5  ;;  %v6535_v52 = vshrl.u32 %v17761_v51, 16  ;;  %v10681_v39 = vld [vmem:[#allocation3 + $0x3c] sm:$0xe] }
 0x2a9   : > { %v5831_v1 = vmax.f32 %v5799_v28, 0.0  ;;  %v5829_v41 = vmax.f32 %v5797_v5, 0.0  ;;  %13862 = vmatprep.subr.bf16.mxu0 %v14358_v36  ;;  %v12682_v3 = vpack.c.bf16 %v5828_v57, %v5828_v57  ;;  %v17774_v15 = vrot.slane %v6482_v18, 5  ;;  %v6322_v28 = vld [vmem:[#allocation3 + $0x74] sm:$0x1]  ;;  %v13656_v18 = vpop.f32.mrf.mxu1 }
 0x2aa   : > { %v12680_v59 = vpack.c.bf16 %v5826_v25, %v5826_v25  ;;  %v6475_v4 = vsel %vm14685_vm6, %v17767_v62, %v17769_v12  ;;  %v6479_v22 = vor.u32 %v6478_v7, %v17769_v12  ;;  %v17791_v2 = vrot.slane %v6535_v52, 4  ;;  %v5694_v7 = vpop.f32.mrf.mxu0 }
 0x2ab   : > { %v12685_v31 = vpack.c.bf16 %v5831_v1, %v5831_v1  ;;  %v12683_v27 = vpack.c.bf16 %v5829_v41, %v5829_v41  ;;  %v6099_v13 = vshrl.u32 %v12682_v3, 16  ;;  %v6102_v9 = vshll.u32 %v12682_v3, 16  ;;  %v6339_v3 = vld [vmem:[#allocation3 + $0x90] sm:$0xf] }
 0x2ac   : > { %v6082_v40 = vshrl.u32 %v12680_v59, 16  ;;  %v6085_v11 = vshll.u32 %v12680_v59, 16  ;;  %13863 = vmatpush3.bf16.msra.mxu0 %v14358_v36  ;;  %v6480_v5 = vrot.slane %v6479_v22, 4  ;;  %v6538_v25 = vshll.u32 %v17761_v51, 16  ;;  %v6332_v59 = vld [vmem:[#allocation3 + $0x84] sm:$0xf] }
 0x2ad   : > { %v6125_v44 = vshrl.u32 %v12685_v31, 16  ;;  %v6128_v33 = vshll.u32 %v12685_v31, 16  ;;  %v6108_v21 = vshrl.u32 %v12683_v27, 16  ;;  %v6111_v47 = vshll.u32 %v12683_v27, 16  ;;  %13864 = vmatprep.subr.bf16.mxu0 %v14362_v0 }
 0x2ae   : > { %v6101_v45 = vrot.slane %v6099_v13, 7  ;;  %v6084_v30 = vrot.slane %v6082_v40, 7  ;;  %v6548_v36 = vshrl.u32 %v17789_v10, 16  ;;  %v14367_v13 = vld [vmem:[%s20107_s3 + $0xc0] sm:$0xff]   ;;  %v6485_v38 = vsel %vm14685_vm6, %v6480_v5, %v17774_v15  ;;  %v14345_v15 = vld [vmem:[%s20107_s3 + $0xb0] sm:$0xff]  }
 0x2af   : > { %v17793_v19 = vrot.slane %v6125_v44, 7  ;;  %v17795_v57 = vrot.slane %v6108_v21, 7  ;;  %v6424_v44 = vld [vmem:[#allocation3 + $0x20] sm:$0x1]  ;;  %v12210_v21 = vcombine.low %v6475_v4, %v6485_v38  ;;  %v6496_v5 = vshll.u32 %v17704_v48, 16 }
 0x2b0   : > { %v6104_v1 = vor.u32 %v6102_v9, %v6101_v45  ;;  %v6106_v41 = vrot.slane %v6101_v45, 4  ;;  %v6087_v62 = vor.u32 %v6085_v11, %v6084_v30  ;;  %v6089_v12 = vrot.slane %v6084_v30, 4  ;;  %13865 = vmatpush3.bf16.msra.mxu0 %v14362_v0  ;;  %v20589_v45 = vld [vmem:[#allocation33_spill] sm:$0xff] }
 0x2b1   : > { %v6130_v52 = vor.u32 %v6128_v33, %v17793_v19  ;;  %v6131_v31 = vrot.slane %v17793_v19, 4  ;;  %v6113_v27 = vor.u32 %v6111_v47, %v17795_v57  ;;  %v6114_v22 = vrot.slane %v17795_v57, 4  ;;  %13866 = vmatprep.subr.bf16.mxu0 %v14364_v17  ;;  %v5209_v33 = vpop.f32.mrf.mxu1  ;;  %13727 = vmatmul.mubr.bf16.vlgmr.msra.gmra.mxu1 %v12210_v21  ;;  %v14361_v19 = vld [vmem:[%s20107_s3 + $0x90] sm:$0xff]  }
 0x2b2   : > { %v6105_v9 = vsel %vm14709_vm10, %v6097_v53, %v6104_v1  ;;  %v6330_v0 = vsel %vm17598_vm1, %v6106_v41, %v6329_v32  ;;  %v6088_v40 = vsel %vm14709_vm10, %v6080_v34, %v6087_v62  ;;  %v6323_v11 = vsel %vm17598_vm1, %v6089_v12, %v6322_v28  ;;  %v13704_v34 = vpop.f32.mrf.mxu0  ;;  %v6384_v1 = vld [vmem:[#allocation3 + $0x3c] sm:$0xf]  ;;  %v20590_v41 = vld [vmem:[#allocation50_spill] sm:$0xff] }
 0x2b3   : > { %6328 = vst [vmem:[#allocation3 + $0x7c] sm:$0xf] %v6105_v9  ;;  %6331 = vst [vmem:[#allocation3 + $0x80] sm:$0x1] %v6330_v0  ;;  %v6340_v24 = vsel %vm17585_vm0, %v6130_v52, %v6339_v3  ;;  %v6333_v53 = vsel %vm17585_vm0, %v6113_v27, %v6332_v59  ;;  %v17825_v32 = vrot.slane %v6538_v25, 5  ;;  %v12237_v47 = vcombine.low %v17761_v51, %v17789_v10 }
 0x2b4   : > { %6321 = vst [vmem:[#allocation3 + $0x70] sm:$0xf] %v6088_v40  ;;  %6324 = vst [vmem:[#allocation3 + $0x74] sm:$0x1] %v6323_v11  ;;  %v5263_v30 = vadd.f32 %v17763_v50, %v20589_v45  ;;  %v6493_v28 = vor.u32 %v17716_v6, %v17714_v61  ;;  %13867 = vmatpush3.bf16.msra.mxu0 %v14364_v17  ;;  %v6502_v4 = vrot.slane %v6500_v54, 4  ;;  %v6506_v25 = vshll.u32 %v6424_v44, 16  ;;  %v5707_v12 = vpop.f32.mrf.mxu0 }
 0x2b5   : > { %6341 = vst [vmem:[#allocation3 + $0x90] sm:$0xf] %v6340_v24  ;;  %6334 = vst [vmem:[#allocation3 + $0x84] sm:$0xf] %v6333_v53  ;;  %v5261_v51 = vadd.f32 %v17784_v26, %v17572_v55  ;;  %13868 = vmatprep.subr.bf16.mxu0 %v14367_v13  ;;  %v17844_v61 = vld [vmem:[%s20107_s3 + $0x178] sm:$0xff]   ;;  %13782 = vmatprep.mubr.bf16.mxu0 %v12237_v47  ;;  %v5266_v17 = vadd.f32 %v13656_v18, %v17471_v60  ;;  %v6498_v54 = vrot.slane %v6496_v5, 5 }
 0x2b6   : > { %v5761_v6 = vadd.f32 %v17782_v43, %v5263_v30  ;;  %v6494_v50 = vrot.slane %v6493_v28, 4  ;;  %v5264_v48 = vadd.f32 %v5209_v33, %v20590_v41  ;;  %v6508_v62 = vrot.slane %v6506_v25, 5  ;;  %v14475_v55 = vld [vmem:[%s20107_s3 + $0xb8] sm:$0xff]   ;;  %v14349_v60 = vld [vmem:[%s20107_s3 + $0xa8] sm:$0xff]   ;;  %v17867_v44 = vld [vmem:[%s20106_s2] ss:$0 sm:$0xff]  ;;  %v17877_v28 = vpop.f32.mrf.mxu1 }
 0x2b7   : > { %13807 = vmatpush3.bf16.msra.mxu1 %v14475_v55  ;;  %v5759_v26 = vadd.f32 %v5694_v7, %v5261_v51  ;;  %v6559_v3 = vshrl.u32 %v6384_v1, 16  ;;  %v5764_v52 = vadd.f32 %v13704_v34, %v5266_v17  ;;  %v17853_v43 = vld [vmem:[#allocation3 + $0x40] sm:$0xf]  ;;  %v6562_v9 = vshll.u32 %v6384_v1, 16  ;;  %v14353_v5 = vld [vmem:[%s20107_s3 + $0xa0] sm:$0xff]  }
 0x2b8   : > { %v5800_v59 = vadd.f32 %v17538_v58, %v5761_v6  ;;  %v5762_v27 = vadd.f32 %v5707_v12, %v5264_v48  ;;  %13808 = vmatprep.subr.bf16.mxu1 %v14345_v15  ;;  %13869 = vmatpush3.bf16.msra.mxu0 %v14367_v13  ;;  %v6499_v18 = vsel %vm14685_vm6, %v6494_v50, %v6498_v54  ;;  %v17887_v50 = vld [vmem:[#allocation3 + $0x2c] sm:$0x1]  ;;  %v17894_v12 = vpop.f32.mrf.mxu0 }
 0x2b9   : > { %v6503_v0 = vor.u32 %v6502_v4, %v6498_v54  ;;  %v5798_v7 = vadd.f32 %v17538_v58, %v5759_v26  ;;  %v17861_v40 = vrot.slane %v6559_v3, 4  ;;  %13950 = vmatprep.subr.bf16.mxu0 %v17844_v61  ;;  %v5803_v24 = vadd.f32 %v17867_v44, %v5764_v52  ;;  %v17896_v3 = vpop.f32.mrf.mxu1 }
 0x2ba   : > { %v5832_v11 = vmax.f32 %v5800_v59, 0.0  ;;  %v5801_v13 = vadd.f32 %v17867_v44, %v5762_v27  ;;  %v17871_v53 = vrot.slane %v6562_v9, 5  ;;  %v6572_v58 = vshrl.u32 %v17853_v43, 16  ;;  %v6343_v59 = vld [vmem:[#allocation3 + $0x98] sm:$0x1] }
 0x2bb   : > { %v6504_v38 = vrot.slane %v6503_v0, 4  ;;  %v5830_v34 = vmax.f32 %v5798_v7, 0.0  ;;  %v12238_v33 = vcombine.low %v6384_v1, %v17853_v43  ;;  %13809 = vmatpush3.bf16.msra.mxu1 %v14345_v15  ;;  %v5835_v47 = vmax.f32 %v5803_v24, 0.0  ;;  %v6336_v7 = vld [vmem:[#allocation3 + $0x8c] sm:$0x1] }
 0x2bc   : > { %v12686_v21 = vpack.c.bf16 %v5832_v11, %v5832_v11  ;;  %v5833_v45 = vmax.f32 %v5801_v13, 0.0  ;;  %v6517_v30 = vor.u32 %v17754_v16, %v17752_v23  ;;  %13810 = vmatprep.subr.bf16.mxu1 %v14349_v60  ;;  %v6520_v1 = vshll.u32 %v17728_v14, 16 }
 0x2bd   : > { %v6509_v4 = vsel %vm14685_vm6, %v6504_v38, %v6508_v62  ;;  %v12684_v25 = vpack.c.bf16 %v5830_v34, %v5830_v34  ;;  %13783 = vmatmul.mubr.bf16.gmra.mxu0 %v12238_v33  ;;  %v6526_v15 = vrot.slane %v6524_v8, 4  ;;  %v12689_v16 = vpack.c.bf16 %v5835_v47, %v5835_v47  ;;  %v14357_v62 = vld [vmem:[%s20107_s3 + $0x98] sm:$0xff]   ;;  %v6353_v34 = vld [vmem:[#allocation3 + $0xa8] sm:$0xf] }
 0x2be   : > { %v6133_v51 = vshrl.u32 %v12686_v21, 16  ;;  %v6136_v6 = vshll.u32 %v12686_v21, 16  ;;  %v12211_v23 = vcombine.low %v6499_v18, %v6509_v4  ;;  %v12687_v48 = vpack.c.bf16 %v5833_v45, %v5833_v45  ;;  %v6386_v47 = vld [vmem:[#allocation3 + $0x48] sm:$0xf] }
 0x2bf   : > { %v6116_v17 = vshrl.u32 %v12684_v25, 16  ;;  %v6119_v41 = vshll.u32 %v12684_v25, 16  ;;  %v17889_v54 = vrot.slane %v6517_v30, 4  ;;  %13811 = vmatpush3.bf16.msra.mxu1 %v14349_v60  ;;  %v6159_v14 = vshrl.u32 %v12689_v16, 16 }
 0x2c0   : > { %v6135_v55 = vrot.slane %v6133_v51, 7  ;;  %13730 = vmatprep.mubr.bf16.mxu1 %v12211_v23  ;;  %v6162_v8 = vshll.u32 %v12689_v16, 16  ;;  %v6522_v26 = vrot.slane %v6520_v1, 5  ;;  %13812 = vmatprep.subr.bf16.mxu1 %v14353_v5  ;;  %v6142_v27 = vshrl.u32 %v12687_v48, 16  ;;  %v6346_v1 = vld [vmem:[#allocation3 + $0x9c] sm:$0xf]  ;;  %v13660_v23 = vpop.f32.mrf.mxu1 }
 0x2c1   : > { %v6118_v52 = vrot.slane %v6116_v17, 7  ;;  %v6145_v9 = vshll.u32 %v12687_v48, 16  ;;  %v6530_v60 = vshll.u32 %v17887_v50, 16  ;;  %v17899_v11 = vrot.slane %v6159_v14, 7  ;;  %v17914_v51 = vld [vmem:[#allocation3 + $0x4c] sm:$0xf] }
 0x2c2   : > { %v6138_v18 = vor.u32 %v6136_v6, %v6135_v55  ;;  %v6140_v0 = vrot.slane %v6135_v55, 4  ;;  %v6523_v24 = vsel %vm14685_vm6, %v17889_v54, %v6522_v26  ;;  %v17904_v33 = vrot.slane %v6142_v27, 7  ;;  %v5710_v6 = vpop.f32.mrf.mxu0 }
 0x2c3   : > { %v6121_v13 = vor.u32 %v6119_v41, %v6118_v52  ;;  %v6123_v38 = vrot.slane %v6118_v52, 4  ;;  %v6527_v21 = vor.u32 %v6526_v15, %v6522_v26  ;;  %13813 = vmatpush3.bf16.msra.mxu1 %v14353_v5  ;;  %v6164_v4 = vor.u32 %v6162_v8, %v17899_v11  ;;  %v17933_v8 = vld [vmem:[#allocation3 + $0x38] sm:$0x1] }
 0x2c4   : > { %v6139_v45 = vsel %vm14709_vm10, %v6131_v31, %v6138_v18  ;;  %v6344_v30 = vsel %vm17598_vm1, %v6140_v0, %v6343_v59  ;;  %v6165_v25 = vrot.slane %v17899_v11, 4  ;;  %13814 = vmatprep.subr.bf16.mxu1 %v14357_v62  ;;  %v6147_v15 = vor.u32 %v6145_v9, %v17904_v33  ;;  %v13708_v9 = vpop.f32.mrf.mxu0  ;;  %v6388_v18 = vld [vmem:[#allocation3 + $0x54] sm:$0xf] }
 0x2c5   : > { %6342 = vst [vmem:[#allocation3 + $0x94] sm:$0xf] %v6139_v45  ;;  %6345 = vst [vmem:[#allocation3 + $0x98] sm:$0x1] %v6344_v30  ;;  %v6122_v31 = vsel %vm14709_vm10, %v6114_v22, %v6121_v13  ;;  %v6337_v5 = vsel %vm17598_vm1, %v6123_v38, %v6336_v7  ;;  %v6148_v16 = vrot.slane %v17904_v33, 4  ;;  %v6354_v17 = vsel %vm17585_vm0, %v6164_v4, %v6353_v34 }
 0x2c6   : > { %6335 = vst [vmem:[#allocation3 + $0x88] sm:$0xf] %v6122_v31  ;;  %6338 = vst [vmem:[#allocation3 + $0x8c] sm:$0x1] %v6337_v5  ;;  %v6528_v41 = vrot.slane %v6527_v21, 4  ;;  %v6532_v48 = vrot.slane %v6530_v60, 5  ;;  %v6347_v57 = vsel %vm17585_vm0, %v6147_v15, %v6346_v1  ;;  %v12239_v14 = vcombine.low %v6386_v47, %v17914_v51  ;;  %v5225_v60 = vpop.f32.mrf.mxu1  ;;  %v5723_v30 = vpop.f32.mrf.mxu0 }
 0x2c7   : > { %v6583_v54 = vshrl.u32 %v6386_v47, 16  ;;  %6355 = vst [vmem:[#allocation3 + $0xa8] sm:$0xf] %v6354_v17  ;;  %v6586_v22 = vshll.u32 %v6386_v47, 16  ;;  %v6596_v55 = vshrl.u32 %v17914_v51, 16  ;;  %13815 = vmatpush3.bf16.msra.mxu1 %v14357_v62  ;;  %v5267_v52 = vadd.f32 %v17877_v28, %v17487_v63  ;;  %v14365_v63 = vld [vmem:[%s20107_s3 + $0x88] sm:$0xff]  }
 0x2c8   : > { %6348 = vst [vmem:[#allocation3 + $0x9c] sm:$0xf] %v6347_v57  ;;  %v6533_v26 = vsel %vm14685_vm6, %v6528_v41, %v6532_v48  ;;  %v6541_v27 = vor.u32 %v17825_v32, %v17791_v2  ;;  %13816 = vmatprep.subr.bf16.mxu1 %v14361_v19  ;;  %13786 = vmatprep.mubr.bf16.mxu0 %v12239_v14  ;;  %v6544_v62 = vshll.u32 %v17789_v10, 16  ;;  %v6550_v13 = vrot.slane %v6548_v36, 4  ;;  %v17958_v4 = vld [vmem:[#allocation3 + $0x58] sm:$0xf] }
 0x2c9   : > { %v17937_v59 = vrot.slane %v6583_v54, 4  ;;  %v12212_v0 = vcombine.low %v6523_v24, %v6533_v26  ;;  %v17943_v7 = vrot.slane %v6586_v22, 5  ;;  %v5765_v28 = vadd.f32 %v17894_v12, %v5267_v52 }
 0x2ca   : > { %v6542_v2 = vrot.slane %v6541_v27, 4  ;;  %v6554_v32 = vshll.u32 %v17933_v8, 16  ;;  %v5265_v24 = vadd.f32 %v17896_v3, %v17575_v56  ;;  %v6546_v38 = vrot.slane %v6544_v62, 5 }
 0x2cb   : > { %13731 = vmatmul.mubr.bf16.gmra.mxu1 %v12212_v0  ;;  %v5270_v34 = vadd.f32 %v13660_v23, %v17499_v20  ;;  %v5268_v21 = vadd.f32 %v5225_v60, %v17512_v35  ;;  %v6607_v10 = vshrl.u32 %v6388_v18, 16  ;;  %v5804_v36 = vadd.f32 %v17867_v44, %v5765_v28  ;;  %v14369_v20 = vld [vmem:[%s20107_s3 + $0x80] sm:$0xff]  }
 0x2cc   : > { %v6556_v47 = vrot.slane %v6554_v32, 5  ;;  %v5763_v45 = vadd.f32 %v5710_v6, %v5265_v24  ;;  %v6610_v12 = vshll.u32 %v6388_v18, 16  ;;  %13817 = vmatpush3.bf16.msra.mxu1 %v14361_v19  ;;  %v6547_v1 = vsel %vm14685_vm6, %v6542_v2, %v6546_v38  ;;  %v17984_v24 = vld [vmem:[#allocation3 + $0x44] sm:$0x1] }
 0x2cd   : > { %v6551_v56 = vor.u32 %v6550_v13, %v6546_v38  ;;  %v5768_v3 = vadd.f32 %v13708_v9, %v5270_v34  ;;  %v5766_v31 = vadd.f32 %v5723_v30, %v5268_v21  ;;  %13818 = vmatprep.subr.bf16.mxu1 %v14365_v63  ;;  %v5836_v35 = vmax.f32 %v5804_v36, 0.0  ;;  %v17982_v9 = vld [vmem:[%s20107_s3 + $0x138] sm:$0xff]   ;;  %v6357_v34 = vld [vmem:[#allocation3 + $0xb0] sm:$0x1] }
 0x2ce   : > { %v5802_v23 = vadd.f32 %v17867_v44, %v5763_v45  ;;  %v17966_v6 = vrot.slane %v6607_v10, 4  ;;  %v17968_v5 = vrot.slane %v6610_v12, 5  ;;  %v6620_v41 = vshrl.u32 %v17958_v4, 16 }
 0x2cf   : > { %v6552_v15 = vrot.slane %v6551_v56, 4  ;;  %v5807_v19 = vadd.f32 %v17867_v44, %v5768_v3  ;;  %v5805_v17 = vadd.f32 %v17867_v44, %v5766_v31  ;;  %v12690_v48 = vpack.c.bf16 %v5836_v35, %v5836_v35  ;;  %v6367_v31 = vld [vmem:[#allocation3 + $0xc0] sm:$0xf] }
 0x2d0   : > { %v5834_v54 = vmax.f32 %v5802_v23, 0.0  ;;  %v12240_v57 = vcombine.low %v6388_v18, %v17958_v4  ;;  %v6565_v22 = vor.u32 %v17871_v53, %v17861_v40  ;;  %13819 = vmatpush3.bf16.msra.mxu1 %v14365_v63  ;;  %v6568_v27 = vshll.u32 %v17853_v43, 16 }
 0x2d1   : > { %v6557_v14 = vsel %vm14685_vm6, %v6552_v15, %v6556_v47  ;;  %v5839_v26 = vmax.f32 %v5807_v19, 0.0  ;;  %v5837_v52 = vmax.f32 %v5805_v17, 0.0  ;;  %13820 = vmatprep.subr.bf16.mxu1 %v14369_v20  ;;  %v6167_v60 = vshrl.u32 %v12690_v48, 16  ;;  %v6360_v17 = vld [vmem:[#allocation3 + $0xb4] sm:$0xf] }
 0x2d2   : > { %v6170_v0 = vshll.u32 %v12690_v48, 16  ;;  %v12213_v18 = vcombine.low %v6547_v1, %v6557_v14  ;;  %v12688_v62 = vpack.c.bf16 %v5834_v54, %v5834_v54  ;;  %13787 = vmatmul.mubr.bf16.gmra.mxu0 %v12240_v57  ;;  %v6566_v13 = vrot.slane %v6565_v22, 4  ;;  %v6350_v1 = vld [vmem:[#allocation3 + $0xa4] sm:$0x1]  ;;  %v6390_v48 = vld [vmem:[#allocation3 + $0x60] sm:$0xf]  ;;  %v13661_v54 = vpop.f32.mrf.mxu1 }
 0x2d3   : > { %v12693_v40 = vpack.c.bf16 %v5839_v26, %v5839_v26  ;;  %v12691_v53 = vpack.c.bf16 %v5837_v52, %v5837_v52  ;;  %v6570_v63 = vrot.slane %v6568_v27, 5  ;;  %v6169_v28 = vrot.slane %v6167_v60, 7  ;;  %v18006_v26 = vld [vmem:[#allocation3 + $0x64] sm:$0xf] }
 0x2d4   : > { %13734 = vmatprep.mubr.bf16.mxu1 %v12213_v18  ;;  %v6150_v2 = vshrl.u32 %v12688_v62, 16  ;;  %v6153_v32 = vshll.u32 %v12688_v62, 16  ;;  %v6574_v38 = vrot.slane %v6572_v58, 4  ;;  %13821 = vmatpush3.bf16.msra.mxu1 %v14369_v20  ;;  %v6578_v20 = vshll.u32 %v17984_v24, 16 }
 0x2d5   : > { %v6193_v21 = vshrl.u32 %v12693_v40, 16  ;;  %v6196_v10 = vshll.u32 %v12693_v40, 16  ;;  %v6176_v36 = vshrl.u32 %v12691_v53, 16  ;;  %v6179_v47 = vshll.u32 %v12691_v53, 16  ;;  %13902 = vmatprep.subr.bf16.mxu1 %v17982_v9 }
 0x2d6   : > { %v6172_v45 = vor.u32 %v6170_v0, %v6169_v28  ;;  %v6174_v30 = vrot.slane %v6169_v28, 4  ;;  %v6152_v12 = vrot.slane %v6150_v2, 7  ;;  %v6571_v56 = vsel %vm14685_vm6, %v6566_v13, %v6570_v63  ;;  %v18014_v0 = vld [vmem:[#allocation3 + $0x50] sm:$0x1]  ;;  %v13709_v28 = vpop.f32.mrf.mxu0  ;;  %v5228_v2 = vpop.f32.mrf.mxu1 }
 0x2d7   : > { %v17991_v3 = vrot.slane %v6193_v21, 7  ;;  %v17993_v43 = vrot.slane %v6176_v36, 7  ;;  %v6575_v58 = vor.u32 %v6574_v38, %v6570_v63  ;;  %v6580_v60 = vrot.slane %v6578_v20, 5 }
 0x2d8   : > { %v6173_v35 = vsel %vm14709_vm10, %v6165_v25, %v6172_v45  ;;  %v6358_v23 = vsel %vm17598_vm1, %v6174_v30, %v6357_v34  ;;  %v6155_v15 = vor.u32 %v6153_v32, %v6152_v12  ;;  %v6157_v19 = vrot.slane %v6152_v12, 4  ;;  %v6392_v32 = vld [vmem:[#allocation3 + $0x6c] sm:$0xf] }
 0x2d9   : > { %6356 = vst [vmem:[#allocation3 + $0xac] sm:$0xf] %v6173_v35  ;;  %6359 = vst [vmem:[#allocation3 + $0xb0] sm:$0x1] %v6358_v23  ;;  %v6198_v57 = vor.u32 %v6196_v10, %v17991_v3  ;;  %v6199_v22 = vrot.slane %v17991_v3, 4  ;;  %v6181_v14 = vor.u32 %v6179_v47, %v17993_v43  ;;  %v6182_v11 = vrot.slane %v17993_v43, 4 }
 0x2da   : > { %v6156_v25 = vsel %vm14709_vm10, %v6148_v16, %v6155_v15  ;;  %v6351_v52 = vsel %vm17598_vm1, %v6157_v19, %v6350_v1  ;;  %v6576_v27 = vrot.slane %v6575_v58, 4  ;;  %v6631_v40 = vshrl.u32 %v6390_v48, 16  ;;  %v18031_v10 = vld [vmem:[#allocation3 + $0x70] sm:$0xf]  ;;  %v5726_v58 = vpop.f32.mrf.mxu0  ;;  %v18040_v35 = vld [vmem:[#allocation3 + $0x5c] sm:$0x1] }
 0x2db   : > { %6349 = vst [vmem:[#allocation3 + $0xa0] sm:$0xf] %v6156_v25  ;;  %6352 = vst [vmem:[#allocation3 + $0xa4] sm:$0x1] %v6351_v52  ;;  %v6368_v18 = vsel %vm17585_vm0, %v6198_v57, %v6367_v31  ;;  %v6361_v62 = vsel %vm17585_vm0, %v6181_v14, %v6360_v17  ;;  %v6634_v33 = vshll.u32 %v6390_v48, 16  ;;  %v6644_v53 = vshrl.u32 %v18006_v26, 16 }
 0x2dc   : > { %6369 = vst [vmem:[#allocation3 + $0xc0] sm:$0xf] %v6368_v18  ;;  %6362 = vst [vmem:[#allocation3 + $0xb4] sm:$0xf] %v6361_v62  ;;  %v6581_v16 = vsel %vm14685_vm6, %v6576_v27, %v6580_v60  ;;  %v12241_v13 = vcombine.low %v6390_v48, %v18006_v26  ;;  %v5271_v63 = vadd.f32 %v13661_v54, %v17523_v42  ;;  %v18025_v34 = vrot.slane %v6631_v40, 4 }
 0x2dd   : > { %v12214_v38 = vcombine.low %v6571_v56, %v6581_v16  ;;  %v18027_v49 = vrot.slane %v6634_v33, 5  ;;  %v6589_v21 = vor.u32 %v17943_v7, %v17937_v59  ;;  %v6592_v47 = vshll.u32 %v17914_v51, 16  ;;  %v6394_v17 = vld [vmem:[#allocation3 + $0x78] sm:$0xf]  ;;  %v18056_v60 = vld [vmem:[#allocation3 + $0x7c] sm:$0xf] }
 0x2de   : > { %13790 = vmatprep.mubr.bf16.mxu0 %v12241_v13  ;;  %v5769_v36 = vadd.f32 %v13709_v28, %v5271_v63  ;;  %v6598_v42 = vrot.slane %v6596_v55, 4  ;;  %v6602_v45 = vshll.u32 %v18014_v0, 16  ;;  %v5269_v12 = vadd.f32 %v5228_v2, %v17578_v29  ;;  %v6400_v43 = vld [vmem:[#allocation3 + $0x9c] sm:$0xf] }
 0x2df   : > { %13735 = vmatmul.mubr.bf16.gmra.mxu1 %v12214_v38  ;;  %v6590_v30 = vrot.slane %v6589_v21, 4  ;;  %v6655_v1 = vshrl.u32 %v6392_v32, 16  ;;  %v6658_v56 = vshll.u32 %v6392_v32, 16  ;;  %v6594_v59 = vrot.slane %v6592_v47, 5 }
 0x2e0   : > { %v5808_v31 = vadd.f32 %v17867_v44, %v5769_v36  ;;  %v6604_v7 = vrot.slane %v6602_v45, 5  ;;  %v6668_v20 = vshrl.u32 %v18031_v10, 16  ;;  %v5767_v23 = vadd.f32 %v5726_v58, %v5269_v12  ;;  %v6371_v12 = vld [vmem:[#allocation3 + $0xc8] sm:$0x1] }
 0x2e1   : > { %v18042_v15 = vrot.slane %v6655_v1, 4  ;;  %v18044_v55 = vrot.slane %v6658_v56, 5  ;;  %v12242_v19 = vcombine.low %v6392_v32, %v18031_v10  ;;  %v6595_v48 = vsel %vm14685_vm6, %v6590_v30, %v6594_v59  ;;  %v18068_v30 = vld [vmem:[#allocation3 + $0x68] sm:$0x1] }
 0x2e2   : > { %v5840_v29 = vmax.f32 %v5808_v31, 0.0  ;;  %v6599_v54 = vor.u32 %v6598_v42, %v6594_v59  ;;  %v6613_v57 = vor.u32 %v17968_v5, %v17966_v6  ;;  %v5806_v14 = vadd.f32 %v17867_v44, %v5767_v23 }
 0x2e3   : > { %13791 = vmatmul.mubr.bf16.gmra.mxu0 %v12242_v19  ;;  %v6616_v25 = vshll.u32 %v17958_v4, 16  ;;  %v6622_v52 = vrot.slane %v6620_v41, 4  ;;  %v6626_v27 = vshll.u32 %v18040_v35, 16  ;;  %v6679_v33 = vshrl.u32 %v6394_v17, 16 }
 0x2e4   : > { %v12694_v18 = vpack.c.bf16 %v5840_v29, %v5840_v29  ;;  %v6600_v62 = vrot.slane %v6599_v54, 4  ;;  %v6614_v40 = vrot.slane %v6613_v57, 4  ;;  %v5838_v16 = vmax.f32 %v5806_v14, 0.0  ;;  %v6396_v29 = vld [vmem:[#allocation3 + $0x84] sm:$0xf] }
 0x2e5   : > { %v6618_v13 = vrot.slane %v6616_v25, 5  ;;  %v6628_v63 = vrot.slane %v6626_v27, 5  ;;  %v6682_v6 = vshll.u32 %v6394_v17, 16  ;;  %v18060_v2 = vrot.slane %v6679_v33, 4  ;;  %v18078_v14 = vld [vmem:[#allocation3 + $0x88] sm:$0xf] }
 0x2e6   : > { %v6201_v5 = vshrl.u32 %v12694_v18, 16  ;;  %v6204_v44 = vshll.u32 %v12694_v18, 16  ;;  %v6605_v28 = vsel %vm14685_vm6, %v6600_v62, %v6604_v7  ;;  %v12692_v32 = vpack.c.bf16 %v5838_v16, %v5838_v16  ;;  %v6364_v25 = vld [vmem:[#allocation3 + $0xbc] sm:$0x1]  ;;  %v18086_v33 = vld [vmem:[#allocation3 + $0x74] sm:$0x1] }
 0x2e7   : > { %v12215_v41 = vcombine.low %v6595_v48, %v6605_v28  ;;  %v6619_v38 = vsel %vm14685_vm6, %v6614_v40, %v6618_v13  ;;  %v6623_v21 = vor.u32 %v6622_v52, %v6618_v13  ;;  %v18064_v47 = vrot.slane %v6682_v6, 5  ;;  %v18091_v6 = vld [vmem:[#allocation3 + $0x94] sm:$0xf] }
 0x2e8   : > { %v6203_v36 = vrot.slane %v6201_v5, 7  ;;  %v6692_v42 = vshrl.u32 %v18056_v60, 16  ;;  %v12243_v45 = vcombine.low %v6394_v17, %v18056_v60  ;;  %v6184_v1 = vshrl.u32 %v12692_v32, 16 }
 0x2e9   : > { %13738 = vmatprep.mubr.bf16.mxu1 %v12215_v41  ;;  %v6187_v56 = vshll.u32 %v12692_v32, 16  ;;  %v6624_v31 = vrot.slane %v6623_v21, 4  ;;  %v6637_v59 = vor.u32 %v18027_v49, %v18025_v34  ;;  %v6640_v23 = vshll.u32 %v18006_v26, 16 }
 0x2ea   : > { %v6206_v7 = vor.u32 %v6204_v44, %v6203_v36  ;;  %v6208_v58 = vrot.slane %v6203_v36, 4  ;;  %13794 = vmatprep.mubr.bf16.mxu0 %v12243_v45  ;;  %v6646_v19 = vrot.slane %v6644_v53, 4  ;;  %v6186_v17 = vrot.slane %v6184_v1, 7  ;;  %v18103_v45 = vld [vmem:[#allocation3 + $0x80] sm:$0x1] }
 0x2eb   : > { %v6629_v48 = vsel %vm14685_vm6, %v6624_v31, %v6628_v63  ;;  %v6638_v54 = vrot.slane %v6637_v59, 4  ;;  %v6650_v57 = vshll.u32 %v18068_v30, 16  ;;  %v6642_v52 = vrot.slane %v6640_v23, 5  ;;  %v6398_v63 = vld [vmem:[#allocation3 + $0x90] sm:$0xf] }
 0x2ec   : > { %v6207_v34 = vsel %vm14709_vm10, %v6199_v22, %v6206_v7  ;;  %v6372_v49 = vsel %vm17598_vm1, %v6208_v58, %v6371_v12  ;;  %v12216_v53 = vcombine.low %v6619_v38, %v6629_v48  ;;  %v6189_v27 = vor.u32 %v6187_v56, %v6186_v17 }
 0x2ed   : > { %6370 = vst [vmem:[#allocation3 + $0xc4] sm:$0xf] %v6207_v34  ;;  %6373 = vst [vmem:[#allocation3 + $0xc8] sm:$0x1] %v6372_v49  ;;  %v6191_v18 = vrot.slane %v6186_v17, 4  ;;  %v6652_v62 = vrot.slane %v6650_v57, 5  ;;  %v6643_v3 = vsel %vm14685_vm6, %v6638_v54, %v6642_v52  ;;  %v6647_v16 = vor.u32 %v6646_v19, %v6642_v52 }
 0x2ee   : > { %v6703_v40 = vshrl.u32 %v6396_v29, 16  ;;  %13739 = vmatmul.mubr.bf16.gmra.mxu1 %v12216_v53  ;;  %v6706_v22 = vshll.u32 %v6396_v29, 16  ;;  %v6716_v13 = vshrl.u32 %v18078_v14, 16  ;;  %v6190_v5 = vsel %vm14709_vm10, %v6182_v11, %v6189_v27  ;;  %v18123_v27 = vld [vmem:[#allocation3 + $0x8c] sm:$0x1] }
 0x2ef   : > { %v6365_v44 = vsel %vm17598_vm1, %v6191_v18, %v6364_v25  ;;  %v12244_v41 = vcombine.low %v6396_v29, %v18078_v14  ;;  %6363 = vst [vmem:[#allocation3 + $0xb8] sm:$0xf] %v6190_v5  ;;  %v6648_v32 = vrot.slane %v6647_v16, 4  ;;  %v6661_v21 = vor.u32 %v18044_v55, %v18042_v15  ;;  %v18111_v55 = vld [vmem:[#allocation3 + $0xa0] sm:$0xf] }
 0x2f0   : > { %v6705_v28 = vrot.slane %v6703_v40, 4  ;;  %6366 = vst [vmem:[#allocation3 + $0xbc] sm:$0x1] %v6365_v44  ;;  %v6708_v38 = vrot.slane %v6706_v22, 5  ;;  %v6664_v36 = vshll.u32 %v18031_v10, 16  ;;  %v6670_v46 = vrot.slane %v6668_v20, 4 }
 0x2f1   : > { %13795 = vmatmul.mubr.bf16.gmra.mxu0 %v12244_v41  ;;  %v6674_v37 = vshll.u32 %v18086_v33, 16  ;;  %v6727_v11 = vshrl.u32 %v6398_v63, 16  ;;  %v6730_v12 = vshll.u32 %v6398_v63, 16  ;;  %v6653_v1 = vsel %vm14685_vm6, %v6648_v32, %v6652_v62  ;;  %v6402_v40 = vld [vmem:[#allocation3 + $0xa8] sm:$0xf] }
 0x2f2   : > { %v6662_v56 = vrot.slane %v6661_v21, 4  ;;  %v6666_v31 = vrot.slane %v6664_v36, 5  ;;  %v6740_v15 = vshrl.u32 %v18091_v6, 16  ;;  %v12217_v59 = vcombine.low %v6643_v3, %v6653_v1 }
 0x2f3   : > { %v6676_v7 = vrot.slane %v6674_v37, 5  ;;  %v6729_v58 = vrot.slane %v6727_v11, 4  ;;  %v6732_v23 = vrot.slane %v6730_v12, 5  ;;  %v12245_v29 = vcombine.low %v6398_v63, %v18091_v6  ;;  %v18131_v63 = vld [vmem:[#allocation3 + $0xac] sm:$0xf] }
 0x2f4   : > { %v6667_v20 = vsel %vm14685_vm6, %v6662_v56, %v6666_v31  ;;  %v6671_v19 = vor.u32 %v6670_v46, %v6666_v31  ;;  %v6685_v17 = vor.u32 %v18064_v47, %v18060_v2  ;;  %13742 = vmatprep.mubr.bf16.mxu1 %v12217_v59  ;;  %v6688_v48 = vshll.u32 %v18056_v60, 16  ;;  %v18138_v12 = vld [vmem:[#allocation3 + $0x98] sm:$0x1]  ;;  %v6404_v59 = vld [vmem:[#allocation3 + $0xb4] sm:$0xf] }
 0x2f5   : > { %v6694_v54 = vrot.slane %v6692_v42, 4  ;;  %v6698_v57 = vshll.u32 %v18103_v45, 16  ;;  %v6751_v34 = vshrl.u32 %v6400_v43, 16  ;;  %13798 = vmatprep.mubr.bf16.mxu0 %v12245_v29  ;;  %v6754_v53 = vshll.u32 %v6400_v43, 16 }
 0x2f6   : > { %v6672_v49 = vrot.slane %v6671_v19, 4  ;;  %v6686_v25 = vrot.slane %v6685_v17, 4  ;;  %v6764_v52 = vshrl.u32 %v18111_v55, 16  ;;  %v6690_v18 = vrot.slane %v6688_v48, 5  ;;  %v18145_v17 = vld [vmem:[#allocation3 + $0xb8] sm:$0xf] }
 0x2f7   : > { %v6700_v62 = vrot.slane %v6698_v57, 5  ;;  %v18125_v2 = vrot.slane %v6751_v34, 4  ;;  %v12246_v47 = vcombine.low %v6400_v43, %v18111_v55  ;;  %v6756_v3 = vrot.slane %v6754_v53, 5 }
 0x2f8   : > { %v6677_v42 = vsel %vm14685_vm6, %v6672_v49, %v6676_v7  ;;  %v6709_v16 = vor.u32 %v6708_v38, %v6705_v28  ;;  %v6712_v22 = vshll.u32 %v18078_v14, 16  ;;  %v6691_v44 = vsel %vm14685_vm6, %v6686_v25, %v6690_v18 }
 0x2f9   : > { %v12218_v5 = vcombine.low %v6667_v20, %v6677_v42  ;;  %v6695_v41 = vor.u32 %v6694_v54, %v6690_v18  ;;  %13799 = vmatmul.mubr.bf16.gmra.mxu0 %v12246_v47  ;;  %v6718_v32 = vrot.slane %v6716_v13, 4  ;;  %v6722_v43 = vshll.u32 %v18123_v27, 16  ;;  %v18154_v42 = vld [vmem:[#allocation3 + $0xb0] sm:$0x1] }
 0x2fa   : > { %v6710_v21 = vrot.slane %v6709_v16, 4  ;;  %v6714_v36 = vrot.slane %v6712_v22, 5  ;;  %v6775_v46 = vshrl.u32 %v6402_v40, 16  ;;  %v6778_v11 = vshll.u32 %v6402_v40, 16 }
 0x2fb   : > { %13743 = vmatmul.mubr.bf16.gmra.mxu1 %v12218_v5  ;;  %v6696_v37 = vrot.slane %v6695_v41, 4  ;;  %v6788_v28 = vshrl.u32 %v18131_v63, 16  ;;  %v12247_v38 = vcombine.low %v6402_v40, %v18131_v63  ;;  %v6724_v31 = vrot.slane %v6722_v43, 5  ;;  %v18152_v40 = vld [vmem:[#allocation3 + $0xa4] sm:$0x1] }
 0x2fc   : > { %v6715_v1 = vsel %vm14685_vm6, %v6710_v21, %v6714_v36  ;;  %v6719_v56 = vor.u32 %v6718_v32, %v6714_v36  ;;  %v6777_v13 = vrot.slane %v6775_v46, 4  ;;  %v6780_v20 = vrot.slane %v6778_v11, 5 }
 0x2fd   : > { %v6701_v7 = vsel %vm14685_vm6, %v6696_v37, %v6700_v62  ;;  %13802 = vmatprep.mubr.bf16.mxu0 %v12247_v38  ;;  %v6733_v19 = vor.u32 %v6732_v23, %v6729_v58  ;;  %v6736_v29 = vshll.u32 %v18091_v6, 16  ;;  %v6742_v57 = vrot.slane %v6740_v15, 4 }
 0x2fe   : > { %v12219_v48 = vcombine.low %v6691_v44, %v6701_v7  ;;  %v6720_v54 = vrot.slane %v6719_v56, 4  ;;  %v6746_v34 = vshll.u32 %v18138_v12, 16  ;;  %v6799_v53 = vshrl.u32 %v6404_v59, 16  ;;  %v14366_v44 = vld [vmem:[#allocation3 + $0xc] sm:$0xff]  }
 0x2ff   : > { %v6734_v49 = vrot.slane %v6733_v19, 4  ;;  %v6738_v25 = vrot.slane %v6736_v29, 5  ;;  %v6802_v18 = vshll.u32 %v6404_v59, 16  ;;  %v6812_v58 = vshrl.u32 %v18145_v17, 16  ;;  %v18165_v19 = vld [vmem:[#allocation3 + $0xbc] sm:$0x1] }
 0x300   : > { %13746 = vmatprep.mubr.bf16.mxu1 %v12219_v48  ;;  %v6725_v62 = vsel %vm14685_vm6, %v6720_v54, %v6724_v31  ;;  %v6748_v47 = vrot.slane %v6746_v34, 5  ;;  %v12248_v23 = vcombine.low %v6404_v59, %v18145_v17  ;;  %v6801_v5 = vrot.slane %v6799_v53, 4  ;;  %v7417_v59 = vld [vmem:[#allocation3] sm:$0xe]  ;;  %v14368_v53 = vld [vmem:[#allocation3 + $0x18] sm:$0xff]  }
 0x301   : > { %v12220_v15 = vcombine.low %v6715_v1, %v6725_v62  ;;  %v6739_v16 = vsel %vm14685_vm6, %v6734_v49, %v6738_v25  ;;  %v6743_v22 = vor.u32 %v6742_v57, %v6738_v25  ;;  %v6804_v41 = vrot.slane %v6802_v18, 5  ;;  %v7418_v49 = vld [vmem:[#allocation3 + $0xc] sm:$0xe] }
 0x302   : > { %13803 = vmatmul.mubr.bf16.gmra.mxu0 %v12248_v23  ;;  %v6757_v32 = vor.u32 %v6756_v3, %v18125_v2  ;;  %v6760_v21 = vshll.u32 %v18111_v55, 16  ;;  %v6766_v36 = vrot.slane %v6764_v52, 4  ;;  %v6770_v46 = vshll.u32 %v18152_v40, 16 }
 0x303   : > { %13747 = vmatmul.mubr.bf16.gmra.mxu1 %v12220_v15  ;;  %v6744_v43 = vrot.slane %v6743_v22, 4  ;;  %13870 = vmatprep.mubr.bf16.mxu0 %v14366_v44  ;;  %v6781_v37 = vor.u32 %v6780_v20, %v6777_v13  ;;  %v6784_v11 = vshll.u32 %v18131_v63, 16  ;;  %v6790_v56 = vrot.slane %v6788_v28, 4  ;;  %v14370_v22 = vld [vmem:[#allocation3 + $0x24] sm:$0xff]  }
 0x304   : > { %v6758_v38 = vrot.slane %v6757_v32, 4  ;;  %v6762_v1 = vrot.slane %v6760_v21, 5  ;;  %v6794_v31 = vshll.u32 %v18154_v42, 16  ;;  %v6772_v3 = vrot.slane %v6770_v46, 5  ;;  %v14477_v44 = vld [vmem:[#allocation3 + $0x4] sm:$0xf] }
 0x305   : > { %v6749_v2 = vsel %vm14685_vm6, %v6744_v43, %v6748_v47  ;;  %v6782_v7 = vrot.slane %v6781_v37, 4  ;;  %v6786_v52 = vrot.slane %v6784_v11, 5  ;;  %v6805_v57 = vor.u32 %v6804_v41, %v6801_v5  ;;  %v14378_v5 = vld [vmem:[%s20107_s3 + $0x170] sm:$0xff]  }
 0x306   : > { %v12221_v29 = vcombine.low %v6739_v16, %v6749_v2  ;;  %v6763_v13 = vsel %vm14685_vm6, %v6758_v38, %v6762_v1  ;;  %v6767_v20 = vor.u32 %v6766_v36, %v6762_v1  ;;  %v6796_v48 = vrot.slane %v6794_v31, 5  ;;  %v14478_v36 = vld [vmem:[#allocation3 + $0x8] sm:$0x1]  ;;  %v7419_v46 = vld [vmem:[#allocation3 + $0x18] sm:$0xe]  ;;  %v20678_v31 = vld [vmem:[#allocation5_spill] sm:$0xff] }
 0x307   : > { %v6787_v28 = vsel %vm14685_vm6, %v6782_v7, %v6786_v52  ;;  %v6791_v54 = vor.u32 %v6790_v56, %v6786_v52  ;;  %v6808_v34 = vshll.u32 %v18145_v17, 16  ;;  %v6814_v18 = vrot.slane %v6812_v58, 4  ;;  %v7420_v52 = vld [vmem:[#allocation3 + $0x24] sm:$0xe] }
 0x308   : > { %13750 = vmatprep.mubr.bf16.mxu1 %v12221_v29  ;;  %v6768_v25 = vrot.slane %v6767_v20, 4  ;;  %v6818_v62 = vshll.u32 %v18165_v19, 16  ;;  %v12257_v47 = vrot.slane %v7417_v59, 9  ;;  %v6806_v15 = vrot.slane %v6805_v57, 4 }
 0x309   : > { %v6792_v23 = vrot.slane %v6791_v54, 4  ;;  %v6810_v16 = vrot.slane %v6808_v34, 5  ;;  %v7467_v32 = vrot.slane %v14477_v44, 5  ;;  %v7470_v58 = vrot.slane %v14478_v36, 5  ;;  %v14481_v54 = vld [vmem:[#allocation3 + $0x1c] sm:$0xf] }
 0x30a   : > { %v6773_v41 = vsel %vm14685_vm6, %v6768_v25, %v6772_v3  ;;  %13871 = vmatmul.mubr.bf16.vlgmr.msra.gmra.mxu0 %v14368_v53  ;;  %v6820_v21 = vrot.slane %v6818_v62, 5  ;;  %v12258_v43 = vrot.slane %v7418_v49, 9  ;;  %v14479_v3 = vld [vmem:[#allocation3 + $0x10] sm:$0xf]  ;;  %v7481_v57 = vrot.slane %v14481_v54, 5 }
 0x30b   : > { %v12222_v37 = vcombine.low %v6763_v13, %v6773_v41  ;;  %v6797_v11 = vsel %vm14685_vm6, %v6792_v23, %v6796_v48  ;;  %v6811_v38 = vsel %vm14685_vm6, %v6806_v15, %v6810_v16  ;;  %v6815_v1 = vor.u32 %v6814_v18, %v6810_v16  ;;  %13874 = vmatprep.mubr.bf16.mxu0 %v14370_v22  ;;  %v14480_v13 = vld [vmem:[#allocation3 + $0x14] sm:$0x1]  ;;  %v14482_v25 = vld [vmem:[#allocation3 + $0x20] sm:$0x1]  ;;  %v7421_v18 = vld [vmem:[#allocation3 + $0x30] sm:$0xe] }
 0x30c   : > { %v12223_v56 = vcombine.low %v6787_v28, %v6797_v11  ;;  %v18184_v59 = vsel %vm15120_vm13, %v12257_v47, %v7467_v32  ;;  %v7469_v2 = vrot.slane %v7467_v32, 4  ;;  %v7474_v7 = vrot.slane %v14479_v3, 5  ;;  %13951 = vmatpush3.bf16.msra.mxu0 %v17844_v61  ;;  %v14382_v28 = vld [vmem:[%s20107_s3 + $0x168] sm:$0xff]   ;;  %v14483_v41 = vld [vmem:[#allocation3 + $0x28] sm:$0xf] }
 0x30d   : > { %13751 = vmatmul.mubr.bf16.gmra.mxu1 %v12222_v37  ;;  %v6816_v29 = vrot.slane %v6815_v1, 4  ;;  %v7477_v20 = vrot.slane %v14480_v13, 5  ;;  %v12259_v48 = vrot.slane %v7419_v46, 9  ;;  %13952 = vmatprep.subr.bf16.mxu0 %v14378_v5  ;;  %v7484_v53 = vrot.slane %v14482_v25, 5  ;;  %v14371_v22 = vld [vmem:[#allocation3 + $0x30] sm:$0xff]   ;;  %v14386_v1 = vld [vmem:[%s20107_s3 + $0x160] sm:$0xff]  }
 0x30e   : > { %13754 = vmatprep.mubr.bf16.mxu1 %v12223_v56  ;;  %v7471_v34 = vsel %vm15120_vm13, %v7469_v2, %v7470_v58  ;;  %v18194_v61 = vsel %vm15120_vm13, %v12258_v43, %v7474_v7  ;;  %v7476_v49 = vrot.slane %v7474_v7, 4  ;;  %v7483_v15 = vrot.slane %v7481_v57, 4  ;;  %v7422_v58 = vld [vmem:[#allocation3 + $0x3c] sm:$0xe]  ;;  %v14484_v2 = vld [vmem:[#allocation3 + $0x34] sm:$0xf] }
 0x30f   : > { %v6821_v62 = vsel %vm14685_vm6, %v6816_v29, %v6820_v21  ;;  %v12289_v47 = vcombine.low %v18184_v59, %v7471_v34  ;;  %v18201_v23 = vsel %vm15120_vm13, %v12259_v48, %v7481_v57  ;;  %v12260_v32 = vrot.slane %v7420_v52, 9  ;;  %v14372_v43 = vld [vmem:[#allocation3 + $0x3c] sm:$0xff]  }
 0x310   : > { %v12224_v16 = vcombine.low %v6811_v38, %v6821_v62  ;;  %v18205_v44 = vsel %vm15120_vm13, %v7476_v49, %v7477_v20  ;;  %v7488_v36 = vrot.slane %v14483_v41, 5  ;;  %13953 = vmatpush3.bf16.msra.mxu0 %v14378_v5  ;;  %v18211_v46 = vsel %vm15120_vm13, %v7483_v15, %v7484_v53  ;;  %v7423_v38 = vld [vmem:[#allocation3 + $0x48] sm:$0xe]  ;;  %v14485_v52 = vld [vmem:[#allocation3 + $0x40] sm:$0xf] }
 0x311   : > { %v12290_v21 = vcombine.low %v18194_v61, %v18205_v44  ;;  %v7491_v37 = vrot.slane %v17887_v50, 5  ;;  %v12261_v11 = vrot.slane %v7421_v18, 9  ;;  %13954 = vmatprep.subr.bf16.mxu0 %v14382_v28  ;;  %v12291_v5 = vcombine.low %v18201_v23, %v18211_v46  ;;  %v7424_v20 = vld [vmem:[#allocation3 + $0x54] sm:$0xe]  ;;  %v14390_v53 = vld [vmem:[%s20107_s3 + $0x158] sm:$0xff]  }
 0x312   : > { %13875 = vmatmul.mubr.bf16.gmra.mxu0 %v14371_v22  ;;  %v18221_v56 = vsel %vm15120_vm13, %v12260_v32, %v7488_v36  ;;  %v7490_v59 = vrot.slane %v7488_v36, 4  ;;  %v7495_v3 = vrot.slane %v14484_v2, 5  ;;  %v7498_v50 = vrot.slane %v17933_v8, 5  ;;  %v7426_v41 = vld [vmem:[#allocation3 + $0x6c] sm:$0xe]  ;;  %v14381_v23 = vld [vmem:[%s20107_s3 + $0x128] sm:$0xff]  }
 0x313   : > { %13878 = vmatprep.mubr.bf16.mxu0 %v14372_v43  ;;  %v12262_v7 = vrot.slane %v7422_v58, 9  ;;  %v7502_v29 = vrot.slane %v14485_v52, 5  ;;  %v7505_v13 = vrot.slane %v17984_v24, 5  ;;  %v12263_v34 = vrot.slane %v7423_v38, 9  ;;  %v14375_v36 = vld [vmem:[#allocation3 + $0x48] sm:$0xff]   ;;  %v14376_v58 = vld [vmem:[#allocation3 + $0x54] sm:$0xff]  }
 0x314   : > { %v18227_v48 = vsel %vm15120_vm13, %v7490_v59, %v7491_v37  ;;  %v18231_v54 = vsel %vm15120_vm13, %v12261_v11, %v7495_v3  ;;  %v7497_v57 = vrot.slane %v7495_v3, 4  ;;  %13955 = vmatpush3.bf16.msra.mxu0 %v14382_v28  ;;  %v7509_v25 = vrot.slane %v17914_v51, 5  ;;  %v7427_v3 = vld [vmem:[#allocation3 + $0x78] sm:$0xe] }
 0x315   : > { %13755 = vmatmul.mubr.bf16.gmra.mxu1 %v12224_v16  ;;  %v12292_v8 = vcombine.low %v18221_v56, %v18227_v48  ;;  %v18237_v49 = vsel %vm15120_vm13, %v12262_v7, %v7502_v29  ;;  %v7504_v24 = vrot.slane %v7502_v29, 4  ;;  %13956 = vmatprep.subr.bf16.mxu0 %v14386_v1  ;;  %v7512_v18 = vrot.slane %v18014_v0, 5  ;;  %v7425_v16 = vld [vmem:[#allocation3 + $0x60] sm:$0xe] }
 0x316   : > { %13822 = vmatprep.mubr.bf16.mxu1 %v12289_v47  ;;  %v18245_v28 = vsel %vm15120_vm13, %v7497_v57, %v7498_v50  ;;  %v12264_v62 = vrot.slane %v7424_v20, 9  ;;  %v7516_v15 = vrot.slane %v17958_v4, 5  ;;  %v18257_v47 = vsel %vm15120_vm13, %v12263_v34, %v7509_v25  ;;  %v14394_v50 = vld [vmem:[%s20107_s3 + $0x150] sm:$0xff]  }
 0x317   : > { %v12293_v22 = vcombine.low %v18231_v54, %v18245_v28  ;;  %v18253_v51 = vsel %vm15120_vm13, %v7504_v24, %v7505_v13  ;;  %v7511_v32 = vrot.slane %v7509_v25, 4  ;;  %v7519_v37 = vrot.slane %v18040_v35, 5 }
 0x318   : > { %v12294_v0 = vcombine.low %v18237_v49, %v18253_v51  ;;  %v18263_v4 = vsel %vm15120_vm13, %v12264_v62, %v7516_v15  ;;  %v7518_v43 = vrot.slane %v7516_v15, 4  ;;  %13957 = vmatpush3.bf16.msra.mxu0 %v14386_v1  ;;  %v12265_v38 = vrot.slane %v7425_v16, 9  ;;  %v7429_v16 = vld [vmem:[#allocation3 + $0x90] sm:$0xe] }
 0x319   : > { %v18268_v11 = vsel %vm15120_vm13, %v7511_v32, %v7512_v18  ;;  %v7523_v59 = vrot.slane %v18006_v26, 5  ;;  %v7526_v2 = vrot.slane %v18068_v30, 5  ;;  %13958 = vmatprep.subr.bf16.mxu0 %v14390_v53  ;;  %v12266_v7 = vrot.slane %v7426_v41, 9  ;;  %v7428_v26 = vld [vmem:[#allocation3 + $0x84] sm:$0xe]  ;;  %v14377_v30 = vld [vmem:[%s20107_s3 + $0x130] sm:$0xff]  }
 0x31a   : > { %13879 = vmatmul.mubr.bf16.gmra.mxu0 %v14375_v36  ;;  %v12295_v35 = vcombine.low %v18257_v47, %v18268_v11  ;;  %v18279_v1 = vsel %vm15120_vm13, %v7518_v43, %v7519_v37  ;;  %v7530_v52 = vrot.slane %v18031_v10, 5  ;;  %v7533_v57 = vrot.slane %v18086_v33, 5  ;;  %v18333_v41 = vld [vmem:[#allocation3 + $0x10] sm:$0xf]  ;;  %v14379_v36 = vld [vmem:[#allocation3 + $0x60] sm:$0xff]  }
 0x31b   : > { %13882 = vmatprep.mubr.bf16.mxu0 %v14376_v58  ;;  %v12296_v29 = vcombine.low %v18263_v4, %v18279_v1  ;;  %v18289_v13 = vsel %vm15120_vm13, %v12265_v38, %v7523_v59  ;;  %v7525_v20 = vrot.slane %v7523_v59, 4  ;;  %v12267_v24 = vrot.slane %v7427_v3, 9  ;;  %v18341_v59 = vld [vmem:[#allocation3 + $0x14] sm:$0x1] }
 0x31c   : > { %v18294_v34 = vsel %vm15120_vm13, %v12266_v7, %v7530_v52  ;;  %v7532_v10 = vrot.slane %v7530_v52, 4  ;;  %v7537_v25 = vrot.slane %v18056_v60, 5  ;;  %13959 = vmatpush3.bf16.msra.mxu0 %v14390_v53  ;;  %v7540_v62 = vrot.slane %v18103_v45, 5  ;;  %v14396_v60 = vld [vmem:[%s20107_s3 + $0x148] sm:$0xff]   ;;  %v9039_v53 = vld [vmem:[#allocation3 + $0xc] sm:$0xe] }
 0x31d   : > { %13823 = vmatmul.mubr.bf16.vlgmr.msra.gmra.mxu1 %v12290_v21  ;;  %v18302_v18 = vsel %vm15120_vm13, %v7525_v20, %v7526_v2  ;;  %v12268_v33 = vrot.slane %v7428_v26, 9  ;;  %v7544_v15 = vrot.slane %v18078_v14, 5  ;;  %13960 = vmatprep.subr.bf16.mxu0 %v14394_v50  ;;  %v7430_v21 = vld [vmem:[#allocation3 + $0x9c] sm:$0xe]  ;;  %v7547_v32 = vrot.slane %v18123_v27, 5  ;;  %v14380_v2 = vld [vmem:[#allocation3 + $0x6c] sm:$0xff]  }
 0x31e   : > { %13826 = vmatprep.mubr.bf16.mxu1 %v12291_v5  ;;  %13903 = vmatpush3.bf16.msra.mxu1 %v17982_v9  ;;  %v12297_v61 = vcombine.low %v18289_v13, %v18302_v18  ;;  %v18317_v45 = vsel %vm15120_vm13, %v7532_v10, %v7533_v57  ;;  %v18321_v14 = vsel %vm15120_vm13, %v12267_v24, %v7537_v25  ;;  %v7539_v44 = vrot.slane %v7537_v25, 4  ;;  %v7431_v26 = vld [vmem:[#allocation3 + $0xa8] sm:$0xe]  ;;  %v9040_v10 = vld [vmem:[#allocation3 + $0x18] sm:$0xe]  ;;  %v18524_v13 = vld [vmem:[%s20107_s3 + $0x1b8] sm:$0xff]  }
 0x31f   : > { %13904 = vmatprep.subr.bf16.mxu1 %v14377_v30  ;;  %v12298_v9 = vcombine.low %v18294_v34, %v18317_v45  ;;  %v18330_v46 = vsel %vm15120_vm13, %v12268_v33, %v7544_v15  ;;  %v7546_v5 = vrot.slane %v7544_v15, 4  ;;  %v12269_v43 = vrot.slane %v7429_v16, 9  ;;  %v18368_v33 = vld [vmem:[#allocation3 + $0x1c] sm:$0xf]  ;;  %v18526_v18 = vld [vmem:[#allocation3 + $0x4c] sm:$0xf] }
 0x320   : > { %v18337_v58 = vsel %vm15120_vm13, %v7539_v44, %v7540_v62  ;;  %v7551_v37 = vrot.slane %v18091_v6, 5  ;;  %v7554_v38 = vrot.slane %v18138_v12, 5  ;;  %13961 = vmatpush3.bf16.msra.mxu0 %v14394_v50  ;;  %v12270_v7 = vrot.slane %v7430_v21, 9  ;;  %v14398_v6 = vld [vmem:[%s20107_s3 + $0x140] sm:$0xff]   ;;  %v18376_v21 = vld [vmem:[#allocation3 + $0x20] sm:$0x1] }
 0x321   : > { %v12299_v3 = vcombine.low %v18321_v14, %v18337_v58  ;;  %v18347_v27 = vsel %vm15120_vm13, %v7546_v5, %v7547_v32  ;;  %13962 = vmatprep.subr.bf16.mxu0 %v14396_v60  ;;  %v7558_v52 = vrot.slane %v18111_v55, 5  ;;  %v7561_v57 = vrot.slane %v18152_v40, 5  ;;  %v14385_v55 = vld [vmem:[%s20107_s3 + $0x120] sm:$0xff]   ;;  %v18560_v34 = vld [vmem:[#allocation3 + $0x58] sm:$0xf] }
 0x322   : > { %13905 = vmatpush3.bf16.msra.mxu1 %v14377_v30  ;;  %13883 = vmatmul.mubr.bf16.gmra.mxu0 %v14379_v36  ;;  %v12300_v12 = vcombine.low %v18330_v46, %v18347_v27  ;;  %v18357_v50 = vsel %vm15120_vm13, %v12269_v43, %v7551_v37  ;;  %v7553_v20 = vrot.slane %v7551_v37, 4  ;;  %v12393_v25 = vrot.slane %v9039_v53, 9  ;;  %v18394_v36 = vld [vmem:[%s20107_s3 + $0x1f8] sm:$0xff]  }
 0x323   : > { %13886 = vmatprep.mubr.bf16.mxu0 %v14380_v2  ;;  %13906 = vmatprep.subr.bf16.mxu1 %v14381_v23  ;;  %v18365_v30 = vsel %vm15120_vm13, %v12270_v7, %v7558_v52  ;;  %v7560_v24 = vrot.slane %v7558_v52, 4  ;;  %v9105_v62 = vrot.slane %v18333_v41, 5  ;;  %v9108_v15 = vrot.slane %v18341_v59, 5  ;;  %v9041_v37 = vld [vmem:[#allocation3 + $0x24] sm:$0xe]  ;;  %v14383_v52 = vld [vmem:[#allocation3 + $0x78] sm:$0xff]  }
 0x324   : > { %v18372_v40 = vsel %vm15120_vm13, %v7553_v20, %v7554_v38  ;;  %13963 = vmatpush3.bf16.msra.mxu0 %v14396_v60  ;;  %v12271_v16 = vrot.slane %v7431_v26, 9  ;;  %v7565_v44 = vrot.slane %v18131_v63, 5  ;;  %v7432_v63 = vld [vmem:[#allocation3 + $0xb4] sm:$0xe]  ;;  %v7568_v43 = vrot.slane %v18154_v42, 5  ;;  %v14389_v2 = vld [vmem:[%s20107_s3 + $0x118] sm:$0xff]  }
 0x325   : > { %13827 = vmatmul.mubr.bf16.gmra.mxu1 %v12292_v8  ;;  %v18385_v5 = vsel %vm15120_vm13, %v7560_v24, %v7561_v57  ;;  %v18389_v60 = vsel %vm15120_vm13, %v12393_v25, %v9105_v62  ;;  %v9107_v32 = vrot.slane %v9105_v62, 4  ;;  %13964 = vmatprep.subr.bf16.mxu0 %v14398_v6  ;;  %v8285_v38 = vld [vmem:[#allocation3 + $0xc] sm:$0xf]  ;;  %v12394_v28 = vrot.slane %v9040_v10, 9  ;;  %v18415_v7 = vld [vmem:[#allocation3 + $0x28] sm:$0xf] }
 0x326   : > { %13830 = vmatprep.mubr.bf16.mxu1 %v12293_v22  ;;  %13907 = vmatpush3.bf16.msra.mxu1 %v14381_v23  ;;  %v18403_v48 = vsel %vm15120_vm13, %v12271_v16, %v7565_v44  ;;  %v7567_v8 = vrot.slane %v7565_v44, 4  ;;  %v9112_v22 = vrot.slane %v18368_v33, 5  ;;  %v9115_v23 = vrot.slane %v18376_v21, 5  ;;  %v18424_v24 = vld [vmem:[#allocation3 + $0x2c] sm:$0x1]  ;;  %v14384_v10 = vld [vmem:[#allocation3 + $0x84] sm:$0xff]  }
 0x327   : > { %13908 = vmatprep.subr.bf16.mxu1 %v14385_v55  ;;  %v18411_v54 = vsel %vm15120_vm13, %v9107_v32, %v9108_v15  ;;  %v12272_v20 = vrot.slane %v7432_v63, 9  ;;  %v7572_v57 = vrot.slane %v18145_v17, 5  ;;  %v7575_v16 = vrot.slane %v18165_v19, 5  ;;  %v14393_v63 = vld [vmem:[%s20107_s3 + $0x110] sm:$0xff]  }
 0x328   : > { %v12425_v42 = vcombine.low %v18389_v60, %v18411_v54  ;;  %v18421_v26 = vsel %vm15120_vm13, %v7567_v8, %v7568_v43  ;;  %13965 = vmatpush3.bf16.msra.mxu0 %v14398_v6  ;;  %v18430_v62 = vsel %vm15120_vm13, %v12394_v28, %v9112_v22  ;;  %v9114_v15 = vrot.slane %v9112_v22, 4  ;;  %v9042_v28 = vld [vmem:[#allocation3 + $0x30] sm:$0xe] }
 0x329   : > { %14046 = vmatprep.subr.bf16.mxu0 %v18394_v36  ;;  %v18436_v17 = vsel %vm15120_vm13, %v12272_v20, %v7572_v57  ;;  %v7574_v6 = vrot.slane %v7572_v57, 4  ;;  %v12395_v44 = vrot.slane %v9041_v37, 9  ;;  %v9119_v32 = vrot.slane %v18415_v7, 5  ;;  %v18457_v57 = vld [vmem:[#allocation3 + $0x34] sm:$0xf] }
 0x32a   : > { %13887 = vmatmul.mubr.bf16.gmra.mxu0 %v14383_v52  ;;  %13909 = vmatpush3.bf16.msra.mxu1 %v14385_v55  ;;  %v18444_v19 = vsel %vm15120_vm13, %v9114_v15, %v9115_v23  ;;  %v9122_v55 = vrot.slane %v18424_v24, 5  ;;  %v8334_v8 = vshrl.u32 %v8285_v38, 16  ;;  %v8337_v43 = vshll.u32 %v8285_v38, 16  ;;  %v8288_v23 = vld [vmem:[#allocation3 + $0x18] sm:$0xf] }
 0x32b   : > { %13890 = vmatprep.mubr.bf16.mxu0 %v14384_v10  ;;  %13910 = vmatprep.subr.bf16.mxu1 %v14389_v2  ;;  %v18451_v22 = vsel %vm15120_vm13, %v7574_v6, %v7575_v16  ;;  %v18455_v52 = vsel %vm15120_vm13, %v12395_v44, %v9119_v32  ;;  %v9121_v20 = vrot.slane %v9119_v32, 4  ;;  %v8343_v16 = vshll.u32 %v18333_v41, 16  ;;  %v18465_v6 = vld [vmem:[#allocation3 + $0x38] sm:$0x1]  ;;  %v14397_v32 = vld [vmem:[%s20107_s3 + $0x108] sm:$0xff]  }
 0x32c   : > { %v8336_v10 = vrot.slane %v8334_v8, 4  ;;  %v8339_v15 = vrot.slane %v8337_v43, 5  ;;  %v8347_v49 = vshrl.u32 %v18333_v41, 16  ;;  %v8353_v51 = vshll.u32 %v18341_v59, 16  ;;  %v9043_v59 = vld [vmem:[#allocation3 + $0x3c] sm:$0xe] }
 0x32d   : > { %13831 = vmatmul.mubr.bf16.gmra.mxu1 %v12294_v0  ;;  %v18472_v44 = vsel %vm15120_vm13, %v9121_v20, %v9122_v55  ;;  %v12396_v0 = vrot.slane %v9042_v28, 9  ;;  %v8345_v11 = vrot.slane %v8343_v16, 5  ;;  %v9129_v41 = vrot.slane %v18465_v6, 5  ;;  %v14388_v28 = vld [vmem:[#allocation3 + $0x9c] sm:$0xff]   ;;  %v8291_v8 = vld [vmem:[#allocation3 + $0x24] sm:$0xf] }
 0x32e   : > { %13834 = vmatprep.mubr.bf16.mxu1 %v12295_v35  ;;  %13911 = vmatpush3.bf16.msra.mxu1 %v14389_v2  ;;  %v8340_v47 = vor.u32 %v8339_v15, %v8336_v10  ;;  %v9126_v35 = vrot.slane %v18457_v57, 5  ;;  %v14387_v2 = vld [vmem:[#allocation3 + $0x90] sm:$0xff]   ;;  %v8349_v55 = vrot.slane %v8347_v49, 4  ;;  %v8355_v43 = vrot.slane %v8353_v51, 5  ;;  %v18489_v51 = vld [vmem:[#allocation3 + $0x40] sm:$0xf] }
 0x32f   : > { %13912 = vmatprep.subr.bf16.mxu1 %v14393_v63  ;;  %v8358_v20 = vshrl.u32 %v8288_v23, 16  ;;  %v8361_v37 = vshll.u32 %v8288_v23, 16  ;;  %v8367_v16 = vshll.u32 %v18368_v33, 16  ;;  %v8371_v49 = vshrl.u32 %v18368_v33, 16 }
 0x330   : > { %v8341_v38 = vrot.slane %v8340_v47, 4  ;;  %v18485_v25 = vsel %vm15120_vm13, %v12396_v0, %v9126_v35  ;;  %v9128_v56 = vrot.slane %v9126_v35, 4  ;;  %v8350_v10 = vor.u32 %v8349_v55, %v8345_v11  ;;  %v14399_v0 = vld [vmem:[%s20107_s3 + $0x100] sm:$0xff]  }
 0x331   : > { %v8360_v15 = vrot.slane %v8358_v20, 4  ;;  %v8363_v47 = vrot.slane %v8361_v37, 5  ;;  %v8377_v35 = vshll.u32 %v18376_v21, 16  ;;  %v8369_v20 = vrot.slane %v8367_v16, 5  ;;  %v9044_v16 = vld [vmem:[#allocation3 + $0x48] sm:$0xe] }
 0x332   : > { %13891 = vmatmul.mubr.bf16.gmra.mxu0 %v14387_v2  ;;  %13913 = vmatpush3.bf16.msra.mxu1 %v14393_v63  ;;  %v8346_v23 = vsel %vm14685_vm6, %v8341_v38, %v8345_v11  ;;  %v18498_v63 = vsel %vm15120_vm13, %v9128_v56, %v9129_v41  ;;  %v18501_v2 = vld [vmem:[#allocation3 + $0x44] sm:$0x1]  ;;  %v8351_v33 = vrot.slane %v8350_v10, 4  ;;  %v12397_v53 = vrot.slane %v9043_v59, 9 }
 0x333   : > { %13894 = vmatprep.mubr.bf16.mxu0 %v14388_v28  ;;  %13914 = vmatprep.subr.bf16.mxu1 %v14397_v32  ;;  %v12428_v55 = vcombine.low %v18485_v25, %v18498_v63  ;;  %v8373_v28 = vrot.slane %v8371_v49, 4  ;;  %v8364_v38 = vor.u32 %v8363_v47, %v8360_v15  ;;  %v8379_v11 = vrot.slane %v8377_v35, 5  ;;  %v14392_v47 = vld [vmem:[#allocation3 + $0xb4] sm:$0xff]  }
 0x334   : > { %v9133_v56 = vrot.slane %v18489_v51, 5  ;;  %v8356_v21 = vsel %vm14685_vm6, %v8351_v33, %v8355_v43  ;;  %v9136_v41 = vrot.slane %v18501_v2, 5  ;;  %v8382_v10 = vshrl.u32 %v8291_v8, 16 }
 0x335   : > { %13835 = vmatmul.mubr.bf16.gmra.mxu1 %v12296_v29  ;;  %v8374_v37 = vor.u32 %v8373_v28, %v8369_v20  ;;  %v18515_v4 = vcombine.low %v8346_v23, %v8356_v21  ;;  %v8365_v1 = vrot.slane %v8364_v38, 4  ;;  %v8385_v49 = vshll.u32 %v8291_v8, 16  ;;  %v18537_v38 = vld [vmem:[#allocation3 + $0x50] sm:$0x1] }
 0x336   : > { %13838 = vmatprep.mubr.bf16.mxu1 %v12297_v61  ;;  %13915 = vmatpush3.bf16.msra.mxu1 %v14397_v32  ;;  %v18519_v29 = vsel %vm15120_vm13, %v12397_v53, %v9133_v56  ;;  %v9135_v59 = vrot.slane %v9133_v56, 4  ;;  %v8294_v61 = vld [vmem:[#allocation3 + $0x30] sm:$0xf]  ;;  %v14391_v32 = vld [vmem:[#allocation3 + $0xa8] sm:$0xff]   ;;  %v8384_v15 = vrot.slane %v8382_v10, 4  ;;  %v8391_v23 = vshll.u32 %v18415_v7, 16 }
 0x337   : > { %13916 = vmatprep.subr.bf16.mxu1 %v14399_v0  ;;  %v8375_v43 = vrot.slane %v8374_v37, 4  ;;  %v8370_v53 = vsel %vm14685_vm6, %v8365_v1, %v8369_v20  ;;  %v8395_v33 = vshrl.u32 %v18415_v7, 16  ;;  %v8401_v28 = vshll.u32 %v18424_v24, 16 }
 0x338   : > { %v18533_v35 = vsel %vm15120_vm13, %v9135_v59, %v9136_v41  ;;  %v8387_v21 = vrot.slane %v8385_v49, 5  ;;  %v8393_v20 = vrot.slane %v8391_v23, 5  ;;  %v12398_v24 = vrot.slane %v9044_v16, 9  ;;  %v9045_v23 = vld [vmem:[#allocation3 + $0x54] sm:$0xe] }
 0x339   : > { %v8380_v8 = vsel %vm14685_vm6, %v8375_v43, %v8379_v11  ;;  %v12429_v56 = vcombine.low %v18519_v29, %v18533_v35  ;;  %v8397_v7 = vrot.slane %v8395_v33, 4  ;;  %v8403_v41 = vrot.slane %v8401_v28, 5  ;;  %v18562_v28 = vld [vmem:[#allocation3 + $0x5c] sm:$0x1]  ;;  %v14409_v29 = vld [vmem:[%s20107_s3 + $0x1d8] sm:$0xff]  }
 0x33a   : > { %13895 = vmatmul.mubr.bf16.gmra.mxu0 %v14391_v32  ;;  %13917 = vmatpush3.bf16.msra.mxu1 %v14399_v0  ;;  %v18543_v37 = vcombine.low %v8370_v53, %v8380_v8  ;;  %v8388_v10 = vor.u32 %v8387_v21, %v8384_v15  ;;  %v9140_v1 = vrot.slane %v18526_v18, 5  ;;  %v9143_v0 = vrot.slane %v18537_v38, 5  ;;  %v8297_v21 = vld [vmem:[#allocation3 + $0x3c] sm:$0xf] }
 0x33b   : > { %13898 = vmatprep.mubr.bf16.mxu0 %v14392_v47  ;;  %13998 = vmatprep.subr.bf16.mxu1 %v18524_v13  ;;  %v8406_v59 = vshrl.u32 %v8294_v61, 16  ;;  %v8398_v11 = vor.u32 %v8397_v7, %v8393_v20  ;;  %v8409_v32 = vshll.u32 %v8294_v61, 16  ;;  %v8415_v43 = vshll.u32 %v18457_v57, 16 }
 0x33c   : > { %v8419_v49 = vshrl.u32 %v18457_v57, 16  ;;  %v8389_v16 = vrot.slane %v8388_v10, 4  ;;  %v18558_v15 = vsel %vm15120_vm13, %v12398_v24, %v9140_v1  ;;  %v9142_v47 = vrot.slane %v9140_v1, 4  ;;  %v14395_v57 = vld [vmem:[#allocation3 + $0xc0] sm:$0xff]  }
 0x33d   : > { %13839 = vmatmul.mubr.bf16.gmra.mxu1 %v12298_v9  ;;  %v8408_v53 = vrot.slane %v8406_v59, 4  ;;  %v8399_v45 = vrot.slane %v8398_v11, 4  ;;  %v8411_v9 = vrot.slane %v8409_v32, 5  ;;  %v8417_v61 = vrot.slane %v8415_v43, 5 }
 0x33e   : > { %13842 = vmatprep.mubr.bf16.mxu1 %v12299_v3  ;;  %v8421_v33 = vrot.slane %v8419_v49, 4  ;;  %v8394_v14 = vsel %vm14685_vm6, %v8389_v16, %v8393_v20  ;;  %v18568_v58 = vsel %vm15120_vm13, %v9142_v47, %v9143_v0  ;;  %v8425_v3 = vshll.u32 %v18465_v6, 16  ;;  %v8300_v49 = vld [vmem:[#allocation3 + $0x48] sm:$0xf] }
 0x33f   : > { %v12399_v8 = vrot.slane %v9045_v23, 9  ;;  %v8404_v7 = vsel %vm14685_vm6, %v8399_v45, %v8403_v41  ;;  %v12430_v24 = vcombine.low %v18558_v15, %v18568_v58  ;;  %v8412_v10 = vor.u32 %v8411_v9, %v8408_v53  ;;  %v9046_v45 = vld [vmem:[#allocation3 + $0x60] sm:$0xe]  ;;  %v18737_v58 = vld [vmem:[#allocation3 + $0x94] sm:$0xf] }
 0x340   : > { %v8422_v1 = vor.u32 %v8421_v33, %v8417_v61  ;;  %v18575_v59 = vcombine.low %v8394_v14, %v8404_v7  ;;  %v8427_v20 = vrot.slane %v8425_v3, 5  ;;  %v9147_v11 = vrot.slane %v18560_v34, 5  ;;  %v18595_v33 = vld [vmem:[#allocation3 + $0x64] sm:$0xf] }
 0x341   : > { %v9150_v0 = vrot.slane %v18562_v28, 5  ;;  %v8413_v6 = vrot.slane %v8412_v10, 4  ;;  %v8430_v41 = vshrl.u32 %v8297_v21, 16  ;;  %v8433_v43 = vshll.u32 %v8297_v21, 16 }
 0x342   : > { %13899 = vmatmul.mubr.bf16.gmra.mxu0 %v14395_v57  ;;  %v8423_v32 = vrot.slane %v8422_v1, 4  ;;  %v18584_v23 = vsel %vm15120_vm13, %v12399_v8, %v9147_v11  ;;  %v9149_v16 = vrot.slane %v9147_v11, 4  ;;  %v8439_v47 = vshll.u32 %v18489_v51, 16  ;;  %v18597_v57 = vld [vmem:[#allocation3 + $0x68] sm:$0x1] }
 0x343   : > { %13966 = vmatprep.mubr.bf16.mxu0 %v12425_v42  ;;  %v8443_v53 = vshrl.u32 %v18489_v51, 16  ;;  %v8418_v60 = vsel %vm14685_vm6, %v8413_v6, %v8417_v61  ;;  %v8432_v42 = vrot.slane %v8430_v41, 4  ;;  %v8435_v9 = vrot.slane %v8433_v43, 5  ;;  %v8303_v41 = vld [vmem:[#allocation3 + $0x54] sm:$0xf] }
 0x344   : > { %v8428_v54 = vsel %vm14685_vm6, %v8423_v32, %v8427_v20  ;;  %v20592_v51 = vcombine.low %v18357_v50, %v18372_v40  ;;  %v18606_v46 = vsel %vm15120_vm13, %v9149_v16, %v9150_v0  ;;  %v8441_v27 = vrot.slane %v8439_v47, 5  ;;  %v14403_v50 = vld [vmem:[%s20107_s3 + $0x1f0] sm:$0xff]   ;;  %v9047_v32 = vld [vmem:[#allocation3 + $0x6c] sm:$0xe] }
 0x345   : > { %13843 = vmatmul.mubr.bf16.gmra.mxu1 %v12300_v12  ;;  %v18602_v14 = vcombine.low %v8418_v60, %v8428_v54  ;;  %v8445_v12 = vrot.slane %v8443_v53, 4  ;;  %v12431_v61 = vcombine.low %v18584_v23, %v18606_v46  ;;  %v8436_v3 = vor.u32 %v8435_v9, %v8432_v42  ;;  %v18633_v42 = vld [vmem:[#allocation3 + $0x74] sm:$0x1] }
 0x346   : > { %13846 = vmatprep.mubr.bf16.mxu1 %v20592_v51  ;;  %v8449_v8 = vshll.u32 %v18501_v2, 16  ;;  %v12400_v21 = vrot.slane %v9046_v45, 9  ;;  %v9154_v40 = vrot.slane %v18595_v33, 5  ;;  %v9157_v10 = vrot.slane %v18597_v57, 5  ;;  %v18624_v45 = vld [vmem:[#allocation3 + $0x70] sm:$0xf] }
 0x347   : > { %v8446_v7 = vor.u32 %v8445_v12, %v8441_v27  ;;  %v8454_v1 = vshrl.u32 %v8300_v49, 16  ;;  %v8437_v20 = vrot.slane %v8436_v3, 4  ;;  %v8457_v0 = vshll.u32 %v8300_v49, 16 }
 0x348   : > { %v8451_v11 = vrot.slane %v8449_v8, 5  ;;  %v8463_v6 = vshll.u32 %v18526_v18, 16  ;;  %v20593_v2 = vcombine.low %v18430_v62, %v18444_v19  ;;  %v18622_v16 = vsel %vm15120_vm13, %v12400_v21, %v9154_v40 }
 0x349   : > { %v8447_v43 = vrot.slane %v8446_v7, 4  ;;  %v9156_v47 = vrot.slane %v9154_v40, 4  ;;  %v8456_v53 = vrot.slane %v8454_v1, 4  ;;  %v20594_v49 = vcombine.low %v18455_v52, %v18472_v44  ;;  %v14405_v44 = vld [vmem:[%s20107_s3 + $0x1e8] sm:$0xff]  }
 0x34a   : > { %13967 = vmatmul.mubr.bf16.vlgmr.msra.gmra.mxu0 %v20593_v2  ;;  %v8442_v60 = vsel %vm14685_vm6, %v8437_v20, %v8441_v27  ;;  %v8459_v62 = vrot.slane %v8457_v0, 5  ;;  %v8465_v19 = vrot.slane %v8463_v6, 5  ;;  %v8467_v54 = vshrl.u32 %v18526_v18, 16 }
 0x34b   : > { %13970 = vmatprep.mubr.bf16.mxu0 %v20594_v49  ;;  %14047 = vmatpush3.bf16.msra.mxu0 %v18394_v36  ;;  %v8452_v9 = vsel %vm14685_vm6, %v8447_v43, %v8451_v11  ;;  %v18639_v51 = vsel %vm15120_vm13, %v9156_v47, %v9157_v10  ;;  %v8473_v52 = vshll.u32 %v18537_v38, 16  ;;  %v12401_v36 = vrot.slane %v9047_v32, 9  ;;  %v9048_v11 = vld [vmem:[#allocation3 + $0x78] sm:$0xe]  ;;  %v18663_v32 = vld [vmem:[#allocation3 + $0x7c] sm:$0xf] }
 0x34c   : > { %14048 = vmatprep.subr.bf16.mxu0 %v14403_v50  ;;  %v20595_v18 = vcombine.low %v18365_v30, %v18385_v5  ;;  %v18648_v27 = vcombine.low %v8442_v60, %v8452_v9  ;;  %v12432_v12 = vcombine.low %v18622_v16, %v18639_v51  ;;  %v8460_v3 = vor.u32 %v8459_v62, %v8456_v53  ;;  %v18670_v53 = vld [vmem:[#allocation3 + $0x80] sm:$0x1] }
 0x34d   : > { %v8469_v8 = vrot.slane %v8467_v54, 4  ;;  %v20596_v21 = vcombine.low %v18403_v48, %v18421_v26  ;;  %v8475_v38 = vrot.slane %v8473_v52, 5  ;;  %v9161_v7 = vrot.slane %v18624_v45, 5  ;;  %v8306_v54 = vld [vmem:[#allocation3 + $0x60] sm:$0xf] }
 0x34e   : > { %13847 = vmatmul.mubr.bf16.gmra.mxu1 %v20595_v18  ;;  %v9164_v40 = vrot.slane %v18633_v42, 5  ;;  %v8478_v10 = vshrl.u32 %v8303_v41, 16  ;;  %v8461_v30 = vrot.slane %v8460_v3, 4  ;;  %v8481_v1 = vshll.u32 %v8303_v41, 16 }
 0x34f   : > { %13850 = vmatprep.mubr.bf16.mxu1 %v20596_v21  ;;  %14049 = vmatpush3.bf16.msra.mxu0 %v14403_v50  ;;  %v8470_v5 = vor.u32 %v8469_v8, %v8465_v19  ;;  %v8487_v20 = vshll.u32 %v18560_v34, 16  ;;  %v18660_v0 = vsel %vm15120_vm13, %v12401_v36, %v9161_v7  ;;  %v9163_v6 = vrot.slane %v9161_v7, 4  ;;  %v14407_v50 = vld [vmem:[%s20107_s3 + $0x1e0] sm:$0xff]   ;;  %v9049_v8 = vld [vmem:[#allocation3 + $0x84] sm:$0xe] }
 0x350   : > { %v8480_v48 = vrot.slane %v8478_v10, 4  ;;  %v8491_v26 = vshrl.u32 %v18560_v34, 16  ;;  %14050 = vmatprep.subr.bf16.mxu0 %v14405_v44  ;;  %v8466_v41 = vsel %vm14685_vm6, %v8461_v30, %v8465_v19  ;;  %v8483_v43 = vrot.slane %v8481_v1, 5  ;;  %v8309_v10 = vld [vmem:[#allocation3 + $0x6c] sm:$0xf] }
 0x351   : > { %v8471_v2 = vrot.slane %v8470_v5, 4  ;;  %v8489_v47 = vrot.slane %v8487_v20, 5  ;;  %v18677_v34 = vsel %vm15120_vm13, %v9163_v6, %v9164_v40  ;;  %v8497_v60 = vshll.u32 %v18562_v28, 16  ;;  %v18711_v1 = vld [vmem:[#allocation3 + $0x88] sm:$0xf] }
 0x352   : > { %13971 = vmatmul.mubr.bf16.gmra.mxu0 %v12428_v55  ;;  %v8493_v49 = vrot.slane %v8491_v26, 4  ;;  %v12402_v62 = vrot.slane %v9048_v11, 9  ;;  %v12433_v25 = vcombine.low %v18660_v0, %v18677_v34  ;;  %v8484_v63 = vor.u32 %v8483_v43, %v8480_v48  ;;  %v14411_v48 = vld [vmem:[%s20107_s3 + $0x1d0] sm:$0xff]  }
 0x353   : > { %13974 = vmatprep.mubr.bf16.mxu0 %v12429_v56  ;;  %v8476_v19 = vsel %vm14685_vm6, %v8471_v2, %v8475_v38  ;;  %14051 = vmatpush3.bf16.msra.mxu0 %v14405_v44  ;;  %v9168_v55 = vrot.slane %v18663_v32, 5  ;;  %v8499_v28 = vrot.slane %v8497_v60, 5  ;;  %v9171_v36 = vrot.slane %v18670_v53, 5  ;;  %v14402_v60 = vld [vmem:[%s20107_s3 + $0x1b0] sm:$0xff]  }
 0x354   : > { %v18688_v9 = vcombine.low %v8466_v41, %v8476_v19  ;;  %v8494_v52 = vor.u32 %v8493_v49, %v8489_v47  ;;  %14052 = vmatprep.subr.bf16.mxu0 %v14407_v50  ;;  %v20597_v35 = vcombine.low %v18436_v17, %v18451_v22  ;;  %v8485_v56 = vrot.slane %v8484_v63, 4 }
 0x355   : > { %v18699_v44 = vsel %vm15120_vm13, %v12402_v62, %v9168_v55  ;;  %v9170_v18 = vrot.slane %v9168_v55, 4  ;;  %v8502_v3 = vshrl.u32 %v8306_v54, 16  ;;  %v8505_v38 = vshll.u32 %v8306_v54, 16 }
 0x356   : > { %13851 = vmatmul.mubr.bf16.gmra.mxu1 %v20597_v35  ;;  %v8495_v21 = vrot.slane %v8494_v52, 4  ;;  %v8511_v7 = vshll.u32 %v18595_v33, 16  ;;  %v8515_v40 = vshrl.u32 %v18595_v33, 16  ;;  %v8490_v17 = vsel %vm14685_vm6, %v8485_v56, %v8489_v47 }
 0x357   : > { %13918 = vmatprep.mubr.bf16.mxu1 %v18515_v4  ;;  %v18708_v22 = vsel %vm15120_vm13, %v9170_v18, %v9171_v36  ;;  %v8504_v30 = vrot.slane %v8502_v3, 4  ;;  %v8521_v5 = vshll.u32 %v18597_v57, 16  ;;  %v18713_v4 = vld [vmem:[#allocation3 + $0x8c] sm:$0x1]  ;;  %14053 = vmatpush3.bf16.msra.mxu0 %v14407_v50  ;;  %v8507_v11 = vrot.slane %v8505_v38, 5 }
 0x358   : > { %v8500_v20 = vsel %vm14685_vm6, %v8495_v21, %v8499_v28  ;;  %v12434_v33 = vcombine.low %v18699_v44, %v18708_v22  ;;  %v8513_v6 = vrot.slane %v8511_v7, 5  ;;  %14054 = vmatprep.subr.bf16.mxu0 %v14409_v29  ;;  %v8517_v57 = vrot.slane %v8515_v40, 4  ;;  %v8312_v3 = vld [vmem:[#allocation3 + $0x78] sm:$0xf] }
 0x359   : > { %v18722_v26 = vcombine.low %v8490_v17, %v8500_v20  ;;  %v8523_v41 = vrot.slane %v8521_v5, 5  ;;  %v12403_v2 = vrot.slane %v9049_v8, 9  ;;  %v8508_v50 = vor.u32 %v8507_v11, %v8504_v30  ;;  %v14404_v8 = vld [vmem:[%s20107_s3 + $0x1a8] sm:$0xff]   ;;  %v8315_v11 = vld [vmem:[#allocation3 + $0x84] sm:$0xf] }
 0x35a   : > { %13975 = vmatmul.mubr.bf16.gmra.mxu0 %v12430_v24  ;;  %v9175_v43 = vrot.slane %v18711_v1, 5  ;;  %v9178_v47 = vrot.slane %v18713_v4, 5  ;;  %v8526_v49 = vshrl.u32 %v8309_v10, 16  ;;  %v8518_v62 = vor.u32 %v8517_v57, %v8513_v6  ;;  %v9050_v24 = vld [vmem:[#allocation3 + $0x90] sm:$0xe]  ;;  %v14406_v57 = vld [vmem:[%s20107_s3 + $0x1a0] sm:$0xff]  }
 0x35b   : > { %13978 = vmatprep.mubr.bf16.mxu0 %v12431_v61  ;;  %v8529_v54 = vshll.u32 %v8309_v10, 16  ;;  %v8535_v19 = vshll.u32 %v18624_v45, 16  ;;  %v8539_v15 = vshrl.u32 %v18624_v45, 16  ;;  %14055 = vmatpush3.bf16.msra.mxu0 %v14409_v29  ;;  %v8509_v63 = vrot.slane %v8508_v50, 4  ;;  %v18743_v61 = vld [vmem:[#allocation3 + $0x98] sm:$0x1] }
 0x35c   : > { %v18741_v55 = vsel %vm15120_vm13, %v12403_v2, %v9175_v43  ;;  %v9177_v23 = vrot.slane %v9175_v43, 4  ;;  %v8528_v46 = vrot.slane %v8526_v49, 4  ;;  %14056 = vmatprep.subr.bf16.mxu0 %v14411_v48  ;;  %v8519_v52 = vrot.slane %v8518_v62, 4  ;;  %v14412_v29 = vld [vmem:[%s20107_s3 + $0x1c8] sm:$0xff]   ;;  %v9051_v43 = vld [vmem:[#allocation3 + $0x9c] sm:$0xe]  ;;  %v18795_v62 = vpop.f32.mrf.mxu0 }
 0x35d   : > { %v8531_v28 = vrot.slane %v8529_v54, 5  ;;  %v8537_v36 = vrot.slane %v8535_v19, 5  ;;  %v8541_v45 = vrot.slane %v8539_v15, 4  ;;  %v8514_v35 = vsel %vm14685_vm6, %v8509_v63, %v8513_v6  ;;  %v14414_v6 = vld [vmem:[%s20107_s3 + $0x1c0] sm:$0xff]   ;;  %v18791_v49 = vld [vmem:[#allocation3 + $0xa0] sm:$0xf] }
 0x35e   : > { %13919 = vmatmul.mubr.bf16.vlgmr.msra.gmra.mxu1 %v18543_v37  ;;  %v18755_v56 = vsel %vm15120_vm13, %v9177_v23, %v9178_v47  ;;  %v8545_v37 = vshll.u32 %v18633_v42, 16  ;;  %v12404_v18 = vrot.slane %v9050_v24, 9  ;;  %v9182_v42 = vrot.slane %v18737_v58, 5  ;;  %v18810_v63 = vld [vmem:[%s20109_s5 + $0x38] sm:$0xff]  }
 0x35f   : > { %13922 = vmatprep.mubr.bf16.mxu1 %v18575_v59  ;;  %13999 = vmatpush3.bf16.msra.mxu1 %v18524_v13  ;;  %v8524_v59 = vsel %vm14685_vm6, %v8519_v52, %v8523_v41  ;;  %v12435_v13 = vcombine.low %v18741_v55, %v18755_v56  ;;  %v8532_v21 = vor.u32 %v8531_v28, %v8528_v46  ;;  %v9185_v10 = vrot.slane %v18743_v61, 5  ;;  %v9052_v28 = vld [vmem:[#allocation3 + $0xa8] sm:$0xe] }
 0x360   : > { %14000 = vmatprep.subr.bf16.mxu1 %v14402_v60  ;;  %v8542_v38 = vor.u32 %v8541_v45, %v8537_v36  ;;  %v18765_v7 = vcombine.low %v8514_v35, %v8524_v59  ;;  %v8547_v40 = vrot.slane %v8545_v37, 5  ;;  %14057 = vmatpush3.bf16.msra.mxu0 %v14411_v48  ;;  %v8550_v5 = vshrl.u32 %v8312_v3, 16  ;;  %v14408_v45 = vld [vmem:[%s20107_s3 + $0x198] sm:$0xff]   ;;  %v8318_v37 = vld [vmem:[#allocation3 + $0x90] sm:$0xf] }
 0x361   : > { %v8533_v17 = vrot.slane %v8532_v21, 4  ;;  %v8553_v20 = vshll.u32 %v8312_v3, 16  ;;  %14058 = vmatprep.subr.bf16.mxu0 %v14412_v29  ;;  %v18780_v48 = vsel %vm15120_vm13, %v12404_v18, %v9182_v42  ;;  %v9184_v41 = vrot.slane %v9182_v42, 4  ;;  %v18825_v21 = vld [vmem:[#allocation3 + $0xac] sm:$0xf] }
 0x362   : > { %v8543_v30 = vrot.slane %v8542_v38, 4  ;;  %13979 = vmatmul.mubr.bf16.gmra.mxu0 %v12432_v12  ;;  %v8559_v2 = vshll.u32 %v18663_v32, 16  ;;  %v8563_v50 = vshrl.u32 %v18663_v32, 16  ;;  %v8552_v12 = vrot.slane %v8550_v5, 4 }
 0x363   : > { %14001 = vmatpush3.bf16.msra.mxu1 %v14402_v60  ;;  %13982 = vmatprep.mubr.bf16.mxu0 %v12433_v25  ;;  %v8538_v16 = vsel %vm14685_vm6, %v8533_v17, %v8537_v36  ;;  %v8555_v47 = vrot.slane %v8553_v20, 5  ;;  %v18793_v60 = vld [vmem:[#allocation3 + $0xa4] sm:$0x1]  ;;  %v18801_v0 = vsel %vm15120_vm13, %v9184_v41, %v9185_v10  ;;  %v8569_v15 = vshll.u32 %v18670_v53, 16  ;;  %v18830_v17 = vld [vmem:[#allocation3 + $0xb0] sm:$0x1] }
 0x364   : > { %14002 = vmatprep.subr.bf16.mxu1 %v14404_v8  ;;  %v8548_v51 = vsel %vm14685_vm6, %v8543_v30, %v8547_v40  ;;  %v8561_v34 = vrot.slane %v8559_v2, 5  ;;  %v8565_v25 = vrot.slane %v8563_v50, 4  ;;  %14059 = vmatpush3.bf16.msra.mxu0 %v14412_v29  ;;  %v12436_v54 = vcombine.low %v18780_v48, %v18801_v0  ;;  %v14415_v48 = vld [vmem:[%s20107_s3 + $0x180] sm:$0xff]  }
 0x365   : > { %v18797_v32 = vcombine.low %v8538_v16, %v8548_v51  ;;  %v8556_v19 = vor.u32 %v8555_v47, %v8552_v12  ;;  %v12405_v24 = vrot.slane %v9051_v43, 9  ;;  %14060 = vmatprep.subr.bf16.mxu0 %v14414_v6  ;;  %v9189_v46 = vrot.slane %v18791_v49, 5  ;;  %v9053_v16 = vld [vmem:[#allocation3 + $0xb4] sm:$0xe] }
 0x366   : > { %13923 = vmatmul.mubr.bf16.gmra.mxu1 %v18602_v14  ;;  %v8566_v23 = vor.u32 %v8565_v25, %v8561_v34  ;;  %v9192_v14 = vrot.slane %v18793_v60, 5  ;;  %v8574_v52 = vshrl.u32 %v8315_v11, 16  ;;  %v8571_v53 = vrot.slane %v8569_v15, 5  ;;  %v18862_v25 = vld [vmem:[#allocation3 + $0xb8] sm:$0xf] }
 0x367   : > { %13926 = vmatprep.mubr.bf16.mxu1 %v18648_v27  ;;  %14003 = vmatpush3.bf16.msra.mxu1 %v14404_v8  ;;  %v8557_v36 = vrot.slane %v8556_v19, 4  ;;  %v8577_v29 = vshll.u32 %v8315_v11, 16  ;;  %v8583_v35 = vshll.u32 %v18711_v1, 16  ;;  %v18819_v27 = vpop.f32.mrf.mxu0  ;;  %v18823_v3 = vsel %vm15120_vm13, %v12405_v24, %v9189_v46 }
 0x368   : > { %14004 = vmatprep.subr.bf16.mxu1 %v14406_v57  ;;  %v8567_v18 = vrot.slane %v8566_v23, 4  ;;  %v9191_v8 = vrot.slane %v9189_v46, 4  ;;  %v8576_v59 = vrot.slane %v8574_v52, 4  ;;  %14061 = vmatpush3.bf16.msra.mxu0 %v14414_v6  ;;  %v8587_v10 = vshrl.u32 %v18711_v1, 16  ;;  %v18866_v23 = vld [vmem:[#allocation3 + $0xbc] sm:$0x1] }
 0x369   : > { %v8562_v38 = vsel %vm14685_vm6, %v8557_v36, %v8561_v34  ;;  %v8579_v40 = vrot.slane %v8577_v29, 5  ;;  %v8585_v42 = vrot.slane %v8583_v35, 5  ;;  %14142 = vmatprep.subr.bf16.mxu0 %v18810_v63  ;;  %v8593_v20 = vshll.u32 %v18713_v4, 16  ;;  %v8321_v36 = vld [vmem:[#allocation3 + $0x9c] sm:$0xf] }
 0x36a   : > { %13983 = vmatmul.mubr.bf16.gmra.mxu0 %v12434_v33  ;;  %v8572_v30 = vsel %vm14685_vm6, %v8567_v18, %v8571_v53  ;;  %v9193_v5 = vsel %vm15120_vm13, %v9191_v8, %v9192_v14  ;;  %v12406_v11 = vrot.slane %v9052_v28, 9  ;;  %v8589_v22 = vrot.slane %v8587_v10, 4  ;;  %v14410_v33 = vld [vmem:[%s20107_s3 + $0x190] sm:$0xff]  }
 0x36b   : > { %14005 = vmatpush3.bf16.msra.mxu1 %v14406_v57  ;;  %13986 = vmatprep.mubr.bf16.mxu0 %v12435_v13  ;;  %v18844_v1 = vcombine.low %v8562_v38, %v8572_v30  ;;  %v12437_v6 = vcombine.low %v18823_v3, %v9193_v5  ;;  %v8580_v44 = vor.u32 %v8579_v40, %v8576_v59  ;;  %v18850_v57 = vpop.f32.mrf.mxu0  ;;  %v8595_v41 = vrot.slane %v8593_v20, 5  ;;  %v8324_v20 = vld [vmem:[#allocation3 + $0xa8] sm:$0xf] }
 0x36c   : > { %14006 = vmatprep.subr.bf16.mxu1 %v14408_v45  ;;  %v9196_v4 = vrot.slane %v18825_v21, 5  ;;  %v9199_v2 = vrot.slane %v18830_v17, 5  ;;  %v8598_v55 = vshrl.u32 %v8318_v37, 16  ;;  %v8590_v13 = vor.u32 %v8589_v22, %v8585_v42 }
 0x36d   : > { %v8581_v56 = vrot.slane %v8580_v44, 4  ;;  %v8601_v50 = vshll.u32 %v8318_v37, 16  ;;  %v8607_v43 = vshll.u32 %v18737_v58, 16  ;;  %v8611_v34 = vshrl.u32 %v18737_v58, 16  ;;  %v18871_v46 = vpop.f32.mrf.mxu0 }
 0x36e   : > { %13927 = vmatmul.mubr.bf16.gmra.mxu1 %v18688_v9  ;;  %v18859_v51 = vsel %vm15120_vm13, %v12406_v11, %v9196_v4  ;;  %v9198_v12 = vrot.slane %v9196_v4, 4  ;;  %v8600_v47 = vrot.slane %v8598_v55, 4  ;;  %v8591_v19 = vrot.slane %v8590_v13, 4 }
 0x36f   : > { %13930 = vmatprep.mubr.bf16.mxu1 %v18722_v26  ;;  %14007 = vmatpush3.bf16.msra.mxu1 %v14408_v45  ;;  %v8586_v9 = vsel %vm14685_vm6, %v8581_v56, %v8585_v42  ;;  %v8603_v15 = vrot.slane %v8601_v50, 5  ;;  %v8609_v24 = vrot.slane %v8607_v43, 5  ;;  %v14413_v26 = vld [vmem:[%s20107_s3 + $0x188] sm:$0xff]   ;;  %v8613_v14 = vrot.slane %v8611_v34, 4  ;;  %v9054_v42 = vld [vmem:[#allocation3 + $0xc0] sm:$0xe]  ;;  %v18891_v0 = vpop.f32.mrf.mxu0 }
 0x370   : > { %14008 = vmatprep.subr.bf16.mxu1 %v14410_v33  ;;  %v9200_v58 = vsel %vm15120_vm13, %v9198_v12, %v9199_v2  ;;  %v8617_v52 = vshll.u32 %v18743_v61, 16  ;;  %v12407_v28 = vrot.slane %v9053_v16, 9  ;;  %v8596_v53 = vsel %vm14685_vm6, %v8591_v19, %v8595_v41  ;;  %v18903_v41 = vld [vmem:[#allocation3 + $0xc8] sm:$0x1] }
 0x371   : > { %v12438_v45 = vcombine.low %v18859_v51, %v9200_v58  ;;  %v8604_v29 = vor.u32 %v8603_v15, %v8600_v47  ;;  %v9203_v35 = vrot.slane %v18862_v25, 5  ;;  %v18883_v37 = vcombine.low %v8586_v9, %v8596_v53  ;;  %v18915_v43 = vpop.f32.mrf.mxu0  ;;  %v9924_v15 = vld [vmem:[#allocation3 + $0x18] sm:$0xf] }
 0x372   : > { %13987 = vmatmul.mubr.bf16.gmra.mxu0 %v12436_v54  ;;  %v8614_v18 = vor.u32 %v8613_v14, %v8609_v24  ;;  %v8619_v3 = vrot.slane %v8617_v52, 5  ;;  %v9206_v61 = vrot.slane %v18866_v23, 5  ;;  %v8622_v40 = vshrl.u32 %v8321_v36, 16 }
 0x373   : > { %14009 = vmatpush3.bf16.msra.mxu1 %v14410_v33  ;;  %13990 = vmatprep.mubr.bf16.mxu0 %v12437_v6  ;;  %v8605_v8 = vrot.slane %v8604_v29, 4  ;;  %v9204_v59 = vsel %vm15120_vm13, %v12407_v28, %v9203_v35  ;;  %v9205_v38 = vrot.slane %v9203_v35, 4  ;;  %v8625_v10 = vshll.u32 %v8321_v36, 16  ;;  %v18901_v33 = vld [vmem:[#allocation3 + $0xc4] sm:$0xf]  ;;  %v18924_v29 = vpop.f32.mrf.mxu0 }
 0x374   : > { %14010 = vmatprep.subr.bf16.mxu1 %v14413_v26  ;;  %v8615_v54 = vrot.slane %v8614_v18, 4  ;;  %v8631_v30 = vshll.u32 %v18791_v49, 16  ;;  %v8635_v5 = vshrl.u32 %v18791_v49, 16  ;;  %v8624_v44 = vrot.slane %v8622_v40, 4  ;;  %v9925_v18 = vld [vmem:[#allocation3 + $0x1c] sm:$0xf] }
 0x375   : > { %v8610_v11 = vsel %vm14685_vm6, %v8605_v8, %v8609_v24  ;;  %v9207_v6 = vsel %vm15120_vm13, %v9205_v38, %v9206_v61  ;;  %v8641_v22 = vshll.u32 %v18793_v60, 16  ;;  %v12408_v50 = vrot.slane %v9054_v42, 9  ;;  %v18913_v60 = vld [vmem:[%s20107_s3 + $0x238] sm:$0xff]   ;;  %v8327_v42 = vld [vmem:[#allocation3 + $0xb4] sm:$0xf] }
 0x376   : > { %13931 = vmatmul.mubr.bf16.gmra.mxu1 %v18765_v7  ;;  %v8620_v49 = vsel %vm14685_vm6, %v8615_v54, %v8619_v3  ;;  %v12439_v4 = vcombine.low %v9204_v59, %v9207_v6  ;;  %v8627_v7 = vrot.slane %v8625_v10, 5  ;;  %v8633_v2 = vrot.slane %v8631_v30, 5  ;;  %v9926_v40 = vld [vmem:[#allocation3 + $0x20] sm:$0x1]  ;;  %v18935_v6 = vpop.f32.mrf.mxu1 }
 0x377   : > { %13934 = vmatprep.mubr.bf16.mxu1 %v18797_v32  ;;  %14011 = vmatpush3.bf16.msra.mxu1 %v14413_v26  ;;  %v18908_v55 = vcombine.low %v8610_v11, %v8620_v49  ;;  %v8637_v56 = vrot.slane %v8635_v5, 4  ;;  %v8643_v13 = vrot.slane %v8641_v22, 5  ;;  %v9210_v16 = vrot.slane %v18901_v33, 5 }
 0x378   : > { %14012 = vmatprep.subr.bf16.mxu1 %v14415_v48  ;;  %v8628_v32 = vor.u32 %v8627_v7, %v8624_v44  ;;  %v9213_v51 = vrot.slane %v18903_v41, 5  ;;  %v8646_v12 = vshrl.u32 %v8324_v20, 16  ;;  %v8649_v34 = vshll.u32 %v8324_v20, 16 }
 0x379   : > { %v8638_v47 = vor.u32 %v8637_v56, %v8633_v2  ;;  %v8655_v9 = vshll.u32 %v18825_v21, 16  ;;  %v8659_v19 = vshrl.u32 %v18825_v21, 16  ;;  %v9211_v26 = vsel %vm15120_vm13, %v12408_v50, %v9210_v16 }
 0x37a   : > { %13991 = vmatmul.mubr.bf16.gmra.mxu0 %v12438_v45  ;;  %v8629_v24 = vrot.slane %v8628_v32, 4  ;;  %v9212_v58 = vrot.slane %v9210_v16, 4  ;;  %v8648_v14 = vrot.slane %v8646_v12, 4  ;;  %v8651_v28 = vrot.slane %v8649_v34, 5 }
 0x37b   : > { %14013 = vmatpush3.bf16.msra.mxu1 %v14415_v48  ;;  %13994 = vmatprep.mubr.bf16.mxu0 %v12439_v4  ;;  %v8639_v52 = vrot.slane %v8638_v47, 4  ;;  %v8657_v36 = vrot.slane %v8655_v9, 5  ;;  %v8661_v53 = vrot.slane %v8659_v19, 4  ;;  %v8665_v35 = vshll.u32 %v18830_v17, 16  ;;  %v18945_v19 = vpop.f32.mrf.mxu1 }
 0x37c   : > { %14094 = vmatprep.subr.bf16.mxu1 %v18913_v60  ;;  %v8634_v21 = vsel %vm14685_vm6, %v8629_v24, %v8633_v2  ;;  %v9214_v45 = vsel %vm15120_vm13, %v9212_v58, %v9213_v51  ;;  %v9973_v3 = vshrl.u32 %v9924_v15, 16  ;;  %v8652_v59 = vor.u32 %v8651_v28, %v8648_v14  ;;  %v18950_v58 = vld [vmem:[#allocation3 + $0x28] sm:$0xf] }
 0x37d   : > { %v8644_v61 = vsel %vm14685_vm6, %v8639_v52, %v8643_v13  ;;  %v12440_v8 = vcombine.low %v9211_v26, %v9214_v45  ;;  %v8662_v38 = vor.u32 %v8661_v53, %v8657_v36  ;;  %v8667_v54 = vrot.slane %v8665_v35, 5  ;;  %v9927_v13 = vld [vmem:[#allocation3 + $0x24] sm:$0xf]  ;;  %v18953_v45 = vld [vmem:[#allocation3 + $0x2c] sm:$0x1] }
 0x37e   : > { %13935 = vmatmul.mubr.bf16.gmra.mxu1 %v18844_v1  ;;  %v12381_v48 = vcombine.low %v8634_v21, %v8644_v61  ;;  %v9975_v10 = vrot.slane %v9973_v3, 4  ;;  %v9976_v30 = vshll.u32 %v9924_v15, 16  ;;  %v8653_v5 = vrot.slane %v8652_v59, 4  ;;  %v18937_v1 = vpop.f32.mrf.mxu0 }
 0x37f   : > { %13938 = vmatprep.mubr.bf16.mxu1 %v18883_v37  ;;  %v8663_v17 = vrot.slane %v8662_v38, 4  ;;  %v9982_v20 = vshll.u32 %v9925_v18, 16  ;;  %v9986_v11 = vshrl.u32 %v9925_v18, 16  ;;  %20598 = vst [vmem:[#allocation78_spill] sm:$0xff] %v18937_v1  ;;  %v9992_v22 = vshll.u32 %v9926_v40, 16  ;;  %v18960_v38 = vpop.f32.mrf.mxu1 }
 0x380   : > { %v9978_v44 = vrot.slane %v9976_v30, 5  ;;  %v8670_v49 = vshrl.u32 %v8327_v42, 16  ;;  %v8673_v4 = vshll.u32 %v8327_v42, 16  ;;  %v8658_v7 = vsel %vm14685_vm6, %v8653_v5, %v8657_v36  ;;  %v18947_v15 = vpop.f32.mrf.mxu0 }
 0x381   : > { %v8668_v37 = vsel %vm14685_vm6, %v8663_v17, %v8667_v54  ;;  %v9984_v2 = vrot.slane %v9982_v20, 5  ;;  %v9988_v56 = vrot.slane %v9986_v11, 4  ;;  %v9994_v16 = vrot.slane %v9992_v22, 5 }
 0x382   : > { %13995 = vmatmul.mubr.bf16.gmra.mxu0 %v12440_v8  ;;  %v12382_v50 = vcombine.low %v8658_v7, %v8668_v37  ;;  %v9979_v32 = vor.u32 %v9978_v44, %v9975_v10  ;;  %v8672_v51 = vrot.slane %v8670_v49, 4  ;;  %v8675_v47 = vrot.slane %v8673_v4, 5  ;;  %v18962_v40 = vpop.f32.mrf.mxu0  ;;  %v9930_v4 = vld [vmem:[#allocation3 + $0x30] sm:$0xf] }
 0x383   : > { %v9989_v12 = vor.u32 %v9988_v56, %v9984_v2  ;;  %v8679_v34 = vshll.u32 %v18862_v25, 16  ;;  %v8683_v9 = vshrl.u32 %v18862_v25, 16  ;;  %v8689_v26 = vshll.u32 %v18866_v23, 16  ;;  %v8330_v23 = vld [vmem:[#allocation3 + $0xc0] sm:$0xf] }
 0x384   : > { %v9980_v24 = vrot.slane %v9979_v32, 4  ;;  %v9997_v14 = vshrl.u32 %v9927_v13, 16  ;;  %v10000_v52 = vshll.u32 %v9927_v13, 16  ;;  %v8676_v36 = vor.u32 %v8675_v47, %v8672_v51  ;;  %v18972_v13 = vld [vmem:[#allocation3 + $0x34] sm:$0xf]  ;;  %v18974_v32 = vpop.f32.mrf.mxu1 }
 0x385   : > { %v9990_v28 = vrot.slane %v9989_v12, 4  ;;  %v8681_v53 = vrot.slane %v8679_v34, 5  ;;  %v8685_v21 = vrot.slane %v8683_v9, 4  ;;  %v8691_v35 = vrot.slane %v8689_v26, 5 }
 0x386   : > { %13939 = vmatmul.mubr.bf16.gmra.mxu1 %v18908_v55  ;;  %v9985_v25 = vsel %vm14685_vm6, %v9980_v24, %v9984_v2  ;;  %v9999_v18 = vrot.slane %v9997_v14, 4  ;;  %v10002_v3 = vrot.slane %v10000_v52, 5  ;;  %v8677_v8 = vrot.slane %v8676_v36, 4 }
 0x387   : > { %13942 = vmatprep.mubr.bf16.mxu1 %v12381_v48  ;;  %v9995_v61 = vsel %vm14685_vm6, %v9990_v28, %v9994_v16  ;;  %v8686_v59 = vor.u32 %v8685_v21, %v8681_v53  ;;  %v10006_v55 = vshll.u32 %v18950_v58, 16  ;;  %v10010_v54 = vshrl.u32 %v18950_v58, 16  ;;  %v18976_v16 = vpop.f32.mrf.mxu0  ;;  %v18981_v28 = vld [vmem:[#allocation3 + $0x38] sm:$0x1] }
 0x388   : > { %v12505_v42 = vcombine.low %v9985_v25, %v9995_v61  ;;  %v10003_v48 = vor.u32 %v10002_v3, %v9999_v18  ;;  %v10016_v10 = vshll.u32 %v18953_v45, 16  ;;  %v8682_v30 = vsel %vm14685_vm6, %v8677_v8, %v8681_v53  ;;  %v9933_v3 = vld [vmem:[#allocation3 + $0x3c] sm:$0xf] }
 0x389   : > { %v8687_v5 = vrot.slane %v8686_v59, 4  ;;  %v10008_v17 = vrot.slane %v10006_v55, 5  ;;  %v8694_v20 = vshrl.u32 %v8330_v23, 16  ;;  %v10012_v44 = vrot.slane %v10010_v54, 4  ;;  %v18991_v55 = vld [vmem:[#allocation3 + $0x40] sm:$0xf] }
 0x38a   : > { %14062 = vmatprep.mubr.bf16.mxu0 %v12505_v42  ;;  %v10004_v11 = vrot.slane %v10003_v48, 4  ;;  %v10018_v22 = vrot.slane %v10016_v10, 5  ;;  %v8697_v49 = vshll.u32 %v8330_v23, 16  ;;  %v8703_v2 = vshll.u32 %v18901_v33, 16  ;;  %v18987_v23 = vpop.f32.mrf.mxu0 }
 0x38b   : > { %v8692_v7 = vsel %vm14685_vm6, %v8687_v5, %v8691_v35  ;;  %v8696_v37 = vrot.slane %v8694_v20, 4  ;;  %v8707_v56 = vshrl.u32 %v18901_v33, 16  ;;  %v10013_v47 = vor.u32 %v10012_v44, %v10008_v17 }
 0x38c   : > { %v12383_v51 = vcombine.low %v8682_v30, %v8692_v7  ;;  %v10009_v12 = vsel %vm14685_vm6, %v10004_v11, %v10008_v17  ;;  %v8699_v34 = vrot.slane %v8697_v49, 5  ;;  %v8705_v9 = vrot.slane %v8703_v2, 5  ;;  %v14424_v30 = vld [vmem:[%s20109_s5 + $0x30] sm:$0xff]   ;;  %v19001_v49 = vld [vmem:[#allocation3 + $0x44] sm:$0x1] }
 0x38d   : > { %v8709_v24 = vrot.slane %v8707_v56, 4  ;;  %v8713_v26 = vshll.u32 %v18903_v41, 16  ;;  %v10021_v14 = vshrl.u32 %v9930_v4, 16  ;;  %v10014_v33 = vrot.slane %v10013_v47, 4  ;;  %v9936_v7 = vld [vmem:[#allocation3 + $0x48] sm:$0xf] }
 0x38e   : > { %13943 = vmatmul.mubr.bf16.gmra.mxu1 %v12382_v50  ;;  %v8700_v52 = vor.u32 %v8699_v34, %v8696_v37  ;;  %v10024_v36 = vshll.u32 %v9930_v4, 16  ;;  %v10030_v53 = vshll.u32 %v18972_v13, 16  ;;  %v10034_v18 = vshrl.u32 %v18972_v13, 16  ;;  %v18985_v50 = vpop.f32.mrf.mxu1  ;;  %v19008_v34 = vld [vmem:[#allocation3 + $0x4c] sm:$0xf] }
 0x38f   : > { %13946 = vmatprep.mubr.bf16.mxu1 %v12383_v51  ;;  %v8710_v21 = vor.u32 %v8709_v24, %v8705_v9  ;;  %v8715_v25 = vrot.slane %v8713_v26, 5  ;;  %v10023_v35 = vrot.slane %v10021_v14, 4  ;;  %v10019_v41 = vsel %vm14685_vm6, %v10014_v33, %v10018_v22  ;;  %v14416_v26 = vld [vmem:[#allocation3 + $0x18] sm:$0xff]  }
 0x390   : > { %v8701_v61 = vrot.slane %v8700_v52, 4  ;;  %v10026_v8 = vrot.slane %v10024_v36, 5  ;;  %v10032_v59 = vrot.slane %v10030_v53, 5  ;;  %v12506_v42 = vcombine.low %v10009_v12, %v10019_v41  ;;  %v19004_v37 = vpop.f32.mrf.mxu1  ;;  %v14428_v52 = vld [vmem:[%s20109_s5 + $0x28] sm:$0xff]  }
 0x391   : > { %v8711_v48 = vrot.slane %v8710_v21, 4  ;;  %v10036_v54 = vrot.slane %v10034_v18, 4  ;;  %v10040_v10 = vshll.u32 %v18981_v28, 16  ;;  %v10045_v17 = vshrl.u32 %v9933_v3, 16 }
 0x392   : > { %v10027_v5 = vor.u32 %v10026_v8, %v10023_v35  ;;  %v10048_v20 = vshll.u32 %v9933_v3, 16  ;;  %14063 = vmatmul.mubr.bf16.vlgmr.msra.gmra.mxu0 %v12506_v42  ;;  %v8706_v11 = vsel %vm14685_vm6, %v8701_v61, %v8705_v9  ;;  %v10054_v4 = vshll.u32 %v18991_v55, 16  ;;  %v19006_v2 = vpop.f32.mrf.mxu0  ;;  %v19026_v61 = vpop.f32.mrf.mxu1 }
 0x393   : > { %v8716_v44 = vsel %vm14685_vm6, %v8711_v48, %v8715_v25  ;;  %v10037_v22 = vor.u32 %v10036_v54, %v10032_v59  ;;  %v10047_v12 = vrot.slane %v10045_v17, 4  ;;  %14143 = vmatpush3.bf16.msra.mxu0 %v18810_v63  ;;  %v10042_v24 = vrot.slane %v10040_v10, 5  ;;  %v19020_v63 = vld [vmem:[#allocation3 + $0x50] sm:$0x1]  ;;  %v9939_v54 = vld [vmem:[#allocation3 + $0x54] sm:$0xf] }
 0x394   : > { %v12384_v56 = vcombine.low %v8706_v11, %v8716_v44  ;;  %v10028_v51 = vrot.slane %v10027_v5, 4  ;;  %v10050_v47 = vrot.slane %v10048_v20, 5  ;;  %v10056_v14 = vrot.slane %v10054_v4, 5  ;;  %14144 = vmatprep.subr.bf16.mxu0 %v14424_v30  ;;  %v19028_v8 = vpop.f32.mrf.mxu0  ;;  %v19033_v20 = vld [vmem:[#allocation3 + $0x58] sm:$0xf]  ;;  %v14432_v11 = vld [vmem:[%s20109_s5 + $0x20] sm:$0xff]  }
 0x395   : > { %v10038_v9 = vrot.slane %v10037_v22, 4  ;;  %v10058_v33 = vshrl.u32 %v18991_v55, 16  ;;  %v10064_v53 = vshll.u32 %v19001_v49, 16  ;;  %v19018_v21 = vadd.f32 %v18795_v62, %v18935_v6 }
 0x396   : > { %13947 = vmatmul.mubr.bf16.gmra.mxu1 %v12384_v56  ;;  %v10051_v36 = vor.u32 %v10050_v47, %v10047_v12  ;;  %v10069_v25 = vshrl.u32 %v9936_v7, 16  ;;  %v10033_v35 = vsel %vm14685_vm6, %v10028_v51, %v10032_v59  ;;  %v10072_v41 = vshll.u32 %v9936_v7, 16  ;;  %v19048_v47 = vld [vmem:[#allocation3 + $0x5c] sm:$0x1] }
 0x397   : > { %v10043_v18 = vsel %vm14685_vm6, %v10038_v9, %v10042_v24  ;;  %14014 = vmatprep.mubr.bf16.mxu1 %v14416_v26  ;;  %v10060_v3 = vrot.slane %v10058_v33, 4  ;;  %v10078_v6 = vshll.u32 %v19008_v34, 16  ;;  %14145 = vmatpush3.bf16.msra.mxu0 %v14424_v30  ;;  %v10082_v59 = vshrl.u32 %v19008_v34, 16  ;;  %v19050_v9 = vpop.f32.mrf.mxu1  ;;  %v19052_v24 = vpop.f32.mrf.mxu0  ;;  %v14417_v26 = vld [vmem:[#allocation3 + $0x24] sm:$0xff]  }
 0x398   : > { %v12507_v42 = vcombine.low %v10033_v35, %v10043_v18  ;;  %v10052_v48 = vrot.slane %v10051_v36, 4  ;;  %v10071_v62 = vrot.slane %v10069_v25, 4  ;;  %v10074_v5 = vrot.slane %v10072_v41, 5  ;;  %14146 = vmatprep.subr.bf16.mxu0 %v14428_v52  ;;  %20599 = vst [vmem:[#allocation58_spill] sm:$0xff] %v19050_v9  ;;  %v14419_v25 = vld [vmem:[#allocation3 + $0x30] sm:$0xff]  }
 0x399   : > { %v10061_v10 = vor.u32 %v10060_v3, %v10056_v14  ;;  %v10088_v17 = vshll.u32 %v19020_v63, 16  ;;  %v10066_v44 = vrot.slane %v10064_v53, 5  ;;  %v10080_v22 = vrot.slane %v10078_v6, 5  ;;  %v9942_v18 = vld [vmem:[#allocation3 + $0x60] sm:$0xf] }
 0x39a   : > { %14066 = vmatprep.mubr.bf16.mxu0 %v12507_v42  ;;  %v19040_v4 = vadd.f32 %v18819_v27, %v18945_v19  ;;  %v19044_v30 = vadd.f32 %v18850_v57, %v18960_v38  ;;  %v10057_v7 = vsel %vm14685_vm6, %v10052_v48, %v10056_v14  ;;  %v10075_v51 = vor.u32 %v10074_v5, %v10071_v62  ;;  %v14422_v57 = vld [vmem:[%s20107_s3 + $0x230] sm:$0xff]   ;;  %v19061_v62 = vld [vmem:[#allocation3 + $0x64] sm:$0xf] }
 0x39b   : > { %v10062_v56 = vrot.slane %v10061_v10, 4  ;;  %v10084_v12 = vrot.slane %v10082_v59, 4  ;;  %v10090_v33 = vrot.slane %v10088_v17, 5  ;;  %v10093_v27 = vshrl.u32 %v9939_v54, 16  ;;  %14147 = vmatpush3.bf16.msra.mxu0 %v14428_v52  ;;  %v14436_v52 = vld [vmem:[%s20109_s5 + $0x18] sm:$0xff]   ;;  %v19072_v17 = vpop.f32.mrf.mxu0 }
 0x39c   : > { %v10096_v19 = vshll.u32 %v9939_v54, 16  ;;  %v10102_v36 = vshll.u32 %v19033_v20, 16  ;;  %v10076_v14 = vrot.slane %v10075_v51, 4  ;;  %v10106_v35 = vshrl.u32 %v19033_v20, 16  ;;  %14148 = vmatprep.subr.bf16.mxu0 %v14432_v11 }
 0x39d   : > { %v10067_v38 = vsel %vm14685_vm6, %v10062_v56, %v10066_v44  ;;  %v10085_v53 = vor.u32 %v10084_v12, %v10080_v22  ;;  %v10095_v41 = vrot.slane %v10093_v27, 4  ;;  %v10112_v5 = vshll.u32 %v19048_v47, 16  ;;  %v19078_v56 = vld [vmem:[#allocation3 + $0x68] sm:$0x1] }
 0x39e   : > { %v12508_v3 = vcombine.low %v10057_v7, %v10067_v38  ;;  %14015 = vmatmul.mubr.bf16.vlgmr.msra.gmra.mxu1 %v14417_v26  ;;  %v10098_v42 = vrot.slane %v10096_v19, 5  ;;  %v10104_v48 = vrot.slane %v10102_v36, 5  ;;  %v10081_v6 = vsel %vm14685_vm6, %v10076_v14, %v10080_v22  ;;  %v14426_v19 = vld [vmem:[%s20107_s3 + $0x228] sm:$0xff]  }
 0x39f   : > { %v10086_v54 = vrot.slane %v10085_v53, 4  ;;  %14018 = vmatprep.mubr.bf16.mxu1 %v14419_v25  ;;  %14095 = vmatpush3.bf16.msra.mxu1 %v18913_v60  ;;  %v10108_v10 = vrot.slane %v10106_v35, 4  ;;  %v19070_v59 = vpop.f32.mrf.mxu1  ;;  %v19076_v7 = vadd.f32 %v18891_v0, %v18985_v50  ;;  %v10117_v22 = vshrl.u32 %v9942_v18, 16  ;;  %v14421_v50 = vld [vmem:[#allocation3 + $0x3c] sm:$0xff]  }
 0x3a0   : > { %14067 = vmatmul.mubr.bf16.gmra.mxu0 %v12508_v3  ;;  %v10099_v44 = vor.u32 %v10098_v42, %v10095_v41  ;;  %v10120_v51 = vshll.u32 %v9942_v18, 16  ;;  %14096 = vmatprep.subr.bf16.mxu1 %v14422_v57  ;;  %v10114_v26 = vrot.slane %v10112_v5, 5  ;;  %v10126_v27 = vshll.u32 %v19061_v62, 16  ;;  %v19107_v5 = vld [vmem:[#allocation3 + $0x74] sm:$0x1] }
 0x3a1   : > { %20600 = vst [vmem:[#allocation42_spill] sm:$0xff] %v19076_v7  ;;  %v10091_v60 = vsel %vm14685_vm6, %v10086_v54, %v10090_v33  ;;  %v10109_v12 = vor.u32 %v10108_v10, %v10104_v48  ;;  %14149 = vmatpush3.bf16.msra.mxu0 %v14432_v11  ;;  %v10119_v38 = vrot.slane %v10117_v22, 4  ;;  %v19086_v53 = vpop.f32.mrf.mxu1  ;;  %v14440_v33 = vld [vmem:[%s20109_s5 + $0x10] sm:$0xff]   ;;  %v10130_v18 = vshrl.u32 %v19061_v62, 16  ;;  %v9945_v11 = vld [vmem:[#allocation3 + $0x6c] sm:$0xf] }
 0x3a2   : > { %v12509_v36 = vcombine.low %v10081_v6, %v10091_v60  ;;  %v10100_v0 = vrot.slane %v10099_v44, 4  ;;  %v10122_v14 = vrot.slane %v10120_v51, 5  ;;  %14150 = vmatprep.subr.bf16.mxu0 %v14436_v52  ;;  %v19091_v35 = vrot.slane %v10126_v27, 5  ;;  %v19105_v10 = vld [vmem:[#allocation3 + $0x70] sm:$0xf]  ;;  %v14423_v51 = vld [vmem:[#allocation3 + $0x48] sm:$0xff]  }
 0x3a3   : > { %v10110_v25 = vrot.slane %v10109_v12, 4  ;;  %v10136_v3 = vshll.u32 %v19078_v56, 16  ;;  %14097 = vmatpush3.bf16.msra.mxu1 %v14422_v57  ;;  %v19095_v41 = vpop.f32.mrf.mxu0  ;;  %v19099_v6 = vadd.f32 %v18915_v43, %v19004_v37  ;;  %v19103_v54 = vadd.f32 %v18924_v29, %v19026_v61  ;;  %v14430_v57 = vld [vmem:[%s20107_s3 + $0x220] sm:$0xff]  }
 0x3a4   : > { %14070 = vmatprep.mubr.bf16.mxu0 %v12509_v36  ;;  %v10123_v42 = vor.u32 %v10122_v14, %v10119_v38  ;;  %v10105_v44 = vsel %vm14685_vm6, %v10100_v0, %v10104_v48  ;;  %v10132_v43 = vrot.slane %v10130_v18, 4  ;;  %14098 = vmatprep.subr.bf16.mxu1 %v14426_v19  ;;  %v10141_v12 = vshrl.u32 %v9945_v11, 16  ;;  %v9948_v36 = vld [vmem:[#allocation3 + $0x78] sm:$0xf]  ;;  %v19118_v38 = vpop.f32.mrf.mxu1  ;;  %v14444_v48 = vld [vmem:[%s20109_s5 + $0x8] sm:$0xff]  }
 0x3a5   : > { %20601 = vst [vmem:[#allocation44_spill] sm:$0xff] %v19099_v6  ;;  %20602 = vst [vmem:[#allocation43_spill] sm:$0xff] %v19103_v54  ;;  %v10115_v22 = vsel %vm14685_vm6, %v10110_v25, %v10114_v26  ;;  %v10138_v37 = vrot.slane %v10136_v3, 5  ;;  %v19116_v29 = vpop.f32.mrf.mxu0  ;;  %14151 = vmatpush3.bf16.msra.mxu0 %v14436_v52  ;;  %v10144_v27 = vshll.u32 %v9945_v11, 16  ;;  %v10150_v0 = vshll.u32 %v19105_v10, 16 }
 0x3a6   : > { %v12510_v61 = vcombine.low %v10105_v44, %v10115_v22  ;;  %14019 = vmatmul.mubr.bf16.gmra.mxu1 %v14421_v50  ;;  %v10124_v60 = vrot.slane %v10123_v42, 4  ;;  %14152 = vmatprep.subr.bf16.mxu0 %v14440_v33  ;;  %v10133_v26 = vor.u32 %v10132_v43, %v19091_v35  ;;  %v10154_v52 = vshrl.u32 %v19105_v10, 16  ;;  %v19127_v14 = vld [vmem:[#allocation3 + $0x7c] sm:$0xf]  ;;  %v19136_v42 = vld [vmem:[#allocation3 + $0x80] sm:$0x1] }
 0x3a7   : > { %14022 = vmatprep.mubr.bf16.mxu1 %v14423_v51  ;;  %v10160_v50 = vshll.u32 %v19107_v5, 16  ;;  %14099 = vmatpush3.bf16.msra.mxu1 %v14426_v19  ;;  %v10143_v18 = vrot.slane %v10141_v12, 4  ;;  %v10146_v3 = vrot.slane %v10144_v27, 5  ;;  %v19134_v11 = vadd.f32 %v18947_v15, %v19070_v59  ;;  %v14434_v44 = vld [vmem:[%s20107_s3 + $0x218] sm:$0xff]   ;;  %v7020_v59 = vpop.f32.mrf.mxu1 }
 0x3a8   : > { %14071 = vmatmul.mubr.bf16.gmra.mxu0 %v12510_v61  ;;  %v10129_v25 = vsel %vm14685_vm6, %v10124_v60, %v19091_v35  ;;  %14100 = vmatprep.subr.bf16.mxu1 %v14430_v57  ;;  %v10134_v22 = vrot.slane %v10133_v26, 4  ;;  %v10152_v19 = vrot.slane %v10150_v0, 5  ;;  %v10156_v43 = vrot.slane %v10154_v52, 4  ;;  %v19141_v61 = vpop.f32.mrf.mxu0  ;;  %v9951_v0 = vld [vmem:[#allocation3 + $0x84] sm:$0xf] }
 0x3a9   : > { %20603 = vst [vmem:[#allocation19_spill] sm:$0xff] %v19134_v11  ;;  %v10162_v51 = vrot.slane %v10160_v50, 5  ;;  %14153 = vmatpush3.bf16.msra.mxu0 %v14440_v33  ;;  %v10147_v35 = vor.u32 %v10146_v3, %v10143_v18  ;;  %v10165_v60 = vshrl.u32 %v9948_v36, 16  ;;  %v10168_v12 = vshll.u32 %v9948_v36, 16  ;;  %v14425_v33 = vld [vmem:[#allocation3 + $0x54] sm:$0xff]   ;;  %v14447_v36 = vld [vmem:[%s20109_s5] sm:$0xff]  }
 0x3aa   : > { %v10174_v15 = vshll.u32 %v19127_v14, 16  ;;  %14154 = vmatprep.subr.bf16.mxu0 %v14444_v48  ;;  %v10139_v27 = vsel %vm14685_vm6, %v10134_v22, %v10138_v37  ;;  %v10157_v11 = vor.u32 %v10156_v43, %v10152_v19  ;;  %v10178_v54 = vshrl.u32 %v19127_v14, 16  ;;  %v14427_v43 = vld [vmem:[#allocation3 + $0x60] sm:$0xff]   ;;  %v19151_v6 = vpop.f32.mrf.mxu0 }
 0x3ab   : > { %v10184_v26 = vshll.u32 %v19136_v42, 16  ;;  %14101 = vmatpush3.bf16.msra.mxu1 %v14430_v57  ;;  %v12511_v52 = vcombine.low %v10129_v25, %v10139_v27  ;;  %v10148_v50 = vrot.slane %v10147_v35, 4  ;;  %v10167_v18 = vrot.slane %v10165_v60, 4  ;;  %v14438_v57 = vld [vmem:[%s20107_s3 + $0x210] sm:$0xff]   ;;  %v19164_v60 = vld [vmem:[#allocation3 + $0x8c] sm:$0x1] }
 0x3ac   : > { %v10170_v3 = vrot.slane %v10168_v12, 5  ;;  %14102 = vmatprep.subr.bf16.mxu1 %v14434_v44  ;;  %v10158_v1 = vrot.slane %v10157_v11, 4  ;;  %v10176_v9 = vrot.slane %v10174_v15, 5  ;;  %v10180_v37 = vrot.slane %v10178_v54, 4  ;;  %v19162_v54 = vld [vmem:[#allocation3 + $0x88] sm:$0xf] }
 0x3ad   : > { %v10186_v22 = vrot.slane %v10184_v26, 5  ;;  %14155 = vmatpush3.bf16.msra.mxu0 %v14444_v48  ;;  %14074 = vmatprep.mubr.bf16.mxu0 %v12511_v52  ;;  %v10153_v25 = vsel %vm14685_vm6, %v10148_v50, %v10152_v19  ;;  %v19160_v11 = vadd.f32 %v18962_v40, %v19086_v53  ;;  %v10189_v12 = vshrl.u32 %v9951_v0, 16  ;;  %v9954_v40 = vld [vmem:[#allocation3 + $0x90] sm:$0xf] }
 0x3ae   : > { %14023 = vmatmul.mubr.bf16.gmra.mxu1 %v14425_v33  ;;  %v10171_v35 = vor.u32 %v10170_v3, %v10167_v18  ;;  %v13740_v15 = vpop.f32.mrf.mxu1  ;;  %v10163_v27 = vsel %vm14685_vm6, %v10158_v1, %v10162_v51  ;;  %v10181_v48 = vor.u32 %v10180_v37, %v10176_v9  ;;  %v19170_v19 = vadd.f32 %v18976_v16, %v19118_v38 }
 0x3af   : > { %20604 = vst [vmem:[#allocation51_spill] sm:$0xff] %v19160_v11  ;;  %14026 = vmatprep.mubr.bf16.mxu1 %v14427_v43  ;;  %v19173_v26 = vadd.f32 %v18987_v23, %v7020_v59  ;;  %v12512_v53 = vcombine.low %v10153_v25, %v10163_v27  ;;  %v10191_v50 = vrot.slane %v10189_v12, 4  ;;  %v10192_v33 = vshll.u32 %v9951_v0, 16  ;;  %14103 = vmatpush3.bf16.msra.mxu1 %v14434_v44  ;;  %v14442_v23 = vld [vmem:[%s20107_s3 + $0x208] sm:$0xff]   ;;  %v19190_v43 = vld [vmem:[#allocation3 + $0x98] sm:$0x1] }
 0x3b0   : > { %20605 = vst [vmem:[#allocation53_spill] sm:$0xff] %v19170_v19  ;;  %v10172_v52 = vrot.slane %v10171_v35, 4  ;;  %v7033_v18 = vpop.f32.mrf.mxu1  ;;  %14156 = vmatprep.subr.bf16.mxu0 %v14447_v36  ;;  %v10182_v3 = vrot.slane %v10181_v48, 4  ;;  %v10198_v1 = vshll.u32 %v19162_v54, 16  ;;  %v10202_v51 = vshrl.u32 %v19162_v54, 16  ;;  %14104 = vmatprep.subr.bf16.mxu1 %v14438_v57  ;;  %20608 = vst [vmem:[#allocation61_spill] sm:$0xff] %v19190_v43 }
 0x3b1   : > { %20606 = vst [vmem:[#allocation55_spill] sm:$0xff] %v19173_v26  ;;  %v10208_v37 = vshll.u32 %v19164_v60, 16  ;;  %v19178_v16 = vpop.f32.mrf.mxu0  ;;  %14157 = vmatpush3.bf16.msra.mxu0 %v14447_v36  ;;  %v10194_v44 = vrot.slane %v10192_v33, 5  ;;  %v19186_v59 = vadd.f32 %v19006_v2, %v13740_v15  ;;  %v19188_v0 = vld [vmem:[#allocation3 + $0x94] sm:$0xf]  ;;  %v10213_v25 = vshrl.u32 %v9954_v40, 16 }
 0x3b2   : > { %14075 = vmatmul.mubr.bf16.gmra.mxu0 %v12512_v53  ;;  %v10177_v38 = vsel %vm14685_vm6, %v10172_v52, %v10176_v9  ;;  %v13741_v35 = vpop.f32.mrf.mxu1  ;;  %v10187_v12 = vsel %vm14685_vm6, %v10182_v3, %v10186_v22  ;;  %v10200_v27 = vrot.slane %v10198_v1, 5  ;;  %v10204_v48 = vrot.slane %v10202_v51, 4  ;;  %v14429_v52 = vld [vmem:[#allocation3 + $0x6c] sm:$0xff]   ;;  %v14431_v15 = vld [vmem:[#allocation3 + $0x78] sm:$0xff]  }
 0x3b3   : > { %20607 = vst [vmem:[#allocation8_spill] sm:$0xff] %v19186_v59  ;;  %v10210_v36 = vrot.slane %v10208_v37, 5  ;;  %v19194_v53 = vpop.f32.mrf.mxu0  ;;  %v12513_v26 = vcombine.low %v10177_v38, %v10187_v12  ;;  %v10195_v9 = vor.u32 %v10194_v44, %v10191_v50  ;;  %v10215_v33 = vrot.slane %v10213_v25, 4  ;;  %14105 = vmatpush3.bf16.msra.mxu1 %v14438_v57  ;;  %v9957_v3 = vld [vmem:[#allocation3 + $0x9c] sm:$0xf]  ;;  %v14446_v50 = vld [vmem:[%s20107_s3 + $0x200] sm:$0xff]  }
 0x3b4   : > { %v10216_v2 = vshll.u32 %v9954_v40, 16  ;;  %v10205_v59 = vor.u32 %v10204_v48, %v10200_v27  ;;  %v10222_v19 = vshll.u32 %v19188_v0, 16  ;;  %v10226_v11 = vshrl.u32 %v19188_v0, 16  ;;  %v7036_v22 = vpop.f32.mrf.mxu1  ;;  %14106 = vmatprep.subr.bf16.mxu1 %v14442_v23  ;;  %v19210_v38 = vld [vmem:[#allocation3 + $0xa0] sm:$0xf] }
 0x3b5   : > { %v10232_v7 = vshll.u32 %v19190_v43, 16  ;;  %v19199_v1 = vpop.f32.mrf.mxu0  ;;  %14078 = vmatprep.mubr.bf16.mxu0 %v12513_v26  ;;  %v10196_v40 = vrot.slane %v10195_v9, 4  ;;  %v19205_v51 = vadd.f32 %v19028_v8, %v7033_v18  ;;  %v19208_v37 = vadd.f32 %v19052_v24, %v13741_v35  ;;  %20611 = vst [vmem:[#allocation24_spill] sm:$0xff] %v19210_v38  ;;  %v19219_v8 = vld [vmem:[#allocation3 + $0xa4] sm:$0x1] }
 0x3b6   : > { %14027 = vmatmul.mubr.bf16.gmra.mxu1 %v14429_v52  ;;  %v10218_v57 = vrot.slane %v10216_v2, 5  ;;  %v10206_v44 = vrot.slane %v10205_v59, 4  ;;  %v10224_v25 = vrot.slane %v10222_v19, 5  ;;  %v10228_v12 = vrot.slane %v10226_v11, 4  ;;  %20613 = vst [vmem:[#allocation59_spill] sm:$0xff] %v19219_v8 }
 0x3b7   : > { %20609 = vst [vmem:[#allocation46_spill] sm:$0xff] %v19205_v51  ;;  %20610 = vst [vmem:[#allocation72_spill] sm:$0xff] %v19208_v37  ;;  %v10234_v48 = vrot.slane %v10232_v7, 5  ;;  %14030 = vmatprep.mubr.bf16.mxu1 %v14431_v15  ;;  %v19212_v43 = vpop.f32.mrf.mxu0  ;;  %v10201_v26 = vsel %vm14685_vm6, %v10196_v40, %v10200_v27  ;;  %v19217_v52 = vadd.f32 %v19072_v17, %v7036_v22  ;;  %v10237_v24 = vshrl.u32 %v9957_v3, 16  ;;  %v9960_v59 = vld [vmem:[#allocation3 + $0xa8] sm:$0xf] }
 0x3b8   : > { %v10219_v9 = vor.u32 %v10218_v57, %v10215_v33  ;;  %14107 = vmatpush3.bf16.msra.mxu1 %v14442_v23  ;;  %v10211_v18 = vsel %vm14685_vm6, %v10206_v44, %v10210_v36  ;;  %v10229_v19 = vor.u32 %v10228_v12, %v10224_v25  ;;  %v10240_v11 = vshll.u32 %v9957_v3, 16  ;;  %v19228_v36 = vld [vmem:[#allocation3 + $0xac] sm:$0xf]  ;;  %v14435_v37 = vld [vmem:[#allocation3 + $0x90] sm:$0xff]  }
 0x3b9   : > { %20612 = vst [vmem:[#allocation73_spill] sm:$0xff] %v19217_v52  ;;  %v10246_v7 = vshll.u32 %v19210_v38, 16  ;;  %v19224_v35 = vpop.f32.mrf.mxu0  ;;  %14108 = vmatprep.subr.bf16.mxu1 %v14446_v50  ;;  %v12514_v27 = vcombine.low %v10201_v26, %v10211_v18  ;;  %v10239_v2 = vrot.slane %v10237_v24, 4  ;;  %v10250_v17 = vshrl.u32 %v19210_v38, 16  ;;  %20614 = vst [vmem:[#allocation34_spill] sm:$0xff] %v19228_v36 }
 0x3ba   : > { %v10220_v33 = vrot.slane %v10219_v9, 4  ;;  %v10230_v15 = vrot.slane %v10229_v19, 4  ;;  %v10242_v22 = vrot.slane %v10240_v11, 5  ;;  %v10256_v23 = vshll.u32 %v19219_v8, 16  ;;  %v14433_v9 = vld [vmem:[#allocation3 + $0x84] sm:$0xff]  }
 0x3bb   : > { %v10248_v40 = vrot.slane %v10246_v7, 5  ;;  %v13744_v57 = vpop.f32.mrf.mxu1  ;;  %v19230_v3 = vpop.f32.mrf.mxu0  ;;  %14079 = vmatmul.mubr.bf16.gmra.mxu0 %v12514_v27  ;;  %v10252_v12 = vrot.slane %v10250_v17, 4  ;;  %v19237_v24 = vld [vmem:[#allocation3 + $0xb0] sm:$0x1]  ;;  %v10261_v18 = vshrl.u32 %v9960_v59, 16  ;;  %v10264_v52 = vshll.u32 %v9960_v59, 16 }
 0x3bc   : > { %v10225_v44 = vsel %vm14685_vm6, %v10220_v33, %v10224_v25  ;;  %v19235_v26 = vadd.f32 %v19095_v41, %v13744_v57  ;;  %20616 = vst [vmem:[#allocation40_spill] sm:$0xff] %v19237_v24  ;;  %14109 = vmatpush3.bf16.msra.mxu1 %v14446_v50  ;;  %v10235_v19 = vsel %vm14685_vm6, %v10230_v15, %v10234_v48  ;;  %v10258_v7 = vrot.slane %v10256_v23, 5 }
 0x3bd   : > { %v10243_v11 = vor.u32 %v10242_v22, %v10239_v2  ;;  %v7049_v27 = vpop.f32.mrf.mxu1  ;;  %v19241_v51 = vpop.f32.mrf.mxu0  ;;  %v12515_v25 = vcombine.low %v10225_v44, %v10235_v19  ;;  %v10253_v33 = vor.u32 %v10252_v12, %v10248_v40  ;;  %v10263_v41 = vrot.slane %v10261_v18, 4  ;;  %v9963_v2 = vld [vmem:[#allocation3 + $0xb4] sm:$0xf]  ;;  %v19254_v12 = vld [vmem:[#allocation3 + $0xb8] sm:$0xf] }
 0x3be   : > { %20615 = vst [vmem:[#allocation57_spill] sm:$0xff] %v19235_v26  ;;  %14031 = vmatmul.mubr.bf16.gmra.mxu1 %v14433_v9  ;;  %v10270_v17 = vshll.u32 %v19228_v36, 16  ;;  %v10266_v26 = vrot.slane %v10264_v52, 5  ;;  %v10274_v50 = vshrl.u32 %v19228_v36, 16  ;;  %v10280_v8 = vshll.u32 %v19237_v24, 16  ;;  %20619 = vst [vmem:[#allocation10_spill] sm:$0xff] %v19254_v12 }
 0x3bf   : > { %v10244_v57 = vrot.slane %v10243_v11, 4  ;;  %14034 = vmatprep.mubr.bf16.mxu1 %v14435_v37  ;;  %v13745_v48 = vpop.f32.mrf.mxu1  ;;  %v19246_v59 = vpop.f32.mrf.mxu0  ;;  %14082 = vmatprep.mubr.bf16.mxu0 %v12515_v25  ;;  %v10254_v15 = vrot.slane %v10253_v33, 4  ;;  %v19249_v23 = vadd.f32 %v19116_v29, %v7049_v27  ;;  %v19258_v11 = vld [vmem:[#allocation3 + $0xbc] sm:$0x1]  ;;  %v10285_v27 = vshrl.u32 %v9963_v2, 16 }
 0x3c0   : > { %v10272_v22 = vrot.slane %v10270_v17, 5  ;;  %v19252_v44 = vadd.f32 %v19141_v61, %v13745_v48  ;;  %v10267_v9 = vor.u32 %v10266_v26, %v10263_v41  ;;  %v10276_v37 = vrot.slane %v10274_v50, 4  ;;  %20620 = vst [vmem:[#allocation66_spill] sm:$0xff] %v19258_v11  ;;  %v9966_v41 = vld [vmem:[#allocation3 + $0xc0] sm:$0xf] }
 0x3c1   : > { %20617 = vst [vmem:[#allocation45_spill] sm:$0xff] %v19249_v23  ;;  %v10249_v52 = vsel %vm14685_vm6, %v10244_v57, %v10248_v40  ;;  %v10282_v18 = vrot.slane %v10280_v8, 5  ;;  %v7052_v19 = vpop.f32.mrf.mxu1  ;;  %v10259_v25 = vsel %vm14685_vm6, %v10254_v15, %v10258_v7  ;;  %v10288_v61 = vshll.u32 %v9963_v2, 16  ;;  %v14437_v8 = vld [vmem:[#allocation3 + $0x9c] sm:$0xff]   ;;  %v19279_v23 = vld [vmem:[#allocation3 + $0xc8] sm:$0x1] }
 0x3c2   : > { %20618 = vst [vmem:[#allocation47_spill] sm:$0xff] %v19252_v44  ;;  %v19263_v29 = vadd.f32 %v19151_v6, %v7052_v19  ;;  %v19265_v33 = vpop.f32.mrf.mxu0  ;;  %v12516_v17 = vcombine.low %v10249_v52, %v10259_v25  ;;  %v10268_v48 = vrot.slane %v10267_v9, 4  ;;  %v10277_v44 = vor.u32 %v10276_v37, %v10272_v22  ;;  %v19270_v6 = vld [vmem:[#allocation3 + $0xc4] sm:$0xf]  ;;  %v14439_v19 = vld [vmem:[#allocation3 + $0xa8] sm:$0xff]   ;;  %20623 = vst [vmem:[#allocation12_spill] sm:$0xff] %v19279_v23 }
 0x3c3   : > { %v10294_v40 = vshll.u32 %v19254_v12, 16  ;;  %v13748_v26 = vpop.f32.mrf.mxu1  ;;  %v10287_v57 = vrot.slane %v10285_v27, 4  ;;  %v10290_v50 = vrot.slane %v10288_v61, 5  ;;  %v10298_v24 = vshrl.u32 %v19254_v12, 16 }
 0x3c4   : > { %20621 = vst [vmem:[#allocation77_spill] sm:$0xff] %v19263_v29  ;;  %v10304_v7 = vshll.u32 %v19258_v11, 16  ;;  %v19272_v15 = vpop.f32.mrf.mxu0  ;;  %14083 = vmatmul.mubr.bf16.gmra.mxu0 %v12516_v17  ;;  %v10273_v2 = vsel %vm14685_vm6, %v10268_v48, %v10272_v22  ;;  %v10278_v52 = vrot.slane %v10277_v44, 4  ;;  %v19277_v37 = vadd.f32 %v19178_v16, %v13748_v26 }
 0x3c5   : > { %v10296_v9 = vrot.slane %v10294_v40, 5  ;;  %v7065_v25 = vpop.f32.mrf.mxu1  ;;  %v10291_v27 = vor.u32 %v10290_v50, %v10287_v57  ;;  %v10300_v61 = vrot.slane %v10298_v24, 4  ;;  %v10309_v36 = vshrl.u32 %v9966_v41, 16  ;;  %v9969_v50 = vld [vmem:[#allocation3 + $0xcc] sm:$0xf] }
 0x3c6   : > { %20622 = vst [vmem:[#allocation37_spill] sm:$0xff] %v19277_v37  ;;  %v10306_v29 = vrot.slane %v10304_v7, 5  ;;  %14035 = vmatmul.mubr.bf16.gmra.mxu1 %v14437_v8  ;;  %v19281_v11 = vpop.f32.mrf.mxu0  ;;  %v10283_v17 = vsel %vm14685_vm6, %v10278_v52, %v10282_v18  ;;  %v10312_v22 = vshll.u32 %v9966_v41, 16  ;;  %v10318_v44 = vshll.u32 %v19270_v6, 16  ;;  %v19290_v41 = vld [vmem:[#allocation3 + $0xd0] sm:$0xf] }
 0x3c7   : > { %v10322_v16 = vshrl.u32 %v19270_v6, 16  ;;  %14038 = vmatprep.mubr.bf16.mxu1 %v14439_v19  ;;  %v13749_v48 = vpop.f32.mrf.mxu1  ;;  %v12517_v40 = vcombine.low %v10273_v2, %v10283_v17  ;;  %v10292_v26 = vrot.slane %v10291_v27, 4  ;;  %v10301_v24 = vor.u32 %v10300_v61, %v10296_v9 }
 0x3c8   : > { %v10311_v57 = vrot.slane %v10309_v36, 4  ;;  %v19287_v8 = vpop.f32.mrf.mxu0  ;;  %v10314_v7 = vrot.slane %v10312_v22, 5  ;;  %v10320_v37 = vrot.slane %v10318_v44, 5  ;;  %v10328_v38 = vshll.u32 %v19279_v23, 16 }
 0x3c9   : > { %v10324_v12 = vrot.slane %v10322_v16, 4  ;;  %v7068_v18 = vpop.f32.mrf.mxu1  ;;  %14086 = vmatprep.mubr.bf16.mxu0 %v12517_v40  ;;  %v10297_v52 = vsel %vm14685_vm6, %v10292_v26, %v10296_v9  ;;  %v10302_v19 = vrot.slane %v10301_v24, 4  ;;  %v19295_v2 = vadd.f32 %v19194_v53, %v7065_v25  ;;  %v14441_v40 = vld [vmem:[#allocation3 + $0xb4] sm:$0xff]  }
 0x3ca   : > { %v19298_v36 = vadd.f32 %v19199_v1, %v13749_v48  ;;  %v19300_v27 = vpop.f32.mrf.mxu0  ;;  %v10315_v61 = vor.u32 %v10314_v7, %v10311_v57  ;;  %v10330_v22 = vrot.slane %v10328_v38, 5  ;;  %v19303_v44 = vadd.f32 %v19212_v43, %v7068_v18  ;;  %v19307_v9 = vld [vmem:[#allocation3 + $0xd4] sm:$0x1]  ;;  %v14443_v38 = vld [vmem:[#allocation3 + $0xc0] sm:$0xff]  }
 0x3cb   : > { %v10325_v17 = vor.u32 %v10324_v12, %v10320_v37  ;;  %v10307_v16 = vsel %vm14685_vm6, %v10302_v19, %v10306_v29  ;;  %v10333_v26 = vshrl.u32 %v9969_v50, 16  ;;  %v10336_v53 = vshll.u32 %v9969_v50, 16 }
 0x3cc   : > { %20624 = vst [vmem:[#allocation54_spill] sm:$0xff] %v19298_v36  ;;  %20625 = vst [vmem:[#allocation65_spill] sm:$0xff] %v19303_v44  ;;  %v10342_v25 = vshll.u32 %v19290_v41, 16  ;;  %v19310_v1 = vpop.f32.mrf.mxu0  ;;  %v12518_v48 = vcombine.low %v10297_v52, %v10307_v16  ;;  %v10316_v24 = vrot.slane %v10315_v61, 4  ;;  %v10346_v43 = vshrl.u32 %v19290_v41, 16 }
 0x3cd   : > { %v10326_v57 = vrot.slane %v10325_v17, 4  ;;  %v13752_v12 = vpop.f32.mrf.mxu1  ;;  %v10335_v29 = vrot.slane %v10333_v26, 4  ;;  %v10338_v18 = vrot.slane %v10336_v53, 5  ;;  %v10678_v44 = vld [vmem:[#allocation3 + $0x18] sm:$0xe] }
 0x3ce   : > { %v19314_v7 = vadd.f32 %v19224_v35, %v13752_v12  ;;  %14039 = vmatmul.mubr.bf16.gmra.mxu1 %v14441_v40  ;;  %v10344_v19 = vrot.slane %v10342_v25, 5  ;;  %v19316_v50 = vpop.f32.mrf.mxu0  ;;  %14087 = vmatmul.mubr.bf16.gmra.mxu0 %v12518_v48  ;;  %v10321_v52 = vsel %vm14685_vm6, %v10316_v24, %v10320_v37  ;;  %v10348_v16 = vrot.slane %v10346_v43, 4  ;;  %v10679_v25 = vld [vmem:[#allocation3 + $0x24] sm:$0xe]  ;;  %v14486_v24 = vld [vmem:[#allocation3 + $0x1c] sm:$0xf] }
 0x3cf   : > { %v10331_v61 = vsel %vm14685_vm6, %v10326_v57, %v10330_v22  ;;  %14042 = vmatprep.mubr.bf16.mxu1 %v14443_v38  ;;  %v7081_v17 = vpop.f32.mrf.mxu1  ;;  %v10352_v35 = vshll.u32 %v19307_v9, 16  ;;  %v10339_v26 = vor.u32 %v10338_v18, %v10335_v29  ;;  %v12529_v37 = vrot.slane %v10678_v44, 9  ;;  %v14445_v38 = vld [vmem:[#allocation3 + $0xcc] sm:$0xff]   ;;  %v14487_v43 = vld [vmem:[#allocation3 + $0x20] sm:$0x1] }
 0x3d0   : > { %20626 = vst [vmem:[#allocation20_spill] sm:$0xff] %v19314_v7  ;;  %v12519_v12 = vcombine.low %v10321_v52, %v10331_v61  ;;  %v19324_v40 = vadd.f32 %v19230_v3, %v7081_v17  ;;  %v19326_v53 = vpop.f32.mrf.mxu0  ;;  %v10349_v7 = vor.u32 %v10348_v16, %v10344_v19  ;;  %v10744_v23 = vrot.slane %v14486_v24, 5  ;;  %v10680_v18 = vld [vmem:[#allocation3 + $0x30] sm:$0xe] }
 0x3d1   : > { %v13753_v48 = vpop.f32.mrf.mxu1  ;;  %v10354_v36 = vrot.slane %v10352_v35, 5  ;;  %v10340_v57 = vrot.slane %v10339_v26, 4  ;;  %v10747_v52 = vrot.slane %v14487_v43, 5  ;;  %v10751_v29 = vrot.slane %v18950_v58, 5 }
 0x3d2   : > { %14090 = vmatprep.mubr.bf16.mxu0 %v12519_v12  ;;  %v19329_v22 = vadd.f32 %v19241_v51, %v13753_v48  ;;  %v19331_v3 = vpop.f32.mrf.mxu0  ;;  %v10350_v61 = vrot.slane %v10349_v7, 4  ;;  %v10745_v44 = vsel %vm15120_vm13, %v12529_v37, %v10744_v23  ;;  %v10746_v16 = vrot.slane %v10744_v23, 4 }
 0x3d3   : > { %v7084_v17 = vpop.f32.mrf.mxu1  ;;  %v12530_v35 = vrot.slane %v10679_v25, 9  ;;  %v10345_v51 = vsel %vm14685_vm6, %v10340_v57, %v10344_v19  ;;  %v10753_v26 = vrot.slane %v10751_v29, 4  ;;  %v10754_v48 = vrot.slane %v18953_v45, 5 }
 0x3d4   : > { %v19339_v12 = vadd.f32 %v19246_v59, %v7084_v17  ;;  %v19342_v24 = vpop.f32.mrf.mxu0  ;;  %v10355_v58 = vsel %vm14685_vm6, %v10350_v61, %v10354_v36  ;;  %v10748_v37 = vsel %vm15120_vm13, %v10746_v16, %v10747_v52  ;;  %v12531_v23 = vrot.slane %v10680_v18, 9  ;;  %v10682_v61 = vld [vmem:[#allocation3 + $0x48] sm:$0xe] }
 0x3d5   : > { %v13756_v7 = vpop.f32.mrf.mxu1  ;;  %v10758_v25 = vrot.slane %v18972_v13, 5  ;;  %v12520_v43 = vcombine.low %v10345_v51, %v10355_v58  ;;  %v12561_v59 = vcombine.low %v10745_v44, %v10748_v37  ;;  %v10755_v45 = vsel %vm15120_vm13, %v10753_v26, %v10754_v48  ;;  %v20628_v51 = vld [vmem:[#allocation14_spill] sm:$0xff]  ;;  %v10683_v26 = vld [vmem:[#allocation3 + $0x54] sm:$0xe] }
 0x3d6   : > { %v19350_v19 = vadd.f32 %v19265_v33, %v13756_v7  ;;  %14043 = vmatmul.mubr.bf16.gmra.mxu1 %v14445_v38  ;;  %v19354_v57 = vpop.f32.mrf.mxu0  ;;  %v19358_v36 = vadd.f32 %v18871_v46, %v18974_v32  ;;  %v10752_v13 = vsel %vm15120_vm13, %v12530_v35, %v10751_v29  ;;  %v10761_v33 = vrot.slane %v18981_v28, 5 }
 0x3d7   : > { %v7097_v52 = vpop.f32.mrf.mxu1  ;;  %v10760_v18 = vrot.slane %v10758_v25, 4  ;;  %14091 = vmatmul.mubr.bf16.gmra.mxu0 %v12520_v43  ;;  %14110 = vmatprep.mubr.bf16.mxu1 %v12561_v59  ;;  %v12562_v17 = vcombine.low %v10752_v13, %v10755_v45  ;;  %v10759_v44 = vsel %vm15120_vm13, %v12531_v23, %v10758_v25  ;;  %v10765_v46 = vrot.slane %v18991_v55, 5  ;;  %v10684_v23 = vld [vmem:[#allocation3 + $0x60] sm:$0xe] }
 0x3d8   : > { %v19364_v38 = vadd.f32 %v19272_v15, %v7097_v52  ;;  %v19368_v16 = vpop.f32.mrf.mxu0  ;;  %14158 = vmatprep.mubr.bf16.mxu0 %v20628_v51  ;;  %v12532_v29 = vrot.slane %v10681_v39, 9  ;;  %v10768_v35 = vrot.slane %v19001_v49, 5  ;;  %v10772_v15 = vrot.slane %v19008_v34, 5 }
 0x3d9   : > { %v13757_v32 = vpop.f32.mrf.mxu1  ;;  %v10762_v28 = vsel %vm15120_vm13, %v10760_v18, %v10761_v33  ;;  %v10767_v7 = vrot.slane %v10765_v46, 4  ;;  %v12533_v37 = vrot.slane %v10682_v61, 9  ;;  %v10775_v55 = vrot.slane %v19020_v63, 5 }
 0x3da   : > { %20627 = vst [vmem:[#allocation48_spill] sm:$0xff] %v19364_v38  ;;  %v19377_v48 = vadd.f32 %v19281_v11, %v13757_v32  ;;  %v19379_v58 = vpop.f32.mrf.mxu0  ;;  %v12563_v43 = vcombine.low %v10759_v44, %v10762_v28  ;;  %v19384_v59 = vsel %vm15120_vm13, %v12532_v29, %v10765_v46  ;;  %v10774_v49 = vrot.slane %v10772_v15, 4  ;;  %v10685_v44 = vld [vmem:[#allocation3 + $0x6c] sm:$0xe] }
 0x3db   : > { %v7100_v25 = vpop.f32.mrf.mxu1  ;;  %v10779_v34 = vrot.slane %v19033_v20, 5  ;;  %v10769_v11 = vsel %vm15120_vm13, %v10767_v7, %v10768_v35  ;;  %v10773_v63 = vsel %vm15120_vm13, %v12533_v37, %v10772_v15  ;;  %v12534_v52 = vrot.slane %v10683_v26, 9  ;;  %v10686_v15 = vld [vmem:[#allocation3 + $0x78] sm:$0xe]  ;;  %v20631_v26 = vld [vmem:[#allocation15_spill] sm:$0xff] }
 0x3dc   : > { %20629 = vst [vmem:[#allocation23_spill] sm:$0xff] %v19377_v48  ;;  %v19388_v45 = vadd.f32 %v19287_v8, %v7100_v25  ;;  %v19392_v39 = vpop.f32.mrf.mxu0  ;;  %v10776_v18 = vsel %vm15120_vm13, %v10774_v49, %v10775_v55  ;;  %v10782_v61 = vrot.slane %v19048_v47, 5  ;;  %v12535_v20 = vrot.slane %v10684_v23, 9  ;;  %v10687_v49 = vld [vmem:[#allocation3 + $0x84] sm:$0xe]  ;;  %v20644_v48 = vld [vmem:[#allocation66_spill] sm:$0xff] }
 0x3dd   : > { %v13824_v13 = vpop.f32.mrf.mxu1  ;;  %v10781_v33 = vrot.slane %v10779_v34, 4  ;;  %v12564_v46 = vcombine.low %v19384_v59, %v10769_v11  ;;  %v19407_v51 = vsel %vm15120_vm13, %v12534_v52, %v10779_v34  ;;  %v10786_v28 = vrot.slane %v19061_v62, 5 }
 0x3de   : > { %20630 = vst [vmem:[#allocation35_spill] sm:$0xff] %v19388_v45  ;;  %v19400_v8 = vadd.f32 %v13824_v13, %v19018_v21  ;;  %14111 = vmatmul.mubr.bf16.vlgmr.msra.gmra.mxu1 %v12562_v17  ;;  %v19403_v32 = vpop.f32.mrf.mxu0  ;;  %v12565_v35 = vcombine.low %v10773_v63, %v10776_v18  ;;  %v10789_v21 = vrot.slane %v19078_v56, 5  ;;  %v10793_v17 = vrot.slane %v19105_v10, 5 }
 0x3df   : > { %14114 = vmatprep.mubr.bf16.mxu1 %v12563_v43  ;;  %v7740_v29 = vpop.f32.mrf.mxu1  ;;  %v19412_v47 = vsel %vm15120_vm13, %v10781_v33, %v10782_v61  ;;  %14159 = vmatmul.mubr.bf16.vlgmr.msra.gmra.mxu0 %v20631_v26  ;;  %v10788_v55 = vrot.slane %v10786_v28, 4  ;;  %v12536_v23 = vrot.slane %v10685_v44, 9  ;;  %v20632_v43 = vld [vmem:[#allocation16_spill] sm:$0xff]  ;;  %v19427_v56 = vsel %vm15120_vm13, %v12535_v20, %v10786_v28  ;;  %v10688_v61 = vld [vmem:[#allocation3 + $0x90] sm:$0xe] }
 0x3e0   : > { %v19418_v7 = vadd.f32 %v7740_v29, %v19040_v4  ;;  %v19420_v37 = vpop.f32.mrf.mxu0  ;;  %14162 = vmatprep.mubr.bf16.mxu0 %v20632_v43  ;;  %v10795_v10 = vrot.slane %v10793_v17, 4  ;;  %v10796_v59 = vrot.slane %v19107_v5, 5  ;;  %v10800_v4 = vrot.slane %v19127_v14, 5 }
 0x3e1   : > { %v13825_v25 = vpop.f32.mrf.mxu1  ;;  %v19438_v63 = vsel %vm15120_vm13, %v10788_v55, %v10789_v21  ;;  %v19442_v52 = vsel %vm15120_vm13, %v12536_v23, %v10793_v17  ;;  %v12537_v13 = vrot.slane %v10686_v15, 9  ;;  %v10803_v33 = vrot.slane %v19136_v42, 5  ;;  %v10689_v55 = vld [vmem:[#allocation3 + $0x9c] sm:$0xe]  ;;  %v20633_v23 = vld [vmem:[#allocation42_spill] sm:$0xff] }
 0x3e2   : > { %v19432_v34 = vadd.f32 %v13825_v25, %v19044_v30  ;;  %v19434_v11 = vpop.f32.mrf.mxu0  ;;  %v12567_v5 = vcombine.low %v19427_v56, %v19438_v63  ;;  %v19448_v14 = vsel %vm15120_vm13, %v10795_v10, %v10796_v59  ;;  %v10802_v30 = vrot.slane %v10800_v4, 4  ;;  %v20635_v63 = vld [vmem:[#allocation24_spill] sm:$0xff] }
 0x3e3   : > { %v7743_v18 = vpop.f32.mrf.mxu1  ;;  %v12538_v29 = vrot.slane %v10687_v49, 9  ;;  %v10807_v21 = vrot.slane %v19162_v54, 5  ;;  %v19461_v15 = vsel %vm15120_vm13, %v12537_v13, %v10800_v4  ;;  %v10814_v26 = vrot.slane %v19188_v0, 5  ;;  %v20634_v0 = vld [vmem:[#allocation61_spill] sm:$0xff]  ;;  %v20642_v54 = vld [vmem:[#allocation43_spill] sm:$0xff] }
 0x3e4   : > { %v19452_v20 = vadd.f32 %v7743_v18, %v19358_v36  ;;  %v19454_v44 = vpop.f32.mrf.mxu0  ;;  %v19465_v42 = vsel %vm15120_vm13, %v10802_v30, %v10803_v33  ;;  %v10810_v36 = vrot.slane %v19164_v60, 5  ;;  %v12539_v10 = vrot.slane %v10688_v61, 9  ;;  %v20636_v18 = vld [vmem:[#allocation17_spill] sm:$0xff] }
 0x3e5   : > { %v13828_v17 = vpop.f32.mrf.mxu1  ;;  %v10809_v56 = vrot.slane %v10807_v21, 4  ;;  %v19478_v4 = vsel %vm15120_vm13, %v12538_v29, %v10807_v21  ;;  %v10816_v60 = vrot.slane %v10814_v26, 4  ;;  %v10817_v49 = vrot.slane %v20634_v0, 5 }
 0x3e6   : > { %v19470_v25 = vadd.f32 %v13828_v17, %v20633_v23  ;;  %14115 = vmatmul.mubr.bf16.gmra.mxu1 %v12564_v46  ;;  %v19472_v43 = vpop.f32.mrf.mxu0  ;;  %v10821_v13 = vrot.slane %v20635_v63, 5  ;;  %v20637_v46 = vld [vmem:[#allocation44_spill] sm:$0xff]  ;;  %v12540_v29 = vrot.slane %v10689_v55, 9  ;;  %v20638_v17 = vld [vmem:[#allocation18_spill] sm:$0xff]  ;;  %v20639_v63 = vld [vmem:[#allocation59_spill] sm:$0xff]  ;;  %v10838_v38 = vrot.slane %v20644_v48, 5 }
 0x3e7   : > { %14118 = vmatprep.mubr.bf16.mxu1 %v12565_v35  ;;  %v7756_v59 = vpop.f32.mrf.mxu1  ;;  %14163 = vmatmul.mubr.bf16.gmra.mxu0 %v20636_v18  ;;  %v19488_v61 = vsel %vm15120_vm13, %v10809_v56, %v10810_v36  ;;  %v19492_v35 = vsel %vm15120_vm13, %v12539_v10, %v10814_v26  ;;  %v10824_v18 = vrot.slane %v20639_v63, 5  ;;  %v20640_v36 = vld [vmem:[#allocation58_spill] sm:$0xff]  ;;  %v20647_v48 = vld [vmem:[#allocation9_spill] sm:$0xff] }
 0x3e8   : > { %v7871_v30 = vadd.f32 %v7756_v59, %v20637_v46  ;;  %v19484_v33 = vpop.f32.mrf.mxu0  ;;  %14166 = vmatprep.mubr.bf16.mxu0 %v20638_v17  ;;  %v19499_v59 = vsel %vm15120_vm13, %v10816_v60, %v10817_v49  ;;  %v10823_v0 = vrot.slane %v10821_v13, 4  ;;  %v20641_v56 = vld [vmem:[#allocation78_spill] sm:$0xff]  ;;  %v10691_v17 = vld [vmem:[#allocation3 + $0xb4] sm:$0xe]  ;;  %v19511_v23 = vsel %vm15120_vm13, %v12540_v29, %v10821_v13 }
 0x3e9   : > { %v13829_v21 = vpop.f32.mrf.mxu1  ;;  %v7310_v46 = vadd.f32 %v20641_v56, %v20640_v36  ;;  %v20643_v49 = vld [vmem:[#allocation10_spill] sm:$0xff]  ;;  %v12542_v62 = vrot.slane %v10691_v17, 9  ;;  %v20645_v13 = vld [vmem:[#allocation19_spill] sm:$0xff] }
 0x3ea   : > { %v7874_v26 = vadd.f32 %v13829_v21, %v20642_v54  ;;  %v19505_v10 = vpop.f32.mrf.mxu0  ;;  %v19515_v60 = vsel %vm15120_vm13, %v10823_v0, %v10824_v18  ;;  %v10835_v63 = vrot.slane %v20643_v49, 5  ;;  %v10693_v36 = vld [vmem:[#allocation3 + $0xcc] sm:$0xe]  ;;  %v20646_v0 = vcombine.low %v19407_v51, %v19412_v47 }
 0x3eb   : > { %v7759_v28 = vpop.f32.mrf.mxu1  ;;  %v12544_v49 = vrot.slane %v10693_v36, 9  ;;  %v10849_v47 = vrot.slane %v19290_v41, 5 }
 0x3ec   : > { %v7872_v56 = vadd.f32 %v7759_v28, %v7310_v46  ;;  %v19518_v54 = vpop.f32.mrf.mxu0  ;;  %v10837_v45 = vrot.slane %v10835_v63, 4  ;;  %v19531_v46 = vsel %vm15120_vm13, %v12542_v62, %v10835_v63  ;;  %v20649_v62 = vld [vmem:[#allocation13_spill] sm:$0xff]  ;;  %v19556_v63 = vadd.f32 %v19316_v50, %v19432_v34 }
 0x3ed   : > { %v13832_v55 = vpop.f32.mrf.mxu1  ;;  %v19574_v50 = vadd.f32 %v19342_v24, %v7871_v30  ;;  %v20652_v30 = vld [vmem:[#allocation8_spill] sm:$0xff] }
 0x3ee   : > { %v7877_v29 = vadd.f32 %v13832_v55, %v20645_v13  ;;  %14119 = vmatmul.mubr.bf16.gmra.mxu1 %v20646_v0  ;;  %v19527_v18 = vpop.f32.mrf.mxu0  ;;  %v19535_v17 = vsel %vm15120_vm13, %v10837_v45, %v10838_v38  ;;  %v20648_v55 = vld [vmem:[#allocation51_spill] sm:$0xff]  ;;  %v19548_v38 = vadd.f32 %v19300_v27, %v19400_v8  ;;  %v19552_v45 = vadd.f32 %v19310_v1, %v19418_v7  ;;  %v20650_v0 = vld [vmem:[#allocation53_spill] sm:$0xff] }
 0x3ef   : > { %14122 = vmatprep.mubr.bf16.mxu1 %v12567_v5  ;;  %v7772_v28 = vpop.f32.mrf.mxu1  ;;  %14167 = vmatmul.mubr.bf16.gmra.mxu0 %v20647_v48  ;;  %v12574_v51 = vcombine.low %v19531_v46, %v19535_v17  ;;  %v10852_v5 = vrot.slane %v19307_v9, 5  ;;  %v19563_v9 = vsel %vm15120_vm13, %v12544_v49, %v10849_v47  ;;  %v10851_v48 = vrot.slane %v10849_v47, 4  ;;  %v20651_v7 = vld [vmem:[#allocation55_spill] sm:$0xff] }
 0x3f0   : > { %v7875_v13 = vadd.f32 %v7772_v28, %v20648_v55  ;;  %v19539_v21 = vpop.f32.mrf.mxu0  ;;  %14170 = vmatprep.mubr.bf16.mxu0 %v20649_v62  ;;  %v19567_v27 = vadd.f32 %v19326_v53, %v19452_v20  ;;  %v19571_v1 = vadd.f32 %v19331_v3, %v19470_v25  ;;  %v19577_v8 = vadd.f32 %v19354_v57, %v7874_v26 }
 0x3f1   : > { %v13833_v36 = vpop.f32.mrf.mxu1  ;;  %v19584_v47 = vsel %vm15120_vm13, %v10851_v48, %v10852_v5  ;;  %v19587_v53 = vadd.f32 %v19368_v16, %v7872_v56  ;;  %v19590_v3 = vadd.f32 %v19379_v58, %v7877_v29  ;;  %v20653_v5 = vcombine.low %v19442_v52, %v19448_v14  ;;  %v20655_v29 = vld [vmem:[#allocation22_spill] sm:$0xff]  ;;  %v20657_v14 = vld [vmem:[#allocation25_spill] sm:$0xff] }
 0x3f2   : > { %v7878_v28 = vadd.f32 %v13833_v36, %v20650_v0  ;;  %v19559_v41 = vpop.f32.mrf.mxu0  ;;  %v12576_v24 = vcombine.low %v19563_v9, %v19584_v47  ;;  %v19595_v57 = vadd.f32 %v19392_v39, %v7875_v13  ;;  %v20654_v56 = vcombine.low %v19461_v15, %v19465_v42  ;;  %v20658_v0 = vld [vmem:[#allocation72_spill] sm:$0xff]  ;;  %v20659_v48 = vld [vmem:[#allocation34_spill] sm:$0xff] }
 0x3f3   : > { %v7775_v55 = vpop.f32.mrf.mxu1  ;;  %v10828_v15 = vrot.slane %v20659_v48, 5 }
 0x3f4   : > { %v7876_v34 = vadd.f32 %v7775_v55, %v20651_v7  ;;  %v19580_v49 = vpop.f32.mrf.mxu0  ;;  %v19598_v25 = vadd.f32 %v19403_v32, %v7878_v28  ;;  %v20656_v32 = vld [vmem:[#allocation46_spill] sm:$0xff]  ;;  %v20660_v7 = vld [vmem:[#allocation73_spill] sm:$0xff] }
 0x3f5   : > { %v13836_v20 = vpop.f32.mrf.mxu1 }
 0x3f6   : > { %v7881_v26 = vadd.f32 %v13836_v20, %v20652_v30  ;;  %14123 = vmatmul.mubr.bf16.gmra.mxu1 %v20653_v5  ;;  %v19604_v16 = vpop.f32.mrf.mxu0  ;;  %v19607_v58 = vadd.f32 %v19420_v37, %v7876_v34 }
 0x3f7   : > { %14126 = vmatprep.mubr.bf16.mxu1 %v20654_v56  ;;  %v7788_v39 = vpop.f32.mrf.mxu1  ;;  %14171 = vmatmul.mubr.bf16.gmra.mxu0 %v20655_v29  ;;  %v20662_v56 = vcombine.low %v19478_v4, %v19488_v61  ;;  %v10830_v29 = vrot.slane %v10828_v15, 4 }
 0x3f8   : > { %v7879_v13 = vadd.f32 %v7788_v39, %v20656_v32  ;;  %v19614_v36 = vpop.f32.mrf.mxu0  ;;  %v19617_v62 = vadd.f32 %v19434_v11, %v7881_v26  ;;  %14174 = vmatprep.mubr.bf16.mxu0 %v20657_v14  ;;  %v20661_v26 = vld [vmem:[#allocation57_spill] sm:$0xff]  ;;  %v10690_v39 = vld [vmem:[#allocation3 + $0xa8] sm:$0xe] }
 0x3f9   : > { %v13837_v52 = vpop.f32.mrf.mxu1  ;;  %v20665_v14 = vld [vmem:[#allocation45_spill] sm:$0xff] }
 0x3fa   : > { %v7882_v37 = vadd.f32 %v13837_v52, %v20658_v0  ;;  %v19621_v28 = vpop.f32.mrf.mxu0  ;;  %v19625_v42 = vadd.f32 %v19454_v44, %v7879_v13  ;;  %v20663_v13 = vcombine.low %v19492_v35, %v19499_v59  ;;  %v20664_v52 = vld [vmem:[#allocation26_spill] sm:$0xff] }
 0x3fb   : > { %v7791_v55 = vpop.f32.mrf.mxu1 }
 0x3fc   : > { %v7880_v34 = vadd.f32 %v7791_v55, %v20660_v7  ;;  %v19628_v20 = vpop.f32.mrf.mxu0  ;;  %v19631_v11 = vadd.f32 %v19472_v43, %v7882_v37  ;;  %v20666_v37 = vld [vmem:[#allocation40_spill] sm:$0xff] }
 0x3fd   : > { %v13840_v30 = vpop.f32.mrf.mxu1  ;;  %v10831_v48 = vrot.slane %v20666_v37, 5  ;;  %v20667_v7 = vld [vmem:[#allocation28_spill] sm:$0xff]  ;;  %v20670_v37 = vld [vmem:[#allocation37_spill] sm:$0xff] }
 0x3fe   : > { %v7885_v5 = vadd.f32 %v13840_v30, %v20661_v26  ;;  %14127 = vmatmul.mubr.bf16.gmra.mxu1 %v20662_v56  ;;  %v19637_v32 = vpop.f32.mrf.mxu0  ;;  %v19640_v44 = vadd.f32 %v19484_v33, %v7880_v34  ;;  %v12541_v33 = vrot.slane %v10690_v39, 9  ;;  %v20668_v34 = vld [vmem:[#allocation47_spill] sm:$0xff]  ;;  %v10842_v26 = vrot.slane %v19270_v6, 5 }
 0x3ff   : > { %14130 = vmatprep.mubr.bf16.mxu1 %v20663_v13  ;;  %v7804_v43 = vpop.f32.mrf.mxu1  ;;  %14175 = vmatmul.mubr.bf16.gmra.mxu0 %v20664_v52  ;;  %v10832_v35 = vsel %vm15120_vm13, %v10830_v29, %v10831_v48  ;;  %v20671_v6 = vcombine.low %v19511_v23, %v19515_v60  ;;  %v20674_v60 = vld [vmem:[#allocation6_spill] sm:$0xff] }
 0x400   : > { %v7883_v0 = vadd.f32 %v7804_v43, %v20665_v14  ;;  %v19648_v4 = vpop.f32.mrf.mxu0  ;;  %v19651_v61 = vadd.f32 %v19505_v10, %v7885_v5  ;;  %14178 = vmatprep.mubr.bf16.mxu0 %v20667_v7  ;;  %v20669_v43 = vld [vmem:[#allocation77_spill] sm:$0xff]  ;;  %v10829_v5 = vsel %vm15120_vm13, %v12541_v33, %v10828_v15 }
 0x401   : > { %v13841_v55 = vpop.f32.mrf.mxu1  ;;  %v12573_v29 = vcombine.low %v10829_v5, %v10832_v35  ;;  %v10692_v7 = vld [vmem:[#allocation3 + $0xc0] sm:$0xe] }
 0x402   : > { %v7886_v30 = vadd.f32 %v13841_v55, %v20668_v34  ;;  %v19657_v59 = vpop.f32.mrf.mxu0  ;;  %v19661_v56 = vadd.f32 %v19518_v54, %v7883_v0  ;;  %v10844_v54 = vrot.slane %v10842_v26, 4  ;;  %v20672_v33 = vld [vmem:[#allocation29_spill] sm:$0xff]  ;;  %v20673_v34 = vld [vmem:[#allocation12_spill] sm:$0xff] }
 0x403   : > { %v7807_v13 = vpop.f32.mrf.mxu1 }
 0x404   : > { %v7884_v10 = vadd.f32 %v7807_v13, %v20669_v43  ;;  %v19666_v52 = vpop.f32.mrf.mxu0  ;;  %v19669_v39 = vadd.f32 %v19527_v18, %v7886_v30  ;;  %v10845_v30 = vrot.slane %v20673_v34, 5  ;;  %v20675_v43 = vld [vmem:[#allocation54_spill] sm:$0xff] }
 0x405   : > { %v13844_v14 = vpop.f32.mrf.mxu1 }
 0x406   : > { %v7889_v48 = vadd.f32 %v13844_v14, %v20670_v37  ;;  %14131 = vmatmul.mubr.bf16.gmra.mxu1 %v20671_v6  ;;  %v13901_v0 = vpop.f32.mrf.mxu0  ;;  %v19676_v55 = vadd.f32 %v19539_v21, %v7884_v10  ;;  %v12543_v21 = vrot.slane %v10692_v7, 9  ;;  %v10846_v10 = vsel %vm15120_vm13, %v10844_v54, %v10845_v30  ;;  %v20676_v37 = vld [vmem:[#allocation65_spill] sm:$0xff]  ;;  %v20677_v7 = vld [vmem:[#allocation20_spill] sm:$0xff] }
 0x407   : > { %14134 = vmatprep.mubr.bf16.mxu1 %v12573_v29  ;;  %v7820_v15 = vpop.f32.mrf.mxu1  ;;  %14179 = vmatmul.mubr.bf16.gmra.mxu0 %v20672_v33 }
 0x408   : > { %v7887_v18 = vadd.f32 %v7820_v15, %v19295_v2  ;;  %v8241_v35 = vpop.f32.mrf.mxu0  ;;  %v19682_v13 = vadd.f32 %v19559_v41, %v7889_v48  ;;  %14182 = vmatprep.mubr.bf16.mxu0 %v20674_v60  ;;  %v10843_v41 = vsel %vm15120_vm13, %v12543_v21, %v10842_v26 }
 0x409   : > { %v13845_v23 = vpop.f32.mrf.mxu1  ;;  %v12575_v34 = vcombine.low %v10843_v41, %v10846_v10 }
 0x40a   : > { %v7890_v5 = vadd.f32 %v13845_v23, %v20675_v43  ;;  %v13968_v14 = vpop.f32.mrf.mxu0  ;;  %v19689_v29 = vadd.f32 %v19580_v49, %v7887_v18  ;;  %v20679_v43 = vld [vmem:[#allocation30_spill] sm:$0xff] }
 0x40b   : > { %v7823_v2 = vpop.f32.mrf.mxu1 }
 0x40c   : > { %v7888_v6 = vadd.f32 %v7823_v2, %v20676_v37  ;;  %v9378_v48 = vpop.f32.mrf.mxu0  ;;  %v19695_v15 = vadd.f32 %v19604_v16, %v7890_v5  ;;  %v20680_v37 = vld [vmem:[#allocation31_spill] sm:$0xff] }
 0x40e   : > { %v13848_v33 = vpop.f32.mrf.mxu1  ;;  %14135 = vmatmul.mubr.bf16.gmra.mxu1 %v12574_v51  ;;  %v13969_v49 = vpop.f32.mrf.mxu0  ;;  %v19702_v54 = vadd.f32 %v19614_v36, %v7888_v6  ;;  %v20681_v6 = vld [vmem:[#allocation48_spill] sm:$0xff] }
 0x40f   : > { %v7893_v23 = vadd.f32 %v13848_v33, %v20677_v7  ;;  %14138 = vmatprep.mubr.bf16.mxu1 %v12575_v34  ;;  %14183 = vmatmul.mubr.bf16.gmra.mxu0 %v20678_v31  ;;  %v20682_v34 = vld [vmem:[#allocation23_spill] sm:$0xff] }
 0x410   : > { %v7836_v18 = vpop.f32.mrf.mxu1  ;;  %v9381_v16 = vpop.f32.mrf.mxu0  ;;  %14186 = vmatprep.mubr.bf16.mxu0 %v20679_v43 }
 0x411   : > { %v7891_v26 = vadd.f32 %v7836_v18, %v19324_v40  ;;  %v19707_v30 = vadd.f32 %v19621_v28, %v7893_v23 }
 0x412   : > { %v13849_v60 = vpop.f32.mrf.mxu1  ;;  %v13972_v17 = vpop.f32.mrf.mxu0 }
 0x413   : > { %v7894_v46 = vadd.f32 %v13849_v60, %v19329_v22  ;;  %v19712_v51 = vadd.f32 %v19628_v20, %v7891_v26 }
 0x414   : > { %v7839_v36 = vpop.f32.mrf.mxu1  ;;  %v9394_v21 = vpop.f32.mrf.mxu0 }
 0x415   : > { %v7892_v5 = vadd.f32 %v7839_v36, %v19339_v12  ;;  %v19716_v10 = vadd.f32 %v19637_v32, %v7894_v46 }
 0x416   : > { %v13852_v40 = vpop.f32.mrf.mxu1  ;;  %14139 = vmatmul.mubr.bf16.gmra.mxu1 %v12576_v24  ;;  %v13973_v2 = vpop.f32.mrf.mxu0  ;;  %v20683_v24 = vld [vmem:[#allocation35_spill] sm:$0xff] }
 0x417   : > { %v7897_v28 = vadd.f32 %v13852_v40, %v19350_v19  ;;  %v19723_v22 = vadd.f32 %v19648_v4, %v7892_v5  ;;  %14187 = vmatmul.mubr.bf16.gmra.mxu0 %v20680_v37 }
 0x418   : > { %v7852_v20 = vpop.f32.mrf.mxu1  ;;  %v9397_v41 = vpop.f32.mrf.mxu0 }
 0x419   : > { %v7895_v12 = vadd.f32 %v7852_v20, %v20681_v6  ;;  %v19728_v32 = vadd.f32 %v19657_v59, %v7897_v28 }
 0x41a   : > { %v13853_v33 = vpop.f32.mrf.mxu1  ;;  %v13976_v7 = vpop.f32.mrf.mxu0 }
 0x41b   : > { %v7898_v19 = vadd.f32 %v13853_v33, %v20682_v34  ;;  %v19732_v9 = vadd.f32 %v19666_v52, %v7895_v12 }
 0x41c   : > { %v7855_v47 = vpop.f32.mrf.mxu1  ;;  %v9410_v23 = vpop.f32.mrf.mxu0 }
 0x41d   : > { %v7896_v4 = vadd.f32 %v7855_v47, %v20683_v24  ;;  %v19735_v18 = vadd.f32 %v13901_v0, %v7898_v19 }
 0x41e   : > { %v13920_v31 = vpop.f32.mrf.mxu1  ;;  %v13977_v60 = vpop.f32.mrf.mxu0 }
 0x41f   : > { %v9009_v26 = vadd.f32 %v13920_v31, %v19548_v38  ;;  %v19738_v43 = vadd.f32 %v8241_v35, %v7896_v4 }
 0x420   : > { %v8880_v59 = vpop.f32.mrf.mxu1  ;;  %v9413_v36 = vpop.f32.mrf.mxu0 }
 0x421   : > { %v9007_v46 = vadd.f32 %v8880_v59, %v19552_v45  ;;  %v19741_v5 = vadd.f32 %v13968_v14, %v9009_v26 }
 0x422   : > { %v13921_v52 = vpop.f32.mrf.mxu1  ;;  %v13980_v28 = vpop.f32.mrf.mxu0 }
 0x423   : > { %v9010_v40 = vadd.f32 %v13921_v52, %v19556_v63  ;;  %v19744_v20 = vadd.f32 %v9378_v48, %v9007_v46 }
 0x424   : > { %v8883_v0 = vpop.f32.mrf.mxu1  ;;  %v9426_v6 = vpop.f32.mrf.mxu0 }
 0x425   : > { %v9008_v37 = vadd.f32 %v8883_v0, %v19567_v27  ;;  %v19747_v38 = vadd.f32 %v13969_v49, %v9010_v40 }
 0x426   : > { %v13924_v35 = vpop.f32.mrf.mxu1  ;;  %v13981_v33 = vpop.f32.mrf.mxu0 }
 0x427   : > { %v9013_v12 = vadd.f32 %v13924_v35, %v19571_v1  ;;  %v19750_v45 = vadd.f32 %v9381_v16, %v9008_v37 }
 0x428   : > { %v8896_v14 = vpop.f32.mrf.mxu1  ;;  %v9429_v19 = vpop.f32.mrf.mxu0 }
 0x429   : > { %v9011_v34 = vadd.f32 %v8896_v14, %v19574_v50  ;;  %v19753_v63 = vadd.f32 %v13972_v17, %v9013_v12 }
 0x42a   : > { %v13925_v48 = vpop.f32.mrf.mxu1  ;;  %v13984_v24 = vpop.f32.mrf.mxu0 }
 0x42b   : > { %v9014_v47 = vadd.f32 %v13925_v48, %v19577_v8  ;;  %v19756_v27 = vadd.f32 %v9394_v21, %v9011_v34 }
 0x42c   : > { %v8899_v49 = vpop.f32.mrf.mxu1  ;;  %v9442_v31 = vpop.f32.mrf.mxu0 }
 0x42d   : > { %v9012_v4 = vadd.f32 %v8899_v49, %v19587_v53  ;;  %v19759_v1 = vadd.f32 %v13973_v2, %v9014_v47 }
 0x42e   : > { %v13928_v16 = vpop.f32.mrf.mxu1  ;;  %v13985_v59 = vpop.f32.mrf.mxu0 }
 0x42f   : > { %v9017_v26 = vadd.f32 %v13928_v16, %v19590_v3  ;;  %v19762_v50 = vadd.f32 %v9397_v41, %v9012_v4 }
 0x430   : > { %v8912_v17 = vpop.f32.mrf.mxu1  ;;  %v9445_v52 = vpop.f32.mrf.mxu0 }
 0x431   : > { %v9015_v46 = vadd.f32 %v8912_v17, %v19595_v57  ;;  %v19765_v8 = vadd.f32 %v13976_v7, %v9017_v26 }
 0x432   : > { %v13929_v21 = vpop.f32.mrf.mxu1  ;;  %v13988_v0 = vpop.f32.mrf.mxu0 }
 0x433   : > { %v9018_v40 = vadd.f32 %v13929_v21, %v19598_v25  ;;  %v19768_v53 = vadd.f32 %v9410_v23, %v9015_v46 }
 0x434   : > { %v8915_v2 = vpop.f32.mrf.mxu1  ;;  %v9458_v35 = vpop.f32.mrf.mxu0 }
 0x435   : > { %v9016_v37 = vadd.f32 %v8915_v2, %v19607_v58  ;;  %v19771_v3 = vadd.f32 %v13977_v60, %v9018_v40 }
 0x436   : > { %v13932_v41 = vpop.f32.mrf.mxu1  ;;  %v13989_v14 = vpop.f32.mrf.mxu0 }
 0x437   : > { %v9021_v12 = vadd.f32 %v13932_v41, %v19617_v62  ;;  %v19774_v57 = vadd.f32 %v9413_v36, %v9016_v37 }
 0x438   : > { %v8928_v7 = vpop.f32.mrf.mxu1  ;;  %v9461_v48 = vpop.f32.mrf.mxu0 }
 0x439   : > { %v9019_v34 = vadd.f32 %v8928_v7, %v19625_v42  ;;  %v19777_v25 = vadd.f32 %v13980_v28, %v9021_v12 }
 0x43a   : > { %v13933_v23 = vpop.f32.mrf.mxu1  ;;  %v13992_v49 = vpop.f32.mrf.mxu0 }
 0x43b   : > { %v9022_v47 = vadd.f32 %v13933_v23, %v19631_v11  ;;  %v19780_v58 = vadd.f32 %v9426_v6, %v9019_v34 }
 0x43c   : > { %v8931_v60 = vpop.f32.mrf.mxu1  ;;  %v9474_v16 = vpop.f32.mrf.mxu0 }
 0x43d   : > { %v9020_v4 = vadd.f32 %v8931_v60, %v19640_v44  ;;  %v19783_v62 = vadd.f32 %v13981_v33, %v9022_v47 }
 0x43e   : > { %v13936_v36 = vpop.f32.mrf.mxu1  ;;  %v13993_v17 = vpop.f32.mrf.mxu0 }
 0x43f   : > { %v9025_v26 = vadd.f32 %v13936_v36, %v19651_v61  ;;  %v19786_v42 = vadd.f32 %v9429_v19, %v9020_v4 }
 0x440   : > { %v8944_v28 = vpop.f32.mrf.mxu1  ;;  %v9477_v21 = vpop.f32.mrf.mxu0 }
 0x441   : > { %v9023_v46 = vadd.f32 %v8944_v28, %v19661_v56  ;;  %v19789_v11 = vadd.f32 %v13984_v24, %v9025_v26 }
 0x442   : > { %v13937_v6 = vpop.f32.mrf.mxu1  ;;  %v13996_v33 = vpop.f32.mrf.mxu0 }
 0x443   : > { %v9026_v40 = vadd.f32 %v13937_v6, %v19669_v39  ;;  %v19792_v2 = vadd.f32 %v9442_v31, %v9023_v46 }
 0x444   : > { %v8947_v44 = vpop.f32.mrf.mxu1  ;;  %v9490_v7 = vpop.f32.mrf.mxu0 }
 0x445   : > { %v9024_v37 = vadd.f32 %v8947_v44, %v19676_v55  ;;  %v19795_v41 = vadd.f32 %v13985_v59, %v9026_v40 }
 0x446   : > { %v13940_v61 = vpop.f32.mrf.mxu1  ;;  %v13997_v55 = vpop.f32.mrf.mxu0 }
 0x447   : > { %v9029_v19 = vadd.f32 %v13940_v61, %v19682_v13  ;;  %v19798_v12 = vadd.f32 %v9445_v52, %v9024_v37 }
 0x448   : > { %v8960_v56 = vpop.f32.mrf.mxu1 }
 0x449   : > { %v9027_v24 = vadd.f32 %v8960_v56, %v19689_v29  ;;  %v19801_v34 = vadd.f32 %v13988_v0, %v9029_v19  ;;  %v9493_v29 = vpop.f32.mrf.mxu0 }
 0x44a   : > { %v13941_v39 = vpop.f32.mrf.mxu1 }
 0x44b   : > { %v9030_v31 = vadd.f32 %v13941_v39, %v19695_v15  ;;  %v19804_v23 = vadd.f32 %v9458_v35, %v9027_v24 }
 0x44c   : > { %v8963_v47 = vpop.f32.mrf.mxu1 }
 0x44d   : > { %v9028_v59 = vadd.f32 %v8963_v47, %v19702_v54  ;;  %v19807_v60 = vadd.f32 %v13989_v14, %v9030_v31 }
 0x44e   : > { %v13944_v13 = vpop.f32.mrf.mxu1 }
 0x44f   : > { %v9033_v52 = vadd.f32 %v13944_v13, %v19707_v30  ;;  %v19810_v4 = vadd.f32 %v9461_v48, %v9028_v59 }
 0x450   : > { %v8976_v36 = vpop.f32.mrf.mxu1 }
 0x451   : > { %v9031_v0 = vadd.f32 %v8976_v36, %v19712_v51  ;;  %v19813_v26 = vadd.f32 %v13992_v49, %v9033_v52 }
 0x452   : > { %v13945_v15 = vpop.f32.mrf.mxu1  ;;  %v14064_v54 = vpop.f32.mrf.mxu0 }
 0x453   : > { %v9034_v35 = vadd.f32 %v13945_v15, %v19716_v10  ;;  %v19816_v28 = vadd.f32 %v9474_v16, %v9031_v0 }
 0x454   : > { %v8979_v46 = vpop.f32.mrf.mxu1  ;;  %v10519_v30 = vpop.f32.mrf.mxu0 }
 0x455   : > { %v9032_v14 = vadd.f32 %v8979_v46, %v19723_v22  ;;  %v19819_v6 = vadd.f32 %v13993_v17, %v9034_v35 }
 0x456   : > { %v13948_v48 = vpop.f32.mrf.mxu1  ;;  %v19824_v49 = vpop.f32.mrf.mxu0 }
 0x457   : > { %20684 = vst [vmem:[#allocation56_spill] sm:$0xff] %v19819_v6  ;;  %v19821_v40 = vadd.f32 %v9477_v21, %v9032_v14  ;;  %v9037_v44 = vadd.f32 %v13948_v48, %v19728_v32 }
 0x458   : > { %v8992_v51 = vpop.f32.mrf.mxu1  ;;  %v19832_v22 = vpop.f32.mrf.mxu0 }
 0x459   : > { %20685 = vst [vmem:[#allocation64_spill] sm:$0xff] %v19821_v40  ;;  %v9035_v37 = vadd.f32 %v8992_v51, %v19732_v9  ;;  %v19827_v10 = vadd.f32 %v13996_v33, %v9037_v44 }
 0x45a   : > { %v13949_v16 = vpop.f32.mrf.mxu1 }
 0x45b   : > { %v9038_v61 = vadd.f32 %v13949_v16, %v19735_v18  ;;  %v19830_v19 = vadd.f32 %v9490_v7, %v9035_v37 }
 0x45c   : > { %v8995_v17 = vpop.f32.mrf.mxu1 }
 0x45d   : > { %v9036_v21 = vadd.f32 %v8995_v17, %v19738_v43  ;;  %v19835_v56 = vadd.f32 %v13997_v55, %v9038_v61 }
 0x45e   : > { %v14016_v32 = vpop.f32.mrf.mxu1 }
 0x45f   : > { %20686 = vst [vmem:[#allocation41_spill] sm:$0xff] %v19835_v56  ;;  %v9894_v24 = vadd.f32 %v14016_v32, %v19741_v5  ;;  %v19838_v39 = vadd.f32 %v9493_v29, %v9036_v21 }
 0x460   : > { %v14068_v9 = vpop.f32.mrf.mxu0  ;;  %v9765_v33 = vpop.f32.mrf.mxu1 }
 0x461   : > { %20687 = vst [vmem:[#allocation62_spill] sm:$0xff] %v19838_v39  ;;  %v9892_v31 = vadd.f32 %v9765_v33, %v19744_v20  ;;  %v19841_v47 = vadd.f32 %v14064_v54, %v9894_v24 }
 0x462   : > { %v10535_v18 = vpop.f32.mrf.mxu0  ;;  %v19843_v7 = vpop.f32.mrf.mxu1 }
 0x463   : > { %v19845_v59 = vadd.f32 %v10519_v30, %v9892_v31 }
 0x464   : > { %v19847_v13 = vpop.f32.mrf.mxu0  ;;  %v19849_v43 = vpop.f32.mrf.mxu1 }
 0x466   : > { %v19851_v55 = vpop.f32.mrf.mxu0  ;;  %v14020_v5 = vpop.f32.mrf.mxu1 }
 0x467   : > { %v9898_v52 = vadd.f32 %v14020_v5, %v19753_v63 }
 0x468   : > { %v14072_v36 = vpop.f32.mrf.mxu0  ;;  %v9781_v29 = vpop.f32.mrf.mxu1 }
 0x469   : > { %v9896_v20 = vadd.f32 %v9781_v29, %v19756_v27  ;;  %v19855_v0 = vadd.f32 %v14068_v9, %v9898_v52 }
 0x46a   : > { %v10551_v15 = vpop.f32.mrf.mxu0  ;;  %v19857_v35 = vpop.f32.mrf.mxu1 }
 0x46b   : > { %v19859_v46 = vadd.f32 %v10535_v18, %v9896_v20 }
 0x46c   : > { %v19861_v54 = vpop.f32.mrf.mxu0  ;;  %v19863_v14 = vpop.f32.mrf.mxu1 }
 0x46e   : > { %v19865_v30 = vpop.f32.mrf.mxu0  ;;  %v14024_v48 = vpop.f32.mrf.mxu1 }
 0x46f   : > { %v9902_v63 = vadd.f32 %v14024_v48, %v19765_v8 }
 0x470   : > { %v9797_v44 = vpop.f32.mrf.mxu1 }
 0x471   : > { %v9900_v51 = vadd.f32 %v9797_v44, %v19768_v53  ;;  %v19869_v27 = vadd.f32 %v14072_v36, %v9902_v63 }
 0x472   : > { %v14076_v37 = vpop.f32.mrf.mxu0  ;;  %v19871_v16 = vpop.f32.mrf.mxu1 }
 0x473   : > { %v19873_v61 = vadd.f32 %v10551_v15, %v9900_v51 }
 0x474   : > { %v10567_v17 = vpop.f32.mrf.mxu0  ;;  %v19875_v21 = vpop.f32.mrf.mxu1 }
 0x476   : > { %v19877_v32 = vpop.f32.mrf.mxu0  ;;  %v14028_v24 = vpop.f32.mrf.mxu1 }
 0x477   : > { %v9906_v9 = vadd.f32 %v14028_v24, %v19777_v25 }
 0x478   : > { %v19880_v33 = vpop.f32.mrf.mxu0  ;;  %v9813_v8 = vpop.f32.mrf.mxu1 }
 0x479   : > { %v9904_v53 = vadd.f32 %v9813_v8, %v19780_v58  ;;  %v19883_v31 = vadd.f32 %v14076_v37, %v9906_v9 }
 0x47a   : > { %v19885_v18 = vpop.f32.mrf.mxu1 }
 0x47b   : > { %v19887_v5 = vadd.f32 %v10567_v17, %v9904_v53  ;;  %v14080_v52 = vpop.f32.mrf.mxu0 }
 0x47c   : > { %v19889_v36 = vpop.f32.mrf.mxu1 }
 0x47d   : > { %v10583_v29 = vpop.f32.mrf.mxu0 }
 0x47e   : > { %v14032_v20 = vpop.f32.mrf.mxu1 }
 0x47f   : > { %v9910_v15 = vadd.f32 %v14032_v20, %v19789_v11  ;;  %v19892_v48 = vpop.f32.mrf.mxu0 }
 0x480   : > { %v9829_v25 = vpop.f32.mrf.mxu1 }
 0x481   : > { %v9908_v63 = vadd.f32 %v9829_v25, %v19792_v2  ;;  %v19895_v44 = vadd.f32 %v14080_v52, %v9910_v15  ;;  %v19897_v58 = vpop.f32.mrf.mxu0 }
 0x482   : > { %v19899_v51 = vpop.f32.mrf.mxu1 }
 0x483   : > { %v19901_v37 = vadd.f32 %v10583_v29, %v9908_v63 }
 0x484   : > { %v19903_v17 = vpop.f32.mrf.mxu1  ;;  %v14084_v24 = vpop.f32.mrf.mxu0 }
 0x486   : > { %v14036_v9 = vpop.f32.mrf.mxu1  ;;  %v10599_v8 = vpop.f32.mrf.mxu0 }
 0x487   : > { %v9914_v11 = vadd.f32 %v14036_v9, %v19801_v34 }
 0x488   : > { %v9845_v53 = vpop.f32.mrf.mxu1  ;;  %v19906_v20 = vpop.f32.mrf.mxu0 }
 0x489   : > { %20688 = vst [vmem:[#allocation60_spill] sm:$0xff] %v19906_v20  ;;  %v9912_v2 = vadd.f32 %v9845_v53, %v19804_v23  ;;  %v19909_v52 = vadd.f32 %v14084_v24, %v9914_v11 }
 0x48a   : > { %v19911_v15 = vpop.f32.mrf.mxu1  ;;  %v19913_v25 = vpop.f32.mrf.mxu0 }
 0x48b   : > { %20689 = vst [vmem:[#allocation52_spill] sm:$0xff] %v19913_v25  ;;  %v19915_v29 = vadd.f32 %v10599_v8, %v9912_v2 }
 0x48c   : > { %v19917_v63 = vpop.f32.mrf.mxu1 }
 0x48d   : > { %20690 = vst [vmem:[#allocation27_spill] sm:$0xff] %v19915_v29 }
 0x48e   : > { %v14040_v39 = vpop.f32.mrf.mxu1  ;;  %v14088_v56 = vpop.f32.mrf.mxu0 }
 0x48f   : > { %v9918_v40 = vadd.f32 %v14040_v39, %v19813_v26 }
 0x490   : > { %v9861_v34 = vpop.f32.mrf.mxu1  ;;  %v10615_v9 = vpop.f32.mrf.mxu0 }
 0x491   : > { %v9916_v6 = vadd.f32 %v9861_v34, %v19816_v28  ;;  %v19921_v20 = vadd.f32 %v14088_v56, %v9918_v40 }
 0x492   : > { %v19923_v23 = vpop.f32.mrf.mxu1  ;;  %v19925_v24 = vpop.f32.mrf.mxu0 }
 0x493   : > { %20691 = vst [vmem:[#allocation70_spill] sm:$0xff] %v19925_v24  ;;  %v19927_v11 = vadd.f32 %v10615_v9, %v9916_v6 }
 0x494   : > { %v19929_v8 = vpop.f32.mrf.mxu1  ;;  %v19931_v53 = vpop.f32.mrf.mxu0 }
 0x495   : > { %20692 = vst [vmem:[#allocation21_spill] sm:$0xff] %v19931_v53  ;;  %v9895_v53 = vadd.f32 %v19843_v7, %v19747_v38 }
 0x496   : > { %v14044_v2 = vpop.f32.mrf.mxu1 }
 0x497   : > { %v9922_v25 = vadd.f32 %v14044_v2, %v19827_v10  ;;  %v14092_v26 = vpop.f32.mrf.mxu0  ;;  %v19952_v10 = vld [vmem:[%s20110_s6] ss:$0 sm:$0xff]  ;;  %v9893_v2 = vadd.f32 %v19849_v43, %v19750_v45 }
 0x498   : > { %v9877_v39 = vpop.f32.mrf.mxu1 }
 0x499   : > { %v9920_v29 = vadd.f32 %v9877_v39, %v19830_v19  ;;  %v19935_v28 = vadd.f32 %v14092_v26, %v9922_v25  ;;  %v10631_v40 = vpop.f32.mrf.mxu0  ;;  %v19957_v25 = vld [vmem:[%s20108_s4] ss:$0 sm:$0xff] }
 0x49a   : > { %v19937_v56 = vpop.f32.mrf.mxu1 }
 0x49b   : > { %20693 = vst [vmem:[#allocation63_spill] sm:$0xff] %v19935_v28  ;;  %20694 = vst [vmem:[#allocation36_spill] sm:$0xff] %v19937_v56  ;;  %v19939_v34 = vadd.f32 %v10631_v40, %v9920_v29  ;;  %v19941_v6 = vpop.f32.mrf.mxu0 }
 0x49c   : > { %20696 = vst [vmem:[#allocation38_spill] sm:$0xff] %v19941_v6  ;;  %v19943_v9 = vpop.f32.mrf.mxu1 }
 0x49d   : > { %20695 = vst [vmem:[#allocation49_spill] sm:$0xff] %v19939_v34  ;;  %20697 = vst [vmem:[#allocation7_spill] sm:$0xff] %v19943_v9  ;;  %v19947_v24 = vpop.f32.mrf.mxu0 }
 0x49e   : > { %20698 = vst [vmem:[#allocation71_spill] sm:$0xff] %v19947_v24  ;;  %v14112_v19 = vpop.f32.mrf.mxu1  ;;  %v10649_v24 = vadd.f32 %v19824_v49, %v9895_v53 }
 0x49f   : > { %v11146_v29 = vadd.f32 %v14112_v19, %v19841_v47  ;;  %v14160_v26 = vpop.f32.mrf.mxu0  ;;  %v10647_v47 = vadd.f32 %v19832_v22, %v9893_v2 }
 0x4a0   : > { %v11017_v38 = vpop.f32.mrf.mxu1  ;;  %v11329_v7 = vadd.f32 %v14160_v26, %v19952_v10 }
 0x4a1   : > { %v11185_v39 = vadd.f32 %v19957_v25, %v11146_v29  ;;  %v11144_v40 = vadd.f32 %v11017_v38, %v19845_v59  ;;  %v11320_v6 = vpop.f32.mrf.mxu0  ;;  %v9899_v29 = vadd.f32 %v19857_v35, %v19759_v1 }
 0x4a2   : > { %v14113_v34 = vpop.f32.mrf.mxu1  ;;  %v11321_v59 = vadd.f32 %v19952_v10, %v11320_v6 }
 0x4a3   : > { %v11147_v28 = vadd.f32 %v14113_v34, %v10649_v24  ;;  %v14161_v9 = vpop.f32.mrf.mxu0  ;;  %v11183_v56 = vadd.f32 %v19957_v25, %v11144_v40  ;;  %v11449_v45 = vadd.f32 %v11329_v7, %v11185_v39  ;;  %v9897_v24 = vadd.f32 %v19863_v14, %v19762_v50 }
 0x4a4   : > { %v11020_v19 = vpop.f32.mrf.mxu1  ;;  %v11332_v43 = vadd.f32 %v14161_v9, %v19952_v10 }
 0x4a5   : > { %v11186_v26 = vadd.f32 %v19957_v25, %v11147_v28  ;;  %v11323_v49 = vpop.f32.mrf.mxu0  ;;  %v11145_v53 = vadd.f32 %v11020_v19, %v10647_v47  ;;  %v11447_v2 = vadd.f32 %v11321_v59, %v11183_v56  ;;  %v11481_v40 = vmax.f32 %v11449_v45, 0.0 }
 0x4a6   : > { %v14116_v38 = vpop.f32.mrf.mxu1  ;;  %v11324_v7 = vadd.f32 %v19952_v10, %v11323_v49 }
 0x4a7   : > { %v11450_v34 = vadd.f32 %v11332_v43, %v11186_v26  ;;  %v11150_v22 = vadd.f32 %v14116_v38, %v19855_v0  ;;  %v14164_v9 = vpop.f32.mrf.mxu0  ;;  %v11184_v28 = vadd.f32 %v19957_v25, %v11145_v53  ;;  %v10653_v0 = vadd.f32 %v19847_v13, %v9899_v29 }
 0x4a8   : > { %v11033_v39 = vpop.f32.mrf.mxu1  ;;  %v11345_v6 = vadd.f32 %v14164_v9, %v19952_v10  ;;  %v10651_v26 = vadd.f32 %v19851_v55, %v9897_v24  ;;  %v11479_v59 = vmax.f32 %v11447_v2, 0.0  ;;  %v9903_v38 = vadd.f32 %v19871_v16, %v19771_v3 }
 0x4a9   : > { %v11482_v1 = vmax.f32 %v11450_v34, 0.0  ;;  %v11148_v35 = vadd.f32 %v11033_v39, %v19859_v46  ;;  %v11448_v47 = vadd.f32 %v11324_v7, %v11184_v28  ;;  %v11336_v19 = vpop.f32.mrf.mxu0  ;;  %v11189_v50 = vadd.f32 %v19957_v25, %v11150_v22 }
 0x4aa   : > { %v14117_v14 = vpop.f32.mrf.mxu1  ;;  %v11337_v34 = vadd.f32 %v19952_v10, %v11336_v19  ;;  %v9901_v3 = vadd.f32 %v19875_v21, %v19774_v57  ;;  %v10657_v19 = vadd.f32 %v19861_v54, %v9903_v38 }
 0x4ab   : > { %v12735_v56 = vpack.c.bf16 %v11482_v1, %v11481_v40  ;;  %v11187_v43 = vadd.f32 %v19957_v25, %v11148_v35  ;;  %v11480_v45 = vmax.f32 %v11448_v47, 0.0  ;;  %v14165_v49 = vpop.f32.mrf.mxu0  ;;  %v11151_v53 = vadd.f32 %v14117_v14, %v10653_v0 }
 0x4ac   : > { %v11036_v46 = vpop.f32.mrf.mxu1  ;;  %v11453_v29 = vadd.f32 %v11345_v6, %v11189_v50  ;;  %v11348_v7 = vadd.f32 %v14165_v49, %v19952_v10 }
 0x4ad   : > { %12807 = vst [vmem:[%s14553_s11 + $0x8] sm:$0xff] %v12735_v56   ;;  %v11149_v22 = vadd.f32 %v11036_v46, %v10651_v26  ;;  %v12730_v13 = vpack.c.bf16 %v11480_v45, %v11479_v59  ;;  %v11339_v9 = vpop.f32.mrf.mxu0  ;;  %v11190_v55 = vadd.f32 %v19957_v25, %v11151_v53  ;;  %v11451_v2 = vadd.f32 %v11337_v34, %v11187_v43 }
 0x4ae   : > { %v14120_v24 = vpop.f32.mrf.mxu1  ;;  %v11340_v28 = vadd.f32 %v19952_v10, %v11339_v9  ;;  %v11485_v50 = vmax.f32 %v11453_v29, 0.0  ;;  %v9907_v53 = vadd.f32 %v19885_v18, %v19783_v62 }
 0x4af   : > { %v11188_v39 = vadd.f32 %v19957_v25, %v11149_v22  ;;  %v11154_v40 = vadd.f32 %v14120_v24, %v19869_v27  ;;  %12731 = vst [vmem:[%s14553_s11] sm:$0xff] %v12730_v13   ;;  %v11454_v16 = vadd.f32 %v11348_v7, %v11190_v55  ;;  %v14168_v1 = vpop.f32.mrf.mxu0  ;;  %v11483_v26 = vmax.f32 %v11451_v2, 0.0 }
 0x4b0   : > { %v11049_v35 = vpop.f32.mrf.mxu1  ;;  %v11361_v14 = vadd.f32 %v14168_v1, %v19952_v10  ;;  %v9905_v55 = vadd.f32 %v19889_v36, %v19786_v42  ;;  %v10661_v1 = vadd.f32 %v19877_v32, %v9907_v53 }
 0x4b1   : > { %v11452_v6 = vadd.f32 %v11340_v28, %v11188_v39  ;;  %v11152_v47 = vadd.f32 %v11049_v35, %v19873_v61  ;;  %v11486_v0 = vmax.f32 %v11454_v16, 0.0  ;;  %v11352_v56 = vpop.f32.mrf.mxu0  ;;  %v11193_v27 = vadd.f32 %v19957_v25, %v11154_v40 }
 0x4b2   : > { %v14121_v43 = vpop.f32.mrf.mxu1  ;;  %v10655_v61 = vadd.f32 %v19865_v30, %v9901_v3  ;;  %v11353_v38 = vadd.f32 %v19952_v10, %v11352_v56 }
 0x4b3   : > { %v11484_v57 = vmax.f32 %v11452_v6, 0.0  ;;  %v12745_v21 = vpack.c.bf16 %v11486_v0, %v11485_v50  ;;  %v14169_v59 = vpop.f32.mrf.mxu0  ;;  %v11191_v45 = vadd.f32 %v19957_v25, %v11152_v47  ;;  %v11155_v49 = vadd.f32 %v14121_v43, %v10657_v19 }
 0x4b4   : > { %v11052_v54 = vpop.f32.mrf.mxu1  ;;  %v11457_v34 = vadd.f32 %v11361_v14, %v11193_v27  ;;  %v11364_v22 = vadd.f32 %v14169_v59, %v19952_v10  ;;  %v10659_v19 = vadd.f32 %v19880_v33, %v9905_v55 }
 0x4b5   : > { %v12740_v46 = vpack.c.bf16 %v11484_v57, %v11483_v26  ;;  %12809 = vst [vmem:[%s14553_s11 + $0x18] sm:$0xff] %v12745_v21   ;;  %v11355_v13 = vpop.f32.mrf.mxu0  ;;  %v11194_v29 = vadd.f32 %v19957_v25, %v11155_v49  ;;  %v11153_v7 = vadd.f32 %v11052_v54, %v10655_v61  ;;  %v11455_v24 = vadd.f32 %v11353_v38, %v11191_v45 }
 0x4b6   : > { %v14124_v9 = vpop.f32.mrf.mxu1  ;;  %v11356_v62 = vadd.f32 %v19952_v10, %v11355_v13  ;;  %v11489_v42 = vmax.f32 %v11457_v34, 0.0  ;;  %v9911_v57 = vadd.f32 %v19899_v51, %v19795_v41  ;;  %v9909_v61 = vadd.f32 %v19903_v17, %v19798_v12 }
 0x4b7   : > { %12808 = vst [vmem:[%s14553_s11 + $0x10] sm:$0xff] %v12740_v46   ;;  %v11158_v30 = vadd.f32 %v14124_v9, %v19883_v31  ;;  %v11458_v18 = vadd.f32 %v11364_v22, %v11194_v29  ;;  %v14172_v2 = vpop.f32.mrf.mxu0  ;;  %v11192_v28 = vadd.f32 %v19957_v25, %v11153_v7  ;;  %v11487_v50 = vmax.f32 %v11455_v24, 0.0 }
 0x4b8   : > { %v11065_v39 = vpop.f32.mrf.mxu1  ;;  %v11377_v40 = vadd.f32 %v14172_v2, %v19952_v10 }
 0x4b9   : > { %v11197_v3 = vadd.f32 %v19957_v25, %v11158_v30  ;;  %v11156_v16 = vadd.f32 %v11065_v39, %v19887_v5  ;;  %v11490_v36 = vmax.f32 %v11458_v18, 0.0  ;;  %v11456_v31 = vadd.f32 %v11356_v62, %v11192_v28  ;;  %v11368_v35 = vpop.f32.mrf.mxu0 }
 0x4ba   : > { %v14125_v6 = vpop.f32.mrf.mxu1  ;;  %v11369_v33 = vadd.f32 %v19952_v10, %v11368_v35  ;;  %v10663_v62 = vadd.f32 %v19897_v58, %v9909_v61 }
 0x4bb   : > { %v11159_v47 = vadd.f32 %v14125_v6, %v10661_v1  ;;  %v12755_v0 = vpack.c.bf16 %v11490_v36, %v11489_v42  ;;  %v11488_v14 = vmax.f32 %v11456_v31, 0.0  ;;  %v14173_v56 = vpop.f32.mrf.mxu0  ;;  %v11195_v27 = vadd.f32 %v19957_v25, %v11156_v16 }
 0x4bc   : > { %v11068_v43 = vpop.f32.mrf.mxu1  ;;  %v11461_v5 = vadd.f32 %v11377_v40, %v11197_v3  ;;  %v11380_v32 = vadd.f32 %v14173_v56, %v19952_v10  ;;  %v9915_v40 = vadd.f32 %v19911_v15, %v19807_v60  ;;  %v9913_v60 = vadd.f32 %v19917_v63, %v19810_v4  ;;  %v20699_v56 = vld [vmem:[#allocation27_spill] sm:$0xff] }
 0x4bd   : > { %v11198_v26 = vadd.f32 %v19957_v25, %v11159_v47  ;;  %12811 = vst [vmem:[%s14553_s11 + $0x28] sm:$0xff] %v12755_v0   ;;  %v12750_v21 = vpack.c.bf16 %v11488_v14, %v11487_v50  ;;  %v11371_v59 = vpop.f32.mrf.mxu0  ;;  %v11157_v45 = vadd.f32 %v11068_v43, %v10659_v19  ;;  %v11459_v46 = vadd.f32 %v11369_v33, %v11195_v27  ;;  %v20700_v43 = vld [vmem:[#allocation60_spill] sm:$0xff] }
 0x4be   : > { %v14128_v49 = vpop.f32.mrf.mxu1  ;;  %v11372_v38 = vadd.f32 %v19952_v10, %v11371_v59  ;;  %v11493_v22 = vmax.f32 %v11461_v5, 0.0  ;;  %v10669_v5 = vadd.f32 %v20700_v43, %v9915_v40  ;;  %v20704_v40 = vld [vmem:[#allocation70_spill] sm:$0xff] }
 0x4bf   : > { %v11462_v54 = vadd.f32 %v11380_v32, %v11198_v26  ;;  %v11162_v53 = vadd.f32 %v14128_v49, %v19895_v44  ;;  %12810 = vst [vmem:[%s14553_s11 + $0x20] sm:$0xff] %v12750_v21   ;;  %v14176_v34 = vpop.f32.mrf.mxu0  ;;  %v11196_v41 = vadd.f32 %v19957_v25, %v11157_v45  ;;  %v10665_v44 = vadd.f32 %v19892_v48, %v9911_v57 }
 0x4c0   : > { %v11081_v51 = vpop.f32.mrf.mxu1  ;;  %v11393_v7 = vadd.f32 %v14176_v34, %v19952_v10  ;;  %v11491_v18 = vmax.f32 %v11459_v46, 0.0 }
 0x4c1   : > { %v11494_v13 = vmax.f32 %v11462_v54, 0.0  ;;  %v11160_v29 = vadd.f32 %v11081_v51, %v19901_v37  ;;  %v11460_v9 = vadd.f32 %v11372_v38, %v11196_v41  ;;  %v11384_v12 = vpop.f32.mrf.mxu0  ;;  %v11201_v17 = vadd.f32 %v19957_v25, %v11162_v53  ;;  %v20701_v54 = vld [vmem:[#allocation52_spill] sm:$0xff] }
 0x4c2   : > { %v14129_v55 = vpop.f32.mrf.mxu1  ;;  %v11385_v3 = vadd.f32 %v19952_v10, %v11384_v12  ;;  %v10667_v53 = vadd.f32 %v20701_v54, %v9913_v60  ;;  %v20702_v38 = vld [vmem:[#allocation56_spill] sm:$0xff] }
 0x4c3   : > { %v12765_v30 = vpack.c.bf16 %v11494_v13, %v11493_v22  ;;  %v11199_v24 = vadd.f32 %v19957_v25, %v11160_v29  ;;  %v11492_v2 = vmax.f32 %v11460_v9, 0.0  ;;  %v14177_v28 = vpop.f32.mrf.mxu0  ;;  %v11163_v39 = vadd.f32 %v14129_v55, %v10665_v44 }
 0x4c4   : > { %v11084_v37 = vpop.f32.mrf.mxu1  ;;  %v11465_v1 = vadd.f32 %v11393_v7, %v11201_v17  ;;  %v11396_v42 = vadd.f32 %v14177_v28, %v19952_v10  ;;  %v9919_v34 = vadd.f32 %v19923_v23, %v20702_v38  ;;  %v20703_v17 = vld [vmem:[#allocation64_spill] sm:$0xff]  ;;  %v20711_v38 = vld [vmem:[#allocation49_spill] sm:$0xff] }
 0x4c5   : > { %12813 = vst [vmem:[%s14553_s11 + $0x38] sm:$0xff] %v12765_v30   ;;  %v11161_v16 = vadd.f32 %v11084_v37, %v10663_v62  ;;  %v12760_v48 = vpack.c.bf16 %v11492_v2, %v11491_v18  ;;  %v11387_v36 = vpop.f32.mrf.mxu0  ;;  %v11202_v58 = vadd.f32 %v19957_v25, %v11163_v39  ;;  %v11463_v35 = vadd.f32 %v11385_v3, %v11199_v24 }
 0x4c6   : > { %v14132_v31 = vpop.f32.mrf.mxu1  ;;  %v11388_v6 = vadd.f32 %v19952_v10, %v11387_v36  ;;  %v11497_v32 = vmax.f32 %v11465_v1, 0.0  ;;  %v9917_v44 = vadd.f32 %v19929_v8, %v20703_v17  ;;  %v10673_v3 = vadd.f32 %v20704_v40, %v9919_v34  ;;  %v20705_v36 = vld [vmem:[#allocation21_spill] sm:$0xff] }
 0x4c7   : > { %v11200_v47 = vadd.f32 %v19957_v25, %v11161_v16  ;;  %v11166_v19 = vadd.f32 %v14132_v31, %v19909_v52  ;;  %12812 = vst [vmem:[%s14553_s11 + $0x30] sm:$0xff] %v12760_v48   ;;  %v11466_v15 = vadd.f32 %v11396_v42, %v11202_v58  ;;  %v14180_v50 = vpop.f32.mrf.mxu0  ;;  %v11495_v59 = vmax.f32 %v11463_v35, 0.0 }
 0x4c8   : > { %v11097_v0 = vpop.f32.mrf.mxu1  ;;  %v11409_v57 = vadd.f32 %v14180_v50, %v19952_v10  ;;  %v10671_v58 = vadd.f32 %v20705_v36, %v9917_v44  ;;  %v20713_v44 = vld [vmem:[#allocation71_spill] sm:$0xff] }
 0x4c9   : > { %v11464_v14 = vadd.f32 %v11388_v6, %v11200_v47  ;;  %v11164_v27 = vadd.f32 %v11097_v0, %v20699_v56  ;;  %v11498_v26 = vmax.f32 %v11466_v15, 0.0  ;;  %v11400_v21 = vpop.f32.mrf.mxu0  ;;  %v11205_v52 = vadd.f32 %v19957_v25, %v11166_v19  ;;  %v20706_v0 = vld [vmem:[#allocation41_spill] sm:$0xff] }
 0x4ca   : > { %v14133_v33 = vpop.f32.mrf.mxu1  ;;  %v11401_v51 = vadd.f32 %v19952_v10, %v11400_v21  ;;  %v20709_v21 = vld [vmem:[#allocation7_spill] sm:$0xff] }
 0x4cb   : > { %v11496_v4 = vmax.f32 %v11464_v14, 0.0  ;;  %v12775_v63 = vpack.c.bf16 %v11498_v26, %v11497_v32  ;;  %v14181_v45 = vpop.f32.mrf.mxu0  ;;  %v11203_v49 = vadd.f32 %v19957_v25, %v11164_v27  ;;  %v11167_v61 = vadd.f32 %v14133_v33, %v10669_v5  ;;  %v20707_v14 = vld [vmem:[#allocation36_spill] sm:$0xff] }
 0x4cc   : > { %v11100_v46 = vpop.f32.mrf.mxu1  ;;  %v11469_v22 = vadd.f32 %v11409_v57, %v11205_v52  ;;  %v11412_v13 = vadd.f32 %v14181_v45, %v19952_v10  ;;  %v9923_v56 = vadd.f32 %v20707_v14, %v20706_v0  ;;  %v20708_v57 = vld [vmem:[#allocation62_spill] sm:$0xff] }
 0x4cd   : > { %v12770_v41 = vpack.c.bf16 %v11496_v4, %v11495_v59  ;;  %12815 = vst [vmem:[%s14553_s11 + $0x48] sm:$0xff] %v12775_v63   ;;  %v11403_v29 = vpop.f32.mrf.mxu0  ;;  %v11206_v7 = vadd.f32 %v19957_v25, %v11167_v61  ;;  %v11165_v9 = vadd.f32 %v11100_v46, %v10667_v53  ;;  %v11467_v30 = vadd.f32 %v11401_v51, %v11203_v49  ;;  %v20710_v59 = vld [vmem:[#allocation63_spill] sm:$0xff] }
 0x4ce   : > { %v14136_v12 = vpop.f32.mrf.mxu1  ;;  %v11404_v23 = vadd.f32 %v19952_v10, %v11403_v29  ;;  %v11501_v8 = vmax.f32 %v11469_v22, 0.0  ;;  %v9921_v52 = vadd.f32 %v20709_v21, %v20708_v57  ;;  %v20712_v29 = vld [vmem:[#allocation38_spill] sm:$0xff] }
 0x4cf   : > { %12814 = vst [vmem:[%s14553_s11 + $0x40] sm:$0xff] %v12770_v41   ;;  %v11170_v55 = vadd.f32 %v14136_v12, %v19921_v20  ;;  %v11470_v24 = vadd.f32 %v11412_v13, %v11206_v7  ;;  %v14184_v62 = vpop.f32.mrf.mxu0  ;;  %v11204_v18 = vadd.f32 %v19957_v25, %v11165_v9  ;;  %v11499_v31 = vmax.f32 %v11467_v30, 0.0 }
 0x4d0   : > { %v11113_v2 = vpop.f32.mrf.mxu1  ;;  %v11425_v28 = vadd.f32 %v14184_v62, %v19952_v10  ;;  %v10677_v7 = vadd.f32 %v20712_v29, %v9923_v56 }
 0x4d1   : > { %v11209_v39 = vadd.f32 %v19957_v25, %v11170_v55  ;;  %v11168_v37 = vadd.f32 %v11113_v2, %v19927_v11  ;;  %v11502_v16 = vmax.f32 %v11470_v24, 0.0  ;;  %v11468_v20 = vadd.f32 %v11404_v23, %v11204_v18  ;;  %v11416_v48 = vpop.f32.mrf.mxu0 }
 0x4d2   : > { %v14137_v1 = vpop.f32.mrf.mxu1  ;;  %v11417_v43 = vadd.f32 %v19952_v10, %v11416_v48  ;;  %v10675_v55 = vadd.f32 %v20713_v44, %v9921_v52 }
 0x4d3   : > { %v11171_v42 = vadd.f32 %v14137_v1, %v10673_v3  ;;  %v12785_v35 = vpack.c.bf16 %v11502_v16, %v11501_v8  ;;  %v11500_v6 = vmax.f32 %v11468_v20, 0.0  ;;  %v14185_v47 = vpop.f32.mrf.mxu0  ;;  %v11207_v19 = vadd.f32 %v19957_v25, %v11168_v37 }
 0x4d4   : > { %v11116_v60 = vpop.f32.mrf.mxu1  ;;  %v11473_v11 = vadd.f32 %v11425_v28, %v11209_v39  ;;  %v11428_v15 = vadd.f32 %v14185_v47, %v19952_v10 }
 0x4d5   : > { %v11210_v50 = vadd.f32 %v19957_v25, %v11171_v42  ;;  %12817 = vst [vmem:[%s14553_s11 + $0x58] sm:$0xff] %v12785_v35   ;;  %v12780_v27 = vpack.c.bf16 %v11500_v6, %v11499_v31  ;;  %v11419_v5 = vpop.f32.mrf.mxu0  ;;  %v11169_v32 = vadd.f32 %v11116_v60, %v10671_v58  ;;  %v11471_v63 = vadd.f32 %v11417_v43, %v11207_v19 }
 0x4d6   : > { %v14140_v26 = vpop.f32.mrf.mxu1  ;;  %v11420_v45 = vadd.f32 %v19952_v10, %v11419_v5  ;;  %v11505_v53 = vmax.f32 %v11473_v11, 0.0 }
 0x4d7   : > { %v11474_v33 = vadd.f32 %v11428_v15, %v11210_v50  ;;  %v11174_v4 = vadd.f32 %v14140_v26, %v20710_v59  ;;  %12816 = vst [vmem:[%s14553_s11 + $0x50] sm:$0xff] %v12780_v27   ;;  %v14188_v49 = vpop.f32.mrf.mxu0  ;;  %v11208_v61 = vadd.f32 %v19957_v25, %v11169_v32  ;;  %v11503_v30 = vmax.f32 %v11471_v63, 0.0 }
 0x4d8   : > { %v11129_v54 = vpop.f32.mrf.mxu1  ;;  %v11441_v41 = vadd.f32 %v14188_v49, %v19952_v10 }
 0x4d9   : > { %v11506_v46 = vmax.f32 %v11474_v33, 0.0  ;;  %v11172_v34 = vadd.f32 %v11129_v54, %v20711_v38  ;;  %v11472_v51 = vadd.f32 %v11420_v45, %v11208_v61  ;;  %v11432_v22 = vpop.f32.mrf.mxu0  ;;  %v11213_v13 = vadd.f32 %v19957_v25, %v11174_v4 }
 0x4da   : > { %v14141_v9 = vpop.f32.mrf.mxu1  ;;  %v11433_v2 = vadd.f32 %v19952_v10, %v11432_v22 }
 0x4db   : > { %v12795_v12 = vpack.c.bf16 %v11506_v46, %v11505_v53  ;;  %v11211_v17 = vadd.f32 %v19957_v25, %v11172_v34  ;;  %v11504_v23 = vmax.f32 %v11472_v51, 0.0  ;;  %v14189_v24 = vpop.f32.mrf.mxu0  ;;  %v11175_v62 = vadd.f32 %v14141_v9, %v10677_v7 }
 0x4dc   : > { %v11132_v18 = vpop.f32.mrf.mxu1  ;;  %v11477_v37 = vadd.f32 %v11441_v41, %v11213_v13  ;;  %v11444_v40 = vadd.f32 %v14189_v24, %v19952_v10 }
 0x4dd   : > { %12819 = vst [vmem:[%s14553_s11 + $0x68] sm:$0xff] %v12795_v12   ;;  %v11173_v28 = vadd.f32 %v11132_v18, %v10675_v55  ;;  %v12790_v39 = vpack.c.bf16 %v11504_v23, %v11503_v30  ;;  %v11435_v3 = vpop.f32.mrf.mxu0  ;;  %v11214_v8 = vadd.f32 %v19957_v25, %v11175_v62  ;;  %v11475_v16 = vadd.f32 %v11433_v2, %v11211_v17 }
 0x4de   : > { %v11436_v20 = vadd.f32 %v19952_v10, %v11435_v3  ;;  %v11509_v36 = vmax.f32 %v11477_v37, 0.0 }
 0x4df   : > { %v11212_v48 = vadd.f32 %v19957_v25, %v11173_v28  ;;  %12818 = vst [vmem:[%s14553_s11 + $0x60] sm:$0xff] %v12790_v39   ;;  %v11478_v1 = vadd.f32 %v11444_v40, %v11214_v8  ;;  %v11507_v31 = vmax.f32 %v11475_v16, 0.0 }
 0x4e1   : > { %v11476_v42 = vadd.f32 %v11436_v20, %v11212_v48  ;;  %v11510_v58 = vmax.f32 %v11478_v1, 0.0 }
 0x4e3   : > { %v11508_v35 = vmax.f32 %v11476_v42, 0.0  ;;  %v12805_v6 = vpack.c.bf16 %v11510_v58, %v11509_v36 }
 0x4e5   : > { %v12800_v47 = vpack.c.bf16 %v11508_v35, %v11507_v31  ;;  %12821 = vst [vmem:[%s14553_s11 + $0x78] sm:$0xff] %v12805_v6  }
 0x4e7   : > { %12820 = vst [vmem:[%s14553_s11 + $0x70] sm:$0xff] %v12800_v47  }
 0x4e8 PF: > { %s17_s24 = sadd.s32 1, %s14494_s24  }
 0x4e9   : > { %p14_p5 = scmp.ge.s32.totalorder %s17_s24, 4  }
 0x4eb   :  { %16 = sbr.rel (!%p14_p5) target bundleno = 1 (0x1), region = 102 }

</bundles_post_ra>
